<compile_context>
chip_gen: v7x
topology: tpu7x:2x2x1
jax: 0.10.0
libtpu: 0.0.40
codegen_flags: <defaults>
</compile_context>

<pallas_src>
import jax
import jax.numpy as jnp
from jax import lax
from jax.experimental import pallas as pl
from jax.experimental.pallas import tpu as pltpu


# ----------------------------- fused Pallas kernel ---------------------------

_PADL = 8  # left offset of the valid interior inside the (W + 16)-wide scratch


def hypernet_fused_kernel(x_ref, wc1_ref, bc1_ref, wc2_ref, bc2_ref,
                          wf1_ref, bf1_ref, wf2_ref, bf2_ref,
                          o_ref, xpad_ref, h1pad_ref):
    """conv1+BN1+ReLU -> conv2+BN2+ReLU -> flatten(CHW) -> fc1+ReLU -> fc2.

    All activations stay in VMEM; only the (B, output_dim) result leaves.
      x_ref:     (B, H, W, Cin)        NHWC input
      wc*_ref:   (9, Cin, Cout)        conv taps in row-major (kh, kw) order
      bc*_ref:   (1, Cout)
      wf1_ref:   (16*H*W, hidden)      bf16, rows in PyTorch CHW-flatten order
      wf2_ref:   (hidden, output_dim)
      o_ref:     (B, output_dim)
      xpad_ref:  (B, H+2, W+16, Cin)   zero-padded scratch (interior at col 8)
      h1pad_ref: (B, H+2, W+16, 32)    zero-padded scratch for h1
    """
    B, H, W, C = x_ref.shape
    M = B * H * W
    P = H * W
    C1 = wc1_ref.shape[-1]   # 32
    C2 = wc2_ref.shape[-1]   # 16

    # ---- padded copy of the input (zero-fill + aligned interior store) ----
    xpad_ref[...] = jnp.zeros_like(xpad_ref)
    xpad_ref[:, 1:1 + H, _PADL:_PADL + W, :] = x_ref[...]

    def conv_bn_relu(src, cin, w_ref, b_ref):
        # 3x3 "same" conv as 9 shifted (M, Cin) x (Cin, Cout) MXU matmuls,
        # accumulator initialized from the first tap (no zeros-init pass).
        acc = None
        for kh in range(3):
            for kw in range(3):
                patch = src[:, kh:kh + H, _PADL - 1 + kw:_PADL - 1 + kw + W, :]
                patch = patch.reshape(M, cin)
                part = jnp.dot(patch, w_ref[kh * 3 + kw],
                               preferred_element_type=jnp.float32)
                acc = part if acc is None else acc + part
        acc = acc + b_ref[...]
        # training-mode BatchNorm2d: one-pass biased stats over (B, H, W)
        inv_n = 1.0 / float(M)
        mean = jnp.sum(acc, axis=0, keepdims=True) * inv_n
        ex2 = jnp.sum(acc * acc, axis=0, keepdims=True) * inv_n
        var = ex2 - mean * mean
        return jnp.maximum((acc - mean) * lax.rsqrt(var + 1e-5), 0.0)

    h1 = conv_bn_relu(xpad_ref[...], C, wc1_ref, bc1_ref)          # (M, 32)

    # ---- padded copy of h1, kept entirely in VMEM ----
    h1pad_ref[...] = jnp.zeros_like(h1pad_ref)
    h1pad_ref[:, 1:1 + H, _PADL:_PADL + W, :] = h1.reshape(B, H, W, C1)

    h2 = conv_bn_relu(h1pad_ref[...], C1, wc2_ref, bc2_ref)        # (M, 16)

    # ---- flatten in PyTorch CHW order, then one batched fc1 and fc2 matmul ----
    # h2t lane index = b*P + p; row [b, c*P + p] == flatten(start_dim=1) on NCHW.
    h2t = jnp.transpose(h2)                                        # (C2, M)
    rows = []
    for b in range(B):
        pieces = [h2t[c:c + 1, b * P:(b + 1) * P] for c in range(C2)]
        rows.append(jnp.concatenate(pieces, axis=1))               # (1, C2*P)
    flat = jnp.concatenate(rows, axis=0)                           # (B, C2*P)

    wf1 = wf1_ref[...].astype(jnp.float32)     # bf16 weight -> f32 for the MXU
    hid = jnp.dot(flat, wf1, preferred_element_type=jnp.float32)
    hid = jnp.maximum(hid + bf1_ref[...], 0.0)                     # (B, hidden)
    out = jnp.dot(hid, wf2_ref[...], preferred_element_type=jnp.float32)
    o_ref[...] = out + bf2_ref[...]                                # (B, out_dim)


# ------------------------------ pallas_call glue ------------------------------

def hypernet_pallas(x, p):
    """x: (B, H, W, C) float32 NHWC.  Returns (B, output_dim) float32."""
    B, H, W, C = x.shape
    c1 = p['w_c1'].shape[-1]
    out_dim = p['w_f2'].shape[1]
    return pl.pallas_call(
        hypernet_fused_kernel,
        out_shape=jax.ShapeDtypeStruct((B, out_dim), jnp.float32),
        in_specs=[pl.BlockSpec(memory_space=pltpu.MemorySpace.VMEM)] * 9,
        out_specs=pl.BlockSpec(memory_space=pltpu.MemorySpace.VMEM),
        scratch_shapes=[
            pltpu.VMEM((B, H + 2, W + 16, C), jnp.float32),
            pltpu.VMEM((B, H + 2, W + 16, c1), jnp.float32),
        ],
        compiler_params=pltpu.CompilerParams(
            vmem_limit_bytes=32 * 1024 * 1024),
    )(x, p['w_c1'], p['b_c1'], p['w_c2'], p['b_c2'],
      p['w_f1'], p['b_f1'], p['w_f2'], p['b_f2'])


# ------------------------------ parameters ------------------------------------

def init_params(key, input_shape, output_dim, hidden_dim):
    """Deterministic xavier_normal weights, zero biases (mirrors _init_weights)."""
    C, H, W = input_shape
    flat = 16 * H * W
    k1, k2, k3, k4 = jax.random.split(key, 4)

    def xavier_normal(k, shape, fan_in, fan_out):
        std = (2.0 / (fan_in + fan_out)) ** 0.5
        return std * jax.random.normal(k, shape, jnp.float32)

    # Conv weights generated in (kh, kw, Cin, Cout) -> stored as (9, Cin, Cout).
    w_c1 = xavier_normal(k1, (3, 3, C, 32), fan_in=C * 9, fan_out=32 * 9)
    w_c2 = xavier_normal(k2, (3, 3, 32, 16), fan_in=32 * 9, fan_out=16 * 9)
    # fc1 weight laid out (flat, hidden); flat index uses CHW order, matching
    # PyTorch's x.flatten(start_dim=1) on NCHW.  Stored in bf16 (largest HBM
    # transfer of the forward); both kernel and reference upcast to f32.
    w_f1 = xavier_normal(k3, (flat, hidden_dim), fan_in=flat,
                         fan_out=hidden_dim).astype(jnp.bfloat16)
    w_f2 = xavier_normal(k4, (hidden_dim, output_dim),
                         fan_in=hidden_dim, fan_out=output_dim)
    return dict(
        w_c1=w_c1.reshape(9, C, 32), b_c1=jnp.zeros((1, 32), jnp.float32),
        w_c2=w_c2.reshape(9, 32, 16), b_c2=jnp.zeros((1, 16), jnp.float32),
        w_f1=w_f1, b_f1=jnp.zeros((1, hidden_dim), jnp.float32),
        w_f2=w_f2, b_f2=jnp.zeros((1, output_dim), jnp.float32),
    )


# ------------------------------ forward pass ----------------------------------

@jax.jit
def hypernetwork_forward(params, state):
    """state: NCHW (B, C, H, W) float32, like the PyTorch module; (C,H,W) OK."""
    if state.ndim == 3:
        state = state[None]
    x = jnp.transpose(state, (0, 2, 3, 1)).astype(jnp.float32)   # NCHW -> NHWC
    return hypernet_pallas(x, params)


# ------------------------------ pure-JAX reference ----------------------------

def reference_forward(params, state):
    if state.ndim == 3:
        state = state[None]
    x = jnp.transpose(state, (0, 2, 3, 1)).astype(jnp.float32)

    def conv_bn_relu_ref(x, w9, b):
        B, H, W, _ = x.shape
        Cout = w9.shape[-1]
        xp = jnp.pad(x, ((0, 0), (1, 1), (1, 1), (0, 0)))
        acc = jnp.zeros((B, H, W, Cout), jnp.float32)
        for kh in range(3):
            for kw in range(3):
                acc = acc + jnp.einsum('bhwc,co->bhwo',
                                       xp[:, kh:kh + H, kw:kw + W, :],
                                       w9[kh * 3 + kw])
        acc = acc + b[0]
        mean = acc.mean(axis=(0, 1, 2), keepdims=True)
        var = ((acc - mean) ** 2).mean(axis=(0, 1, 2), keepdims=True)
        return jnp.maximum((acc - mean) / jnp.sqrt(var + 1e-5), 0.0)

    h1 = conv_bn_relu_ref(x, params['w_c1'], params['b_c1'])
    h2 = conv_bn_relu_ref(h1, params['w_c2'], params['b_c2'])
    B = h2.shape[0]
    xf = jnp.transpose(h2, (0, 3, 1, 2)).reshape(B, -1)   # CHW flatten order
    w_f1 = params['w_f1'].astype(jnp.float32)
    h = jnp.maximum(xf @ w_f1 + params['b_f1'][0], 0.0)
    return h @ params['w_f2'] + params['b_f2'][0]


# ---------------------------------- main ---------------------------------------

if __name__ == "__main__":
    key = jax.random.PRNGKey(0)
    input_shape = (4, 16, 16)          # (C, H, W)
    output_dim, hidden_dim, batch = 8, 32, 2

    pkey, xkey = jax.random.split(key)
    params = init_params(pkey, input_shape, output_dim, hidden_dim)
    state = jax.random.normal(xkey, (batch,) + input_shape, jnp.float32)  # NCHW

    out = jax.block_until_ready(hypernetwork_forward(params, state))
    ref = reference_forward(params, state)

    assert out.shape == (batch, output_dim), out.shape
    assert jnp.allclose(out, ref, atol=1e-3, rtol=1e-3), \
        float(jnp.max(jnp.abs(out - ref)))
    print("KERNEL_OK")
</pallas_src>

<mosaic_0001>
module attributes {stable_mosaic.version = 11 : i64} {
  func.func @hypernet_fused_kernel(%arg0: memref<2x16x16x4xf32, #tpu.memory_space<vmem>>, %arg1: memref<9x4x32xf32, #tpu.memory_space<vmem>>, %arg2: memref<1x32xf32, #tpu.memory_space<vmem>>, %arg3: memref<9x32x16xf32, #tpu.memory_space<vmem>>, %arg4: memref<1x16xf32, #tpu.memory_space<vmem>>, %arg5: memref<4096x32xbf16, #tpu.memory_space<vmem>>, %arg6: memref<1x32xf32, #tpu.memory_space<vmem>>, %arg7: memref<32x8xf32, #tpu.memory_space<vmem>>, %arg8: memref<1x8xf32, #tpu.memory_space<vmem>>, %arg9: memref<2x8xf32, #tpu.memory_space<vmem>>, %arg10: memref<2x18x32x4xf32, #tpu.memory_space<vmem>>, %arg11: memref<2x18x32x32xf32, #tpu.memory_space<vmem>>) attributes {dimension_semantics = [], scalar_prefetch = 0 : i64, scratch_operands = 2 : i64, tpu.core_type = #tpu.core_type<tc>} {
    %cst = arith.constant 0.000000e+00 : f32
    %0 = vector.broadcast %cst : f32 to vector<2x18x32x4xf32>
    %c0 = arith.constant 0 : index
    %c0_0 = arith.constant 0 : index
    %c0_1 = arith.constant 0 : index
    %c0_2 = arith.constant 0 : index
    %1 = vector.load %arg10[%c0, %c0_0, %c0_1, %c0_2] : memref<2x18x32x4xf32, #tpu.memory_space<vmem>>, vector<2x18x32x4xf32>
    tpu.vector_store %arg10[%c0, %c0_0, %c0_1, %c0_2], %0 {strides = array<i32>} : memref<2x18x32x4xf32, #tpu.memory_space<vmem>>, vector<2x18x32x4xf32>,
    %c0_3 = arith.constant 0 : index
    %c0_4 = arith.constant 0 : index
    %c0_5 = arith.constant 0 : index
    %c0_6 = arith.constant 0 : index
    %2 = vector.load %arg0[%c0_3, %c0_4, %c0_5, %c0_6] : memref<2x16x16x4xf32, #tpu.memory_space<vmem>>, vector<2x16x16x4xf32>
    %c0_7 = arith.constant 0 : index
    %c1 = arith.constant 1 : index
    %c8 = arith.constant 8 : index
    %c0_8 = arith.constant 0 : index
    %3 = vector.load %arg10[%c0_7, %c1, %c8, %c0_8] : memref<2x18x32x4xf32, #tpu.memory_space<vmem>>, vector<2x16x16x4xf32>
    tpu.vector_store %arg10[%c0_7, %c1, %c8, %c0_8], %2 {strides = array<i32>} : memref<2x18x32x4xf32, #tpu.memory_space<vmem>>, vector<2x16x16x4xf32>,
    %c0_9 = arith.constant 0 : index
    %c0_10 = arith.constant 0 : index
    %c0_11 = arith.constant 0 : index
    %c0_12 = arith.constant 0 : index
    %4 = vector.load %arg10[%c0_9, %c0_10, %c0_11, %c0_12] : memref<2x18x32x4xf32, #tpu.memory_space<vmem>>, vector<2x18x32x4xf32>
    %5 = vector.extract_strided_slice %4 {offsets = [0, 0, 7, 0], sizes = [2, 16, 16, 4], strides = [1, 1, 1, 1]} : vector<2x18x32x4xf32> to vector<2x16x16x4xf32>
    %6 = vector.shape_cast %5 : vector<2x16x16x4xf32> to vector<512x4xf32>
    %c0_13 = arith.constant 0 : index
    %c0_14 = arith.constant 0 : index
    %c0_15 = arith.constant 0 : index
    %7 = vector.load %arg1[%c0_13, %c0_14, %c0_15] : memref<9x4x32xf32, #tpu.memory_space<vmem>>, vector<1x4x32xf32>
    %8 = vector.shape_cast %7 : vector<1x4x32xf32> to vector<4x32xf32>
    %cst_16 = arith.constant dense<0.000000e+00> : vector<512x32xf32>
    %9 = tpu.matmul %6, %8, %cst_16 {dimension_numbers = #tpu.dot_dimension_numbers<[1], [0], [0], [1], [0, 0, 1, 1], [], []>} : vector<512x4xf32>, vector<4x32xf32>, vector<512x32xf32> -> vector<512x32xf32>
    %10 = vector.extract_strided_slice %4 {offsets = [0, 0, 8, 0], sizes = [2, 16, 16, 4], strides = [1, 1, 1, 1]} : vector<2x18x32x4xf32> to vector<2x16x16x4xf32>
    %11 = vector.shape_cast %10 : vector<2x16x16x4xf32> to vector<512x4xf32>
    %c1_17 = arith.constant 1 : index
    %c0_18 = arith.constant 0 : index
    %c0_19 = arith.constant 0 : index
    %12 = vector.load %arg1[%c1_17, %c0_18, %c0_19] : memref<9x4x32xf32, #tpu.memory_space<vmem>>, vector<1x4x32xf32>
    %13 = vector.shape_cast %12 : vector<1x4x32xf32> to vector<4x32xf32>
    %cst_20 = arith.constant dense<0.000000e+00> : vector<512x32xf32>
    %14 = tpu.matmul %11, %13, %cst_20 {dimension_numbers = #tpu.dot_dimension_numbers<[1], [0], [0], [1], [0, 0, 1, 1], [], []>} : vector<512x4xf32>, vector<4x32xf32>, vector<512x32xf32> -> vector<512x32xf32>
    %15 = arith.addf %9, %14 : vector<512x32xf32>
    %16 = vector.extract_strided_slice %4 {offsets = [0, 0, 9, 0], sizes = [2, 16, 16, 4], strides = [1, 1, 1, 1]} : vector<2x18x32x4xf32> to vector<2x16x16x4xf32>
    %17 = vector.shape_cast %16 : vector<2x16x16x4xf32> to vector<512x4xf32>
    %c2 = arith.constant 2 : index
    %c0_21 = arith.constant 0 : index
    %c0_22 = arith.constant 0 : index
    %18 = vector.load %arg1[%c2, %c0_21, %c0_22] : memref<9x4x32xf32, #tpu.memory_space<vmem>>, vector<1x4x32xf32>
    %19 = vector.shape_cast %18 : vector<1x4x32xf32> to vector<4x32xf32>
    %cst_23 = arith.constant dense<0.000000e+00> : vector<512x32xf32>
    %20 = tpu.matmul %17, %19, %cst_23 {dimension_numbers = #tpu.dot_dimension_numbers<[1], [0], [0], [1], [0, 0, 1, 1], [], []>} : vector<512x4xf32>, vector<4x32xf32>, vector<512x32xf32> -> vector<512x32xf32>
    %21 = arith.addf %15, %20 : vector<512x32xf32>
    %22 = vector.extract_strided_slice %4 {offsets = [0, 1, 7, 0], sizes = [2, 16, 16, 4], strides = [1, 1, 1, 1]} : vector<2x18x32x4xf32> to vector<2x16x16x4xf32>
    %23 = vector.shape_cast %22 : vector<2x16x16x4xf32> to vector<512x4xf32>
    %c3 = arith.constant 3 : index
    %c0_24 = arith.constant 0 : index
    %c0_25 = arith.constant 0 : index
    %24 = vector.load %arg1[%c3, %c0_24, %c0_25] : memref<9x4x32xf32, #tpu.memory_space<vmem>>, vector<1x4x32xf32>
    %25 = vector.shape_cast %24 : vector<1x4x32xf32> to vector<4x32xf32>
    %cst_26 = arith.constant dense<0.000000e+00> : vector<512x32xf32>
    %26 = tpu.matmul %23, %25, %cst_26 {dimension_numbers = #tpu.dot_dimension_numbers<[1], [0], [0], [1], [0, 0, 1, 1], [], []>} : vector<512x4xf32>, vector<4x32xf32>, vector<512x32xf32> -> vector<512x32xf32>
    %27 = arith.addf %21, %26 : vector<512x32xf32>
    %28 = vector.extract_strided_slice %4 {offsets = [0, 1, 8, 0], sizes = [2, 16, 16, 4], strides = [1, 1, 1, 1]} : vector<2x18x32x4xf32> to vector<2x16x16x4xf32>
    %29 = vector.shape_cast %28 : vector<2x16x16x4xf32> to vector<512x4xf32>
    %c4 = arith.constant 4 : index
    %c0_27 = arith.constant 0 : index
    %c0_28 = arith.constant 0 : index
    %30 = vector.load %arg1[%c4, %c0_27, %c0_28] : memref<9x4x32xf32, #tpu.memory_space<vmem>>, vector<1x4x32xf32>
    %31 = vector.shape_cast %30 : vector<1x4x32xf32> to vector<4x32xf32>
    %cst_29 = arith.constant dense<0.000000e+00> : vector<512x32xf32>
    %32 = tpu.matmul %29, %31, %cst_29 {dimension_numbers = #tpu.dot_dimension_numbers<[1], [0], [0], [1], [0, 0, 1, 1], [], []>} : vector<512x4xf32>, vector<4x32xf32>, vector<512x32xf32> -> vector<512x32xf32>
    %33 = arith.addf %27, %32 : vector<512x32xf32>
    %34 = vector.extract_strided_slice %4 {offsets = [0, 1, 9, 0], sizes = [2, 16, 16, 4], strides = [1, 1, 1, 1]} : vector<2x18x32x4xf32> to vector<2x16x16x4xf32>
    %35 = vector.shape_cast %34 : vector<2x16x16x4xf32> to vector<512x4xf32>
    %c5 = arith.constant 5 : index
    %c0_30 = arith.constant 0 : index
    %c0_31 = arith.constant 0 : index
    %36 = vector.load %arg1[%c5, %c0_30, %c0_31] : memref<9x4x32xf32, #tpu.memory_space<vmem>>, vector<1x4x32xf32>
    %37 = vector.shape_cast %36 : vector<1x4x32xf32> to vector<4x32xf32>
    %cst_32 = arith.constant dense<0.000000e+00> : vector<512x32xf32>
    %38 = tpu.matmul %35, %37, %cst_32 {dimension_numbers = #tpu.dot_dimension_numbers<[1], [0], [0], [1], [0, 0, 1, 1], [], []>} : vector<512x4xf32>, vector<4x32xf32>, vector<512x32xf32> -> vector<512x32xf32>
    %39 = arith.addf %33, %38 : vector<512x32xf32>
    %40 = vector.extract_strided_slice %4 {offsets = [0, 2, 7, 0], sizes = [2, 16, 16, 4], strides = [1, 1, 1, 1]} : vector<2x18x32x4xf32> to vector<2x16x16x4xf32>
    %41 = vector.shape_cast %40 : vector<2x16x16x4xf32> to vector<512x4xf32>
    %c6 = arith.constant 6 : index
    %c0_33 = arith.constant 0 : index
    %c0_34 = arith.constant 0 : index
    %42 = vector.load %arg1[%c6, %c0_33, %c0_34] : memref<9x4x32xf32, #tpu.memory_space<vmem>>, vector<1x4x32xf32>
    %43 = vector.shape_cast %42 : vector<1x4x32xf32> to vector<4x32xf32>
    %cst_35 = arith.constant dense<0.000000e+00> : vector<512x32xf32>
    %44 = tpu.matmul %41, %43, %cst_35 {dimension_numbers = #tpu.dot_dimension_numbers<[1], [0], [0], [1], [0, 0, 1, 1], [], []>} : vector<512x4xf32>, vector<4x32xf32>, vector<512x32xf32> -> vector<512x32xf32>
    %45 = arith.addf %39, %44 : vector<512x32xf32>
    %46 = vector.extract_strided_slice %4 {offsets = [0, 2, 8, 0], sizes = [2, 16, 16, 4], strides = [1, 1, 1, 1]} : vector<2x18x32x4xf32> to vector<2x16x16x4xf32>
    %47 = vector.shape_cast %46 : vector<2x16x16x4xf32> to vector<512x4xf32>
    %c7 = arith.constant 7 : index
    %c0_36 = arith.constant 0 : index
    %c0_37 = arith.constant 0 : index
    %48 = vector.load %arg1[%c7, %c0_36, %c0_37] : memref<9x4x32xf32, #tpu.memory_space<vmem>>, vector<1x4x32xf32>
    %49 = vector.shape_cast %48 : vector<1x4x32xf32> to vector<4x32xf32>
    %cst_38 = arith.constant dense<0.000000e+00> : vector<512x32xf32>
    %50 = tpu.matmul %47, %49, %cst_38 {dimension_numbers = #tpu.dot_dimension_numbers<[1], [0], [0], [1], [0, 0, 1, 1], [], []>} : vector<512x4xf32>, vector<4x32xf32>, vector<512x32xf32> -> vector<512x32xf32>
    %51 = arith.addf %45, %50 : vector<512x32xf32>
    %52 = vector.extract_strided_slice %4 {offsets = [0, 2, 9, 0], sizes = [2, 16, 16, 4], strides = [1, 1, 1, 1]} : vector<2x18x32x4xf32> to vector<2x16x16x4xf32>
    %53 = vector.shape_cast %52 : vector<2x16x16x4xf32> to vector<512x4xf32>
    %c8_39 = arith.constant 8 : index
    %c0_40 = arith.constant 0 : index
    %c0_41 = arith.constant 0 : index
    %54 = vector.load %arg1[%c8_39, %c0_40, %c0_41] : memref<9x4x32xf32, #tpu.memory_space<vmem>>, vector<1x4x32xf32>
    %55 = vector.shape_cast %54 : vector<1x4x32xf32> to vector<4x32xf32>
    %cst_42 = arith.constant dense<0.000000e+00> : vector<512x32xf32>
    %56 = tpu.matmul %53, %55, %cst_42 {dimension_numbers = #tpu.dot_dimension_numbers<[1], [0], [0], [1], [0, 0, 1, 1], [], []>} : vector<512x4xf32>, vector<4x32xf32>, vector<512x32xf32> -> vector<512x32xf32>
    %57 = arith.addf %51, %56 : vector<512x32xf32>
    %c0_43 = arith.constant 0 : index
    %c0_44 = arith.constant 0 : index
    %58 = vector.load %arg2[%c0_43, %c0_44] : memref<1x32xf32, #tpu.memory_space<vmem>>, vector<1x32xf32>
    %59 = vector.broadcast %58 : vector<1x32xf32> to vector<512x32xf32>
    %60 = arith.addf %57, %59 : vector<512x32xf32>
    %cst_45 = arith.constant dense<0.000000e+00> : vector<32xf32>
    %61 = vector.multi_reduction <add>, %60, %cst_45 [0] : vector<512x32xf32> to vector<32xf32>
    %62 = vector.shape_cast %61 : vector<32xf32> to vector<1x32xf32>
    %cst_46 = arith.constant 0.001953125 : f32
    %63 = vector.broadcast %cst_46 : f32 to vector<1x32xf32>
    %64 = arith.mulf %62, %63 : vector<1x32xf32>
    %65 = arith.mulf %60, %60 : vector<512x32xf32>
    %cst_47 = arith.constant dense<0.000000e+00> : vector<32xf32>
    %66 = vector.multi_reduction <add>, %65, %cst_47 [0] : vector<512x32xf32> to vector<32xf32>
    %67 = vector.shape_cast %66 : vector<32xf32> to vector<1x32xf32>
    %cst_48 = arith.constant 0.001953125 : f32
    %68 = vector.broadcast %cst_48 : f32 to vector<1x32xf32>
    %69 = arith.mulf %67, %68 : vector<1x32xf32>
    %70 = arith.mulf %64, %64 : vector<1x32xf32>
    %71 = arith.subf %69, %70 : vector<1x32xf32>
    %72 = vector.broadcast %64 : vector<1x32xf32> to vector<512x32xf32>
    %73 = arith.subf %60, %72 : vector<512x32xf32>
    %cst_49 = arith.constant 9.99999974E-6 : f32
    %74 = vector.broadcast %cst_49 : f32 to vector<1x32xf32>
    %75 = arith.addf %71, %74 : vector<1x32xf32>
    %76 = math.rsqrt %75 : vector<1x32xf32>
    %77 = vector.broadcast %76 : vector<1x32xf32> to vector<512x32xf32>
    %78 = arith.mulf %73, %77 : vector<512x32xf32>
    %cst_50 = arith.constant 0.000000e+00 : f32
    %79 = vector.broadcast %cst_50 : f32 to vector<512x32xf32>
    %80 = arith.maximumf %78, %79 : vector<512x32xf32>
    %cst_51 = arith.constant 0.000000e+00 : f32
    %81 = vector.broadcast %cst_51 : f32 to vector<2x18x32x32xf32>
    %c0_52 = arith.constant 0 : index
    %c0_53 = arith.constant 0 : index
    %c0_54 = arith.constant 0 : index
    %c0_55 = arith.constant 0 : index
    %82 = vector.load %arg11[%c0_52, %c0_53, %c0_54, %c0_55] : memref<2x18x32x32xf32, #tpu.memory_space<vmem>>, vector<2x18x32x32xf32>
    tpu.vector_store %arg11[%c0_52, %c0_53, %c0_54, %c0_55], %81 {strides = array<i32>} : memref<2x18x32x32xf32, #tpu.memory_space<vmem>>, vector<2x18x32x32xf32>,
    %83 = vector.shape_cast %80 : vector<512x32xf32> to vector<2x16x16x32xf32>
    %c0_56 = arith.constant 0 : index
    %c1_57 = arith.constant 1 : index
    %c8_58 = arith.constant 8 : index
    %c0_59 = arith.constant 0 : index
    %84 = vector.load %arg11[%c0_56, %c1_57, %c8_58, %c0_59] : memref<2x18x32x32xf32, #tpu.memory_space<vmem>>, vector<2x16x16x32xf32>
    tpu.vector_store %arg11[%c0_56, %c1_57, %c8_58, %c0_59], %83 {strides = array<i32>} : memref<2x18x32x32xf32, #tpu.memory_space<vmem>>, vector<2x16x16x32xf32>,
    %c0_60 = arith.constant 0 : index
    %c0_61 = arith.constant 0 : index
    %c0_62 = arith.constant 0 : index
    %c0_63 = arith.constant 0 : index
    %85 = vector.load %arg11[%c0_60, %c0_61, %c0_62, %c0_63] : memref<2x18x32x32xf32, #tpu.memory_space<vmem>>, vector<2x18x32x32xf32>
    %86 = vector.extract_strided_slice %85 {offsets = [0, 0, 7, 0], sizes = [2, 16, 16, 32], strides = [1, 1, 1, 1]} : vector<2x18x32x32xf32> to vector<2x16x16x32xf32>
    %87 = vector.shape_cast %86 : vector<2x16x16x32xf32> to vector<512x32xf32>
    %c0_64 = arith.constant 0 : index
    %c0_65 = arith.constant 0 : index
    %c0_66 = arith.constant 0 : index
    %88 = vector.load %arg3[%c0_64, %c0_65, %c0_66] : memref<9x32x16xf32, #tpu.memory_space<vmem>>, vector<1x32x16xf32>
    %89 = vector.shape_cast %88 : vector<1x32x16xf32> to vector<32x16xf32>
    %cst_67 = arith.constant dense<0.000000e+00> : vector<512x16xf32>
    %90 = tpu.matmul %87, %89, %cst_67 {dimension_numbers = #tpu.dot_dimension_numbers<[1], [0], [0], [1], [0, 0, 1, 1], [], []>} : vector<512x32xf32>, vector<32x16xf32>, vector<512x16xf32> -> vector<512x16xf32>
    %91 = vector.extract_strided_slice %85 {offsets = [0, 0, 8, 0], sizes = [2, 16, 16, 32], strides = [1, 1, 1, 1]} : vector<2x18x32x32xf32> to vector<2x16x16x32xf32>
    %92 = vector.shape_cast %91 : vector<2x16x16x32xf32> to vector<512x32xf32>
    %c1_68 = arith.constant 1 : index
    %c0_69 = arith.constant 0 : index
    %c0_70 = arith.constant 0 : index
    %93 = vector.load %arg3[%c1_68, %c0_69, %c0_70] : memref<9x32x16xf32, #tpu.memory_space<vmem>>, vector<1x32x16xf32>
    %94 = vector.shape_cast %93 : vector<1x32x16xf32> to vector<32x16xf32>
    %cst_71 = arith.constant dense<0.000000e+00> : vector<512x16xf32>
    %95 = tpu.matmul %92, %94, %cst_71 {dimension_numbers = #tpu.dot_dimension_numbers<[1], [0], [0], [1], [0, 0, 1, 1], [], []>} : vector<512x32xf32>, vector<32x16xf32>, vector<512x16xf32> -> vector<512x16xf32>
    %96 = arith.addf %90, %95 : vector<512x16xf32>
    %97 = vector.extract_strided_slice %85 {offsets = [0, 0, 9, 0], sizes = [2, 16, 16, 32], strides = [1, 1, 1, 1]} : vector<2x18x32x32xf32> to vector<2x16x16x32xf32>
    %98 = vector.shape_cast %97 : vector<2x16x16x32xf32> to vector<512x32xf32>
    %c2_72 = arith.constant 2 : index
    %c0_73 = arith.constant 0 : index
    %c0_74 = arith.constant 0 : index
    %99 = vector.load %arg3[%c2_72, %c0_73, %c0_74] : memref<9x32x16xf32, #tpu.memory_space<vmem>>, vector<1x32x16xf32>
    %100 = vector.shape_cast %99 : vector<1x32x16xf32> to vector<32x16xf32>
    %cst_75 = arith.constant dense<0.000000e+00> : vector<512x16xf32>
    %101 = tpu.matmul %98, %100, %cst_75 {dimension_numbers = #tpu.dot_dimension_numbers<[1], [0], [0], [1], [0, 0, 1, 1], [], []>} : vector<512x32xf32>, vector<32x16xf32>, vector<512x16xf32> -> vector<512x16xf32>
    %102 = arith.addf %96, %101 : vector<512x16xf32>
    %103 = vector.extract_strided_slice %85 {offsets = [0, 1, 7, 0], sizes = [2, 16, 16, 32], strides = [1, 1, 1, 1]} : vector<2x18x32x32xf32> to vector<2x16x16x32xf32>
    %104 = vector.shape_cast %103 : vector<2x16x16x32xf32> to vector<512x32xf32>
    %c3_76 = arith.constant 3 : index
    %c0_77 = arith.constant 0 : index
    %c0_78 = arith.constant 0 : index
    %105 = vector.load %arg3[%c3_76, %c0_77, %c0_78] : memref<9x32x16xf32, #tpu.memory_space<vmem>>, vector<1x32x16xf32>
    %106 = vector.shape_cast %105 : vector<1x32x16xf32> to vector<32x16xf32>
    %cst_79 = arith.constant dense<0.000000e+00> : vector<512x16xf32>
    %107 = tpu.matmul %104, %106, %cst_79 {dimension_numbers = #tpu.dot_dimension_numbers<[1], [0], [0], [1], [0, 0, 1, 1], [], []>} : vector<512x32xf32>, vector<32x16xf32>, vector<512x16xf32> -> vector<512x16xf32>
    %108 = arith.addf %102, %107 : vector<512x16xf32>
    %109 = vector.extract_strided_slice %85 {offsets = [0, 1, 8, 0], sizes = [2, 16, 16, 32], strides = [1, 1, 1, 1]} : vector<2x18x32x32xf32> to vector<2x16x16x32xf32>
    %110 = vector.shape_cast %109 : vector<2x16x16x32xf32> to vector<512x32xf32>
    %c4_80 = arith.constant 4 : index
    %c0_81 = arith.constant 0 : index
    %c0_82 = arith.constant 0 : index
    %111 = vector.load %arg3[%c4_80, %c0_81, %c0_82] : memref<9x32x16xf32, #tpu.memory_space<vmem>>, vector<1x32x16xf32>
    %112 = vector.shape_cast %111 : vector<1x32x16xf32> to vector<32x16xf32>
    %cst_83 = arith.constant dense<0.000000e+00> : vector<512x16xf32>
    %113 = tpu.matmul %110, %112, %cst_83 {dimension_numbers = #tpu.dot_dimension_numbers<[1], [0], [0], [1], [0, 0, 1, 1], [], []>} : vector<512x32xf32>, vector<32x16xf32>, vector<512x16xf32> -> vector<512x16xf32>
    %114 = arith.addf %108, %113 : vector<512x16xf32>
    %115 = vector.extract_strided_slice %85 {offsets = [0, 1, 9, 0], sizes = [2, 16, 16, 32], strides = [1, 1, 1, 1]} : vector<2x18x32x32xf32> to vector<2x16x16x32xf32>
    %116 = vector.shape_cast %115 : vector<2x16x16x32xf32> to vector<512x32xf32>
    %c5_84 = arith.constant 5 : index
    %c0_85 = arith.constant 0 : index
    %c0_86 = arith.constant 0 : index
    %117 = vector.load %arg3[%c5_84, %c0_85, %c0_86] : memref<9x32x16xf32, #tpu.memory_space<vmem>>, vector<1x32x16xf32>
    %118 = vector.shape_cast %117 : vector<1x32x16xf32> to vector<32x16xf32>
    %cst_87 = arith.constant dense<0.000000e+00> : vector<512x16xf32>
    %119 = tpu.matmul %116, %118, %cst_87 {dimension_numbers = #tpu.dot_dimension_numbers<[1], [0], [0], [1], [0, 0, 1, 1], [], []>} : vector<512x32xf32>, vector<32x16xf32>, vector<512x16xf32> -> vector<512x16xf32>
    %120 = arith.addf %114, %119 : vector<512x16xf32>
    %121 = vector.extract_strided_slice %85 {offsets = [0, 2, 7, 0], sizes = [2, 16, 16, 32], strides = [1, 1, 1, 1]} : vector<2x18x32x32xf32> to vector<2x16x16x32xf32>
    %122 = vector.shape_cast %121 : vector<2x16x16x32xf32> to vector<512x32xf32>
    %c6_88 = arith.constant 6 : index
    %c0_89 = arith.constant 0 : index
    %c0_90 = arith.constant 0 : index
    %123 = vector.load %arg3[%c6_88, %c0_89, %c0_90] : memref<9x32x16xf32, #tpu.memory_space<vmem>>, vector<1x32x16xf32>
    %124 = vector.shape_cast %123 : vector<1x32x16xf32> to vector<32x16xf32>
    %cst_91 = arith.constant dense<0.000000e+00> : vector<512x16xf32>
    %125 = tpu.matmul %122, %124, %cst_91 {dimension_numbers = #tpu.dot_dimension_numbers<[1], [0], [0], [1], [0, 0, 1, 1], [], []>} : vector<512x32xf32>, vector<32x16xf32>, vector<512x16xf32> -> vector<512x16xf32>
    %126 = arith.addf %120, %125 : vector<512x16xf32>
    %127 = vector.extract_strided_slice %85 {offsets = [0, 2, 8, 0], sizes = [2, 16, 16, 32], strides = [1, 1, 1, 1]} : vector<2x18x32x32xf32> to vector<2x16x16x32xf32>
    %128 = vector.shape_cast %127 : vector<2x16x16x32xf32> to vector<512x32xf32>
    %c7_92 = arith.constant 7 : index
    %c0_93 = arith.constant 0 : index
    %c0_94 = arith.constant 0 : index
    %129 = vector.load %arg3[%c7_92, %c0_93, %c0_94] : memref<9x32x16xf32, #tpu.memory_space<vmem>>, vector<1x32x16xf32>
    %130 = vector.shape_cast %129 : vector<1x32x16xf32> to vector<32x16xf32>
    %cst_95 = arith.constant dense<0.000000e+00> : vector<512x16xf32>
    %131 = tpu.matmul %128, %130, %cst_95 {dimension_numbers = #tpu.dot_dimension_numbers<[1], [0], [0], [1], [0, 0, 1, 1], [], []>} : vector<512x32xf32>, vector<32x16xf32>, vector<512x16xf32> -> vector<512x16xf32>
    %132 = arith.addf %126, %131 : vector<512x16xf32>
    %133 = vector.extract_strided_slice %85 {offsets = [0, 2, 9, 0], sizes = [2, 16, 16, 32], strides = [1, 1, 1, 1]} : vector<2x18x32x32xf32> to vector<2x16x16x32xf32>
    %134 = vector.shape_cast %133 : vector<2x16x16x32xf32> to vector<512x32xf32>
    %c8_96 = arith.constant 8 : index
    %c0_97 = arith.constant 0 : index
    %c0_98 = arith.constant 0 : index
    %135 = vector.load %arg3[%c8_96, %c0_97, %c0_98] : memref<9x32x16xf32, #tpu.memory_space<vmem>>, vector<1x32x16xf32>
    %136 = vector.shape_cast %135 : vector<1x32x16xf32> to vector<32x16xf32>
    %cst_99 = arith.constant dense<0.000000e+00> : vector<512x16xf32>
    %137 = tpu.matmul %134, %136, %cst_99 {dimension_numbers = #tpu.dot_dimension_numbers<[1], [0], [0], [1], [0, 0, 1, 1], [], []>} : vector<512x32xf32>, vector<32x16xf32>, vector<512x16xf32> -> vector<512x16xf32>
    %138 = arith.addf %132, %137 : vector<512x16xf32>
    %c0_100 = arith.constant 0 : index
    %c0_101 = arith.constant 0 : index
    %139 = vector.load %arg4[%c0_100, %c0_101] : memref<1x16xf32, #tpu.memory_space<vmem>>, vector<1x16xf32>
    %140 = vector.broadcast %139 : vector<1x16xf32> to vector<512x16xf32>
    %141 = arith.addf %138, %140 : vector<512x16xf32>
    %cst_102 = arith.constant dense<0.000000e+00> : vector<16xf32>
    %142 = vector.multi_reduction <add>, %141, %cst_102 [0] : vector<512x16xf32> to vector<16xf32>
    %143 = vector.shape_cast %142 : vector<16xf32> to vector<1x16xf32>
    %cst_103 = arith.constant 0.001953125 : f32
    %144 = vector.broadcast %cst_103 : f32 to vector<1x16xf32>
    %145 = arith.mulf %143, %144 : vector<1x16xf32>
    %146 = arith.mulf %141, %141 : vector<512x16xf32>
    %cst_104 = arith.constant dense<0.000000e+00> : vector<16xf32>
    %147 = vector.multi_reduction <add>, %146, %cst_104 [0] : vector<512x16xf32> to vector<16xf32>
    %148 = vector.shape_cast %147 : vector<16xf32> to vector<1x16xf32>
    %cst_105 = arith.constant 0.001953125 : f32
    %149 = vector.broadcast %cst_105 : f32 to vector<1x16xf32>
    %150 = arith.mulf %148, %149 : vector<1x16xf32>
    %151 = arith.mulf %145, %145 : vector<1x16xf32>
    %152 = arith.subf %150, %151 : vector<1x16xf32>
    %153 = vector.broadcast %145 : vector<1x16xf32> to vector<512x16xf32>
    %154 = arith.subf %141, %153 : vector<512x16xf32>
    %cst_106 = arith.constant 9.99999974E-6 : f32
    %155 = vector.broadcast %cst_106 : f32 to vector<1x16xf32>
    %156 = arith.addf %152, %155 : vector<1x16xf32>
    %157 = math.rsqrt %156 : vector<1x16xf32>
    %158 = vector.broadcast %157 : vector<1x16xf32> to vector<512x16xf32>
    %159 = arith.mulf %154, %158 : vector<512x16xf32>
    %cst_107 = arith.constant 0.000000e+00 : f32
    %160 = vector.broadcast %cst_107 : f32 to vector<512x16xf32>
    %161 = arith.maximumf %159, %160 : vector<512x16xf32>
    %162 = tpu.transpose %161, [1, 0] : vector<512x16xf32> -> vector<16x512xf32>
    %163 = vector.extract_strided_slice %162 {offsets = [0, 0], sizes = [1, 256], strides = [1, 1]} : vector<16x512xf32> to vector<1x256xf32>
    %164 = vector.extract_strided_slice %162 {offsets = [1, 0], sizes = [1, 256], strides = [1, 1]} : vector<16x512xf32> to vector<1x256xf32>
    %165 = vector.extract_strided_slice %162 {offsets = [2, 0], sizes = [1, 256], strides = [1, 1]} : vector<16x512xf32> to vector<1x256xf32>
    %166 = vector.extract_strided_slice %162 {offsets = [3, 0], sizes = [1, 256], strides = [1, 1]} : vector<16x512xf32> to vector<1x256xf32>
    %167 = vector.extract_strided_slice %162 {offsets = [4, 0], sizes = [1, 256], strides = [1, 1]} : vector<16x512xf32> to vector<1x256xf32>
    %168 = vector.extract_strided_slice %162 {offsets = [5, 0], sizes = [1, 256], strides = [1, 1]} : vector<16x512xf32> to vector<1x256xf32>
    %169 = vector.extract_strided_slice %162 {offsets = [6, 0], sizes = [1, 256], strides = [1, 1]} : vector<16x512xf32> to vector<1x256xf32>
    %170 = vector.extract_strided_slice %162 {offsets = [7, 0], sizes = [1, 256], strides = [1, 1]} : vector<16x512xf32> to vector<1x256xf32>
    %171 = vector.extract_strided_slice %162 {offsets = [8, 0], sizes = [1, 256], strides = [1, 1]} : vector<16x512xf32> to vector<1x256xf32>
    %172 = vector.extract_strided_slice %162 {offsets = [9, 0], sizes = [1, 256], strides = [1, 1]} : vector<16x512xf32> to vector<1x256xf32>
    %173 = vector.extract_strided_slice %162 {offsets = [10, 0], sizes = [1, 256], strides = [1, 1]} : vector<16x512xf32> to vector<1x256xf32>
    %174 = vector.extract_strided_slice %162 {offsets = [11, 0], sizes = [1, 256], strides = [1, 1]} : vector<16x512xf32> to vector<1x256xf32>
    %175 = vector.extract_strided_slice %162 {offsets = [12, 0], sizes = [1, 256], strides = [1, 1]} : vector<16x512xf32> to vector<1x256xf32>
    %176 = vector.extract_strided_slice %162 {offsets = [13, 0], sizes = [1, 256], strides = [1, 1]} : vector<16x512xf32> to vector<1x256xf32>
    %177 = vector.extract_strided_slice %162 {offsets = [14, 0], sizes = [1, 256], strides = [1, 1]} : vector<16x512xf32> to vector<1x256xf32>
    %178 = vector.extract_strided_slice %162 {offsets = [15, 0], sizes = [1, 256], strides = [1, 1]} : vector<16x512xf32> to vector<1x256xf32>
    %179 = tpu.concatenate %163, %164, %165, %166, %167, %168, %169, %170, %171, %172, %173, %174, %175, %176, %177, %178 in 1 : vector<1x256xf32>, vector<1x256xf32>, vector<1x256xf32>, vector<1x256xf32>, vector<1x256xf32>, vector<1x256xf32>, vector<1x256xf32>, vector<1x256xf32>, vector<1x256xf32>, vector<1x256xf32>, vector<1x256xf32>, vector<1x256xf32>, vector<1x256xf32>, vector<1x256xf32>, vector<1x256xf32>, vector<1x256xf32> -> vector<1x4096xf32>
    %180 = vector.extract_strided_slice %162 {offsets = [0, 256], sizes = [1, 256], strides = [1, 1]} : vector<16x512xf32> to vector<1x256xf32>
    %181 = vector.extract_strided_slice %162 {offsets = [1, 256], sizes = [1, 256], strides = [1, 1]} : vector<16x512xf32> to vector<1x256xf32>
    %182 = vector.extract_strided_slice %162 {offsets = [2, 256], sizes = [1, 256], strides = [1, 1]} : vector<16x512xf32> to vector<1x256xf32>
    %183 = vector.extract_strided_slice %162 {offsets = [3, 256], sizes = [1, 256], strides = [1, 1]} : vector<16x512xf32> to vector<1x256xf32>
    %184 = vector.extract_strided_slice %162 {offsets = [4, 256], sizes = [1, 256], strides = [1, 1]} : vector<16x512xf32> to vector<1x256xf32>
    %185 = vector.extract_strided_slice %162 {offsets = [5, 256], sizes = [1, 256], strides = [1, 1]} : vector<16x512xf32> to vector<1x256xf32>
    %186 = vector.extract_strided_slice %162 {offsets = [6, 256], sizes = [1, 256], strides = [1, 1]} : vector<16x512xf32> to vector<1x256xf32>
    %187 = vector.extract_strided_slice %162 {offsets = [7, 256], sizes = [1, 256], strides = [1, 1]} : vector<16x512xf32> to vector<1x256xf32>
    %188 = vector.extract_strided_slice %162 {offsets = [8, 256], sizes = [1, 256], strides = [1, 1]} : vector<16x512xf32> to vector<1x256xf32>
    %189 = vector.extract_strided_slice %162 {offsets = [9, 256], sizes = [1, 256], strides = [1, 1]} : vector<16x512xf32> to vector<1x256xf32>
    %190 = vector.extract_strided_slice %162 {offsets = [10, 256], sizes = [1, 256], strides = [1, 1]} : vector<16x512xf32> to vector<1x256xf32>
    %191 = vector.extract_strided_slice %162 {offsets = [11, 256], sizes = [1, 256], strides = [1, 1]} : vector<16x512xf32> to vector<1x256xf32>
    %192 = vector.extract_strided_slice %162 {offsets = [12, 256], sizes = [1, 256], strides = [1, 1]} : vector<16x512xf32> to vector<1x256xf32>
    %193 = vector.extract_strided_slice %162 {offsets = [13, 256], sizes = [1, 256], strides = [1, 1]} : vector<16x512xf32> to vector<1x256xf32>
    %194 = vector.extract_strided_slice %162 {offsets = [14, 256], sizes = [1, 256], strides = [1, 1]} : vector<16x512xf32> to vector<1x256xf32>
    %195 = vector.extract_strided_slice %162 {offsets = [15, 256], sizes = [1, 256], strides = [1, 1]} : vector<16x512xf32> to vector<1x256xf32>
    %196 = tpu.concatenate %180, %181, %182, %183, %184, %185, %186, %187, %188, %189, %190, %191, %192, %193, %194, %195 in 1 : vector<1x256xf32>, vector<1x256xf32>, vector<1x256xf32>, vector<1x256xf32>, vector<1x256xf32>, vector<1x256xf32>, vector<1x256xf32>, vector<1x256xf32>, vector<1x256xf32>, vector<1x256xf32>, vector<1x256xf32>, vector<1x256xf32>, vector<1x256xf32>, vector<1x256xf32>, vector<1x256xf32>, vector<1x256xf32> -> vector<1x4096xf32>
    %197 = tpu.concatenate %179, %196 in 0 : vector<1x4096xf32>, vector<1x4096xf32> -> vector<2x4096xf32>
    %c0_108 = arith.constant 0 : index
    %c0_109 = arith.constant 0 : index
    %198 = vector.load %arg5[%c0_108, %c0_109] : memref<4096x32xbf16, #tpu.memory_space<vmem>>, vector<4096x32xbf16>
    %199 = arith.extf %198 : vector<4096x32xbf16> to vector<4096x32xf32>
    %cst_110 = arith.constant dense<0.000000e+00> : vector<2x32xf32>
    %200 = tpu.matmul %197, %199, %cst_110 {dimension_numbers = #tpu.dot_dimension_numbers<[1], [0], [0], [1], [0, 0, 1, 1], [], []>} : vector<2x4096xf32>, vector<4096x32xf32>, vector<2x32xf32> -> vector<2x32xf32>
    %c0_111 = arith.constant 0 : index
    %c0_112 = arith.constant 0 : index
    %201 = vector.load %arg6[%c0_111, %c0_112] : memref<1x32xf32, #tpu.memory_space<vmem>>, vector<1x32xf32>
    %202 = vector.broadcast %201 : vector<1x32xf32> to vector<2x32xf32>
    %203 = arith.addf %200, %202 : vector<2x32xf32>
    %cst_113 = arith.constant 0.000000e+00 : f32
    %204 = vector.broadcast %cst_113 : f32 to vector<2x32xf32>
    %205 = arith.maximumf %203, %204 : vector<2x32xf32>
    %c0_114 = arith.constant 0 : index
    %c0_115 = arith.constant 0 : index
    %206 = vector.load %arg7[%c0_114, %c0_115] : memref<32x8xf32, #tpu.memory_space<vmem>>, vector<32x8xf32>
    %cst_116 = arith.constant dense<0.000000e+00> : vector<2x8xf32>
    %207 = tpu.matmul %205, %206, %cst_116 {dimension_numbers = #tpu.dot_dimension_numbers<[1], [0], [0], [1], [0, 0, 1, 1], [], []>} : vector<2x32xf32>, vector<32x8xf32>, vector<2x8xf32> -> vector<2x8xf32>
    %c0_117 = arith.constant 0 : index
    %c0_118 = arith.constant 0 : index
    %208 = vector.load %arg8[%c0_117, %c0_118] : memref<1x8xf32, #tpu.memory_space<vmem>>, vector<1x8xf32>
    %209 = vector.broadcast %208 : vector<1x8xf32> to vector<2x8xf32>
    %210 = arith.addf %207, %209 : vector<2x8xf32>
    %c0_119 = arith.constant 0 : index
    %c0_120 = arith.constant 0 : index
    %211 = vector.load %arg9[%c0_119, %c0_120] : memref<2x8xf32, #tpu.memory_space<vmem>>, vector<2x8xf32>
    tpu.vector_store %arg9[%c0_119, %c0_120], %210 {strides = array<i32>} : memref<2x8xf32, #tpu.memory_space<vmem>>, vector<2x8xf32>,
    return
  }
}

</mosaic_0001>

<bundles_post_ra>
// kernel: hypernetwork_forward.1
= control target key start
LH: loop header
LB: loop body
LE: loop exit
PB: predicated region body
PF: predicated region fallthrough
CT: control target
= control target key end

     0   :  { %vm839_vm0 = vcmask 1043456   ;;  %vm33_vm1 = vcmask 31744   ;;  %v30358_v2 = vmov 0.0   ;;  %vm547_vm2 = vcmask 1040384   ;;  %s30348_s0 = inlined_call_operand.vmem [shape: f32[2,16,16,4], index: 0, kind: input, shape index: {}]   ;;  %s30349_s1 = inlined_call_operand.vmem [shape: f32[9,4,32], index: 1, kind: input, shape index: {}]   ;;  %s30350_s2 = inlined_call_operand.vmem [shape: f32[1,32], index: 2, kind: input, shape index: {}]   ;;  %s30351_s3 = inlined_call_operand.vmem [shape: f32[9,32,16], index: 3, kind: input, shape index: {}]   ;;  %s30352_s4 = inlined_call_operand.vmem [shape: f32[1,16], index: 4, kind: input, shape index: {}]   ;;  %s30353_s5 = inlined_call_operand.vmem [shape: bf16[4096,32], index: 5, kind: input, shape index: {}]   ;;  %s30354_s6 = inlined_call_operand.vmem [shape: f32[1,32], index: 6, kind: input, shape index: {}]   ;;  %s30355_s7 = inlined_call_operand.vmem [shape: f32[32,8], index: 7, kind: input, shape index: {}]   ;;  %s30356_s8 = inlined_call_operand.vmem [shape: f32[1,8], index: 8, kind: input, shape index: {}]   ;;  %s30357_s9 = inlined_call_operand.hbm [shape: f32[2,8], index: 9, kind: output, shape index: {}]  }
   0x1   :  { %v22366_v0 = vld [vmem:[%s30349_s1 + $0x4] sm:$0xf]  ;;  %35 = vst.msk [vmem:[#allocation2 + $0x8] sm:$0xff] %vm33_vm1, %v30358_v2  ;;  %34 = vst.msk [vmem:[#allocation2] sm:$0xff] %vm33_vm1, %v30358_v2  ;;  %v708_v3 = vld [vmem:[%s30349_s1] sm:$0xf] }
   0x2   :  { %v22371_v1 = vld [vmem:[%s30348_s0] sm:$0xff]  ;;  %18628 = vmatprep.subr.msk.mxu0 %vm839_vm0, %v22366_v0  ;;  %36 = vst.msk [vmem:[#allocation2 + $0x10] sm:$0xff] %vm33_vm1, %v30358_v2  ;;  %37 = vst.msk [vmem:[#allocation2 + $0x18] sm:$0xff] %vm33_vm1, %v30358_v2  ;;  %v179_v4 = vld [vmem:[%s30348_s0 + $0x8] sm:$0xff] }
   0x3   :  { %38 = vst.msk [vmem:[#allocation2 + $0x20] sm:$0xff] %vm33_vm1, %v30358_v2  ;;  %39 = vst.msk [vmem:[#allocation2 + $0x28] sm:$0xff] %vm33_vm1, %v30358_v2  ;;  %v180_v5 = vld [vmem:[%s30348_s0 + $0x10] sm:$0xff]  ;;  %18629 = vmatpush3.msk.msra.mxu0 %vm839_vm0, %v22366_v0  ;;  %v181_v6 = vld [vmem:[%s30348_s0 + $0x18] sm:$0xff] }
   0x4   :  { %40 = vst.msk [vmem:[#allocation2 + $0x30] sm:$0xff] %vm33_vm1, %v30358_v2  ;;  %41 = vst.msk [vmem:[#allocation2 + $0x38] sm:$0xff] %vm33_vm1, %v30358_v2  ;;  %v182_v7 = vld [vmem:[%s30348_s0 + $0x20] sm:$0xff]  ;;  %v183_v8 = vld [vmem:[%s30348_s0 + $0x28] sm:$0xff]  ;;  %18726 = vmatprep.subr.msk.mxu0 %vm839_vm0, %v708_v3 }
   0x5   :  { %42 = vst.msk [vmem:[#allocation2 + $0x40] sm:$0xff] %vm33_vm1, %v30358_v2  ;;  %43 = vst.msk [vmem:[#allocation2 + $0x48] sm:$0xff] %vm33_vm1, %v30358_v2  ;;  %v184_v9 = vld [vmem:[%s30348_s0 + $0x30] sm:$0xff]  ;;  %v185_v10 = vld [vmem:[%s30348_s0 + $0x38] sm:$0xff] }
   0x6   :  { %44 = vst.msk [vmem:[#allocation2 + $0x50] sm:$0xff] %vm33_vm1, %v30358_v2  ;;  %45 = vst.msk [vmem:[#allocation2 + $0x58] sm:$0xff] %vm33_vm1, %v30358_v2  ;;  %v186_v11 = vld [vmem:[%s30348_s0 + $0x40] sm:$0xff]  ;;  %v187_v12 = vld [vmem:[%s30348_s0 + $0x48] sm:$0xff] }
   0x7   :  { %46 = vst.msk [vmem:[#allocation2 + $0x60] sm:$0xff] %vm33_vm1, %v30358_v2  ;;  %47 = vst.msk [vmem:[#allocation2 + $0x68] sm:$0xff] %vm33_vm1, %v30358_v2  ;;  %v188_v13 = vld [vmem:[%s30348_s0 + $0x50] sm:$0xff]  ;;  %v189_v14 = vld [vmem:[%s30348_s0 + $0x58] sm:$0xff] }
   0x8   :  { %48 = vst.msk [vmem:[#allocation2 + $0x70] sm:$0xff] %vm33_vm1, %v30358_v2  ;;  %49 = vst.msk [vmem:[#allocation2 + $0x78] sm:$0xff] %vm33_vm1, %v30358_v2  ;;  %v190_v15 = vld [vmem:[%s30348_s0 + $0x60] sm:$0xff]  ;;  %v191_v16 = vld [vmem:[%s30348_s0 + $0x68] sm:$0xff] }
   0x9   :  { %50 = vst.msk [vmem:[#allocation2 + $0x80] sm:$0xff] %vm33_vm1, %v30358_v2  ;;  %51 = vst.msk [vmem:[#allocation2 + $0x88] sm:$0xff] %vm33_vm1, %v30358_v2  ;;  %v192_v17 = vld [vmem:[%s30348_s0 + $0x70] sm:$0xff]  ;;  %v193_v18 = vld [vmem:[%s30348_s0 + $0x78] sm:$0xff] }
   0xa   :  { %52 = vst.msk [vmem:[#allocation2 + $0x90] sm:$0xff] %vm33_vm1, %v30358_v2  ;;  %53 = vst.msk [vmem:[#allocation2 + $0x98] sm:$0xff] %vm33_vm1, %v30358_v2  ;;  %v194_v19 = vld [vmem:[%s30348_s0 + $0x80] sm:$0xff]  ;;  %v195_v20 = vld [vmem:[%s30348_s0 + $0x88] sm:$0xff] }
   0xb   :  { %54 = vst.msk [vmem:[#allocation2 + $0xa0] sm:$0xff] %vm33_vm1, %v30358_v2  ;;  %55 = vst.msk [vmem:[#allocation2 + $0xa8] sm:$0xff] %vm33_vm1, %v30358_v2  ;;  %v196_v21 = vld [vmem:[%s30348_s0 + $0x90] sm:$0xff]  ;;  %v197_v22 = vld [vmem:[%s30348_s0 + $0x98] sm:$0xff] }
   0xc   :  { %56 = vst.msk [vmem:[#allocation2 + $0xb0] sm:$0xff] %vm33_vm1, %v30358_v2  ;;  %57 = vst.msk [vmem:[#allocation2 + $0xb8] sm:$0xff] %vm33_vm1, %v30358_v2  ;;  %v198_v23 = vld [vmem:[%s30348_s0 + $0xa0] sm:$0xff]  ;;  %v22748_v24 = vld [vmem:[#allocation2 + $0x8] sm:$0xff] }
   0xd   :  { %58 = vst.msk [vmem:[#allocation2 + $0xc0] sm:$0xff] %vm33_vm1, %v30358_v2  ;;  %59 = vst.msk [vmem:[#allocation2 + $0xc8] sm:$0xff] %vm33_vm1, %v30358_v2  ;;  %v22750_v25 = vld [vmem:[#allocation2 + $0x10] sm:$0xff]  ;;  %v199_v26 = vld [vmem:[%s30348_s0 + $0xa8] sm:$0xff]  ;;  %v30361_v27 = vrot.slane %v22748_v24, 7  ;;  %18630 = vmatprep.mubr.msk.f32.mxu0 %vm33_vm1, %v22748_v24 }
   0xe   :  { %60 = vst.msk [vmem:[#allocation2 + $0xd0] sm:$0xff] %vm33_vm1, %v30358_v2  ;;  %61 = vst.msk [vmem:[#allocation2 + $0xd8] sm:$0xff] %vm33_vm1, %v30358_v2  ;;  %v551_v28 = vrot.slane %v22750_v25, 7  ;;  %18631 = vmatmul.mubr.msk.f32.vlgmr.msra.gmra.mrb[0].mxu0 %vm33_vm1, %v22750_v25  ;;  %v200_v35 = vld [vmem:[%s30348_s0 + $0xb0] sm:$0xff]  ;;  %v201_v36 = vld [vmem:[%s30348_s0 + $0xb8] sm:$0xff] }
   0xf   :  { %62 = vst.msk [vmem:[#allocation2 + $0xe0] sm:$0xff] %vm33_vm1, %v30358_v2  ;;  %63 = vst.msk [vmem:[#allocation2 + $0xe8] sm:$0xff] %vm33_vm1, %v30358_v2  ;;  %18727 = vmatpush3.msk.msra.mxu0 %vm839_vm0, %v708_v3  ;;  %v202_v37 = vld [vmem:[%s30348_s0 + $0xc0] sm:$0xff]  ;;  %v203_v38 = vld [vmem:[%s30348_s0 + $0xc8] sm:$0xff] }
  0x10   :  { %64 = vst.msk [vmem:[#allocation2 + $0xf0] sm:$0xff] %vm33_vm1, %v30358_v2  ;;  %65 = vst.msk [vmem:[#allocation2 + $0xf8] sm:$0xff] %vm33_vm1, %v30358_v2  ;;  %v22775_v31 = vsel %vm547_vm2, %v30361_v27, %v551_v28  ;;  %v204_v39 = vld [vmem:[%s30348_s0 + $0xd0] sm:$0xff]  ;;  %v205_v40 = vld [vmem:[%s30348_s0 + $0xd8] sm:$0xff] }
  0x11   :  { %66 = vst.msk [vmem:[#allocation2 + $0x100] sm:$0xff] %vm33_vm1, %v30358_v2  ;;  %67 = vst.msk [vmem:[#allocation2 + $0x108] sm:$0xff] %vm33_vm1, %v30358_v2  ;;  %v206_v42 = vld [vmem:[%s30348_s0 + $0xe0] sm:$0xff]  ;;  %v207_v43 = vld [vmem:[%s30348_s0 + $0xe8] sm:$0xff] }
  0x12   :  { %68 = vst.msk [vmem:[#allocation2 + $0x110] sm:$0xff] %vm33_vm1, %v30358_v2  ;;  %69 = vst.msk [vmem:[#allocation2 + $0x118] sm:$0xff] %vm33_vm1, %v30358_v2  ;;  %v210_v45 = vld [vmem:[%s30348_s0 + $0x100] sm:$0xff]  ;;  %v211_v46 = vld [vmem:[%s30348_s0 + $0x108] sm:$0xff] }
  0x13   :  { %70 = vst.msk [vmem:[#allocation2 + $0x120] sm:$0xff] %vm33_vm1, %v30358_v2  ;;  %71 = vst.msk [vmem:[#allocation2 + $0x128] sm:$0xff] %vm33_vm1, %v30358_v2  ;;  %v212_v48 = vld [vmem:[%s30348_s0 + $0x110] sm:$0xff]  ;;  %v213_v49 = vld [vmem:[%s30348_s0 + $0x118] sm:$0xff] }
  0x14   :  { %72 = vst.msk [vmem:[#allocation2 + $0x130] sm:$0xff] %vm33_vm1, %v30358_v2  ;;  %73 = vst.msk [vmem:[#allocation2 + $0x138] sm:$0xff] %vm33_vm1, %v30358_v2  ;;  %v214_v50 = vld [vmem:[%s30348_s0 + $0x120] sm:$0xff]  ;;  %v215_v52 = vld [vmem:[%s30348_s0 + $0x128] sm:$0xff] }
  0x15   :  { %74 = vst.msk [vmem:[#allocation2 + $0x140] sm:$0xff] %vm33_vm1, %v30358_v2  ;;  %75 = vst.msk [vmem:[#allocation2 + $0x148] sm:$0xff] %vm33_vm1, %v30358_v2  ;;  %v216_v53 = vld [vmem:[%s30348_s0 + $0x130] sm:$0xff]  ;;  %v217_v54 = vld [vmem:[%s30348_s0 + $0x138] sm:$0xff] }
  0x16   :  { %76 = vst.msk [vmem:[#allocation2 + $0x150] sm:$0xff] %vm33_vm1, %v30358_v2  ;;  %77 = vst.msk [vmem:[#allocation2 + $0x158] sm:$0xff] %vm33_vm1, %v30358_v2  ;;  %v218_v55 = vld [vmem:[%s30348_s0 + $0x140] sm:$0xff]  ;;  %v219_v56 = vld [vmem:[%s30348_s0 + $0x148] sm:$0xff] }
  0x17   :  { %78 = vst.msk [vmem:[#allocation2 + $0x160] sm:$0xff] %vm33_vm1, %v30358_v2  ;;  %79 = vst.msk [vmem:[#allocation2 + $0x168] sm:$0xff] %vm33_vm1, %v30358_v2  ;;  %v220_v57 = vld [vmem:[%s30348_s0 + $0x150] sm:$0xff]  ;;  %v221_v58 = vld [vmem:[%s30348_s0 + $0x158] sm:$0xff] }
  0x18   :  { %80 = vst.msk [vmem:[#allocation2 + $0x170] sm:$0xff] %vm33_vm1, %v30358_v2  ;;  %81 = vst.msk [vmem:[#allocation2 + $0x178] sm:$0xff] %vm33_vm1, %v30358_v2  ;;  %v222_v59 = vld [vmem:[%s30348_s0 + $0x160] sm:$0xff]  ;;  %v223_v60 = vld [vmem:[%s30348_s0 + $0x168] sm:$0xff] }
  0x19   :  { %82 = vst.msk [vmem:[#allocation2 + $0x180] sm:$0xff] %vm33_vm1, %v30358_v2  ;;  %83 = vst.msk [vmem:[#allocation2 + $0x188] sm:$0xff] %vm33_vm1, %v30358_v2  ;;  %v224_v62 = vld [vmem:[%s30348_s0 + $0x170] sm:$0xff]  ;;  %v225_v0 = vld [vmem:[%s30348_s0 + $0x178] sm:$0xff] }
  0x1a   :  { %84 = vst.msk [vmem:[#allocation2 + $0x190] sm:$0xff] %vm33_vm1, %v30358_v2  ;;  %85 = vst.msk [vmem:[#allocation2 + $0x198] sm:$0xff] %vm33_vm1, %v30358_v2 }
  0x1b   :  { %86 = vst.msk [vmem:[#allocation2 + $0x1a0] sm:$0xff] %vm33_vm1, %v30358_v2  ;;  %87 = vst.msk [vmem:[#allocation2 + $0x1a8] sm:$0xff] %vm33_vm1, %v30358_v2 }
  0x1c   :  { %88 = vst.msk [vmem:[#allocation2 + $0x1b0] sm:$0xff] %vm33_vm1, %v30358_v2  ;;  %89 = vst.msk [vmem:[#allocation2 + $0x1b8] sm:$0xff] %vm33_vm1, %v30358_v2 }
  0x1d   :  { %90 = vst.msk [vmem:[#allocation2 + $0x1c0] sm:$0xff] %vm33_vm1, %v30358_v2  ;;  %91 = vst.msk [vmem:[#allocation2 + $0x1c8] sm:$0xff] %vm33_vm1, %v30358_v2 }
  0x1e   :  { %92 = vst.msk [vmem:[#allocation2 + $0x1d0] sm:$0xff] %vm33_vm1, %v30358_v2  ;;  %93 = vst.msk [vmem:[#allocation2 + $0x1d8] sm:$0xff] %vm33_vm1, %v30358_v2 }
  0x1f   :  { %94 = vst.msk [vmem:[#allocation2 + $0x1e0] sm:$0xff] %vm33_vm1, %v30358_v2  ;;  %95 = vst.msk [vmem:[#allocation2 + $0x1e8] sm:$0xff] %vm33_vm1, %v30358_v2 }
  0x20   :  { %96 = vst.msk [vmem:[#allocation2 + $0x1f0] sm:$0xff] %vm33_vm1, %v30358_v2  ;;  %97 = vst.msk [vmem:[#allocation2 + $0x1f8] sm:$0xff] %vm33_vm1, %v30358_v2 }
  0x21   :  { %98 = vst.msk [vmem:[#allocation2 + $0x200] sm:$0xff] %vm33_vm1, %v30358_v2  ;;  %99 = vst.msk [vmem:[#allocation2 + $0x208] sm:$0xff] %vm33_vm1, %v30358_v2 }
  0x22   :  { %100 = vst.msk [vmem:[#allocation2 + $0x210] sm:$0xff] %vm33_vm1, %v30358_v2  ;;  %101 = vst.msk [vmem:[#allocation2 + $0x218] sm:$0xff] %vm33_vm1, %v30358_v2 }
  0x23   :  { %102 = vst.msk [vmem:[#allocation2 + $0x220] sm:$0xff] %vm33_vm1, %v30358_v2  ;;  %103 = vst.msk [vmem:[#allocation2 + $0x228] sm:$0xff] %vm33_vm1, %v30358_v2 }
  0x24   :  { %104 = vst.msk [vmem:[#allocation2 + $0x230] sm:$0xff] %vm33_vm1, %v30358_v2  ;;  %105 = vst.msk [vmem:[#allocation2 + $0x238] sm:$0xff] %vm33_vm1, %v30358_v2 }
  0x25   :  { %106 = vst.msk [vmem:[#allocation2 + $0x240] sm:$0xff] %vm33_vm1, %v30358_v2  ;;  %107 = vst.msk [vmem:[#allocation2 + $0x248] sm:$0xff] %vm33_vm1, %v30358_v2 }
  0x26   :  { %108 = vst.msk [vmem:[#allocation2 + $0x250] sm:$0xff] %vm33_vm1, %v30358_v2  ;;  %109 = vst.msk [vmem:[#allocation2 + $0x258] sm:$0xff] %vm33_vm1, %v30358_v2 }
  0x27   :  { %110 = vst.msk [vmem:[#allocation2 + $0x260] sm:$0xff] %vm33_vm1, %v30358_v2  ;;  %111 = vst.msk [vmem:[#allocation2 + $0x268] sm:$0xff] %vm33_vm1, %v30358_v2 }
  0x28   :  { %112 = vst.msk [vmem:[#allocation2 + $0x270] sm:$0xff] %vm33_vm1, %v30358_v2  ;;  %113 = vst.msk [vmem:[#allocation2 + $0x278] sm:$0xff] %vm33_vm1, %v30358_v2 }
  0x29   :  { %114 = vst.msk [vmem:[#allocation2 + $0x280] sm:$0xff] %vm33_vm1, %v30358_v2  ;;  %115 = vst.msk [vmem:[#allocation2 + $0x288] sm:$0xff] %vm33_vm1, %v30358_v2 }
  0x2a   :  { %116 = vst.msk [vmem:[#allocation2 + $0x290] sm:$0xff] %vm33_vm1, %v30358_v2  ;;  %117 = vst.msk [vmem:[#allocation2 + $0x298] sm:$0xff] %vm33_vm1, %v30358_v2 }
  0x2b   :  { %118 = vst.msk [vmem:[#allocation2 + $0x2a0] sm:$0xff] %vm33_vm1, %v30358_v2  ;;  %119 = vst.msk [vmem:[#allocation2 + $0x2a8] sm:$0xff] %vm33_vm1, %v30358_v2 }
  0x2c   :  { %120 = vst.msk [vmem:[#allocation2 + $0x2b0] sm:$0xff] %vm33_vm1, %v30358_v2  ;;  %121 = vst.msk [vmem:[#allocation2 + $0x2b8] sm:$0xff] %vm33_vm1, %v30358_v2 }
  0x2d   :  { %122 = vst.msk [vmem:[#allocation2 + $0x2c0] sm:$0xff] %vm33_vm1, %v30358_v2  ;;  %123 = vst.msk [vmem:[#allocation2 + $0x2c8] sm:$0xff] %vm33_vm1, %v30358_v2 }
  0x2e   :  { %124 = vst.msk [vmem:[#allocation2 + $0x2d0] sm:$0xff] %vm33_vm1, %v30358_v2  ;;  %125 = vst.msk [vmem:[#allocation2 + $0x2d8] sm:$0xff] %vm33_vm1, %v30358_v2 }
  0x2f   :  { %126 = vst.msk [vmem:[#allocation2 + $0x2e0] sm:$0xff] %vm33_vm1, %v30358_v2  ;;  %127 = vst.msk [vmem:[#allocation2 + $0x2e8] sm:$0xff] %vm33_vm1, %v30358_v2 }
  0x30   :  { %128 = vst.msk [vmem:[#allocation2 + $0x2f0] sm:$0xff] %vm33_vm1, %v30358_v2  ;;  %129 = vst.msk [vmem:[#allocation2 + $0x2f8] sm:$0xff] %vm33_vm1, %v30358_v2 }
  0x31   :  { %130 = vst.msk [vmem:[#allocation2 + $0x300] sm:$0xff] %vm33_vm1, %v30358_v2  ;;  %131 = vst.msk [vmem:[#allocation2 + $0x308] sm:$0xff] %vm33_vm1, %v30358_v2 }
  0x32   :  { %132 = vst.msk [vmem:[#allocation2 + $0x310] sm:$0xff] %vm33_vm1, %v30358_v2  ;;  %133 = vst.msk [vmem:[#allocation2 + $0x318] sm:$0xff] %vm33_vm1, %v30358_v2 }
  0x33   :  { %134 = vst.msk [vmem:[#allocation2 + $0x320] sm:$0xff] %vm33_vm1, %v30358_v2  ;;  %135 = vst.msk [vmem:[#allocation2 + $0x328] sm:$0xff] %vm33_vm1, %v30358_v2 }
  0x34   :  { %136 = vst.msk [vmem:[#allocation2 + $0x330] sm:$0xff] %vm33_vm1, %v30358_v2  ;;  %137 = vst.msk [vmem:[#allocation2 + $0x338] sm:$0xff] %vm33_vm1, %v30358_v2 }
  0x35   :  { %138 = vst.msk [vmem:[#allocation2 + $0x340] sm:$0xff] %vm33_vm1, %v30358_v2  ;;  %139 = vst.msk [vmem:[#allocation2 + $0x348] sm:$0xff] %vm33_vm1, %v30358_v2 }
  0x36   :  { %140 = vst.msk [vmem:[#allocation2 + $0x350] sm:$0xff] %vm33_vm1, %v30358_v2  ;;  %141 = vst.msk [vmem:[#allocation2 + $0x358] sm:$0xff] %vm33_vm1, %v30358_v2 }
  0x37   :  { %142 = vst.msk [vmem:[#allocation2 + $0x360] sm:$0xff] %vm33_vm1, %v30358_v2  ;;  %143 = vst.msk [vmem:[#allocation2 + $0x368] sm:$0xff] %vm33_vm1, %v30358_v2 }
  0x38   :  { %144 = vst.msk [vmem:[#allocation2 + $0x370] sm:$0xff] %vm33_vm1, %v30358_v2  ;;  %145 = vst.msk [vmem:[#allocation2 + $0x378] sm:$0xff] %vm33_vm1, %v30358_v2 }
  0x39   :  { %146 = vst.msk [vmem:[#allocation2 + $0x380] sm:$0xff] %vm33_vm1, %v30358_v2  ;;  %147 = vst.msk [vmem:[#allocation2 + $0x388] sm:$0xff] %vm33_vm1, %v30358_v2 }
  0x3a   :  { %148 = vst.msk [vmem:[#allocation2 + $0x390] sm:$0xff] %vm33_vm1, %v30358_v2  ;;  %149 = vst.msk [vmem:[#allocation2 + $0x398] sm:$0xff] %vm33_vm1, %v30358_v2 }
  0x3b   :  { %150 = vst.msk [vmem:[#allocation2 + $0x3a0] sm:$0xff] %vm33_vm1, %v30358_v2  ;;  %151 = vst.msk [vmem:[#allocation2 + $0x3a8] sm:$0xff] %vm33_vm1, %v30358_v2 }
  0x3c   :  { %152 = vst.msk [vmem:[#allocation2 + $0x3b0] sm:$0xff] %vm33_vm1, %v30358_v2  ;;  %153 = vst.msk [vmem:[#allocation2 + $0x3b8] sm:$0xff] %vm33_vm1, %v30358_v2 }
  0x3d   :  { %154 = vst.msk [vmem:[#allocation2 + $0x3c0] sm:$0xff] %vm33_vm1, %v30358_v2  ;;  %155 = vst.msk [vmem:[#allocation2 + $0x3c8] sm:$0xff] %vm33_vm1, %v30358_v2 }
  0x3e   :  { %156 = vst.msk [vmem:[#allocation2 + $0x3d0] sm:$0xff] %vm33_vm1, %v30358_v2  ;;  %157 = vst.msk [vmem:[#allocation2 + $0x3d8] sm:$0xff] %vm33_vm1, %v30358_v2 }
  0x3f   :  { %158 = vst.msk [vmem:[#allocation2 + $0x3e0] sm:$0xff] %vm33_vm1, %v30358_v2  ;;  %159 = vst.msk [vmem:[#allocation2 + $0x3e8] sm:$0xff] %vm33_vm1, %v30358_v2 }
  0x40   :  { %160 = vst.msk [vmem:[#allocation2 + $0x3f0] sm:$0xff] %vm33_vm1, %v30358_v2  ;;  %161 = vst.msk [vmem:[#allocation2 + $0x3f8] sm:$0xff] %vm33_vm1, %v30358_v2 }
  0x41   :  { %162 = vst.msk [vmem:[#allocation2 + $0x400] sm:$0xff] %vm33_vm1, %v30358_v2  ;;  %163 = vst.msk [vmem:[#allocation2 + $0x408] sm:$0xff] %vm33_vm1, %v30358_v2 }
  0x42   :  { %164 = vst.msk [vmem:[#allocation2 + $0x410] sm:$0xff] %vm33_vm1, %v30358_v2  ;;  %165 = vst.msk [vmem:[#allocation2 + $0x418] sm:$0xff] %vm33_vm1, %v30358_v2 }
  0x43   :  { %166 = vst.msk [vmem:[#allocation2 + $0x420] sm:$0xff] %vm33_vm1, %v30358_v2  ;;  %167 = vst.msk [vmem:[#allocation2 + $0x428] sm:$0xff] %vm33_vm1, %v30358_v2 }
  0x44   :  { %168 = vst.msk [vmem:[#allocation2 + $0x430] sm:$0xff] %vm33_vm1, %v30358_v2  ;;  %169 = vst.msk [vmem:[#allocation2 + $0x438] sm:$0xff] %vm33_vm1, %v30358_v2 }
  0x45   :  { %170 = vst.msk [vmem:[#allocation2 + $0x440] sm:$0xff] %vm33_vm1, %v30358_v2  ;;  %171 = vst.msk [vmem:[#allocation2 + $0x448] sm:$0xff] %vm33_vm1, %v30358_v2 }
  0x46   :  { %172 = vst.msk [vmem:[#allocation2 + $0x450] sm:$0xff] %vm33_vm1, %v30358_v2  ;;  %173 = vst.msk [vmem:[#allocation2 + $0x458] sm:$0xff] %vm33_vm1, %v30358_v2 }
  0x47   :  { %174 = vst.msk [vmem:[#allocation2 + $0x460] sm:$0xff] %vm33_vm1, %v30358_v2  ;;  %175 = vst.msk [vmem:[#allocation2 + $0x468] sm:$0xff] %vm33_vm1, %v30358_v2 }
  0x48   :  { %176 = vst.msk [vmem:[#allocation2 + $0x470] sm:$0xff] %vm33_vm1, %v30358_v2  ;;  %177 = vst.msk [vmem:[#allocation2 + $0x478] sm:$0xff] %vm33_vm1, %v30358_v2 }
  0x49   :  { %243 = vst.msk [vmem:[#allocation2 + $0x28] sm:$0xff] %vm33_vm1, %v22371_v1  ;;  %244 = vst.msk [vmem:[#allocation2 + $0x30] sm:$0xff] %vm33_vm1, %v179_v4  ;;  %v226_v4 = vld [vmem:[%s30348_s0 + $0x180] sm:$0xff] }
  0x4a   :  { %245 = vst.msk [vmem:[#allocation2 + $0x48] sm:$0xff] %vm33_vm1, %v180_v5  ;;  %246 = vst.msk [vmem:[#allocation2 + $0x50] sm:$0xff] %vm33_vm1, %v181_v6  ;;  %v227_v5 = vld [vmem:[%s30348_s0 + $0x188] sm:$0xff]  ;;  %v228_v6 = vld [vmem:[%s30348_s0 + $0x190] sm:$0xff] }
  0x4b   :  { %247 = vst.msk [vmem:[#allocation2 + $0x68] sm:$0xff] %vm33_vm1, %v182_v7  ;;  %248 = vst.msk [vmem:[#allocation2 + $0x70] sm:$0xff] %vm33_vm1, %v183_v8  ;;  %v229_v7 = vld [vmem:[%s30348_s0 + $0x198] sm:$0xff]  ;;  %v230_v8 = vld [vmem:[%s30348_s0 + $0x1a0] sm:$0xff] }
  0x4c   :  { %249 = vst.msk [vmem:[#allocation2 + $0x88] sm:$0xff] %vm33_vm1, %v184_v9  ;;  %250 = vst.msk [vmem:[#allocation2 + $0x90] sm:$0xff] %vm33_vm1, %v185_v10  ;;  %v231_v10 = vld [vmem:[%s30348_s0 + $0x1a8] sm:$0xff] }
  0x4d   :  { %251 = vst.msk [vmem:[#allocation2 + $0xa8] sm:$0xff] %vm33_vm1, %v186_v11  ;;  %252 = vst.msk [vmem:[#allocation2 + $0xb0] sm:$0xff] %vm33_vm1, %v187_v12  ;;  %v232_v11 = vld [vmem:[%s30348_s0 + $0x1b0] sm:$0xff] }
  0x4e   :  { %253 = vst.msk [vmem:[#allocation2 + $0xc8] sm:$0xff] %vm33_vm1, %v188_v13  ;;  %254 = vst.msk [vmem:[#allocation2 + $0xd0] sm:$0xff] %vm33_vm1, %v189_v14  ;;  %v233_v13 = vld [vmem:[%s30348_s0 + $0x1b8] sm:$0xff]  ;;  %v234_v14 = vld [vmem:[%s30348_s0 + $0x1c0] sm:$0xff] }
  0x4f   :  { %255 = vst.msk [vmem:[#allocation2 + $0xe8] sm:$0xff] %vm33_vm1, %v190_v15  ;;  %256 = vst.msk [vmem:[#allocation2 + $0xf0] sm:$0xff] %vm33_vm1, %v191_v16  ;;  %v235_v15 = vld [vmem:[%s30348_s0 + $0x1c8] sm:$0xff]  ;;  %v236_v16 = vld [vmem:[%s30348_s0 + $0x1d0] sm:$0xff] }
  0x50   :  { %257 = vst.msk [vmem:[#allocation2 + $0x108] sm:$0xff] %vm33_vm1, %v192_v17  ;;  %258 = vst.msk [vmem:[#allocation2 + $0x110] sm:$0xff] %vm33_vm1, %v193_v18  ;;  %v22762_v29 = vld [vmem:[#allocation2 + $0x28] sm:$0xff]  ;;  %v22770_v30 = vld [vmem:[#allocation2 + $0x30] sm:$0xff] }
  0x51   :  { %259 = vst.msk [vmem:[#allocation2 + $0x128] sm:$0xff] %vm33_vm1, %v194_v19  ;;  %260 = vst.msk [vmem:[#allocation2 + $0x130] sm:$0xff] %vm33_vm1, %v195_v20  ;;  %18633 = vmatprep.mubr.msk.f32.mxu0 %vm33_vm1, %v22762_v29  ;;  %v22777_v32 = vld [vmem:[#allocation2 + $0x48] sm:$0xff]  ;;  %v22783_v33 = vld [vmem:[#allocation2 + $0x50] sm:$0xff] }
  0x52   :  { %261 = vst.msk [vmem:[#allocation2 + $0x148] sm:$0xff] %vm33_vm1, %v196_v21  ;;  %262 = vst.msk [vmem:[#allocation2 + $0x150] sm:$0xff] %vm33_vm1, %v197_v22  ;;  %18634 = vmatmul.mubr.msk.f32.gmra.mrb[2].mxu0 %vm33_vm1, %v22770_v30  ;;  %v22785_v34 = vld [vmem:[#allocation2 + $0x68] sm:$0xff]  ;;  %v22812_v41 = vld [vmem:[#allocation2 + $0x70] sm:$0xff] }
  0x53   :  { %263 = vst.msk [vmem:[#allocation2 + $0x168] sm:$0xff] %vm33_vm1, %v198_v23  ;;  %30926 = vst [vmem:[#allocation7_spill] sm:$0xff] %v22762_v29  ;;  %18636 = vmatprep.mubr.msk.f32.mxu0 %vm33_vm1, %v22777_v32  ;;  %v22823_v44 = vld [vmem:[#allocation2 + $0x88] sm:$0xff]  ;;  %v22833_v47 = vld [vmem:[#allocation2 + $0x90] sm:$0xff] }
  0x54   :  { %264 = vst.msk [vmem:[#allocation2 + $0x170] sm:$0xff] %vm33_vm1, %v199_v26  ;;  %265 = vst.msk [vmem:[#allocation2 + $0x188] sm:$0xff] %vm33_vm1, %v200_v35  ;;  %v22848_v51 = vld [vmem:[#allocation2 + $0xa8] sm:$0xff]  ;;  %v22895_v61 = vld [vmem:[#allocation2 + $0xb0] sm:$0xff] }
  0x55   :  { %266 = vst.msk [vmem:[#allocation2 + $0x190] sm:$0xff] %vm33_vm1, %v201_v36  ;;  %267 = vst.msk [vmem:[#allocation2 + $0x1a8] sm:$0xff] %vm33_vm1, %v202_v37  ;;  %v22900_v63 = vld [vmem:[#allocation2 + $0xc8] sm:$0xff]  ;;  %v22911_v1 = vld [vmem:[#allocation2 + $0xd0] sm:$0xff] }
  0x56   :  { %18637 = vmatmul.mubr.msk.f32.gmra.mrb[4].mxu0 %vm33_vm1, %v22783_v33  ;;  %268 = vst.msk [vmem:[#allocation2 + $0x1b0] sm:$0xff] %vm33_vm1, %v203_v38  ;;  %269 = vst.msk [vmem:[#allocation2 + $0x1c8] sm:$0xff] %vm33_vm1, %v204_v39  ;;  %v22913_v3 = vld [vmem:[#allocation2 + $0xe8] sm:$0xff]  ;;  %v22936_v9 = vld [vmem:[#allocation2 + $0xf0] sm:$0xff] }
  0x57   :  { %18639 = vmatprep.mubr.msk.f32.mxu0 %vm33_vm1, %v22785_v34  ;;  %270 = vst.msk [vmem:[#allocation2 + $0x1d0] sm:$0xff] %vm33_vm1, %v205_v40  ;;  %271 = vst.msk [vmem:[#allocation2 + $0x1e8] sm:$0xff] %vm33_vm1, %v206_v42  ;;  %v22947_v12 = vld [vmem:[#allocation2 + $0x108] sm:$0xff]  ;;  %v237_v17 = vld [vmem:[%s30348_s0 + $0x1d8] sm:$0xff] }
  0x58   :  { %272 = vst.msk [vmem:[#allocation2 + $0x1f0] sm:$0xff] %vm33_vm1, %v207_v43  ;;  %275 = vst.msk [vmem:[#allocation2 + $0x268] sm:$0xff] %vm33_vm1, %v210_v45  ;;  %v238_v18 = vld [vmem:[%s30348_s0 + $0x1e0] sm:$0xff]  ;;  %v239_v19 = vld [vmem:[%s30348_s0 + $0x1e8] sm:$0xff] }
  0x59   :  { %276 = vst.msk [vmem:[#allocation2 + $0x270] sm:$0xff] %vm33_vm1, %v211_v46  ;;  %277 = vst.msk [vmem:[#allocation2 + $0x288] sm:$0xff] %vm33_vm1, %v212_v48  ;;  %v22981_v20 = vld [vmem:[#allocation2 + $0x110] sm:$0xff]  ;;  %v22988_v21 = vld [vmem:[%s30349_s1 + $0x8] sm:$0xf] }
  0x5a   :  { %18640 = vmatmul.mubr.msk.f32.gmra.mrb[6].mxu0 %vm33_vm1, %v22812_v41  ;;  %278 = vst.msk [vmem:[#allocation2 + $0x290] sm:$0xff] %vm33_vm1, %v213_v49  ;;  %279 = vst.msk [vmem:[#allocation2 + $0x2a8] sm:$0xff] %vm33_vm1, %v214_v50  ;;  %v22990_v22 = vld [vmem:[#allocation2 + $0x128] sm:$0xff]  ;;  %18824 = vmatprep.subr.msk.mxu0 %vm839_vm0, %v22988_v21  ;;  %v22998_v23 = vld [vmem:[#allocation2 + $0x130] sm:$0xff] }
  0x5b   :  { %18642 = vmatprep.mubr.msk.f32.mxu0 %vm33_vm1, %v22823_v44  ;;  %280 = vst.msk [vmem:[#allocation2 + $0x2b0] sm:$0xff] %vm33_vm1, %v215_v52  ;;  %281 = vst.msk [vmem:[#allocation2 + $0x2c8] sm:$0xff] %vm33_vm1, %v216_v53  ;;  %v23000_v26 = vld [vmem:[#allocation2 + $0x148] sm:$0xff]  ;;  %v23006_v28 = vld [vmem:[#allocation2 + $0x150] sm:$0xff] }
  0x5c   :  { %282 = vst.msk [vmem:[#allocation2 + $0x2d0] sm:$0xff] %vm33_vm1, %v217_v54  ;;  %283 = vst.msk [vmem:[#allocation2 + $0x2e8] sm:$0xff] %vm33_vm1, %v218_v55 }
  0x5d   :  { %284 = vst.msk [vmem:[#allocation2 + $0x2f0] sm:$0xff] %vm33_vm1, %v219_v56  ;;  %285 = vst.msk [vmem:[#allocation2 + $0x308] sm:$0xff] %vm33_vm1, %v220_v57 }
  0x5e   :  { %286 = vst.msk [vmem:[#allocation2 + $0x310] sm:$0xff] %vm33_vm1, %v221_v58  ;;  %287 = vst.msk [vmem:[#allocation2 + $0x328] sm:$0xff] %vm33_vm1, %v222_v59  ;;  %18643 = vmatmul.mubr.msk.f32.gmra.mrb[8].mxu0 %vm33_vm1, %v22833_v47 }
  0x5f   :  { %288 = vst.msk [vmem:[#allocation2 + $0x330] sm:$0xff] %vm33_vm1, %v223_v60  ;;  %18645 = vmatprep.mubr.msk.f32.mxu0 %vm33_vm1, %v22848_v51  ;;  %289 = vst.msk [vmem:[#allocation2 + $0x348] sm:$0xff] %vm33_vm1, %v224_v62 }
  0x60   :  { %290 = vst.msk [vmem:[#allocation2 + $0x350] sm:$0xff] %vm33_vm1, %v225_v0  ;;  %291 = vst.msk [vmem:[#allocation2 + $0x368] sm:$0xff] %vm33_vm1, %v226_v4 }
  0x61   :  { %292 = vst.msk [vmem:[#allocation2 + $0x370] sm:$0xff] %vm33_vm1, %v227_v5  ;;  %293 = vst.msk [vmem:[#allocation2 + $0x388] sm:$0xff] %vm33_vm1, %v228_v6 }
  0x62   :  { %18646 = vmatmul.mubr.msk.f32.gmra.mrb[10].mxu0 %vm33_vm1, %v22895_v61  ;;  %294 = vst.msk [vmem:[#allocation2 + $0x390] sm:$0xff] %vm33_vm1, %v229_v7  ;;  %295 = vst.msk [vmem:[#allocation2 + $0x3a8] sm:$0xff] %vm33_vm1, %v230_v8 }
  0x63   :  { %18648 = vmatprep.mubr.msk.f32.mxu0 %vm33_vm1, %v22900_v63  ;;  %296 = vst.msk [vmem:[#allocation2 + $0x3b0] sm:$0xff] %vm33_vm1, %v231_v10  ;;  %297 = vst.msk [vmem:[#allocation2 + $0x3c8] sm:$0xff] %vm33_vm1, %v232_v11 }
  0x64   :  { %298 = vst.msk [vmem:[#allocation2 + $0x3d0] sm:$0xff] %vm33_vm1, %v233_v13  ;;  %299 = vst.msk [vmem:[#allocation2 + $0x3e8] sm:$0xff] %vm33_vm1, %v234_v14 }
  0x65   :  { %300 = vst.msk [vmem:[#allocation2 + $0x3f0] sm:$0xff] %vm33_vm1, %v235_v15  ;;  %301 = vst.msk [vmem:[#allocation2 + $0x408] sm:$0xff] %vm33_vm1, %v236_v16 }
  0x66   :  { %18649 = vmatmul.mubr.msk.f32.gmra.mrb[12].mxu0 %vm33_vm1, %v22911_v1  ;;  %302 = vst.msk [vmem:[#allocation2 + $0x410] sm:$0xff] %vm33_vm1, %v237_v17  ;;  %303 = vst.msk [vmem:[#allocation2 + $0x428] sm:$0xff] %vm33_vm1, %v238_v18 }
  0x67   :  { %18651 = vmatprep.mubr.msk.f32.mxu0 %vm33_vm1, %v22913_v3  ;;  %304 = vst.msk [vmem:[#allocation2 + $0x430] sm:$0xff] %vm33_vm1, %v239_v19 }
  0x6a   :  { %18652 = vmatmul.mubr.msk.f32.gmra.mrb[14].mxu0 %vm33_vm1, %v22936_v9 }
  0x6b   :  { %18654 = vmatprep.mubr.msk.f32.mxu0 %vm33_vm1, %v22947_v12 }
  0x6e   :  { %18655 = vmatmul.mubr.msk.f32.gmra.mrb[16].mxu0 %vm33_vm1, %v22981_v20 }
  0x6f   :  { %18657 = vmatprep.mubr.msk.f32.mxu0 %vm33_vm1, %v22990_v22 }
  0x72   :  { %18658 = vmatmul.mubr.msk.f32.gmra.mrb[18].mxu0 %vm33_vm1, %v22998_v23 }
  0x73   :  { %18660 = vmatprep.mubr.msk.f32.mxu0 %vm33_vm1, %v23000_v26 }
  0x74   :  { %14 = vsyncpa [#allocation5], 0  ;;  %v23008_v35 = vld [vmem:[#allocation2 + $0x168] sm:$0xff]  ;;  %v23014_v36 = vld [vmem:[#allocation2 + $0x170] sm:$0xff]  ;;  %vm1776_vm3 = vcmask 1046528   ;;  %vm5418_vm4 = vcmask 261120  }
  0x75   :  { %v23016_v37 = vld [vmem:[#allocation2 + $0x188] sm:$0xff]  ;;  %v23022_v38 = vld [vmem:[#allocation2 + $0x190] sm:$0xff]  ;;  %vm11264_vm5 = vcmask 130048   ;;  %vm22311_vm6 = vmmov 0   ;;  %s22312_s29 = smov [#allocation4]   ;;  %vm14341_vm7 = vcmask 58368  }
  0x76   :  { %18661 = vmatmul.mubr.msk.f32.gmra.mrb[20].mxu0 %vm33_vm1, %v23006_v28  ;;  %v23024_v39 = vld [vmem:[#allocation2 + $0x1a8] sm:$0xff]  ;;  %v23030_v40 = vld [vmem:[#allocation2 + $0x1b0] sm:$0xff]  ;;  %s14349_s30 = sshll.u32 %s22312_s29, 4  ;;  %s14350_s30 = int_to_ptr.vmem [resolvable:$true] %s14349_s30 }
  0x77   :  { %18663 = vmatprep.mubr.msk.f32.mxu0 %vm33_vm1, %v23008_v35  ;;  %v23032_v42 = vld [vmem:[#allocation2 + $0x1c8] sm:$0xff]  ;;  %v23038_v43 = vld [vmem:[#allocation2 + $0x1d0] sm:$0xff]  ;;  %s22285_s10 = scalar_lea.vmem %s14350_s30, 32  ;;  %p22290_p1 = scmp.lt.s32.totalorder %s14350_s30, %s14350_s30 }
  0x78   :  { %v23040_v45 = vld [vmem:[#allocation2 + $0x1e8] sm:$0xff]  ;;  %v23046_v48 = vld [vmem:[#allocation2 + $0x250] sm:$0xff]  ;;  %p22286_p0 = scmp.ne.s32.totalorder %s14350_s30, %s22285_s10  ;;  %p22291_p2 = scmp.lt.s32.totalorder %s22285_s10, %s22285_s10 }
  0x79   :  { %30927 = vst [vmem:[#allocation8_spill] sm:$0xff] %v23040_v45  ;;  %v23044_v46 = vld [vmem:[#allocation2 + $0x248] sm:$0xff]  ;;  %v23050_v49 = vld [vmem:[#allocation2 + $0x1f0] sm:$0xff]  ;;  %v631_v52 = vrot.slane %v23046_v48, 7 }
  0x7a   :  { %18664 = vmatmul.mubr.msk.f32.gmra.mrb[22].mxu0 %vm33_vm1, %v23014_v36  ;;  %v30360_v50 = vrot.slane %v23044_v46, 7  ;;  %v23063_v54 = vld [vmem:[#allocation2 + $0x268] sm:$0xff]  ;;  %v23069_v55 = vld [vmem:[#allocation2 + $0x270] sm:$0xff]  ;;  %p22292_p3 = por %p22291_p2, %p22290_p1 }
  0x7b   :  { %18666 = vmatprep.mubr.msk.f32.mxu0 %vm33_vm1, %v23016_v37  ;;  %v23071_v56 = vld [vmem:[#allocation2 + $0x288] sm:$0xff]  ;;  %v23077_v57 = vld [vmem:[#allocation2 + $0x290] sm:$0xff] }
  0x7c   :  { %v23061_v53 = vsel %vm547_vm2, %v30360_v50, %v631_v52  ;;  %v23079_v58 = vld [vmem:[#allocation2 + $0x2a8] sm:$0xff]  ;;  %v23085_v59 = vld [vmem:[#allocation2 + $0x2b0] sm:$0xff]  ;;  %p22293_p4 = pnand %p22292_p3, %p22286_p0 }
  0x7d   :  { %v23087_v60 = vld [vmem:[#allocation2 + $0x2c8] sm:$0xff]  ;;  %v23093_v62 = vld [vmem:[#allocation2 + $0x2d0] sm:$0xff] }
  0x7e   :  { %18667 = vmatmul.mubr.msk.f32.gmra.mrb[24].mxu0 %vm33_vm1, %v23022_v38  ;;  %v23095_v0 = vld [vmem:[#allocation2 + $0x2e8] sm:$0xff]  ;;  %v23101_v4 = vld [vmem:[#allocation2 + $0x2f0] sm:$0xff] }
  0x7f   :  { %18669 = vmatprep.mubr.msk.f32.mxu0 %vm33_vm1, %v23024_v39  ;;  %v23103_v5 = vld [vmem:[#allocation2 + $0x308] sm:$0xff]  ;;  %v23109_v6 = vld [vmem:[#allocation2 + $0x310] sm:$0xff] }
  0x80   :  { %v23111_v7 = vld [vmem:[#allocation2 + $0x328] sm:$0xff]  ;;  %v23117_v8 = vld [vmem:[#allocation2 + $0x330] sm:$0xff] }
  0x81   :  { %v23119_v10 = vld [vmem:[#allocation2 + $0x348] sm:$0xff]  ;;  %v23125_v11 = vld [vmem:[#allocation2 + $0x350] sm:$0xff] }
  0x82   :  { %18670 = vmatmul.mubr.msk.f32.gmra.mrb[26].mxu0 %vm33_vm1, %v23030_v40  ;;  %30928 = vst [vmem:[#allocation9_spill] sm:$0xff] %v23119_v10  ;;  %30929 = vst [vmem:[#allocation10_spill] sm:$0xff] %v23125_v11  ;;  %v23127_v13 = vld [vmem:[#allocation2 + $0x368] sm:$0xff]  ;;  %v23133_v14 = vld [vmem:[#allocation2 + $0x370] sm:$0xff] }
  0x83   :  { %18672 = vmatprep.mubr.msk.f32.mxu0 %vm33_vm1, %v23032_v42  ;;  %30930 = vst [vmem:[#allocation11_spill] sm:$0xff] %v23127_v13  ;;  %30931 = vst [vmem:[#allocation12_spill] sm:$0xff] %v23133_v14  ;;  %v23135_v15 = vld [vmem:[#allocation2 + $0x388] sm:$0xff]  ;;  %v23141_v16 = vld [vmem:[#allocation2 + $0x390] sm:$0xff] }
  0x84   :  { %30932 = vst [vmem:[#allocation13_spill] sm:$0xff] %v23135_v15  ;;  %30933 = vst [vmem:[#allocation14_spill] sm:$0xff] %v23141_v16  ;;  %v23143_v17 = vld [vmem:[#allocation2 + $0x3a8] sm:$0xff]  ;;  %v23149_v18 = vld [vmem:[#allocation2 + $0x3b0] sm:$0xff] }
  0x85   :  { %30934 = vst [vmem:[#allocation15_spill] sm:$0xff] %v23143_v17  ;;  %30935 = vst [vmem:[#allocation16_spill] sm:$0xff] %v23149_v18  ;;  %v23151_v19 = vld [vmem:[#allocation2 + $0x3c8] sm:$0xff]  ;;  %v23157_v52 = vld [vmem:[#allocation2 + $0x3d0] sm:$0xff] }
  0x86   :  { %18673 = vmatmul.mubr.msk.f32.gmra.mrb[28].mxu0 %vm33_vm1, %v23038_v43  ;;  %30936 = vst [vmem:[#allocation17_spill] sm:$0xff] %v23151_v19  ;;  %30937 = vst [vmem:[#allocation18_spill] sm:$0xff] %v23157_v52  ;;  %v23159_v2 = vld [vmem:[#allocation2 + $0x3e8] sm:$0xff]  ;;  %v23165_v50 = vld [vmem:[#allocation2 + $0x3f0] sm:$0xff] }
  0x87   :  { %18675 = vmatprep.mubr.msk.f32.mxu0 %vm33_vm1, %v23040_v45  ;;  %30938 = vst [vmem:[#allocation19_spill] sm:$0xff] %v23159_v2  ;;  %30939 = vst [vmem:[#allocation20_spill] sm:$0xff] %v23165_v50  ;;  %v23167_v27 = vld [vmem:[#allocation2 + $0x408] sm:$0xff] }
  0x88   :  { %30940 = vst [vmem:[#allocation21_spill] sm:$0xff] %v23167_v27 }
  0x8a   :  { %18676 = vmatmul.mubr.msk.f32.gmra.mrb[30].mxu0 %vm33_vm1, %v23050_v49 }
  0x8b   :  { %18678 = vmatprep.mubr.msk.f32.mxu0 %vm33_vm1, %v23044_v46 }
  0x8e   :  { %18679 = vmatmul.mubr.msk.f32.gmra.mrb[32].mxu0 %vm33_vm1, %v23046_v48 }
  0x8f   :  { %18681 = vmatprep.mubr.msk.f32.mxu0 %vm33_vm1, %v23063_v54 }
  0x92   :  { %18682 = vmatmul.mubr.msk.f32.gmra.mrb[34].mxu0 %vm33_vm1, %v23069_v55 }
  0x93   :  { %18684 = vmatprep.mubr.msk.f32.mxu0 %vm33_vm1, %v23071_v56 }
  0x96   :  { %18685 = vmatmul.mubr.msk.f32.gmra.mrb[36].mxu0 %vm33_vm1, %v23077_v57 }
  0x97   :  { %18687 = vmatprep.mubr.msk.f32.mxu0 %vm33_vm1, %v23079_v58 }
  0x9a   :  { %18688 = vmatmul.mubr.msk.f32.gmra.mrb[38].mxu0 %vm33_vm1, %v23085_v59 }
  0x9b   :  { %18690 = vmatprep.mubr.msk.f32.mxu0 %vm33_vm1, %v23087_v60 }
  0x9e   :  { %18691 = vmatmul.mubr.msk.f32.gmra.mrb[40].mxu0 %vm33_vm1, %v23093_v62 }
  0x9f   :  { %18693 = vmatprep.mubr.msk.f32.mxu0 %vm33_vm1, %v23095_v0 }
  0xa2   :  { %18694 = vmatmul.mubr.msk.f32.gmra.mrb[42].mxu0 %vm33_vm1, %v23101_v4 }
  0xa3   :  { %18696 = vmatprep.mubr.msk.f32.mxu0 %vm33_vm1, %v23103_v5 }
  0xa6   :  { %18697 = vmatmul.mubr.msk.f32.gmra.mrb[44].mxu0 %vm33_vm1, %v23109_v6 }
  0xa7   :  { %18699 = vmatprep.mubr.msk.f32.mxu0 %vm33_vm1, %v23111_v7 }
  0xaa   :  { %18700 = vmatmul.mubr.msk.f32.gmra.mrb[46].mxu0 %vm33_vm1, %v23117_v8 }
  0xab   :  { %18702 = vmatprep.mubr.msk.f32.mxu0 %vm33_vm1, %v23119_v10 }
  0xae   :  { %18703 = vmatmul.mubr.msk.f32.gmra.mrb[48].mxu0 %vm33_vm1, %v23125_v11  ;;  %v315_v11 = vld [vmem:[#allocation2 + $0x40] sm:$0xff] }
  0xaf   :  { %18705 = vmatprep.mubr.msk.f32.mxu0 %vm33_vm1, %v23127_v13 }
  0xb2   :  { %18706 = vmatmul.mubr.msk.f32.gmra.mrb[50].mxu0 %vm33_vm1, %v23133_v14  ;;  %v30943_v14 = vrot.slane %v22748_v24, 7 }
  0xb3   :  { %18708 = vmatprep.mubr.msk.f32.mxu0 %vm33_vm1, %v23135_v15  ;;  %v30390_v15 = vrot.slane %v22750_v25, 1 }
  0xb6   :  { %18709 = vmatmul.mubr.msk.f32.gmra.mrb[52].mxu0 %vm33_vm1, %v23141_v16 }
  0xb7   :  { %18711 = vmatprep.mubr.msk.f32.mxu0 %vm33_vm1, %v23143_v17  ;;  %v307_v17 = vld [vmem:[#allocation2] sm:$0xff] }
  0xb8   :  { %v548_v16 = vrot.slane %v307_v17, 7 }
  0xba   :  { %18712 = vmatmul.mubr.msk.f32.gmra.mrb[54].mxu0 %vm33_vm1, %v23149_v18  ;;  %v23175_v18 = vld [vmem:[#allocation2 + $0x428] sm:$0xff]  ;;  %v550_v13 = vsel %vm547_vm2, %v548_v16, %v30943_v14  ;;  %v559_v14 = vrot.slane %v22777_v32, 7  ;;  %v319_v16 = vld [vmem:[#allocation2 + $0x60] sm:$0xff] }
  0xbb   :  { %18714 = vmatprep.mubr.msk.f32.mxu0 %vm33_vm1, %v23151_v19  ;;  %v23173_v19 = vld [vmem:[#allocation2 + $0x410] sm:$0xff]  ;;  %30942 = vst [vmem:[#allocation23_spill] sm:$0xff] %v23175_v18 }
  0xbc   :  { %30941 = vst [vmem:[#allocation22_spill] sm:$0xff] %v23173_v19 }
  0xbe   :  { %18715 = vmatmul.mubr.msk.f32.gmra.mrb[56].mxu0 %vm33_vm1, %v23157_v52  ;;  %v311_v52 = vld [vmem:[#allocation2 + $0x20] sm:$0xff] }
  0xbf   :  { %18717 = vmatprep.mubr.msk.f32.mxu0 %vm33_vm1, %v23159_v2  ;;  %v1777_v2 = vrot.slane %v22748_v24, 1  ;;  %v553_v17 = vrot.slane %v311_v52, 7  ;;  %v558_v24 = vrot.slane %v315_v11, 7  ;;  %v23205_v52 = vld [vmem:[%s30349_s1 + $0xc] sm:$0xf]  ;;  %v561_v11 = vrot.slane %v22783_v33, 7 }
  0xc2   :  { %18718 = vmatmul.mubr.msk.f32.gmra.mrb[58].mxu0 %vm33_vm1, %v23165_v50  ;;  %v23183_v50 = vld [vmem:[#allocation2 + $0x430] sm:$0xff] }
  0xc3   :  { %18720 = vmatprep.mubr.msk.f32.mxu0 %vm33_vm1, %v23167_v27  ;;  %v554_v27 = vrot.slane %v22762_v29, 7 }
  0xc5   :  { %v23199_v29 = vsel %vm547_vm2, %v553_v17, %v554_v27  ;;  %v563_v17 = vrot.slane %v319_v16, 7  ;;  %v569_v16 = vrot.slane %v22823_v44, 7 }
  0xc6   :  { %18721 = vmatmul.mubr.msk.f32.gmra.mrb[60].mxu0 %vm33_vm1, %v23173_v19  ;;  %v556_v19 = vrot.slane %v22770_v30, 7  ;;  %30944 = vst [vmem:[#allocation24_spill] sm:$0xff] %v23199_v29 }
  0xc7   :  { %18723 = vmatprep.mubr.msk.f32.mxu0 %vm33_vm1, %v23175_v18  ;;  %v23196_v18 = vsel %vm1776_vm3, %v1777_v2, %v30390_v15  ;;  %v564_v15 = vrot.slane %v22785_v34, 7 }
  0xc8   :  { %v23214_v2 = vsel %vm547_vm2, %v554_v27, %v556_v19  ;;  %v23228_v27 = vsel %vm547_vm2, %v559_v14, %v561_v11 }
  0xc9   :  { %30945 = vst [vmem:[#allocation25_spill] sm:$0xff] %v23214_v2  ;;  %30947 = vst [vmem:[#allocation27_spill] sm:$0xff] %v23228_v27  ;;  %v23232_v19 = vsel %vm547_vm2, %v563_v17, %v564_v15 }
  0xca   :  { %18724 = vmatmul.mubr.msk.f32.gmra.mrb[62].mxu0 %vm33_vm1, %v23183_v50  ;;  %30948 = vst [vmem:[#allocation28_spill] sm:$0xff] %v23232_v19 }
  0xcb   :  { %18728 = vmatprep.mubr.msk.f32.mxu0 %vm33_vm1, %v550_v13  ;;  %v23218_v13 = vsel %vm547_vm2, %v558_v24, %v559_v14  ;;  %v571_v14 = vrot.slane %v22833_v47, 7 }
  0xcc   :  { %30946 = vst [vmem:[#allocation26_spill] sm:$0xff] %v23218_v13 }
  0xce   :  { %18729 = vmatmul.mubr.msk.f32.vlgmr.msra.gmra.mrb[0].mxu0 %vm33_vm1, %v22775_v31  ;;  %v323_v31 = vld [vmem:[#allocation2 + $0x80] sm:$0xff] }
  0xcf   :  { %18825 = vmatpush3.msk.msra.mxu0 %vm839_vm0, %v22988_v21  ;;  %18731 = vmatprep.mubr.msk.f32.mxu0 %vm33_vm1, %v23199_v29  ;;  %v566_v21 = vrot.slane %v22812_v41, 7  ;;  %v568_v24 = vrot.slane %v323_v31, 7  ;;  %v327_v29 = vld [vmem:[#allocation2 + $0xa0] sm:$0xff]  ;;  %v574_v31 = vrot.slane %v22848_v51, 7 }
  0xd0   :  { %18922 = vmatprep.subr.msk.mxu0 %vm839_vm0, %v23205_v52  ;;  %v573_v17 = vrot.slane %v327_v29, 7  ;;  %v579_v29 = vrot.slane %v22900_v63, 7 }
  0xd1   :  { %v23244_v11 = vsel %vm547_vm2, %v568_v24, %v569_v16 }
  0xd2   :  { %18732 = vmatmul.mubr.msk.f32.gmra.mrb[2].mxu0 %vm33_vm1, %v23214_v2  ;;  %30950 = vst [vmem:[#allocation30_spill] sm:$0xff] %v23244_v11  ;;  %v331_v2 = vld [vmem:[#allocation2 + $0xc0] sm:$0xff] }
  0xd3   :  { %18734 = vmatprep.mubr.msk.f32.mxu0 %vm33_vm1, %v23218_v13  ;;  %v23240_v13 = vsel %vm547_vm2, %v564_v15, %v566_v21  ;;  %v576_v15 = vrot.slane %v22895_v61, 7  ;;  %v23256_v21 = vsel %vm547_vm2, %v573_v17, %v574_v31  ;;  %v578_v24 = vrot.slane %v331_v2, 7 }
  0xd4   :  { %30949 = vst [vmem:[#allocation29_spill] sm:$0xff] %v23240_v13  ;;  %30952 = vst [vmem:[#allocation32_spill] sm:$0xff] %v23256_v21  ;;  %v584_v2 = vrot.slane %v22913_v3, 7 }
  0xd6   :  { %18735 = vmatmul.mubr.msk.f32.gmra.mrb[4].mxu0 %vm33_vm1, %v23228_v27  ;;  %v335_v27 = vld [vmem:[#allocation2 + $0xe0] sm:$0xff] }
  0xd7   :  { %18737 = vmatprep.mubr.msk.f32.mxu0 %vm33_vm1, %v23232_v19  ;;  %v23252_v19 = vsel %vm547_vm2, %v569_v16, %v571_v14  ;;  %v581_v16 = vrot.slane %v22911_v1, 7  ;;  %v23268_v14 = vsel %vm547_vm2, %v578_v24, %v579_v29  ;;  %v583_v17 = vrot.slane %v335_v27, 7 }
  0xd8   :  { %30951 = vst [vmem:[#allocation31_spill] sm:$0xff] %v23252_v19  ;;  %30954 = vst [vmem:[#allocation34_spill] sm:$0xff] %v23268_v14  ;;  %v589_v27 = vrot.slane %v22947_v12, 7 }
  0xda   :  { %18738 = vmatmul.mubr.msk.f32.gmra.mrb[6].mxu0 %vm33_vm1, %v23240_v13  ;;  %v339_v13 = vld [vmem:[#allocation2 + $0x100] sm:$0xff] }
  0xdb   :  { %18740 = vmatprep.mubr.msk.f32.mxu0 %vm33_vm1, %v23244_v11  ;;  %v23264_v11 = vsel %vm547_vm2, %v574_v31, %v576_v15  ;;  %v586_v31 = vrot.slane %v22936_v9, 7  ;;  %v23280_v15 = vsel %vm547_vm2, %v583_v17, %v584_v2  ;;  %v588_v24 = vrot.slane %v339_v13, 7 }
  0xdc   :  { %30953 = vst [vmem:[#allocation33_spill] sm:$0xff] %v23264_v11  ;;  %30956 = vst [vmem:[#allocation36_spill] sm:$0xff] %v23280_v15  ;;  %v594_v13 = vrot.slane %v22990_v22, 7 }
  0xde   :  { %18741 = vmatmul.mubr.msk.f32.gmra.mrb[8].mxu0 %vm33_vm1, %v23252_v19  ;;  %v343_v19 = vld [vmem:[#allocation2 + $0x120] sm:$0xff] }
  0xdf   :  { %18743 = vmatprep.mubr.msk.f32.mxu0 %vm33_vm1, %v23256_v21  ;;  %v23276_v21 = vsel %vm547_vm2, %v579_v29, %v581_v16  ;;  %v591_v29 = vrot.slane %v22981_v20, 7  ;;  %v23292_v16 = vsel %vm547_vm2, %v588_v24, %v589_v27  ;;  %v593_v17 = vrot.slane %v343_v19, 7 }
  0xe0   :  { %30955 = vst [vmem:[#allocation35_spill] sm:$0xff] %v23276_v21  ;;  %30958 = vst [vmem:[#allocation38_spill] sm:$0xff] %v23292_v16  ;;  %v599_v19 = vrot.slane %v23000_v26, 7 }
  0xe2   :  { %18744 = vmatmul.mubr.msk.f32.gmra.mrb[10].mxu0 %vm33_vm1, %v23264_v11  ;;  %v347_v11 = vld [vmem:[#allocation2 + $0x140] sm:$0xff] }
  0xe3   :  { %18746 = vmatprep.mubr.msk.f32.mxu0 %vm33_vm1, %v23268_v14  ;;  %v23288_v14 = vsel %vm547_vm2, %v584_v2, %v586_v31  ;;  %v596_v2 = vrot.slane %v22998_v23, 7  ;;  %v23304_v31 = vsel %vm547_vm2, %v593_v17, %v594_v13  ;;  %v598_v24 = vrot.slane %v347_v11, 7 }
  0xe4   :  { %30957 = vst [vmem:[#allocation37_spill] sm:$0xff] %v23288_v14  ;;  %30960 = vst [vmem:[#allocation40_spill] sm:$0xff] %v23304_v31  ;;  %v604_v11 = vrot.slane %v23008_v35, 7 }
  0xe6   :  { %18747 = vmatmul.mubr.msk.f32.gmra.mrb[12].mxu0 %vm33_vm1, %v23276_v21  ;;  %v351_v21 = vld [vmem:[#allocation2 + $0x160] sm:$0xff] }
  0xe7   :  { %18749 = vmatprep.mubr.msk.f32.mxu0 %vm33_vm1, %v23280_v15  ;;  %v23300_v15 = vsel %vm547_vm2, %v589_v27, %v591_v29  ;;  %v601_v27 = vrot.slane %v23006_v28, 7  ;;  %v23316_v29 = vsel %vm547_vm2, %v598_v24, %v599_v19  ;;  %v603_v17 = vrot.slane %v351_v21, 7 }
  0xe8   :  { %30959 = vst [vmem:[#allocation39_spill] sm:$0xff] %v23300_v15  ;;  %30962 = vst [vmem:[#allocation42_spill] sm:$0xff] %v23316_v29  ;;  %v609_v21 = vrot.slane %v23016_v37, 7 }
  0xea   :  { %18750 = vmatmul.mubr.msk.f32.gmra.mrb[14].mxu0 %vm33_vm1, %v23288_v14  ;;  %v355_v14 = vld [vmem:[#allocation2 + $0x180] sm:$0xff] }
  0xeb   :  { %18752 = vmatprep.mubr.msk.f32.mxu0 %vm33_vm1, %v23292_v16  ;;  %v23312_v16 = vsel %vm547_vm2, %v594_v13, %v596_v2  ;;  %v606_v13 = vrot.slane %v23014_v36, 7  ;;  %v23328_v2 = vsel %vm547_vm2, %v603_v17, %v604_v11  ;;  %v608_v24 = vrot.slane %v355_v14, 7 }
  0xec   :  { %30961 = vst [vmem:[#allocation41_spill] sm:$0xff] %v23312_v16  ;;  %30964 = vst [vmem:[#allocation44_spill] sm:$0xff] %v23328_v2  ;;  %v614_v14 = vrot.slane %v23024_v39, 7 }
  0xee   :  { %18753 = vmatmul.mubr.msk.f32.gmra.mrb[16].mxu0 %vm33_vm1, %v23300_v15  ;;  %v359_v15 = vld [vmem:[#allocation2 + $0x1a0] sm:$0xff] }
  0xef   :  { %18755 = vmatprep.mubr.msk.f32.mxu0 %vm33_vm1, %v23304_v31  ;;  %v23324_v31 = vsel %vm547_vm2, %v599_v19, %v601_v27  ;;  %v611_v19 = vrot.slane %v23022_v38, 7  ;;  %v23340_v27 = vsel %vm547_vm2, %v608_v24, %v609_v21  ;;  %v613_v17 = vrot.slane %v359_v15, 7 }
  0xf0   :  { %30963 = vst [vmem:[#allocation43_spill] sm:$0xff] %v23324_v31  ;;  %30966 = vst [vmem:[#allocation46_spill] sm:$0xff] %v23340_v27  ;;  %v619_v15 = vrot.slane %v23032_v42, 7 }
  0xf2   :  { %18756 = vmatmul.mubr.msk.f32.gmra.mrb[18].mxu0 %vm33_vm1, %v23312_v16  ;;  %v363_v16 = vld [vmem:[#allocation2 + $0x1c0] sm:$0xff] }
  0xf3   :  { %18758 = vmatprep.mubr.msk.f32.mxu0 %vm33_vm1, %v23316_v29  ;;  %v23336_v29 = vsel %vm547_vm2, %v604_v11, %v606_v13  ;;  %v616_v11 = vrot.slane %v23030_v40, 7  ;;  %v23352_v13 = vsel %vm547_vm2, %v613_v17, %v614_v14  ;;  %v618_v24 = vrot.slane %v363_v16, 7 }
  0xf4   :  { %30965 = vst [vmem:[#allocation45_spill] sm:$0xff] %v23336_v29  ;;  %30968 = vst [vmem:[#allocation48_spill] sm:$0xff] %v23352_v13  ;;  %v624_v16 = vrot.slane %v23040_v45, 7  ;;  %v30448_v45 = vrot.slane %v23046_v48, 1 }
  0xf6   :  { %18759 = vmatmul.mubr.msk.f32.gmra.mrb[20].mxu0 %vm33_vm1, %v23324_v31  ;;  %v367_v31 = vld [vmem:[#allocation2 + $0x1e0] sm:$0xff] }
  0xf7   :  { %18761 = vmatprep.mubr.msk.f32.mxu0 %vm33_vm1, %v23328_v2  ;;  %v23348_v2 = vsel %vm547_vm2, %v609_v21, %v611_v19  ;;  %v621_v21 = vrot.slane %v23038_v43, 7  ;;  %v23364_v19 = vsel %vm547_vm2, %v618_v24, %v619_v15  ;;  %v623_v17 = vrot.slane %v367_v31, 7 }
  0xf8   :  { %30967 = vst [vmem:[#allocation47_spill] sm:$0xff] %v23348_v2  ;;  %30970 = vst [vmem:[#allocation50_spill] sm:$0xff] %v23364_v19  ;;  %v1857_v31 = vrot.slane %v23044_v46, 1 }
  0xfa   :  { %18762 = vmatmul.mubr.msk.f32.gmra.mrb[22].mxu0 %vm33_vm1, %v23336_v29  ;;  %v379_v29 = vld [vmem:[#allocation2 + $0x240] sm:$0xff] }
  0xfb   :  { %18764 = vmatprep.mubr.msk.f32.mxu0 %vm33_vm1, %v23340_v27  ;;  %v23360_v27 = vsel %vm547_vm2, %v614_v14, %v616_v11  ;;  %v626_v14 = vrot.slane %v23050_v49, 7  ;;  %v23376_v11 = vsel %vm547_vm2, %v623_v17, %v624_v16  ;;  %v628_v24 = vrot.slane %v379_v29, 7 }
  0xfc   :  { %30969 = vst [vmem:[#allocation49_spill] sm:$0xff] %v23360_v27  ;;  %30972 = vst [vmem:[#allocation52_spill] sm:$0xff] %v23376_v11  ;;  %v30974_v17 = vrot.slane %v23044_v46, 7 }
  0xfe   :  { %18765 = vmatmul.mubr.msk.f32.gmra.mrb[24].mxu0 %vm33_vm1, %v23348_v2  ;;  %v383_v2 = vld [vmem:[#allocation2 + $0x260] sm:$0xff]  ;;  %v630_v29 = vsel %vm547_vm2, %v628_v24, %v30974_v17 }
  0xff   :  { %18767 = vmatprep.mubr.msk.f32.mxu0 %vm33_vm1, %v23352_v13  ;;  %v23372_v13 = vsel %vm547_vm2, %v619_v15, %v621_v21  ;;  %v23385_v15 = vsel %vm547_vm2, %v624_v16, %v626_v14  ;;  %v634_v21 = vrot.slane %v23063_v54, 7  ;;  %v639_v14 = vrot.slane %v23071_v56, 7 }
 0x100   :  { %30971 = vst [vmem:[#allocation51_spill] sm:$0xff] %v23372_v13  ;;  %30973 = vst [vmem:[#allocation53_spill] sm:$0xff] %v23385_v15 }
 0x102   :  { %18768 = vmatmul.mubr.msk.f32.gmra.mrb[26].mxu0 %vm33_vm1, %v23360_v27  ;;  %v387_v27 = vld [vmem:[#allocation2 + $0x280] sm:$0xff] }
 0x103   :  { %18770 = vmatprep.mubr.msk.f32.mxu0 %vm33_vm1, %v23364_v19  ;;  %v633_v19 = vrot.slane %v383_v2, 7  ;;  %v638_v46 = vrot.slane %v387_v27, 7  ;;  %v391_v2 = vld [vmem:[#allocation2 + $0x2a0] sm:$0xff]  ;;  %v644_v27 = vrot.slane %v23079_v58, 7 }
 0x105   :  { %v23401_v16 = vsel %vm547_vm2, %v633_v19, %v634_v21  ;;  %v23413_v17 = vsel %vm547_vm2, %v638_v46, %v639_v14  ;;  %v643_v19 = vrot.slane %v391_v2, 7  ;;  %v649_v2 = vrot.slane %v23087_v60, 7 }
 0x106   :  { %18771 = vmatmul.mubr.msk.f32.gmra.mrb[28].mxu0 %vm33_vm1, %v23372_v13  ;;  %v23396_v13 = vsel %vm1776_vm3, %v1857_v31, %v30448_v45  ;;  %30975 = vst [vmem:[#allocation54_spill] sm:$0xff] %v23401_v16  ;;  %v641_v31 = vrot.slane %v23077_v57, 7  ;;  %30977 = vst [vmem:[#allocation56_spill] sm:$0xff] %v23413_v17  ;;  %v399_v45 = vld [vmem:[#allocation2 + $0x2e0] sm:$0xff] }
 0x107   :  { %18773 = vmatprep.mubr.msk.f32.mxu0 %vm33_vm1, %v23376_v11  ;;  %v636_v11 = vrot.slane %v23069_v55, 7 }
 0x109   :  { %v23409_v24 = vsel %vm547_vm2, %v634_v21, %v636_v11  ;;  %v646_v11 = vrot.slane %v23085_v59, 7  ;;  %v23425_v21 = vsel %vm547_vm2, %v643_v19, %v644_v27  ;;  %v653_v19 = vrot.slane %v399_v45, 7 }
 0x10a   :  { %18774 = vmatmul.mubr.msk.f32.gmra.mrb[30].mxu0 %vm33_vm1, %v23385_v15  ;;  %30976 = vst [vmem:[#allocation55_spill] sm:$0xff] %v23409_v24  ;;  %30979 = vst [vmem:[#allocation58_spill] sm:$0xff] %v23425_v21  ;;  %v659_v45 = vrot.slane %v23103_v5, 7  ;;  %v419_v15 = vld [vmem:[#allocation2 + $0x380] sm:$0xff] }
 0x10b   :  { %18776 = vmatprep.mubr.msk.f32.mxu0 %vm33_vm1, %v630_v29  ;;  %v395_v29 = vld [vmem:[#allocation2 + $0x2c0] sm:$0xff] }
 0x10c   :  { %v648_v46 = vrot.slane %v395_v29, 7  ;;  %v654_v29 = vrot.slane %v23095_v0, 7 }
 0x10e   :  { %18777 = vmatmul.mubr.msk.f32.gmra.mrb[32].mxu0 %vm33_vm1, %v23061_v53  ;;  %v23421_v53 = vsel %vm547_vm2, %v639_v14, %v641_v31  ;;  %v651_v14 = vrot.slane %v23093_v62, 7  ;;  %v23437_v31 = vsel %vm547_vm2, %v648_v46, %v649_v2 }
 0x10f   :  { %18779 = vmatprep.mubr.msk.f32.mxu0 %vm33_vm1, %v23401_v16  ;;  %30978 = vst [vmem:[#allocation57_spill] sm:$0xff] %v23421_v53  ;;  %30981 = vst [vmem:[#allocation60_spill] sm:$0xff] %v23437_v31  ;;  %v30991_v16 = vld [vmem:[#allocation11_spill] sm:$0xff] }
 0x112   :  { %18780 = vmatmul.mubr.msk.f32.gmra.mrb[34].mxu0 %vm33_vm1, %v23409_v24  ;;  %v403_v24 = vld [vmem:[#allocation2 + $0x300] sm:$0xff] }
 0x113   :  { %18782 = vmatprep.mubr.msk.f32.mxu0 %vm33_vm1, %v23413_v17  ;;  %v23433_v17 = vsel %vm547_vm2, %v644_v27, %v646_v11  ;;  %v656_v27 = vrot.slane %v23101_v4, 7  ;;  %v23449_v11 = vsel %vm547_vm2, %v653_v19, %v654_v29  ;;  %v658_v46 = vrot.slane %v403_v24, 7 }
 0x114   :  { %30980 = vst [vmem:[#allocation59_spill] sm:$0xff] %v23433_v17  ;;  %30983 = vst [vmem:[#allocation62_spill] sm:$0xff] %v23449_v11  ;;  %v664_v24 = vrot.slane %v23111_v7, 7 }
 0x116   :  { %18783 = vmatmul.mubr.msk.f32.gmra.mrb[36].mxu0 %vm33_vm1, %v23421_v53  ;;  %v407_v53 = vld [vmem:[#allocation2 + $0x320] sm:$0xff] }
 0x117   :  { %18785 = vmatprep.mubr.msk.f32.mxu0 %vm33_vm1, %v23425_v21  ;;  %v23445_v21 = vsel %vm547_vm2, %v649_v2, %v651_v14  ;;  %v661_v2 = vrot.slane %v23109_v6, 7  ;;  %v23461_v14 = vsel %vm547_vm2, %v658_v46, %v659_v45  ;;  %v663_v19 = vrot.slane %v407_v53, 7 }
 0x118   :  { %30982 = vst [vmem:[#allocation61_spill] sm:$0xff] %v23445_v21  ;;  %30985 = vst [vmem:[#allocation64_spill] sm:$0xff] %v23461_v14  ;;  %v669_v53 = vrot.slane %v23119_v10, 7  ;;  %v423_v10 = vld [vmem:[#allocation2 + $0x3a0] sm:$0xff] }
 0x11a   :  { %18786 = vmatmul.mubr.msk.f32.gmra.mrb[38].mxu0 %vm33_vm1, %v23433_v17  ;;  %v411_v17 = vld [vmem:[#allocation2 + $0x340] sm:$0xff] }
 0x11b   :  { %18788 = vmatprep.mubr.msk.f32.mxu0 %vm33_vm1, %v23437_v31  ;;  %v23457_v31 = vsel %vm547_vm2, %v654_v29, %v656_v27  ;;  %v666_v29 = vrot.slane %v23117_v8, 7  ;;  %v23473_v27 = vsel %vm547_vm2, %v663_v19, %v664_v24  ;;  %v668_v46 = vrot.slane %v411_v17, 7 }
 0x11c   :  { %30984 = vst [vmem:[#allocation63_spill] sm:$0xff] %v23457_v31  ;;  %30987 = vst [vmem:[#allocation66_spill] sm:$0xff] %v23473_v27  ;;  %v674_v17 = vrot.slane %v30991_v16, 7  ;;  %v427_v16 = vld [vmem:[#allocation2 + $0x3c0] sm:$0xff] }
 0x11e   :  { %18789 = vmatmul.mubr.msk.f32.gmra.mrb[40].mxu0 %vm33_vm1, %v23445_v21  ;;  %v415_v21 = vld [vmem:[#allocation2 + $0x360] sm:$0xff] }
 0x11f   :  { %18791 = vmatprep.mubr.msk.f32.mxu0 %vm33_vm1, %v23449_v11  ;;  %v23469_v11 = vsel %vm547_vm2, %v659_v45, %v661_v2  ;;  %v30989_v45 = vld [vmem:[#allocation10_spill] sm:$0xff]  ;;  %v673_v19 = vrot.slane %v415_v21, 7 }
 0x120   :  { %30986 = vst [vmem:[#allocation65_spill] sm:$0xff] %v23469_v11  ;;  %v671_v2 = vrot.slane %v30989_v45, 7  ;;  %v30995_v45 = vld [vmem:[#allocation13_spill] sm:$0xff] }
 0x121   :  { %v679_v21 = vrot.slane %v30995_v45, 7  ;;  %v431_v45 = vld [vmem:[#allocation2 + $0x3e0] sm:$0xff] }
 0x122   :  { %18792 = vmatmul.mubr.msk.f32.gmra.mrb[42].mxu0 %vm33_vm1, %v23457_v31  ;;  %v23485_v31 = vsel %vm547_vm2, %v668_v46, %v669_v53  ;;  %v678_v46 = vrot.slane %v419_v15, 7 }
 0x123   :  { %18794 = vmatprep.mubr.msk.f32.mxu0 %vm33_vm1, %v23461_v14  ;;  %v23481_v14 = vsel %vm547_vm2, %v664_v24, %v666_v29  ;;  %30990 = vst [vmem:[#allocation68_spill] sm:$0xff] %v23485_v31  ;;  %v30993_v24 = vld [vmem:[#allocation12_spill] sm:$0xff] }
 0x124   :  { %30988 = vst [vmem:[#allocation67_spill] sm:$0xff] %v23481_v14  ;;  %v676_v29 = vrot.slane %v30993_v24, 7  ;;  %v30999_v24 = vld [vmem:[#allocation15_spill] sm:$0xff] }
 0x125   :  { %v684_v15 = vrot.slane %v30999_v24, 7  ;;  %v435_v24 = vld [vmem:[#allocation2 + $0x400] sm:$0xff] }
 0x126   :  { %18795 = vmatmul.mubr.msk.f32.gmra.mrb[44].mxu0 %vm33_vm1, %v23469_v11  ;;  %v23497_v11 = vsel %vm547_vm2, %v673_v19, %v674_v17  ;;  %v683_v19 = vrot.slane %v423_v10, 7 }
 0x127   :  { %18797 = vmatprep.mubr.msk.f32.mxu0 %vm33_vm1, %v23473_v27  ;;  %v23493_v27 = vsel %vm547_vm2, %v669_v53, %v671_v2  ;;  %30994 = vst [vmem:[#allocation70_spill] sm:$0xff] %v23497_v11  ;;  %v30997_v53 = vld [vmem:[#allocation14_spill] sm:$0xff] }
 0x128   :  { %30992 = vst [vmem:[#allocation69_spill] sm:$0xff] %v23493_v27  ;;  %v681_v2 = vrot.slane %v30997_v53, 7  ;;  %v31003_v53 = vld [vmem:[#allocation17_spill] sm:$0xff] }
 0x129   :  { %v689_v10 = vrot.slane %v31003_v53, 7  ;;  %v439_v53 = vld [vmem:[#allocation2 + $0x420] sm:$0xff] }
 0x12a   :  { %18798 = vmatmul.mubr.msk.f32.gmra.mrb[46].mxu0 %vm33_vm1, %v23481_v14  ;;  %v23509_v14 = vsel %vm547_vm2, %v678_v46, %v679_v21  ;;  %v688_v46 = vrot.slane %v427_v16, 7 }
 0x12b   :  { %18800 = vmatprep.mubr.msk.f32.mxu0 %vm33_vm1, %v23485_v31  ;;  %v23505_v31 = vsel %vm547_vm2, %v674_v17, %v676_v29  ;;  %30998 = vst [vmem:[#allocation72_spill] sm:$0xff] %v23509_v14  ;;  %v31001_v17 = vld [vmem:[#allocation16_spill] sm:$0xff] }
 0x12c   :  { %30996 = vst [vmem:[#allocation71_spill] sm:$0xff] %v23505_v31  ;;  %v686_v29 = vrot.slane %v31001_v17, 7  ;;  %v31007_v17 = vld [vmem:[#allocation19_spill] sm:$0xff] }
 0x12d   :  { %v694_v16 = vrot.slane %v31007_v17, 7 }
 0x12e   :  { %18801 = vmatmul.mubr.msk.f32.gmra.mrb[48].mxu0 %vm33_vm1, %v23493_v27  ;;  %v23521_v27 = vsel %vm547_vm2, %v683_v19, %v684_v15  ;;  %v693_v19 = vrot.slane %v431_v45, 7 }
 0x12f   :  { %18803 = vmatprep.mubr.msk.f32.mxu0 %vm33_vm1, %v23497_v11  ;;  %v23517_v11 = vsel %vm547_vm2, %v679_v21, %v681_v2  ;;  %31002 = vst [vmem:[#allocation74_spill] sm:$0xff] %v23521_v27  ;;  %v31005_v21 = vld [vmem:[#allocation18_spill] sm:$0xff] }
 0x130   :  { %31000 = vst [vmem:[#allocation73_spill] sm:$0xff] %v23517_v11  ;;  %v691_v2 = vrot.slane %v31005_v21, 7  ;;  %v31011_v21 = vld [vmem:[#allocation21_spill] sm:$0xff] }
 0x131   :  { %v699_v45 = vrot.slane %v31011_v21, 7 }
 0x132   :  { %18804 = vmatmul.mubr.msk.f32.gmra.mrb[50].mxu0 %vm33_vm1, %v23505_v31  ;;  %v23533_v31 = vsel %vm547_vm2, %v688_v46, %v689_v10  ;;  %v698_v46 = vrot.slane %v435_v24, 7 }
 0x133   :  { %18806 = vmatprep.mubr.msk.f32.mxu0 %vm33_vm1, %v23509_v14  ;;  %v23529_v14 = vsel %vm547_vm2, %v684_v15, %v686_v29  ;;  %31006 = vst [vmem:[#allocation76_spill] sm:$0xff] %v23533_v31  ;;  %v31009_v15 = vld [vmem:[#allocation20_spill] sm:$0xff] }
 0x134   :  { %31004 = vst [vmem:[#allocation75_spill] sm:$0xff] %v23529_v14  ;;  %v696_v29 = vrot.slane %v31009_v15, 7  ;;  %v31014_v15 = vld [vmem:[#allocation23_spill] sm:$0xff] }
 0x135   :  { %v704_v24 = vrot.slane %v31014_v15, 7 }
 0x136   :  { %18807 = vmatmul.mubr.msk.f32.gmra.mrb[52].mxu0 %vm33_vm1, %v23517_v11  ;;  %v23545_v11 = vsel %vm547_vm2, %v693_v19, %v694_v16  ;;  %v703_v19 = vrot.slane %v439_v53, 7 }
 0x137   :  { %18809 = vmatprep.mubr.msk.f32.mxu0 %vm33_vm1, %v23521_v27  ;;  %v23541_v27 = vsel %vm547_vm2, %v689_v10, %v691_v2  ;;  %31010 = vst [vmem:[#allocation77_spill] sm:$0xff] %v23545_v11  ;;  %v31012_v10 = vld [vmem:[#allocation22_spill] sm:$0xff] }
 0x138   :  { %31008 = vst [vmem:[#allocation19_spill] sm:$0xff] %v23541_v27  ;;  %v701_v2 = vrot.slane %v31012_v10, 7 }
 0x13a   :  { %18810 = vmatmul.mubr.msk.f32.gmra.mrb[54].mxu0 %vm33_vm1, %v23529_v14  ;;  %v23557_v14 = vsel %vm547_vm2, %v698_v46, %v699_v45  ;;  %v31017_v46 = vld [vmem:[#allocation7_spill] sm:$0xff] }
 0x13b   :  { %18812 = vmatprep.mubr.msk.f32.mxu0 %vm33_vm1, %v23533_v31  ;;  %v23553_v31 = vsel %vm547_vm2, %v694_v16, %v696_v29  ;;  %31013 = vst [vmem:[#allocation21_spill] sm:$0xff] %v23557_v14  ;;  %v706_v16 = vrot.slane %v23183_v50, 7  ;;  %v23569_v29 = vsel %vm547_vm2, %v703_v19, %v704_v24  ;;  %v31018_v19 = vrot.slane %v22750_v25, 1 }
 0x13c   :  { %31016 = vst [vmem:[#allocation23_spill] sm:$0xff] %v23569_v29 }
 0x13d   :  { %v23576_v53 = vsel %vm547_vm2, %v704_v24, %v706_v16  ;;  %v1788_v16 = vrot.slane %v22783_v33, 1 }
 0x13e   :  { %18813 = vmatmul.mubr.msk.f32.gmra.mrb[56].mxu0 %vm33_vm1, %v23541_v27  ;;  %v23565_v27 = vsel %vm547_vm2, %v699_v45, %v701_v2  ;;  %v1783_v45 = vrot.slane %v22770_v30, 1  ;;  %v314_v2 = vld [vmem:[#allocation2 + $0x38] sm:$0xff] }
 0x13f   :  { %18815 = vmatprep.mubr.msk.f32.mxu0 %vm33_vm1, %v23545_v11  ;;  %31015 = vst [vmem:[#allocation22_spill] sm:$0xff] %v23565_v27  ;;  %v310_v11 = vld [vmem:[#allocation2 + $0x18] sm:$0xff] }
 0x140   :  { %v1780_v15 = vrot.slane %v310_v11, 1  ;;  %v1787_v11 = vrot.slane %v22777_v32, 1  ;;  %v318_v30 = vld [vmem:[#allocation2 + $0x58] sm:$0xff] }
 0x141   :  { %v1790_v32 = vrot.slane %v318_v30, 1  ;;  %v330_v30 = vld [vmem:[#allocation2 + $0xb8] sm:$0xff] }
 0x142   :  { %18816 = vmatmul.mubr.msk.f32.gmra.mrb[58].mxu0 %vm33_vm1, %v23553_v31  ;;  %v23606_v33 = vsel %vm1776_vm3, %v1787_v11, %v1788_v16 }
 0x143   :  { %18818 = vmatprep.mubr.msk.f32.mxu0 %vm33_vm1, %v23557_v14  ;;  %v1782_v14 = vrot.slane %v31017_v46, 1  ;;  %v23595_v46 = vld [vmem:[%s30349_s1 + $0x10] sm:$0xf] }
 0x145   :  { %v23588_v24 = vsel %vm1776_vm3, %v1782_v14, %v1783_v45  ;;  %v1793_v14 = vrot.slane %v22812_v41, 1  ;;  %v1798_v41 = vrot.slane %v22833_v47, 1 }
 0x146   :  { %18819 = vmatmul.mubr.msk.f32.gmra.mrb[60].mxu0 %vm33_vm1, %v23565_v27  ;;  %v1781_v27 = vsel %vm1776_vm3, %v31018_v19, %v1780_v15  ;;  %v322_v15 = vld [vmem:[#allocation2 + $0x78] sm:$0xff] }
 0x147   :  { %18821 = vmatprep.mubr.msk.f32.mxu0 %vm33_vm1, %v23569_v29  ;;  %v1785_v29 = vrot.slane %v314_v2, 1 }
 0x149   :  { %v23603_v25 = vsel %vm1776_vm3, %v1783_v45, %v1785_v29  ;;  %v326_v45 = vld [vmem:[#allocation2 + $0x98] sm:$0xff] }
 0x14a   :  { %18822 = vmatmul.mubr.msk.f32.gmra.mrb[62].mxu0 %vm33_vm1, %v23576_v53  ;;  %v1800_v19 = vrot.slane %v326_v45, 1  ;;  %v338_v45 = vld [vmem:[#allocation2 + $0xf8] sm:$0xff] }
 0x14b   :  { %18826 = vmatprep.mubr.msk.f32.mxu0 %vm33_vm1, %v23196_v18  ;;  %v1792_v18 = vrot.slane %v22785_v34, 1  ;;  %v1797_v34 = vrot.slane %v22823_v44, 1  ;;  %v1803_v44 = vrot.slane %v22895_v61, 1 }
 0x14c   :  { %v23641_v47 = vsel %vm1776_vm3, %v1798_v41, %v1800_v19  ;;  %v1815_v19 = vrot.slane %v338_v45, 1  ;;  %v350_v45 = vld [vmem:[#allocation2 + $0x158] sm:$0xff] }
 0x14d   :  { %v23620_v29 = vsel %vm1776_vm3, %v1792_v18, %v1793_v14  ;;  %v23632_v11 = vsel %vm1776_vm3, %v1797_v34, %v1798_v41  ;;  %v1812_v41 = vrot.slane %v22913_v3, 1  ;;  %v1818_v3 = vrot.slane %v22981_v20, 1 }
 0x14e   :  { %18827 = vmatmul.mubr.msk.f32.vlgmr.msra.gmra.mrb[0].mxu0 %vm33_vm1, %v1781_v27  ;;  %v1795_v27 = vrot.slane %v322_v15, 1  ;;  %v334_v15 = vld [vmem:[#allocation2 + $0xd8] sm:$0xff] }
 0x14f   :  { %18923 = vmatpush3.msk.msra.mxu0 %vm839_vm0, %v23205_v52  ;;  %18829 = vmatprep.mubr.msk.f32.mxu0 %vm33_vm1, %v23588_v24  ;;  %v23617_v52 = vsel %vm1776_vm3, %v1788_v16, %v1790_v32  ;;  %v1802_v16 = vrot.slane %v22848_v51, 1  ;;  %v1805_v32 = vrot.slane %v330_v30, 1  ;;  %v1808_v51 = vrot.slane %v22911_v1, 1  ;;  %v342_v30 = vld [vmem:[#allocation2 + $0x118] sm:$0xff] }
 0x150   :  { %19020 = vmatprep.subr.msk.mxu0 %vm839_vm0, %v23595_v46  ;;  %v23629_v2 = vsel %vm1776_vm3, %v1793_v14, %v1795_v27  ;;  %v1807_v14 = vrot.slane %v22900_v63, 1  ;;  %v1810_v27 = vrot.slane %v334_v15, 1  ;;  %v1813_v63 = vrot.slane %v22936_v9, 1  ;;  %v346_v15 = vld [vmem:[#allocation2 + $0x138] sm:$0xff] }
 0x151   :  { %v23644_v18 = vsel %vm1776_vm3, %v1802_v16, %v1803_v44  ;;  %v23653_v61 = vsel %vm1776_vm3, %v1803_v44, %v1805_v32  ;;  %v1817_v44 = vrot.slane %v22947_v12, 1  ;;  %v1820_v32 = vrot.slane %v342_v30, 1  ;;  %v354_v30 = vld [vmem:[#allocation2 + $0x178] sm:$0xff] }
 0x152   :  { %18830 = vmatmul.mubr.msk.f32.gmra.mrb[2].mxu0 %vm33_vm1, %v23603_v25  ;;  %v23656_v34 = vsel %vm1776_vm3, %v1807_v14, %v1808_v51  ;;  %v23665_v1 = vsel %vm1776_vm3, %v1808_v51, %v1810_v27  ;;  %v23668_v16 = vsel %vm1776_vm3, %v1812_v41, %v1813_v63  ;;  %v23677_v9 = vsel %vm1776_vm3, %v1813_v63, %v1815_v19 }
 0x153   :  { %18832 = vmatprep.mubr.msk.f32.mxu0 %vm33_vm1, %v23606_v33  ;;  %v23680_v14 = vsel %vm1776_vm3, %v1817_v44, %v1818_v3  ;;  %v1822_v51 = vrot.slane %v22990_v22, 1  ;;  %v1823_v12 = vrot.slane %v22998_v23, 1  ;;  %v23689_v20 = vsel %vm1776_vm3, %v1818_v3, %v1820_v32 }
 0x154   :  { %v1825_v27 = vrot.slane %v346_v15, 1  ;;  %v1827_v63 = vrot.slane %v23000_v26, 1  ;;  %v1828_v22 = vrot.slane %v23006_v28, 1  ;;  %v1830_v19 = vrot.slane %v350_v45, 1  ;;  %v358_v15 = vld [vmem:[#allocation2 + $0x198] sm:$0xff] }
 0x155   :  { %v23692_v41 = vsel %vm1776_vm3, %v1822_v51, %v1823_v12  ;;  %v1832_v3 = vrot.slane %v23008_v35, 1  ;;  %v1833_v26 = vrot.slane %v23014_v36, 1  ;;  %v1835_v32 = vrot.slane %v354_v30, 1  ;;  %v362_v45 = vld [vmem:[#allocation2 + $0x1b8] sm:$0xff] }
 0x156   :  { %18833 = vmatmul.mubr.msk.f32.gmra.mrb[4].mxu0 %vm33_vm1, %v23617_v52  ;;  %v23701_v23 = vsel %vm1776_vm3, %v1823_v12, %v1825_v27  ;;  %v23704_v44 = vsel %vm1776_vm3, %v1827_v63, %v1828_v22  ;;  %v23713_v28 = vsel %vm1776_vm3, %v1828_v22, %v1830_v19  ;;  %v1837_v12 = vrot.slane %v23016_v37, 1  ;;  %v366_v30 = vld [vmem:[#allocation2 + $0x1d8] sm:$0xff] }
 0x157   :  { %18835 = vmatprep.mubr.msk.f32.mxu0 %vm33_vm1, %v23620_v29  ;;  %v23716_v51 = vsel %vm1776_vm3, %v1832_v3, %v1833_v26  ;;  %v1838_v35 = vrot.slane %v23022_v38, 1  ;;  %v23725_v36 = vsel %vm1776_vm3, %v1833_v26, %v1835_v32  ;;  %v1840_v27 = vrot.slane %v358_v15, 1  ;;  %v209_v32 = vld [vmem:[%s30348_s0 + $0xf8] sm:$0xff] }
 0x158   :  { %v1842_v22 = vrot.slane %v23024_v39, 1  ;;  %v1843_v37 = vrot.slane %v23030_v40, 1  ;;  %v1845_v19 = vrot.slane %v362_v45, 1  ;;  %v1847_v26 = vrot.slane %v23032_v42, 1  ;;  %v208_v40 = vld [vmem:[%s30348_s0 + $0xf0] sm:$0xff]  ;;  %274 = vst.msk [vmem:[#allocation2 + $0x210] sm:$0xff] %vm33_vm1, %v209_v32 }
 0x159   :  { %v23728_v63 = vsel %vm1776_vm3, %v1837_v12, %v1838_v35  ;;  %v23737_v38 = vsel %vm1776_vm3, %v1838_v35, %v1840_v27  ;;  %v1848_v39 = vrot.slane %v23038_v43, 1  ;;  %273 = vst.msk [vmem:[#allocation2 + $0x208] sm:$0xff] %vm33_vm1, %v208_v40  ;;  %v1850_v43 = vrot.slane %v366_v30, 1  ;;  %v31022_v35 = vld [vmem:[#allocation8_spill] sm:$0xff]  ;;  %v386_v32 = vld [vmem:[#allocation2 + $0x278] sm:$0xff] }
 0x15a   :  { %18836 = vmatmul.mubr.msk.f32.gmra.mrb[6].mxu0 %vm33_vm1, %v23629_v2  ;;  %31019 = vst [vmem:[#allocation7_spill] sm:$0xff] %v23737_v38  ;;  %v23740_v3 = vsel %vm1776_vm3, %v1842_v22, %v1843_v37  ;;  %v23756_v42 = vsel %vm1776_vm3, %v1843_v37, %v1845_v19  ;;  %v1852_v15 = vrot.slane %v31022_v35, 1  ;;  %v1853_v27 = vrot.slane %v23050_v49, 1  ;;  %v370_v22 = vld [vmem:[#allocation2 + $0x1f8] sm:$0xff] }
 0x15b   :  { %18838 = vmatprep.mubr.msk.f32.mxu0 %vm33_vm1, %v23632_v11  ;;  %31020 = vst [vmem:[#allocation78_spill] sm:$0xff] %v23740_v3  ;;  %v23760_v12 = vsel %vm1776_vm3, %v1847_v26, %v1848_v39  ;;  %v23769_v37 = vsel %vm1776_vm3, %v1848_v39, %v1850_v43  ;;  %v1855_v45 = vrot.slane %v370_v22, 1  ;;  %v382_v26 = vld [vmem:[#allocation2 + $0x258] sm:$0xff]  ;;  %v1862_v40 = vrot.slane %v23063_v54, 1 }
 0x15c   :  { %31021 = vst [vmem:[#allocation79_spill] sm:$0xff] %v23760_v12  ;;  %v23772_v19 = vsel %vm1776_vm3, %v1852_v15, %v1853_v27  ;;  %v1860_v30 = vrot.slane %v382_v26, 1  ;;  %v1863_v39 = vrot.slane %v23069_v55, 1  ;;  %v31023_v43 = vrot.slane %v23046_v48, 1  ;;  %v390_v55 = vld [vmem:[#allocation2 + $0x298] sm:$0xff] }
 0x15d   :  { %v23779_v49 = vsel %vm1776_vm3, %v1853_v27, %v1855_v45  ;;  %v1865_v15 = vrot.slane %v386_v32, 1  ;;  %v1867_v22 = vrot.slane %v23071_v56, 1  ;;  %v1868_v54 = vrot.slane %v23077_v57, 1  ;;  %v394_v56 = vld [vmem:[#allocation2 + $0x2b8] sm:$0xff] }
 0x15e   :  { %18839 = vmatmul.mubr.msk.f32.gmra.mrb[8].mxu0 %vm33_vm1, %v23641_v47  ;;  %v1861_v35 = vsel %vm1776_vm3, %v31023_v43, %v1860_v30  ;;  %v23791_v27 = vsel %vm1776_vm3, %v1862_v40, %v1863_v39  ;;  %v1870_v48 = vrot.slane %v390_v55, 1  ;;  %v1872_v26 = vrot.slane %v23079_v58, 1  ;;  %v398_v43 = vld [vmem:[#allocation2 + $0x2d8] sm:$0xff] }
 0x15f   :  { %18841 = vmatprep.mubr.msk.f32.mxu0 %vm33_vm1, %v23644_v18  ;;  %v23802_v45 = vsel %vm1776_vm3, %v1867_v22, %v1868_v54  ;;  %v1873_v30 = vrot.slane %v23085_v59, 1  ;;  %v1875_v40 = vrot.slane %v394_v56, 1  ;;  %v1877_v32 = vrot.slane %v23087_v60, 1 }
 0x160   :  { %v23811_v57 = vsel %vm1776_vm3, %v1868_v54, %v1870_v48  ;;  %v1878_v58 = vrot.slane %v23093_v62, 1  ;;  %v1882_v22 = vrot.slane %v23095_v0, 1  ;;  %v1883_v60 = vrot.slane %v23101_v4, 1  ;;  %v402_v54 = vld [vmem:[#allocation2 + $0x2f8] sm:$0xff] }
 0x161   :  { %v23823_v59 = vsel %vm1776_vm3, %v1873_v30, %v1875_v40  ;;  %v1885_v55 = vrot.slane %v402_v54, 1  ;;  %v1888_v0 = vrot.slane %v23109_v6, 1  ;;  %v31028_v54 = vld [vmem:[#allocation10_spill] sm:$0xff] }
 0x162   :  { %18842 = vmatmul.mubr.msk.f32.gmra.mrb[10].mxu0 %vm33_vm1, %v23653_v61  ;;  %v23838_v48 = vsel %vm1776_vm3, %v1882_v22, %v1883_v60  ;;  %v31027_v22 = vld [vmem:[#allocation9_spill] sm:$0xff] }
 0x163   :  { %18844 = vmatprep.mubr.msk.f32.mxu0 %vm33_vm1, %v23656_v34  ;;  %v23847_v4 = vsel %vm1776_vm3, %v1883_v60, %v1885_v55  ;;  %v1897_v60 = vrot.slane %v31027_v22, 1  ;;  %v414_v55 = vld [vmem:[#allocation2 + $0x358] sm:$0xff] }
 0x164   :  { %v418_v22 = vld [vmem:[#allocation2 + $0x378] sm:$0xff] }
 0x166   :  { %18845 = vmatmul.mubr.msk.f32.gmra.mrb[12].mxu0 %vm33_vm1, %v23665_v1 }
 0x167   :  { %18847 = vmatprep.mubr.msk.f32.mxu0 %vm33_vm1, %v23668_v16 }
 0x16a   :  { %18848 = vmatmul.mubr.msk.f32.gmra.mrb[14].mxu0 %vm33_vm1, %v23677_v9 }
 0x16b   :  { %18850 = vmatprep.mubr.msk.f32.mxu0 %vm33_vm1, %v23680_v14 }
 0x16e   :  { %18851 = vmatmul.mubr.msk.f32.gmra.mrb[16].mxu0 %vm33_vm1, %v23689_v20 }
 0x16f   :  { %18853 = vmatprep.mubr.msk.f32.mxu0 %vm33_vm1, %v23692_v41 }
 0x172   :  { %18854 = vmatmul.mubr.msk.f32.gmra.mrb[18].mxu0 %vm33_vm1, %v23701_v23 }
 0x173   :  { %18856 = vmatprep.mubr.msk.f32.mxu0 %vm33_vm1, %v23704_v44 }
 0x176   :  { %18857 = vmatmul.mubr.msk.f32.gmra.mrb[20].mxu0 %vm33_vm1, %v23713_v28 }
 0x177   :  { %18859 = vmatprep.mubr.msk.f32.mxu0 %vm33_vm1, %v23716_v51 }
 0x17a   :  { %18860 = vmatmul.mubr.msk.f32.gmra.mrb[22].mxu0 %vm33_vm1, %v23725_v36 }
 0x17b   :  { %18862 = vmatprep.mubr.msk.f32.mxu0 %vm33_vm1, %v23728_v63 }
 0x17e   :  { %18863 = vmatmul.mubr.msk.f32.gmra.mrb[24].mxu0 %vm33_vm1, %v23737_v38 }
 0x17f   :  { %18865 = vmatprep.mubr.msk.f32.mxu0 %vm33_vm1, %v23740_v3 }
 0x182   :  { %18866 = vmatmul.mubr.msk.f32.gmra.mrb[26].mxu0 %vm33_vm1, %v23756_v42 }
 0x183   :  { %18868 = vmatprep.mubr.msk.f32.mxu0 %vm33_vm1, %v23760_v12 }
 0x186   :  { %18869 = vmatmul.mubr.msk.f32.gmra.mrb[28].mxu0 %vm33_vm1, %v23769_v37 }
 0x187   :  { %18871 = vmatprep.mubr.msk.f32.mxu0 %vm33_vm1, %v23772_v19 }
 0x18a   :  { %18872 = vmatmul.mubr.msk.f32.gmra.mrb[30].mxu0 %vm33_vm1, %v23779_v49 }
 0x18b   :  { %18874 = vmatprep.mubr.msk.f32.mxu0 %vm33_vm1, %v23396_v13  ;;  %v23799_v13 = vsel %vm1776_vm3, %v1863_v39, %v1865_v15  ;;  %v23814_v39 = vsel %vm1776_vm3, %v1872_v26, %v1873_v30  ;;  %v23826_v15 = vsel %vm1776_vm3, %v1877_v32, %v1878_v58  ;;  %v1887_v26 = vrot.slane %v23103_v5, 1  ;;  %v406_v30 = vld [vmem:[#allocation2 + $0x318] sm:$0xff] }
 0x18c   :  { %v1890_v56 = vrot.slane %v406_v30, 1  ;;  %v1892_v32 = vrot.slane %v23111_v7, 1  ;;  %v1893_v5 = vrot.slane %v23117_v8, 1  ;;  %v1898_v7 = vrot.slane %v31028_v54, 1  ;;  %v31031_v30 = vld [vmem:[#allocation11_spill] sm:$0xff] }
 0x18d   :  { %v23850_v40 = vsel %vm1776_vm3, %v1887_v26, %v1888_v0  ;;  %v1900_v26 = vrot.slane %v414_v55, 1 }
 0x18e   :  { %18875 = vmatmul.mubr.msk.f32.gmra.mrb[32].mxu0 %vm33_vm1, %v1861_v35  ;;  %v1880_v35 = vrot.slane %v398_v43, 1  ;;  %31024 = vst [vmem:[#allocation8_spill] sm:$0xff] %v23850_v40  ;;  %v23859_v6 = vsel %vm1776_vm3, %v1888_v0, %v1890_v56  ;;  %v23874_v0 = vsel %vm1776_vm3, %v1897_v60, %v1898_v7  ;;  %v1902_v56 = vrot.slane %v31031_v30, 1  ;;  %v31035_v60 = vld [vmem:[#allocation13_spill] sm:$0xff] }
 0x18f   :  { %18877 = vmatprep.mubr.msk.f32.mxu0 %vm33_vm1, %v23791_v27  ;;  %31025 = vst [vmem:[#allocation80_spill] sm:$0xff] %v23859_v6  ;;  %31030 = vst [vmem:[#allocation10_spill] sm:$0xff] %v23874_v0  ;;  %v23883_v54 = vsel %vm1776_vm3, %v1898_v7, %v1900_v26  ;;  %v1907_v55 = vrot.slane %v31035_v60, 1 }
 0x190   :  { %v23835_v62 = vsel %vm1776_vm3, %v1878_v58, %v1880_v35  ;;  %v410_v58 = vld [vmem:[#allocation2 + $0x338] sm:$0xff]  ;;  %v23862_v35 = vsel %vm1776_vm3, %v1892_v32, %v1893_v5  ;;  %v31032_v32 = vld [vmem:[#allocation12_spill] sm:$0xff]  ;;  %31033 = vst [vmem:[#allocation11_spill] sm:$0xff] %v23883_v54 }
 0x191   :  { %v1895_v43 = vrot.slane %v410_v58, 1  ;;  %31026 = vst [vmem:[#allocation81_spill] sm:$0xff] %v23862_v35  ;;  %v1903_v58 = vrot.slane %v31032_v32, 1 }
 0x192   :  { %18878 = vmatmul.mubr.msk.f32.gmra.mrb[34].mxu0 %vm33_vm1, %v23799_v13 }
 0x193   :  { %18880 = vmatprep.mubr.msk.f32.mxu0 %vm33_vm1, %v23802_v45  ;;  %v23871_v8 = vsel %vm1776_vm3, %v1893_v5, %v1895_v43  ;;  %v1905_v5 = vrot.slane %v418_v22, 1  ;;  %v23886_v43 = vsel %vm1776_vm3, %v1902_v56, %v1903_v58  ;;  %v31039_v56 = vld [vmem:[#allocation15_spill] sm:$0xff] }
 0x194   :  { %31029 = vst [vmem:[#allocation9_spill] sm:$0xff] %v23871_v8  ;;  %31034 = vst [vmem:[#allocation12_spill] sm:$0xff] %v23886_v43  ;;  %v1912_v22 = vrot.slane %v31039_v56, 1 }
 0x195   :  { %v23895_v32 = vsel %vm1776_vm3, %v1903_v58, %v1905_v5  ;;  %v31043_v5 = vld [vmem:[#allocation17_spill] sm:$0xff] }
 0x196   :  { %18881 = vmatmul.mubr.msk.f32.gmra.mrb[36].mxu0 %vm33_vm1, %v23811_v57  ;;  %31037 = vst [vmem:[#allocation13_spill] sm:$0xff] %v23895_v32 }
 0x197   :  { %18883 = vmatprep.mubr.msk.f32.mxu0 %vm33_vm1, %v23814_v39 }
 0x19a   :  { %18884 = vmatmul.mubr.msk.f32.gmra.mrb[38].mxu0 %vm33_vm1, %v23823_v59 }
 0x19b   :  { %18886 = vmatprep.mubr.msk.f32.mxu0 %vm33_vm1, %v23826_v15 }
 0x19e   :  { %18887 = vmatmul.mubr.msk.f32.gmra.mrb[40].mxu0 %vm33_vm1, %v23835_v62 }
 0x19f   :  { %18889 = vmatprep.mubr.msk.f32.mxu0 %vm33_vm1, %v23838_v48 }
 0x1a2   :  { %18890 = vmatmul.mubr.msk.f32.gmra.mrb[42].mxu0 %vm33_vm1, %v23847_v4 }
 0x1a3   :  { %18892 = vmatprep.mubr.msk.f32.mxu0 %vm33_vm1, %v23850_v40 }
 0x1a6   :  { %18893 = vmatmul.mubr.msk.f32.gmra.mrb[44].mxu0 %vm33_vm1, %v23859_v6  ;;  %v422_v6 = vld [vmem:[#allocation2 + $0x398] sm:$0xff] }
 0x1a7   :  { %18895 = vmatprep.mubr.msk.f32.mxu0 %vm33_vm1, %v23862_v35  ;;  %v31036_v35 = vld [vmem:[#allocation14_spill] sm:$0xff]  ;;  %v1910_v7 = vrot.slane %v422_v6, 1 }
 0x1a8   :  { %v1908_v30 = vrot.slane %v31036_v35, 1 }
 0x1aa   :  { %18896 = vmatmul.mubr.msk.f32.gmra.mrb[46].mxu0 %vm33_vm1, %v23871_v8  ;;  %v23898_v26 = vsel %vm1776_vm3, %v1907_v55, %v1908_v30  ;;  %v426_v8 = vld [vmem:[#allocation2 + $0x3b8] sm:$0xff]  ;;  %v23907_v35 = vsel %vm1776_vm3, %v1908_v30, %v1910_v7  ;;  %v1917_v55 = vrot.slane %v31043_v5, 1  ;;  %v1922_v7 = vrot.slane %v31007_v17, 1 }
 0x1ab   :  { %18898 = vmatprep.mubr.msk.f32.mxu0 %vm33_vm1, %v23874_v0  ;;  %31038 = vst [vmem:[#allocation14_spill] sm:$0xff] %v23898_v26  ;;  %v31040_v0 = vld [vmem:[#allocation16_spill] sm:$0xff]  ;;  %31041 = vst [vmem:[#allocation15_spill] sm:$0xff] %v23907_v35  ;;  %v1915_v58 = vrot.slane %v426_v8, 1  ;;  %v1928_v17 = vrot.slane %v31012_v10, 1 }
 0x1ac   :  { %v1913_v60 = vrot.slane %v31040_v0, 1 }
 0x1ae   :  { %18899 = vmatmul.mubr.msk.f32.gmra.mrb[48].mxu0 %vm33_vm1, %v23883_v54  ;;  %v23910_v6 = vsel %vm1776_vm3, %v1912_v22, %v1913_v60  ;;  %v430_v54 = vld [vmem:[#allocation2 + $0x3d8] sm:$0xff]  ;;  %v23919_v0 = vsel %vm1776_vm3, %v1913_v60, %v1915_v58  ;;  %v31047_v22 = vld [vmem:[#allocation20_spill] sm:$0xff]  ;;  %v1927_v58 = vrot.slane %v31011_v21, 1 }
 0x1af   :  { %18901 = vmatprep.mubr.msk.f32.mxu0 %vm33_vm1, %v23886_v43  ;;  %31042 = vst [vmem:[#allocation16_spill] sm:$0xff] %v23910_v6  ;;  %v31044_v43 = vld [vmem:[#allocation18_spill] sm:$0xff]  ;;  %31045 = vst [vmem:[#allocation17_spill] sm:$0xff] %v23919_v0  ;;  %v1920_v30 = vrot.slane %v430_v54, 1  ;;  %v1923_v5 = vrot.slane %v31047_v22, 1  ;;  %v240_v22 = vld [vmem:[%s30348_s0 + $0x1f0] sm:$0xff] }
 0x1b0   :  { %v1918_v56 = vrot.slane %v31044_v43, 1  ;;  %305 = vst.msk [vmem:[#allocation2 + $0x448] sm:$0xff] %vm33_vm1, %v240_v22  ;;  %v1933_v22 = vrot.slane %v23183_v50, 1 }
 0x1b1   :  { %v23934_v54 = vsel %vm1776_vm3, %v1922_v7, %v1923_v5 }
 0x1b2   :  { %18902 = vmatmul.mubr.msk.f32.gmra.mrb[50].mxu0 %vm33_vm1, %v23895_v32  ;;  %v23922_v8 = vsel %vm1776_vm3, %v1917_v55, %v1918_v56  ;;  %v23931_v43 = vsel %vm1776_vm3, %v1918_v56, %v1920_v30  ;;  %31049 = vst [vmem:[#allocation82_spill] sm:$0xff] %v23934_v54  ;;  %v438_v55 = vld [vmem:[#allocation2 + $0x418] sm:$0xff]  ;;  %v23954_v56 = vsel %vm1776_vm3, %v1927_v58, %v1928_v17  ;;  %v23956_v30 = vld [vmem:[#allocation2 + $0x428] sm:$0xff] }
 0x1b3   :  { %18904 = vmatprep.mubr.msk.f32.mxu0 %vm33_vm1, %v23898_v26  ;;  %31046 = vst [vmem:[#allocation18_spill] sm:$0xff] %v23922_v8  ;;  %v434_v26 = vld [vmem:[#allocation2 + $0x3f8] sm:$0xff]  ;;  %31048 = vst [vmem:[#allocation20_spill] sm:$0xff] %v23931_v43  ;;  %v1930_v10 = vrot.slane %v438_v55, 1  ;;  %v1932_v7 = vrot.slane %v23956_v30, 1  ;;  %v31055_v55 = vld [vmem:[#allocation24_spill] sm:$0xff] }
 0x1b4   :  { %v1925_v60 = vrot.slane %v434_v26, 1  ;;  %v241_v26 = vld [vmem:[%s30348_s0 + $0x1f8] sm:$0xff]  ;;  %31051 = vst [vmem:[#allocation84_spill] sm:$0xff] %v23954_v56 }
 0x1b5   :  { %306 = vst.msk [vmem:[#allocation2 + $0x450] sm:$0xff] %vm33_vm1, %v241_v26  ;;  %v23968_v58 = vsel %vm1776_vm3, %v1932_v7, %v1933_v22  ;;  %v31057_v26 = vld [vmem:[#allocation26_spill] sm:$0xff]  ;;  %v31059_v7 = vld [vmem:[#allocation28_spill] sm:$0xff] }
 0x1b6   :  { %18905 = vmatmul.mubr.msk.f32.gmra.mrb[52].mxu0 %vm33_vm1, %v23907_v35  ;;  %v23950_v21 = vsel %vm1776_vm3, %v1923_v5, %v1925_v60  ;;  %v23965_v5 = vsel %vm1776_vm3, %v1928_v17, %v1930_v10  ;;  %31053 = vst [vmem:[#allocation86_spill] sm:$0xff] %v23968_v58  ;;  %v31056_v17 = vld [vmem:[#allocation25_spill] sm:$0xff]  ;;  %v31058_v10 = vld [vmem:[#allocation27_spill] sm:$0xff] }
 0x1b7   :  { %18907 = vmatprep.mubr.msk.f32.mxu0 %vm33_vm1, %v23910_v6  ;;  %31050 = vst [vmem:[#allocation83_spill] sm:$0xff] %v23950_v21  ;;  %31052 = vst [vmem:[#allocation85_spill] sm:$0xff] %v23965_v5 }
 0x1ba   :  { %18908 = vmatmul.mubr.msk.f32.gmra.mrb[54].mxu0 %vm33_vm1, %v23919_v0 }
 0x1bb   :  { %18910 = vmatprep.mubr.msk.f32.mxu0 %vm33_vm1, %v23922_v8 }
 0x1be   :  { %18911 = vmatmul.mubr.msk.f32.gmra.mrb[56].mxu0 %vm33_vm1, %v23931_v43  ;;  %v442_v43 = vld [vmem:[#allocation2 + $0x438] sm:$0xff] }
 0x1bf   :  { %18913 = vmatprep.mubr.msk.f32.mxu0 %vm33_vm1, %v23934_v54  ;;  %v1935_v60 = vrot.slane %v442_v43, 1  ;;  %v23984_v43 = vld [vmem:[%s30349_s1 + $0x14] sm:$0xf] }
 0x1c1   :  { %v23975_v50 = vsel %vm1776_vm3, %v1933_v22, %v1935_v60  ;;  %v31060_v22 = vld [vmem:[#allocation29_spill] sm:$0xff]  ;;  %v31061_v60 = vld [vmem:[#allocation30_spill] sm:$0xff] }
 0x1c2   :  { %18914 = vmatmul.mubr.msk.f32.gmra.mrb[58].mxu0 %vm33_vm1, %v23950_v21  ;;  %31054 = vst [vmem:[#allocation87_spill] sm:$0xff] %v23975_v50 }
 0x1c3   :  { %18916 = vmatprep.mubr.msk.f32.mxu0 %vm33_vm1, %v23954_v56 }
 0x1c6   :  { %18917 = vmatmul.mubr.msk.f32.gmra.mrb[60].mxu0 %vm33_vm1, %v23965_v5 }
 0x1c7   :  { %18919 = vmatprep.mubr.msk.f32.mxu0 %vm33_vm1, %v23968_v58  ;;  %v24045_v58 = vld [vmem:[#allocation2 + $0x210] sm:$0xff] }
 0x1ca   :  { %18920 = vmatmul.mubr.msk.f32.gmra.mrb[62].mxu0 %vm33_vm1, %v23975_v50  ;;  %v31080_v50 = vld [vmem:[#allocation49_spill] sm:$0xff] }
 0x1cb   :  { %18924 = vmatprep.mubr.msk.f32.mxu0 %vm33_vm1, %v31055_v55  ;;  %v31062_v55 = vld [vmem:[#allocation31_spill] sm:$0xff] }
 0x1ce   :  { %18925 = vmatmul.mubr.msk.f32.vlgmr.msra.gmra.mrb[0].mxu0 %vm33_vm1, %v31056_v17  ;;  %v31064_v17 = vld [vmem:[#allocation33_spill] sm:$0xff] }
 0x1cf   :  { %19021 = vmatpush3.msk.msra.mxu0 %vm839_vm0, %v23595_v46  ;;  %18927 = vmatprep.mubr.msk.f32.mxu0 %vm33_vm1, %v31057_v26  ;;  %v31063_v46 = vld [vmem:[#allocation32_spill] sm:$0xff]  ;;  %v31065_v26 = vld [vmem:[#allocation34_spill] sm:$0xff] }
 0x1d0   :  { %19118 = vmatprep.subr.msk.mxu0 %vm839_vm0, %v23984_v43 }
 0x1d2   :  { %18928 = vmatmul.mubr.msk.f32.gmra.mrb[2].mxu0 %vm33_vm1, %v31058_v10  ;;  %v31066_v10 = vld [vmem:[#allocation35_spill] sm:$0xff] }
 0x1d3   :  { %18930 = vmatprep.mubr.msk.f32.mxu0 %vm33_vm1, %v31059_v7  ;;  %v31067_v7 = vld [vmem:[#allocation36_spill] sm:$0xff] }
 0x1d6   :  { %18931 = vmatmul.mubr.msk.f32.gmra.mrb[4].mxu0 %vm33_vm1, %v31060_v22  ;;  %v31068_v22 = vld [vmem:[#allocation37_spill] sm:$0xff] }
 0x1d7   :  { %18933 = vmatprep.mubr.msk.f32.mxu0 %vm33_vm1, %v31061_v60  ;;  %v31069_v60 = vld [vmem:[#allocation38_spill] sm:$0xff] }
 0x1da   :  { %18934 = vmatmul.mubr.msk.f32.gmra.mrb[6].mxu0 %vm33_vm1, %v31062_v55  ;;  %v31070_v55 = vld [vmem:[#allocation39_spill] sm:$0xff] }
 0x1db   :  { %18936 = vmatprep.mubr.msk.f32.mxu0 %vm33_vm1, %v31063_v46  ;;  %v31071_v46 = vld [vmem:[#allocation40_spill] sm:$0xff] }
 0x1de   :  { %18937 = vmatmul.mubr.msk.f32.gmra.mrb[8].mxu0 %vm33_vm1, %v31064_v17  ;;  %v31072_v17 = vld [vmem:[#allocation41_spill] sm:$0xff] }
 0x1df   :  { %18939 = vmatprep.mubr.msk.f32.mxu0 %vm33_vm1, %v31065_v26  ;;  %v31073_v26 = vld [vmem:[#allocation42_spill] sm:$0xff] }
 0x1e2   :  { %18940 = vmatmul.mubr.msk.f32.gmra.mrb[10].mxu0 %vm33_vm1, %v31066_v10  ;;  %v31074_v10 = vld [vmem:[#allocation43_spill] sm:$0xff] }
 0x1e3   :  { %18942 = vmatprep.mubr.msk.f32.mxu0 %vm33_vm1, %v31067_v7  ;;  %v31075_v7 = vld [vmem:[#allocation44_spill] sm:$0xff] }
 0x1e6   :  { %18943 = vmatmul.mubr.msk.f32.gmra.mrb[12].mxu0 %vm33_vm1, %v31068_v22  ;;  %v31076_v22 = vld [vmem:[#allocation45_spill] sm:$0xff] }
 0x1e7   :  { %18945 = vmatprep.mubr.msk.f32.mxu0 %vm33_vm1, %v31069_v60  ;;  %v31077_v60 = vld [vmem:[#allocation46_spill] sm:$0xff] }
 0x1ea   :  { %18946 = vmatmul.mubr.msk.f32.gmra.mrb[14].mxu0 %vm33_vm1, %v31070_v55  ;;  %v31078_v55 = vld [vmem:[#allocation47_spill] sm:$0xff] }
 0x1eb   :  { %18948 = vmatprep.mubr.msk.f32.mxu0 %vm33_vm1, %v31071_v46  ;;  %v31079_v46 = vld [vmem:[#allocation48_spill] sm:$0xff] }
 0x1ee   :  { %18949 = vmatmul.mubr.msk.f32.gmra.mrb[16].mxu0 %vm33_vm1, %v31072_v17  ;;  %v371_v17 = vld [vmem:[#allocation2 + $0x200] sm:$0xff] }
 0x1ef   :  { %18951 = vmatprep.mubr.msk.f32.mxu0 %vm33_vm1, %v31073_v26  ;;  %v24038_v26 = vld [vmem:[#allocation2 + $0x208] sm:$0xff] }
 0x1f2   :  { %18952 = vmatmul.mubr.msk.f32.gmra.mrb[18].mxu0 %vm33_vm1, %v31074_v10  ;;  %v31081_v10 = vld [vmem:[#allocation50_spill] sm:$0xff] }
 0x1f3   :  { %18954 = vmatprep.mubr.msk.f32.mxu0 %vm33_vm1, %v31075_v7  ;;  %v2525_v7 = vrot.slane %v371_v17, 7 }
 0x1f6   :  { %18955 = vmatmul.mubr.msk.f32.gmra.mrb[20].mxu0 %vm33_vm1, %v31076_v22  ;;  %v2526_v22 = vrot.slane %v24038_v26, 7 }
 0x1f7   :  { %18957 = vmatprep.mubr.msk.f32.mxu0 %vm33_vm1, %v31077_v60  ;;  %v31082_v60 = vld [vmem:[#allocation51_spill] sm:$0xff] }
 0x1f8   :  { %v24053_v5 = vsel %vm547_vm2, %v2525_v7, %v2526_v22  ;;  %v31089_v7 = vld [vmem:[#allocation56_spill] sm:$0xff] }
 0x1f9   :  { %31084 = vst [vmem:[#allocation24_spill] sm:$0xff] %v24053_v5 }
 0x1fa   :  { %18958 = vmatmul.mubr.msk.f32.gmra.mrb[22].mxu0 %vm33_vm1, %v31078_v55  ;;  %v31083_v55 = vld [vmem:[#allocation52_spill] sm:$0xff] }
 0x1fb   :  { %18960 = vmatprep.mubr.msk.f32.mxu0 %vm33_vm1, %v31079_v46  ;;  %v2528_v46 = vrot.slane %v24045_v58, 7 }
 0x1fd   :  { %v24060_v17 = vsel %vm547_vm2, %v2526_v22, %v2528_v46  ;;  %v31092_v22 = vld [vmem:[#allocation59_spill] sm:$0xff]  ;;  %v31093_v46 = vld [vmem:[#allocation60_spill] sm:$0xff] }
 0x1fe   :  { %18961 = vmatmul.mubr.msk.f32.gmra.mrb[24].mxu0 %vm33_vm1, %v31080_v50  ;;  %v31085_v50 = vld [vmem:[#allocation53_spill] sm:$0xff]  ;;  %31086 = vst [vmem:[#allocation25_spill] sm:$0xff] %v24060_v17 }
 0x1ff   :  { %18963 = vmatprep.mubr.msk.f32.mxu0 %vm33_vm1, %v31081_v10  ;;  %v31090_v10 = vld [vmem:[#allocation57_spill] sm:$0xff] }
 0x202   :  { %18964 = vmatmul.mubr.msk.f32.gmra.mrb[26].mxu0 %vm33_vm1, %v31082_v60  ;;  %v31087_v60 = vld [vmem:[#allocation54_spill] sm:$0xff] }
 0x203   :  { %18966 = vmatprep.mubr.msk.f32.mxu0 %vm33_vm1, %v31083_v55  ;;  %v31088_v55 = vld [vmem:[#allocation55_spill] sm:$0xff] }
 0x206   :  { %18967 = vmatmul.mubr.msk.f32.gmra.mrb[28].mxu0 %vm33_vm1, %v31085_v50  ;;  %v31091_v50 = vld [vmem:[#allocation58_spill] sm:$0xff] }
 0x207   :  { %18969 = vmatprep.mubr.msk.f32.mxu0 %vm33_vm1, %v24053_v5  ;;  %v24121_v5 = vld [vmem:[#allocation2 + $0x450] sm:$0xff] }
 0x20a   :  { %18970 = vmatmul.mubr.msk.f32.gmra.mrb[30].mxu0 %vm33_vm1, %v24060_v17  ;;  %v31094_v17 = vld [vmem:[#allocation61_spill] sm:$0xff] }
 0x20b   :  { %18972 = vmatprep.mubr.msk.f32.mxu0 %vm33_vm1, %v31087_v60  ;;  %v31095_v60 = vld [vmem:[#allocation62_spill] sm:$0xff] }
 0x20e   :  { %18973 = vmatmul.mubr.msk.f32.gmra.mrb[32].mxu0 %vm33_vm1, %v31088_v55  ;;  %v31096_v55 = vld [vmem:[#allocation63_spill] sm:$0xff] }
 0x20f   :  { %18975 = vmatprep.mubr.msk.f32.mxu0 %vm33_vm1, %v31089_v7  ;;  %v31097_v7 = vld [vmem:[#allocation64_spill] sm:$0xff] }
 0x212   :  { %18976 = vmatmul.mubr.msk.f32.gmra.mrb[34].mxu0 %vm33_vm1, %v31090_v10  ;;  %v31098_v10 = vld [vmem:[#allocation65_spill] sm:$0xff] }
 0x213   :  { %18978 = vmatprep.mubr.msk.f32.mxu0 %vm33_vm1, %v31091_v50  ;;  %v31099_v50 = vld [vmem:[#allocation66_spill] sm:$0xff] }
 0x216   :  { %18979 = vmatmul.mubr.msk.f32.gmra.mrb[36].mxu0 %vm33_vm1, %v31092_v22  ;;  %v31100_v22 = vld [vmem:[#allocation67_spill] sm:$0xff] }
 0x217   :  { %18981 = vmatprep.mubr.msk.f32.mxu0 %vm33_vm1, %v31093_v46  ;;  %v31101_v46 = vld [vmem:[#allocation68_spill] sm:$0xff] }
 0x21a   :  { %18982 = vmatmul.mubr.msk.f32.gmra.mrb[38].mxu0 %vm33_vm1, %v31094_v17  ;;  %v31102_v17 = vld [vmem:[#allocation69_spill] sm:$0xff] }
 0x21b   :  { %18984 = vmatprep.mubr.msk.f32.mxu0 %vm33_vm1, %v31095_v60  ;;  %v31103_v60 = vld [vmem:[#allocation70_spill] sm:$0xff] }
 0x21e   :  { %18985 = vmatmul.mubr.msk.f32.gmra.mrb[40].mxu0 %vm33_vm1, %v31096_v55  ;;  %v31104_v55 = vld [vmem:[#allocation71_spill] sm:$0xff] }
 0x21f   :  { %18987 = vmatprep.mubr.msk.f32.mxu0 %vm33_vm1, %v31097_v7  ;;  %v31105_v7 = vld [vmem:[#allocation72_spill] sm:$0xff] }
 0x222   :  { %18988 = vmatmul.mubr.msk.f32.gmra.mrb[42].mxu0 %vm33_vm1, %v31098_v10  ;;  %v31106_v10 = vld [vmem:[#allocation73_spill] sm:$0xff] }
 0x223   :  { %18990 = vmatprep.mubr.msk.f32.mxu0 %vm33_vm1, %v31099_v50  ;;  %v31107_v50 = vld [vmem:[#allocation74_spill] sm:$0xff] }
 0x226   :  { %18991 = vmatmul.mubr.msk.f32.gmra.mrb[44].mxu0 %vm33_vm1, %v31100_v22  ;;  %v31108_v22 = vld [vmem:[#allocation75_spill] sm:$0xff] }
 0x227   :  { %18993 = vmatprep.mubr.msk.f32.mxu0 %vm33_vm1, %v31101_v46  ;;  %v31109_v46 = vld [vmem:[#allocation76_spill] sm:$0xff] }
 0x22a   :  { %18994 = vmatmul.mubr.msk.f32.gmra.mrb[46].mxu0 %vm33_vm1, %v31102_v17  ;;  %v31110_v17 = vld [vmem:[#allocation19_spill] sm:$0xff] }
 0x22b   :  { %18996 = vmatprep.mubr.msk.f32.mxu0 %vm33_vm1, %v31103_v60  ;;  %v31111_v60 = vld [vmem:[#allocation77_spill] sm:$0xff] }
 0x22e   :  { %18997 = vmatmul.mubr.msk.f32.gmra.mrb[48].mxu0 %vm33_vm1, %v31104_v55  ;;  %v443_v55 = vld [vmem:[#allocation2 + $0x440] sm:$0xff] }
 0x22f   :  { %18999 = vmatprep.mubr.msk.f32.mxu0 %vm33_vm1, %v31105_v7  ;;  %v24114_v7 = vld [vmem:[#allocation2 + $0x448] sm:$0xff] }
 0x232   :  { %19000 = vmatmul.mubr.msk.f32.gmra.mrb[50].mxu0 %vm33_vm1, %v31106_v10  ;;  %v31112_v10 = vld [vmem:[#allocation21_spill] sm:$0xff] }
 0x233   :  { %19002 = vmatprep.mubr.msk.f32.mxu0 %vm33_vm1, %v31107_v50  ;;  %v2530_v50 = vrot.slane %v443_v55, 7 }
 0x236   :  { %19003 = vmatmul.mubr.msk.f32.gmra.mrb[52].mxu0 %vm33_vm1, %v31108_v22  ;;  %v2531_v22 = vrot.slane %v24114_v7, 7 }
 0x237   :  { %19005 = vmatprep.mubr.msk.f32.mxu0 %vm33_vm1, %v31109_v46  ;;  %v31113_v46 = vld [vmem:[#allocation22_spill] sm:$0xff] }
 0x238   :  { %v24129_v56 = vsel %vm547_vm2, %v2530_v50, %v2531_v22  ;;  %v24144_v50 = vld [vmem:[%s30349_s1 + $0x18] sm:$0xf] }
 0x239   :  { %31115 = vst [vmem:[#allocation54_spill] sm:$0xff] %v24129_v56 }
 0x23a   :  { %19006 = vmatmul.mubr.msk.f32.gmra.mrb[54].mxu0 %vm33_vm1, %v31110_v17  ;;  %v31114_v17 = vld [vmem:[#allocation23_spill] sm:$0xff] }
 0x23b   :  { %19008 = vmatprep.mubr.msk.f32.mxu0 %vm33_vm1, %v31111_v60  ;;  %v2533_v60 = vrot.slane %v24121_v5, 7 }
 0x23d   :  { %v24136_v55 = vsel %vm547_vm2, %v2531_v22, %v2533_v60  ;;  %v24155_v22 = vld [vmem:[#allocation2 + $0x50] sm:$0xff] }
 0x23e   :  { %19009 = vmatmul.mubr.msk.f32.gmra.mrb[56].mxu0 %vm33_vm1, %v23553_v31  ;;  %31117 = vst [vmem:[#allocation21_spill] sm:$0xff] %v24155_v22  ;;  %v24171_v60 = vld [vmem:[#allocation2 + $0x90] sm:$0xff] }
 0x23f   :  { %19011 = vmatprep.mubr.msk.f32.mxu0 %vm33_vm1, %v31112_v10  ;;  %31121 = vst [vmem:[#allocation91_spill] sm:$0xff] %v24171_v60 }
 0x242   :  { %19012 = vmatmul.mubr.msk.f32.gmra.mrb[58].mxu0 %vm33_vm1, %v31113_v46  ;;  %v22164_v46 = vld [vmem:[#allocation2 + $0x28] sm:$0xff] }
 0x243   :  { %19014 = vmatprep.mubr.msk.f32.mxu0 %vm33_vm1, %v31114_v17  ;;  %v22165_v17 = vld [vmem:[#allocation2 + $0x30] sm:$0xff] }
 0x246   :  { %19015 = vmatmul.mubr.msk.f32.gmra.mrb[60].mxu0 %vm33_vm1, %v23576_v53 }
 0x247   :  { %19017 = vmatprep.mubr.msk.f32.mxu0 %vm33_vm1, %v24129_v56  ;;  %v24149_v56 = vld [vmem:[#allocation2 + $0x48] sm:$0xff] }
 0x248   :  { %31116 = vst [vmem:[#allocation55_spill] sm:$0xff] %v24149_v56 }
 0x24a   :  { %19018 = vmatmul.mubr.msk.f32.gmra.mrb[62].mxu0 %vm33_vm1, %v24136_v55 }
 0x24b   :  { %19022 = vmatprep.mubr.msk.f32.mxu0 %vm33_vm1, %v22164_v46  ;;  %v24159_v46 = vld [vmem:[#allocation2 + $0x68] sm:$0xff] }
 0x24c   :  { %31118 = vst [vmem:[#allocation88_spill] sm:$0xff] %v24159_v46 }
 0x24e   :  { %19023 = vmatmul.mubr.msk.f32.vlgmr.msra.gmra.mrb[0].mxu0 %vm33_vm1, %v22165_v17  ;;  %v24163_v17 = vld [vmem:[#allocation2 + $0x70] sm:$0xff] }
 0x24f   :  { %19119 = vmatpush3.msk.msra.mxu0 %vm839_vm0, %v23984_v43  ;;  %19025 = vmatprep.mubr.msk.f32.mxu0 %vm33_vm1, %v24149_v56  ;;  %31119 = vst [vmem:[#allocation89_spill] sm:$0xff] %v24163_v17  ;;  %v24167_v43 = vld [vmem:[#allocation2 + $0x88] sm:$0xff]  ;;  %v24281_v56 = vld [vmem:[#allocation2 + $0x2b0] sm:$0xff] }
 0x250   :  { %19216 = vmatprep.subr.msk.mxu0 %vm839_vm0, %v24144_v50  ;;  %31120 = vst [vmem:[#allocation90_spill] sm:$0xff] %v24167_v43  ;;  %31146 = vst [vmem:[#allocation116_spill] sm:$0xff] %v24281_v56 }
 0x252   :  { %19026 = vmatmul.mubr.msk.f32.gmra.mrb[2].mxu0 %vm33_vm1, %v24155_v22  ;;  %v24175_v22 = vld [vmem:[#allocation2 + $0xa8] sm:$0xff] }
 0x253   :  { %19028 = vmatprep.mubr.msk.f32.mxu0 %vm33_vm1, %v24159_v46  ;;  %31122 = vst [vmem:[#allocation92_spill] sm:$0xff] %v24175_v22  ;;  %v24179_v46 = vld [vmem:[#allocation2 + $0xb0] sm:$0xff] }
 0x254   :  { %31123 = vst [vmem:[#allocation93_spill] sm:$0xff] %v24179_v46 }
 0x256   :  { %19029 = vmatmul.mubr.msk.f32.gmra.mrb[4].mxu0 %vm33_vm1, %v24163_v17  ;;  %v24183_v17 = vld [vmem:[#allocation2 + $0xc8] sm:$0xff] }
 0x257   :  { %19031 = vmatprep.mubr.msk.f32.mxu0 %vm33_vm1, %v24167_v43  ;;  %31124 = vst [vmem:[#allocation94_spill] sm:$0xff] %v24183_v17  ;;  %v24187_v43 = vld [vmem:[#allocation2 + $0xd0] sm:$0xff] }
 0x258   :  { %31125 = vst [vmem:[#allocation95_spill] sm:$0xff] %v24187_v43 }
 0x25a   :  { %19032 = vmatmul.mubr.msk.f32.gmra.mrb[6].mxu0 %vm33_vm1, %v24171_v60  ;;  %v24191_v60 = vld [vmem:[#allocation2 + $0xe8] sm:$0xff] }
 0x25b   :  { %19034 = vmatprep.mubr.msk.f32.mxu0 %vm33_vm1, %v24175_v22  ;;  %31126 = vst [vmem:[#allocation96_spill] sm:$0xff] %v24191_v60  ;;  %v24195_v22 = vld [vmem:[#allocation2 + $0xf0] sm:$0xff] }
 0x25c   :  { %31127 = vst [vmem:[#allocation97_spill] sm:$0xff] %v24195_v22 }
 0x25e   :  { %19035 = vmatmul.mubr.msk.f32.gmra.mrb[8].mxu0 %vm33_vm1, %v24179_v46  ;;  %v24199_v46 = vld [vmem:[#allocation2 + $0x108] sm:$0xff] }
 0x25f   :  { %19037 = vmatprep.mubr.msk.f32.mxu0 %vm33_vm1, %v24183_v17  ;;  %31128 = vst [vmem:[#allocation98_spill] sm:$0xff] %v24199_v46  ;;  %v24203_v17 = vld [vmem:[#allocation2 + $0x110] sm:$0xff] }
 0x260   :  { %31129 = vst [vmem:[#allocation99_spill] sm:$0xff] %v24203_v17 }
 0x262   :  { %19038 = vmatmul.mubr.msk.f32.gmra.mrb[10].mxu0 %vm33_vm1, %v24187_v43  ;;  %v24207_v43 = vld [vmem:[#allocation2 + $0x128] sm:$0xff] }
 0x263   :  { %19040 = vmatprep.mubr.msk.f32.mxu0 %vm33_vm1, %v24191_v60  ;;  %31130 = vst [vmem:[#allocation100_spill] sm:$0xff] %v24207_v43  ;;  %v24211_v60 = vld [vmem:[#allocation2 + $0x130] sm:$0xff] }
 0x264   :  { %31131 = vst [vmem:[#allocation101_spill] sm:$0xff] %v24211_v60 }
 0x266   :  { %19041 = vmatmul.mubr.msk.f32.gmra.mrb[12].mxu0 %vm33_vm1, %v24195_v22  ;;  %v24215_v22 = vld [vmem:[#allocation2 + $0x148] sm:$0xff] }
 0x267   :  { %19043 = vmatprep.mubr.msk.f32.mxu0 %vm33_vm1, %v24199_v46  ;;  %31132 = vst [vmem:[#allocation102_spill] sm:$0xff] %v24215_v22  ;;  %v24219_v46 = vld [vmem:[#allocation2 + $0x150] sm:$0xff] }
 0x268   :  { %31133 = vst [vmem:[#allocation103_spill] sm:$0xff] %v24219_v46 }
 0x26a   :  { %19044 = vmatmul.mubr.msk.f32.gmra.mrb[14].mxu0 %vm33_vm1, %v24203_v17  ;;  %v24223_v17 = vld [vmem:[#allocation2 + $0x168] sm:$0xff] }
 0x26b   :  { %19046 = vmatprep.mubr.msk.f32.mxu0 %vm33_vm1, %v24207_v43  ;;  %31134 = vst [vmem:[#allocation104_spill] sm:$0xff] %v24223_v17  ;;  %v24227_v43 = vld [vmem:[#allocation2 + $0x170] sm:$0xff] }
 0x26c   :  { %31135 = vst [vmem:[#allocation105_spill] sm:$0xff] %v24227_v43 }
 0x26e   :  { %19047 = vmatmul.mubr.msk.f32.gmra.mrb[16].mxu0 %vm33_vm1, %v24211_v60  ;;  %v24231_v60 = vld [vmem:[#allocation2 + $0x188] sm:$0xff] }
 0x26f   :  { %19049 = vmatprep.mubr.msk.f32.mxu0 %vm33_vm1, %v24215_v22  ;;  %31136 = vst [vmem:[#allocation106_spill] sm:$0xff] %v24231_v60  ;;  %v24235_v22 = vld [vmem:[#allocation2 + $0x190] sm:$0xff] }
 0x270   :  { %31137 = vst [vmem:[#allocation107_spill] sm:$0xff] %v24235_v22 }
 0x272   :  { %19050 = vmatmul.mubr.msk.f32.gmra.mrb[18].mxu0 %vm33_vm1, %v24219_v46  ;;  %v24239_v46 = vld [vmem:[#allocation2 + $0x1a8] sm:$0xff] }
 0x273   :  { %19052 = vmatprep.mubr.msk.f32.mxu0 %vm33_vm1, %v24223_v17  ;;  %31138 = vst [vmem:[#allocation108_spill] sm:$0xff] %v24239_v46  ;;  %v24243_v17 = vld [vmem:[#allocation2 + $0x1b0] sm:$0xff] }
 0x274   :  { %31139 = vst [vmem:[#allocation109_spill] sm:$0xff] %v24243_v17 }
 0x276   :  { %19053 = vmatmul.mubr.msk.f32.gmra.mrb[20].mxu0 %vm33_vm1, %v24227_v43  ;;  %v24247_v43 = vld [vmem:[#allocation2 + $0x1c8] sm:$0xff] }
 0x277   :  { %19055 = vmatprep.mubr.msk.f32.mxu0 %vm33_vm1, %v24231_v60  ;;  %31140 = vst [vmem:[#allocation110_spill] sm:$0xff] %v24247_v43  ;;  %v24251_v60 = vld [vmem:[#allocation2 + $0x1d0] sm:$0xff] }
 0x278   :  { %31141 = vst [vmem:[#allocation111_spill] sm:$0xff] %v24251_v60 }
 0x27a   :  { %19056 = vmatmul.mubr.msk.f32.gmra.mrb[22].mxu0 %vm33_vm1, %v24235_v22  ;;  %v24255_v22 = vld [vmem:[#allocation2 + $0x1e8] sm:$0xff] }
 0x27b   :  { %19058 = vmatprep.mubr.msk.f32.mxu0 %vm33_vm1, %v24239_v46  ;;  %31142 = vst [vmem:[#allocation112_spill] sm:$0xff] %v24255_v22  ;;  %v24259_v46 = vld [vmem:[#allocation2 + $0x1f0] sm:$0xff] }
 0x27c   :  { %31143 = vst [vmem:[#allocation113_spill] sm:$0xff] %v24259_v46 }
 0x27e   :  { %19059 = vmatmul.mubr.msk.f32.gmra.mrb[24].mxu0 %vm33_vm1, %v24243_v17  ;;  %v24269_v17 = vld [vmem:[#allocation2 + $0x288] sm:$0xff] }
 0x27f   :  { %19061 = vmatprep.mubr.msk.f32.mxu0 %vm33_vm1, %v24247_v43  ;;  %v22194_v43 = vld [vmem:[#allocation2 + $0x268] sm:$0xff] }
 0x282   :  { %19062 = vmatmul.mubr.msk.f32.gmra.mrb[26].mxu0 %vm33_vm1, %v24251_v60  ;;  %v22195_v60 = vld [vmem:[#allocation2 + $0x270] sm:$0xff] }
 0x283   :  { %19064 = vmatprep.mubr.msk.f32.mxu0 %vm33_vm1, %v24255_v22  ;;  %v24273_v22 = vld [vmem:[#allocation2 + $0x290] sm:$0xff] }
 0x284   :  { %31144 = vst [vmem:[#allocation114_spill] sm:$0xff] %v24273_v22 }
 0x286   :  { %19065 = vmatmul.mubr.msk.f32.gmra.mrb[28].mxu0 %vm33_vm1, %v24259_v46  ;;  %v24277_v46 = vld [vmem:[#allocation2 + $0x2a8] sm:$0xff] }
 0x287   :  { %19067 = vmatprep.mubr.msk.f32.mxu0 %vm33_vm1, %v24038_v26  ;;  %31145 = vst [vmem:[#allocation115_spill] sm:$0xff] %v24277_v46 }
 0x28a   :  { %19068 = vmatmul.mubr.msk.f32.gmra.mrb[30].mxu0 %vm33_vm1, %v24045_v58 }
 0x28b   :  { %19070 = vmatprep.mubr.msk.f32.mxu0 %vm33_vm1, %v22194_v43  ;;  %v24285_v43 = vld [vmem:[#allocation2 + $0x2c8] sm:$0xff] }
 0x28c   :  { %31147 = vst [vmem:[#allocation117_spill] sm:$0xff] %v24285_v43 }
 0x28e   :  { %19071 = vmatmul.mubr.msk.f32.gmra.mrb[32].mxu0 %vm33_vm1, %v22195_v60  ;;  %v24289_v60 = vld [vmem:[#allocation2 + $0x2d0] sm:$0xff] }
 0x28f   :  { %19073 = vmatprep.mubr.msk.f32.mxu0 %vm33_vm1, %v24269_v17  ;;  %31148 = vst [vmem:[#allocation118_spill] sm:$0xff] %v24289_v60 }
 0x292   :  { %19074 = vmatmul.mubr.msk.f32.gmra.mrb[34].mxu0 %vm33_vm1, %v24273_v22  ;;  %v24293_v22 = vld [vmem:[#allocation2 + $0x2e8] sm:$0xff] }
 0x293   :  { %19076 = vmatprep.mubr.msk.f32.mxu0 %vm33_vm1, %v24277_v46  ;;  %31149 = vst [vmem:[#allocation119_spill] sm:$0xff] %v24293_v22  ;;  %v24297_v46 = vld [vmem:[#allocation2 + $0x2f0] sm:$0xff] }
 0x294   :  { %31150 = vst [vmem:[#allocation120_spill] sm:$0xff] %v24297_v46 }
 0x296   :  { %19077 = vmatmul.mubr.msk.f32.gmra.mrb[36].mxu0 %vm33_vm1, %v24281_v56  ;;  %v24301_v56 = vld [vmem:[#allocation2 + $0x308] sm:$0xff] }
 0x297   :  { %19079 = vmatprep.mubr.msk.f32.mxu0 %vm33_vm1, %v24285_v43  ;;  %31151 = vst [vmem:[#allocation121_spill] sm:$0xff] %v24301_v56  ;;  %v24305_v43 = vld [vmem:[#allocation2 + $0x310] sm:$0xff] }
 0x298   :  { %31152 = vst [vmem:[#allocation122_spill] sm:$0xff] %v24305_v43 }
 0x29a   :  { %19080 = vmatmul.mubr.msk.f32.gmra.mrb[38].mxu0 %vm33_vm1, %v24289_v60  ;;  %v24309_v60 = vld [vmem:[#allocation2 + $0x328] sm:$0xff] }
 0x29b   :  { %19082 = vmatprep.mubr.msk.f32.mxu0 %vm33_vm1, %v24293_v22  ;;  %31153 = vst [vmem:[#allocation123_spill] sm:$0xff] %v24309_v60  ;;  %v24313_v22 = vld [vmem:[#allocation2 + $0x330] sm:$0xff] }
 0x29c   :  { %31154 = vst [vmem:[#allocation124_spill] sm:$0xff] %v24313_v22 }
 0x29e   :  { %19083 = vmatmul.mubr.msk.f32.gmra.mrb[40].mxu0 %vm33_vm1, %v24297_v46  ;;  %v24317_v46 = vld [vmem:[#allocation2 + $0x348] sm:$0xff] }
 0x29f   :  { %19085 = vmatprep.mubr.msk.f32.mxu0 %vm33_vm1, %v24301_v56  ;;  %31155 = vst [vmem:[#allocation125_spill] sm:$0xff] %v24317_v46  ;;  %v24321_v56 = vld [vmem:[#allocation2 + $0x350] sm:$0xff] }
 0x2a0   :  { %31156 = vst [vmem:[#allocation126_spill] sm:$0xff] %v24321_v56 }
 0x2a2   :  { %19086 = vmatmul.mubr.msk.f32.gmra.mrb[42].mxu0 %vm33_vm1, %v24305_v43  ;;  %v24325_v43 = vld [vmem:[#allocation2 + $0x368] sm:$0xff] }
 0x2a3   :  { %19088 = vmatprep.mubr.msk.f32.mxu0 %vm33_vm1, %v24309_v60  ;;  %31157 = vst [vmem:[#allocation127_spill] sm:$0xff] %v24325_v43  ;;  %v24329_v60 = vld [vmem:[#allocation2 + $0x370] sm:$0xff] }
 0x2a4   :  { %31158 = vst [vmem:[#allocation128_spill] sm:$0xff] %v24329_v60 }
 0x2a6   :  { %19089 = vmatmul.mubr.msk.f32.gmra.mrb[44].mxu0 %vm33_vm1, %v24313_v22  ;;  %v24333_v22 = vld [vmem:[#allocation2 + $0x388] sm:$0xff] }
 0x2a7   :  { %19091 = vmatprep.mubr.msk.f32.mxu0 %vm33_vm1, %v24317_v46  ;;  %31159 = vst [vmem:[#allocation129_spill] sm:$0xff] %v24333_v22  ;;  %v24337_v46 = vld [vmem:[#allocation2 + $0x390] sm:$0xff] }
 0x2a8   :  { %31160 = vst [vmem:[#allocation130_spill] sm:$0xff] %v24337_v46 }
 0x2aa   :  { %19092 = vmatmul.mubr.msk.f32.gmra.mrb[46].mxu0 %vm33_vm1, %v24321_v56  ;;  %v24341_v56 = vld [vmem:[#allocation2 + $0x3a8] sm:$0xff] }
 0x2ab   :  { %19094 = vmatprep.mubr.msk.f32.mxu0 %vm33_vm1, %v24325_v43  ;;  %31161 = vst [vmem:[#allocation131_spill] sm:$0xff] %v24341_v56  ;;  %v24345_v43 = vld [vmem:[#allocation2 + $0x3b0] sm:$0xff] }
 0x2ac   :  { %31162 = vst [vmem:[#allocation132_spill] sm:$0xff] %v24345_v43 }
 0x2ae   :  { %19095 = vmatmul.mubr.msk.f32.gmra.mrb[48].mxu0 %vm33_vm1, %v24329_v60  ;;  %v24349_v60 = vld [vmem:[#allocation2 + $0x3c8] sm:$0xff] }
 0x2af   :  { %19097 = vmatprep.mubr.msk.f32.mxu0 %vm33_vm1, %v24333_v22  ;;  %31163 = vst [vmem:[#allocation133_spill] sm:$0xff] %v24349_v60  ;;  %v24353_v22 = vld [vmem:[#allocation2 + $0x3d0] sm:$0xff] }
 0x2b0   :  { %31164 = vst [vmem:[#allocation134_spill] sm:$0xff] %v24353_v22 }
 0x2b2   :  { %19098 = vmatmul.mubr.msk.f32.gmra.mrb[50].mxu0 %vm33_vm1, %v24337_v46  ;;  %v24357_v46 = vld [vmem:[#allocation2 + $0x3e8] sm:$0xff] }
 0x2b3   :  { %19100 = vmatprep.mubr.msk.f32.mxu0 %vm33_vm1, %v24341_v56  ;;  %v24361_v56 = vld [vmem:[#allocation2 + $0x3f0] sm:$0xff] }
 0x2b6   :  { %19101 = vmatmul.mubr.msk.f32.gmra.mrb[52].mxu0 %vm33_vm1, %v24345_v43  ;;  %v24365_v43 = vld [vmem:[#allocation2 + $0x408] sm:$0xff] }
 0x2b7   :  { %19103 = vmatprep.mubr.msk.f32.mxu0 %vm33_vm1, %v24349_v60  ;;  %v24369_v60 = vld [vmem:[#allocation2 + $0x410] sm:$0xff] }
 0x2b8   :  { %31165 = vst [vmem:[#allocation135_spill] sm:$0xff] %v24369_v60 }
 0x2ba   :  { %19104 = vmatmul.mubr.msk.f32.gmra.mrb[54].mxu0 %vm33_vm1, %v24353_v22  ;;  %v24375_v22 = vld [vmem:[#allocation2 + $0x430] sm:$0xff] }
 0x2bb   :  { %19106 = vmatprep.mubr.msk.f32.mxu0 %vm33_vm1, %v24357_v46 }
 0x2be   :  { %19107 = vmatmul.mubr.msk.f32.gmra.mrb[56].mxu0 %vm33_vm1, %v24361_v56 }
 0x2bf   :  { %19109 = vmatprep.mubr.msk.f32.mxu0 %vm33_vm1, %v24365_v43 }
 0x2c2   :  { %19110 = vmatmul.mubr.msk.f32.gmra.mrb[58].mxu0 %vm33_vm1, %v24369_v60  ;;  %v24388_v60 = vld [vmem:[%s30349_s1 + $0x1c] sm:$0xf] }
 0x2c3   :  { %19112 = vmatprep.mubr.msk.f32.mxu0 %vm33_vm1, %v23956_v30 }
 0x2c6   :  { %19113 = vmatmul.mubr.msk.f32.gmra.mrb[60].mxu0 %vm33_vm1, %v24375_v22 }
 0x2c7   :  { %19115 = vmatprep.mubr.msk.f32.mxu0 %vm33_vm1, %v24114_v7 }
 0x2ca   :  { %19116 = vmatmul.mubr.msk.f32.gmra.mrb[62].mxu0 %vm33_vm1, %v24121_v5 }
 0x2cb   :  { %19120 = vmatprep.mubr.msk.f32.mxu0 %vm33_vm1, %v23588_v24  ;;  %v3461_v24 = vrot.slane %v24038_v26, 1 }
 0x2ce   :  { %19121 = vmatmul.mubr.msk.f32.vlgmr.msra.gmra.mrb[0].mxu0 %vm33_vm1, %v23603_v25  ;;  %v3462_v25 = vrot.slane %v24045_v58, 1 }
 0x2cf   :  { %19217 = vmatpush3.msk.msra.mxu0 %vm839_vm0, %v24144_v50  ;;  %19123 = vmatprep.mubr.msk.f32.mxu0 %vm33_vm1, %v23606_v33  ;;  %v374_v50 = vld [vmem:[#allocation2 + $0x218] sm:$0xff] }
 0x2d0   :  { %19314 = vmatprep.subr.msk.mxu0 %vm839_vm0, %v24388_v60 }
 0x2d2   :  { %19124 = vmatmul.mubr.msk.f32.gmra.mrb[2].mxu0 %vm33_vm1, %v23617_v52 }
 0x2d3   :  { %19126 = vmatprep.mubr.msk.f32.mxu0 %vm33_vm1, %v23620_v29 }
 0x2d6   :  { %19127 = vmatmul.mubr.msk.f32.gmra.mrb[4].mxu0 %vm33_vm1, %v23629_v2 }
 0x2d7   :  { %19129 = vmatprep.mubr.msk.f32.mxu0 %vm33_vm1, %v23632_v11 }
 0x2da   :  { %19130 = vmatmul.mubr.msk.f32.gmra.mrb[6].mxu0 %vm33_vm1, %v23641_v47 }
 0x2db   :  { %19132 = vmatprep.mubr.msk.f32.mxu0 %vm33_vm1, %v23644_v18 }
 0x2de   :  { %19133 = vmatmul.mubr.msk.f32.gmra.mrb[8].mxu0 %vm33_vm1, %v23653_v61 }
 0x2df   :  { %19135 = vmatprep.mubr.msk.f32.mxu0 %vm33_vm1, %v23656_v34 }
 0x2e2   :  { %19136 = vmatmul.mubr.msk.f32.gmra.mrb[10].mxu0 %vm33_vm1, %v23665_v1 }
 0x2e3   :  { %19138 = vmatprep.mubr.msk.f32.mxu0 %vm33_vm1, %v23668_v16 }
 0x2e6   :  { %19139 = vmatmul.mubr.msk.f32.gmra.mrb[12].mxu0 %vm33_vm1, %v23677_v9 }
 0x2e7   :  { %19141 = vmatprep.mubr.msk.f32.mxu0 %vm33_vm1, %v23680_v14 }
 0x2ea   :  { %19142 = vmatmul.mubr.msk.f32.gmra.mrb[14].mxu0 %vm33_vm1, %v23689_v20 }
 0x2eb   :  { %19144 = vmatprep.mubr.msk.f32.mxu0 %vm33_vm1, %v23692_v41 }
 0x2ee   :  { %19145 = vmatmul.mubr.msk.f32.gmra.mrb[16].mxu0 %vm33_vm1, %v23701_v23 }
 0x2ef   :  { %19147 = vmatprep.mubr.msk.f32.mxu0 %vm33_vm1, %v23704_v44 }
 0x2f2   :  { %19148 = vmatmul.mubr.msk.f32.gmra.mrb[18].mxu0 %vm33_vm1, %v23713_v28 }
 0x2f3   :  { %19150 = vmatprep.mubr.msk.f32.mxu0 %vm33_vm1, %v23716_v51 }
 0x2f6   :  { %19151 = vmatmul.mubr.msk.f32.gmra.mrb[20].mxu0 %vm33_vm1, %v23725_v36 }
 0x2f7   :  { %19153 = vmatprep.mubr.msk.f32.mxu0 %vm33_vm1, %v23728_v63 }
 0x2fa   :  { %19154 = vmatmul.mubr.msk.f32.gmra.mrb[22].mxu0 %vm33_vm1, %v23737_v38  ;;  %v3464_v38 = vrot.slane %v374_v50, 1  ;;  %v31171_v50 = vld [vmem:[#allocation12_spill] sm:$0xff] }
 0x2fb   :  { %19156 = vmatprep.mubr.msk.f32.mxu0 %vm33_vm1, %v23740_v3  ;;  %v24453_v3 = vsel %vm1776_vm3, %v3461_v24, %v3462_v25  ;;  %v31169_v24 = vld [vmem:[#allocation10_spill] sm:$0xff] }
 0x2fe   :  { %19157 = vmatmul.mubr.msk.f32.gmra.mrb[24].mxu0 %vm33_vm1, %v23756_v42 }
 0x2ff   :  { %19159 = vmatprep.mubr.msk.f32.mxu0 %vm33_vm1, %v23760_v12  ;;  %v24460_v12 = vsel %vm1776_vm3, %v3462_v25, %v3464_v38  ;;  %v31166_v38 = vld [vmem:[#allocation80_spill] sm:$0xff]  ;;  %v31170_v25 = vld [vmem:[#allocation11_spill] sm:$0xff] }
 0x302   :  { %19160 = vmatmul.mubr.msk.f32.gmra.mrb[26].mxu0 %vm33_vm1, %v23769_v37 }
 0x303   :  { %19162 = vmatprep.mubr.msk.f32.mxu0 %vm33_vm1, %v23772_v19 }
 0x306   :  { %19163 = vmatmul.mubr.msk.f32.gmra.mrb[28].mxu0 %vm33_vm1, %v23779_v49 }
 0x307   :  { %19165 = vmatprep.mubr.msk.f32.mxu0 %vm33_vm1, %v24453_v3 }
 0x30a   :  { %19166 = vmatmul.mubr.msk.f32.gmra.mrb[30].mxu0 %vm33_vm1, %v24460_v12 }
 0x30b   :  { %19168 = vmatprep.mubr.msk.f32.mxu0 %vm33_vm1, %v23791_v27  ;;  %v31167_v27 = vld [vmem:[#allocation81_spill] sm:$0xff] }
 0x30e   :  { %19169 = vmatmul.mubr.msk.f32.gmra.mrb[32].mxu0 %vm33_vm1, %v23799_v13  ;;  %v31168_v13 = vld [vmem:[#allocation9_spill] sm:$0xff] }
 0x30f   :  { %19171 = vmatprep.mubr.msk.f32.mxu0 %vm33_vm1, %v23802_v45 }
 0x312   :  { %19172 = vmatmul.mubr.msk.f32.gmra.mrb[34].mxu0 %vm33_vm1, %v23811_v57 }
 0x313   :  { %19174 = vmatprep.mubr.msk.f32.mxu0 %vm33_vm1, %v23814_v39 }
 0x316   :  { %19175 = vmatmul.mubr.msk.f32.gmra.mrb[36].mxu0 %vm33_vm1, %v23823_v59 }
 0x317   :  { %19177 = vmatprep.mubr.msk.f32.mxu0 %vm33_vm1, %v23826_v15 }
 0x31a   :  { %19178 = vmatmul.mubr.msk.f32.gmra.mrb[38].mxu0 %vm33_vm1, %v23835_v62 }
 0x31b   :  { %19180 = vmatprep.mubr.msk.f32.mxu0 %vm33_vm1, %v23838_v48 }
 0x31e   :  { %19181 = vmatmul.mubr.msk.f32.gmra.mrb[40].mxu0 %vm33_vm1, %v23847_v4 }
 0x31f   :  { %19183 = vmatprep.mubr.msk.f32.mxu0 %vm33_vm1, %v23850_v40  ;;  %v31172_v40 = vld [vmem:[#allocation14_spill] sm:$0xff] }
 0x322   :  { %19184 = vmatmul.mubr.msk.f32.gmra.mrb[42].mxu0 %vm33_vm1, %v31166_v38 }
 0x323   :  { %19186 = vmatprep.mubr.msk.f32.mxu0 %vm33_vm1, %v31167_v27 }
 0x326   :  { %19187 = vmatmul.mubr.msk.f32.gmra.mrb[44].mxu0 %vm33_vm1, %v31168_v13  ;;  %v31209_v13 = vld [vmem:[#allocation25_spill] sm:$0xff] }
 0x327   :  { %19189 = vmatprep.mubr.msk.f32.mxu0 %vm33_vm1, %v31169_v24 }
 0x32a   :  { %19190 = vmatmul.mubr.msk.f32.gmra.mrb[46].mxu0 %vm33_vm1, %v31170_v25  ;;  %v31173_v25 = vld [vmem:[#allocation20_spill] sm:$0xff] }
 0x32b   :  { %19192 = vmatprep.mubr.msk.f32.mxu0 %vm33_vm1, %v31171_v50  ;;  %v31178_v50 = vld [vmem:[#allocation87_spill] sm:$0xff] }
 0x32e   :  { %19193 = vmatmul.mubr.msk.f32.gmra.mrb[48].mxu0 %vm33_vm1, %v23895_v32  ;;  %v31175_v32 = vld [vmem:[#allocation85_spill] sm:$0xff] }
 0x32f   :  { %19195 = vmatprep.mubr.msk.f32.mxu0 %vm33_vm1, %v31172_v40  ;;  %v31174_v40 = vld [vmem:[#allocation84_spill] sm:$0xff] }
 0x332   :  { %19196 = vmatmul.mubr.msk.f32.gmra.mrb[50].mxu0 %vm33_vm1, %v23907_v35  ;;  %v3467_v35 = vrot.slane %v24121_v5, 1 }
 0x333   :  { %19198 = vmatprep.mubr.msk.f32.mxu0 %vm33_vm1, %v23910_v6  ;;  %v3466_v6 = vrot.slane %v24114_v7, 1 }
 0x336   :  { %19199 = vmatmul.mubr.msk.f32.gmra.mrb[52].mxu0 %vm33_vm1, %v23919_v0  ;;  %v446_v0 = vld [vmem:[#allocation2 + $0x458] sm:$0xff] }
 0x337   :  { %19201 = vmatprep.mubr.msk.f32.mxu0 %vm33_vm1, %v23922_v8  ;;  %v31176_v8 = vld [vmem:[#allocation86_spill] sm:$0xff] }
 0x33a   :  { %19202 = vmatmul.mubr.msk.f32.gmra.mrb[54].mxu0 %vm33_vm1, %v31173_v25  ;;  %v3469_v25 = vrot.slane %v446_v0, 1  ;;  %v31181_v0 = vld [vmem:[#allocation27_spill] sm:$0xff] }
 0x33b   :  { %19204 = vmatprep.mubr.msk.f32.mxu0 %vm33_vm1, %v23934_v54  ;;  %v24525_v54 = vsel %vm1776_vm3, %v3466_v6, %v3467_v35  ;;  %v24541_v6 = vld [vmem:[%s30349_s1 + $0x20] sm:$0xf] }
 0x33c   :  { %31177 = vst [vmem:[#allocation80_spill] sm:$0xff] %v24525_v54 }
 0x33e   :  { %19205 = vmatmul.mubr.msk.f32.gmra.mrb[56].mxu0 %vm33_vm1, %v23950_v21  ;;  %v24602_v21 = vld [vmem:[#allocation2 + $0x230] sm:$0xff] }
 0x33f   :  { %19207 = vmatprep.mubr.msk.f32.mxu0 %vm33_vm1, %v31174_v40  ;;  %v24532_v40 = vsel %vm1776_vm3, %v3467_v35, %v3469_v25  ;;  %v31183_v35 = vld [vmem:[#allocation29_spill] sm:$0xff]  ;;  %v31185_v25 = vld [vmem:[#allocation31_spill] sm:$0xff] }
 0x340   :  { %31179 = vst [vmem:[#allocation81_spill] sm:$0xff] %v24532_v40 }
 0x342   :  { %19208 = vmatmul.mubr.msk.f32.gmra.mrb[58].mxu0 %vm33_vm1, %v31175_v32  ;;  %v31180_v32 = vld [vmem:[#allocation26_spill] sm:$0xff] }
 0x343   :  { %19210 = vmatprep.mubr.msk.f32.mxu0 %vm33_vm1, %v31176_v8  ;;  %v31205_v8 = vld [vmem:[#allocation51_spill] sm:$0xff] }
 0x346   :  { %19211 = vmatmul.mubr.msk.f32.gmra.mrb[60].mxu0 %vm33_vm1, %v31178_v50  ;;  %v31190_v50 = vld [vmem:[#allocation36_spill] sm:$0xff] }
 0x347   :  { %19213 = vmatprep.mubr.msk.f32.mxu0 %vm33_vm1, %v24525_v54  ;;  %v31182_v54 = vld [vmem:[#allocation28_spill] sm:$0xff] }
 0x34a   :  { %19214 = vmatmul.mubr.msk.f32.gmra.mrb[62].mxu0 %vm33_vm1, %v24532_v40  ;;  %v31186_v40 = vld [vmem:[#allocation32_spill] sm:$0xff] }
 0x34b   :  { %19218 = vmatprep.mubr.msk.f32.mxu0 %vm33_vm1, %v31180_v32  ;;  %v31184_v32 = vld [vmem:[#allocation30_spill] sm:$0xff] }
 0x34e   :  { %19219 = vmatmul.mubr.msk.f32.vlgmr.msra.gmra.mrb[0].mxu0 %vm33_vm1, %v31181_v0  ;;  %v31187_v0 = vld [vmem:[#allocation33_spill] sm:$0xff] }
 0x34f   :  { %19315 = vmatpush3.msk.msra.mxu0 %vm839_vm0, %v24388_v60  ;;  %19221 = vmatprep.mubr.msk.f32.mxu0 %vm33_vm1, %v31182_v54  ;;  %v31188_v60 = vld [vmem:[#allocation34_spill] sm:$0xff]  ;;  %v31189_v54 = vld [vmem:[#allocation35_spill] sm:$0xff] }
 0x350   :  { %19412 = vmatprep.subr.msk.mxu0 %vm839_vm0, %v24541_v6 }
 0x352   :  { %19222 = vmatmul.mubr.msk.f32.gmra.mrb[2].mxu0 %vm33_vm1, %v31183_v35  ;;  %v31191_v35 = vld [vmem:[#allocation37_spill] sm:$0xff] }
 0x353   :  { %19224 = vmatprep.mubr.msk.f32.mxu0 %vm33_vm1, %v31184_v32  ;;  %v31192_v32 = vld [vmem:[#allocation38_spill] sm:$0xff] }
 0x356   :  { %19225 = vmatmul.mubr.msk.f32.gmra.mrb[4].mxu0 %vm33_vm1, %v31185_v25  ;;  %v31193_v25 = vld [vmem:[#allocation39_spill] sm:$0xff] }
 0x357   :  { %19227 = vmatprep.mubr.msk.f32.mxu0 %vm33_vm1, %v31186_v40  ;;  %v31194_v40 = vld [vmem:[#allocation40_spill] sm:$0xff] }
 0x35a   :  { %19228 = vmatmul.mubr.msk.f32.gmra.mrb[6].mxu0 %vm33_vm1, %v31187_v0  ;;  %v31195_v0 = vld [vmem:[#allocation41_spill] sm:$0xff] }
 0x35b   :  { %19230 = vmatprep.mubr.msk.f32.mxu0 %vm33_vm1, %v31188_v60  ;;  %v31196_v60 = vld [vmem:[#allocation42_spill] sm:$0xff] }
 0x35e   :  { %19231 = vmatmul.mubr.msk.f32.gmra.mrb[8].mxu0 %vm33_vm1, %v31189_v54  ;;  %v31197_v54 = vld [vmem:[#allocation43_spill] sm:$0xff] }
 0x35f   :  { %19233 = vmatprep.mubr.msk.f32.mxu0 %vm33_vm1, %v31190_v50  ;;  %v31198_v50 = vld [vmem:[#allocation44_spill] sm:$0xff] }
 0x362   :  { %19234 = vmatmul.mubr.msk.f32.gmra.mrb[10].mxu0 %vm33_vm1, %v31191_v35  ;;  %v31199_v35 = vld [vmem:[#allocation45_spill] sm:$0xff] }
 0x363   :  { %19236 = vmatprep.mubr.msk.f32.mxu0 %vm33_vm1, %v31192_v32  ;;  %v31200_v32 = vld [vmem:[#allocation46_spill] sm:$0xff] }
 0x366   :  { %19237 = vmatmul.mubr.msk.f32.gmra.mrb[12].mxu0 %vm33_vm1, %v31193_v25  ;;  %v31201_v25 = vld [vmem:[#allocation47_spill] sm:$0xff] }
 0x367   :  { %19239 = vmatprep.mubr.msk.f32.mxu0 %vm33_vm1, %v31194_v40  ;;  %v31202_v40 = vld [vmem:[#allocation48_spill] sm:$0xff] }
 0x36a   :  { %19240 = vmatmul.mubr.msk.f32.gmra.mrb[14].mxu0 %vm33_vm1, %v31195_v0  ;;  %v31203_v0 = vld [vmem:[#allocation49_spill] sm:$0xff] }
 0x36b   :  { %19242 = vmatprep.mubr.msk.f32.mxu0 %vm33_vm1, %v31196_v60  ;;  %v31204_v60 = vld [vmem:[#allocation50_spill] sm:$0xff] }
 0x36e   :  { %19243 = vmatmul.mubr.msk.f32.gmra.mrb[16].mxu0 %vm33_vm1, %v31197_v54  ;;  %v375_v54 = vld [vmem:[#allocation2 + $0x220] sm:$0xff] }
 0x36f   :  { %19245 = vmatprep.mubr.msk.f32.mxu0 %vm33_vm1, %v31198_v50  ;;  %v24595_v50 = vld [vmem:[#allocation2 + $0x228] sm:$0xff] }
 0x372   :  { %19246 = vmatmul.mubr.msk.f32.gmra.mrb[18].mxu0 %vm33_vm1, %v31199_v35  ;;  %v31206_v35 = vld [vmem:[#allocation52_spill] sm:$0xff] }
 0x373   :  { %19248 = vmatprep.mubr.msk.f32.mxu0 %vm33_vm1, %v31200_v32  ;;  %v3939_v32 = vrot.slane %v375_v54, 7  ;;  %v31210_v54 = vld [vmem:[#allocation56_spill] sm:$0xff] }
 0x376   :  { %19249 = vmatmul.mubr.msk.f32.gmra.mrb[20].mxu0 %vm33_vm1, %v31201_v25  ;;  %v3940_v25 = vrot.slane %v24595_v50, 7 }
 0x377   :  { %19251 = vmatprep.mubr.msk.f32.mxu0 %vm33_vm1, %v31202_v40  ;;  %v31207_v40 = vld [vmem:[#allocation53_spill] sm:$0xff] }
 0x378   :  { %v3941_v24 = vsel %vm547_vm2, %v3939_v32, %v3940_v25  ;;  %v31214_v32 = vld [vmem:[#allocation60_spill] sm:$0xff] }
 0x37a   :  { %19252 = vmatmul.mubr.msk.f32.gmra.mrb[22].mxu0 %vm33_vm1, %v31203_v0  ;;  %v31208_v0 = vld [vmem:[#allocation24_spill] sm:$0xff] }
 0x37b   :  { %19254 = vmatprep.mubr.msk.f32.mxu0 %vm33_vm1, %v31204_v60  ;;  %v3942_v60 = vrot.slane %v24602_v21, 7 }
 0x37e   :  { %19255 = vmatmul.mubr.msk.f32.gmra.mrb[24].mxu0 %vm33_vm1, %v31205_v8  ;;  %v3943_v8 = vsel %vm547_vm2, %v3940_v25, %v3942_v60  ;;  %v31217_v25 = vld [vmem:[#allocation63_spill] sm:$0xff]  ;;  %v31218_v60 = vld [vmem:[#allocation64_spill] sm:$0xff] }
 0x37f   :  { %19257 = vmatprep.mubr.msk.f32.mxu0 %vm33_vm1, %v31206_v35  ;;  %v31211_v35 = vld [vmem:[#allocation57_spill] sm:$0xff] }
 0x382   :  { %19258 = vmatmul.mubr.msk.f32.gmra.mrb[26].mxu0 %vm33_vm1, %v31207_v40  ;;  %v31212_v40 = vld [vmem:[#allocation58_spill] sm:$0xff] }
 0x383   :  { %19260 = vmatprep.mubr.msk.f32.mxu0 %vm33_vm1, %v31208_v0  ;;  %v31213_v0 = vld [vmem:[#allocation59_spill] sm:$0xff] }
 0x386   :  { %19261 = vmatmul.mubr.msk.f32.gmra.mrb[28].mxu0 %vm33_vm1, %v31209_v13  ;;  %v31215_v13 = vld [vmem:[#allocation61_spill] sm:$0xff] }
 0x387   :  { %19263 = vmatprep.mubr.msk.f32.mxu0 %vm33_vm1, %v3941_v24  ;;  %v31216_v24 = vld [vmem:[#allocation62_spill] sm:$0xff] }
 0x38a   :  { %19264 = vmatmul.mubr.msk.f32.gmra.mrb[30].mxu0 %vm33_vm1, %v3943_v8  ;;  %v31219_v8 = vld [vmem:[#allocation65_spill] sm:$0xff] }
 0x38b   :  { %19266 = vmatprep.mubr.msk.f32.mxu0 %vm33_vm1, %v31210_v54  ;;  %v31220_v54 = vld [vmem:[#allocation66_spill] sm:$0xff] }
 0x38e   :  { %19267 = vmatmul.mubr.msk.f32.gmra.mrb[32].mxu0 %vm33_vm1, %v31211_v35  ;;  %v31221_v35 = vld [vmem:[#allocation67_spill] sm:$0xff] }
 0x38f   :  { %19269 = vmatprep.mubr.msk.f32.mxu0 %vm33_vm1, %v31212_v40  ;;  %v31222_v40 = vld [vmem:[#allocation68_spill] sm:$0xff] }
 0x392   :  { %19270 = vmatmul.mubr.msk.f32.gmra.mrb[34].mxu0 %vm33_vm1, %v31213_v0  ;;  %v31223_v0 = vld [vmem:[#allocation69_spill] sm:$0xff] }
 0x393   :  { %19272 = vmatprep.mubr.msk.f32.mxu0 %vm33_vm1, %v31214_v32  ;;  %v31224_v32 = vld [vmem:[#allocation70_spill] sm:$0xff] }
 0x396   :  { %19273 = vmatmul.mubr.msk.f32.gmra.mrb[36].mxu0 %vm33_vm1, %v31215_v13  ;;  %v31225_v13 = vld [vmem:[#allocation71_spill] sm:$0xff] }
 0x397   :  { %19275 = vmatprep.mubr.msk.f32.mxu0 %vm33_vm1, %v31216_v24  ;;  %v31226_v24 = vld [vmem:[#allocation72_spill] sm:$0xff] }
 0x39a   :  { %19276 = vmatmul.mubr.msk.f32.gmra.mrb[38].mxu0 %vm33_vm1, %v31217_v25  ;;  %v31227_v25 = vld [vmem:[#allocation73_spill] sm:$0xff] }
 0x39b   :  { %19278 = vmatprep.mubr.msk.f32.mxu0 %vm33_vm1, %v31218_v60  ;;  %v31228_v60 = vld [vmem:[#allocation74_spill] sm:$0xff] }
 0x39e   :  { %19279 = vmatmul.mubr.msk.f32.gmra.mrb[40].mxu0 %vm33_vm1, %v31219_v8  ;;  %v31229_v8 = vld [vmem:[#allocation75_spill] sm:$0xff] }
 0x39f   :  { %19281 = vmatprep.mubr.msk.f32.mxu0 %vm33_vm1, %v31220_v54  ;;  %v31230_v54 = vld [vmem:[#allocation76_spill] sm:$0xff] }
 0x3a2   :  { %19282 = vmatmul.mubr.msk.f32.gmra.mrb[42].mxu0 %vm33_vm1, %v31221_v35  ;;  %v31231_v35 = vld [vmem:[#allocation19_spill] sm:$0xff] }
 0x3a3   :  { %19284 = vmatprep.mubr.msk.f32.mxu0 %vm33_vm1, %v31222_v40  ;;  %v31232_v40 = vld [vmem:[#allocation77_spill] sm:$0xff] }
 0x3a6   :  { %19285 = vmatmul.mubr.msk.f32.gmra.mrb[44].mxu0 %vm33_vm1, %v31223_v0  ;;  %v447_v0 = vld [vmem:[#allocation2 + $0x460] sm:$0xff] }
 0x3a7   :  { %19287 = vmatprep.mubr.msk.f32.mxu0 %vm33_vm1, %v31224_v32  ;;  %v24665_v32 = vld [vmem:[#allocation2 + $0x468] sm:$0xff] }
 0x3aa   :  { %19288 = vmatmul.mubr.msk.f32.gmra.mrb[46].mxu0 %vm33_vm1, %v31225_v13  ;;  %v31233_v13 = vld [vmem:[#allocation22_spill] sm:$0xff] }
 0x3ab   :  { %19290 = vmatprep.mubr.msk.f32.mxu0 %vm33_vm1, %v31226_v24  ;;  %v31234_v24 = vld [vmem:[#allocation23_spill] sm:$0xff] }
 0x3ae   :  { %19291 = vmatmul.mubr.msk.f32.gmra.mrb[48].mxu0 %vm33_vm1, %v31227_v25  ;;  %v3944_v25 = vrot.slane %v447_v0, 7  ;;  %v31238_v0 = vld [vmem:[#allocation88_spill] sm:$0xff] }
 0x3af   :  { %19293 = vmatprep.mubr.msk.f32.mxu0 %vm33_vm1, %v31228_v60  ;;  %v3945_v60 = vrot.slane %v24665_v32, 7 }
 0x3b2   :  { %19294 = vmatmul.mubr.msk.f32.gmra.mrb[50].mxu0 %vm33_vm1, %v31229_v8  ;;  %v24672_v8 = vld [vmem:[#allocation2 + $0x470] sm:$0xff] }
 0x3b3   :  { %19296 = vmatprep.mubr.msk.f32.mxu0 %vm33_vm1, %v31230_v54  ;;  %v3946_v54 = vsel %vm547_vm2, %v3944_v25, %v3945_v60  ;;  %v31242_v25 = vld [vmem:[#allocation92_spill] sm:$0xff] }
 0x3b6   :  { %19297 = vmatmul.mubr.msk.f32.gmra.mrb[52].mxu0 %vm33_vm1, %v31231_v35 }
 0x3b7   :  { %19299 = vmatprep.mubr.msk.f32.mxu0 %vm33_vm1, %v31232_v40  ;;  %v31236_v40 = vld [vmem:[#allocation55_spill] sm:$0xff] }
 0x3ba   :  { %19300 = vmatmul.mubr.msk.f32.gmra.mrb[54].mxu0 %vm33_vm1, %v23553_v31  ;;  %v31235_v31 = vld [vmem:[#allocation54_spill] sm:$0xff] }
 0x3bb   :  { %19302 = vmatprep.mubr.msk.f32.mxu0 %vm33_vm1, %v31112_v10  ;;  %v3947_v10 = vrot.slane %v24672_v8, 7 }
 0x3bd   :  { %v3948_v35 = vsel %vm547_vm2, %v3945_v60, %v3947_v10  ;;  %v31243_v60 = vld [vmem:[#allocation93_spill] sm:$0xff]  ;;  %v31246_v10 = vld [vmem:[#allocation96_spill] sm:$0xff] }
 0x3be   :  { %19303 = vmatmul.mubr.msk.f32.gmra.mrb[56].mxu0 %vm33_vm1, %v31233_v13  ;;  %v31239_v13 = vld [vmem:[#allocation89_spill] sm:$0xff] }
 0x3bf   :  { %19305 = vmatprep.mubr.msk.f32.mxu0 %vm33_vm1, %v31234_v24  ;;  %v31241_v24 = vld [vmem:[#allocation91_spill] sm:$0xff] }
 0x3c2   :  { %19306 = vmatmul.mubr.msk.f32.gmra.mrb[58].mxu0 %vm33_vm1, %v23576_v53  ;;  %v31237_v53 = vld [vmem:[#allocation21_spill] sm:$0xff] }
 0x3c3   :  { %19308 = vmatprep.mubr.msk.f32.mxu0 %vm33_vm1, %v31235_v31  ;;  %v31244_v31 = vld [vmem:[#allocation94_spill] sm:$0xff] }
 0x3c6   :  { %19309 = vmatmul.mubr.msk.f32.gmra.mrb[60].mxu0 %vm33_vm1, %v24136_v55  ;;  %v31240_v55 = vld [vmem:[#allocation90_spill] sm:$0xff] }
 0x3c7   :  { %19311 = vmatprep.mubr.msk.f32.mxu0 %vm33_vm1, %v3946_v54  ;;  %v31247_v54 = vld [vmem:[#allocation97_spill] sm:$0xff] }
 0x3ca   :  { %19312 = vmatmul.mubr.msk.f32.gmra.mrb[62].mxu0 %vm33_vm1, %v3948_v35  ;;  %v31248_v35 = vld [vmem:[#allocation98_spill] sm:$0xff] }
 0x3cb   :  { %19316 = vmatprep.mubr.msk.f32.mxu0 %vm33_vm1, %v31236_v40  ;;  %v31249_v40 = vld [vmem:[#allocation99_spill] sm:$0xff] }
 0x3ce   :  { %19317 = vmatmul.mubr.msk.f32.vlgmr.msra.gmra.mrb[0].mxu0 %vm33_vm1, %v31237_v53  ;;  %v31250_v53 = vld [vmem:[#allocation100_spill] sm:$0xff] }
 0x3cf   :  { %19413 = vmatpush3.msk.msra.mxu0 %vm839_vm0, %v24541_v6  ;;  %19319 = vmatprep.mubr.msk.f32.mxu0 %vm33_vm1, %v31238_v0  ;;  %v31245_v6 = vld [vmem:[#allocation95_spill] sm:$0xff]  ;;  %v31251_v0 = vld [vmem:[#allocation101_spill] sm:$0xff] }
 0x3d2   :  { %19320 = vmatmul.mubr.msk.f32.gmra.mrb[2].mxu0 %vm33_vm1, %v31239_v13  ;;  %v31252_v13 = vld [vmem:[#allocation102_spill] sm:$0xff] }
 0x3d3   :  { %19322 = vmatprep.mubr.msk.f32.mxu0 %vm33_vm1, %v31240_v55  ;;  %v31253_v55 = vld [vmem:[#allocation103_spill] sm:$0xff] }
 0x3d6   :  { %19323 = vmatmul.mubr.msk.f32.gmra.mrb[4].mxu0 %vm33_vm1, %v31241_v24  ;;  %v31254_v24 = vld [vmem:[#allocation104_spill] sm:$0xff] }
 0x3d7   :  { %19325 = vmatprep.mubr.msk.f32.mxu0 %vm33_vm1, %v31242_v25  ;;  %v31255_v25 = vld [vmem:[#allocation105_spill] sm:$0xff] }
 0x3da   :  { %19326 = vmatmul.mubr.msk.f32.gmra.mrb[6].mxu0 %vm33_vm1, %v31243_v60  ;;  %v31256_v60 = vld [vmem:[#allocation106_spill] sm:$0xff] }
 0x3db   :  { %19328 = vmatprep.mubr.msk.f32.mxu0 %vm33_vm1, %v31244_v31  ;;  %v31257_v31 = vld [vmem:[#allocation107_spill] sm:$0xff] }
 0x3de   :  { %19329 = vmatmul.mubr.msk.f32.gmra.mrb[8].mxu0 %vm33_vm1, %v31245_v6  ;;  %v31258_v6 = vld [vmem:[#allocation108_spill] sm:$0xff] }
 0x3df   :  { %19331 = vmatprep.mubr.msk.f32.mxu0 %vm33_vm1, %v31246_v10  ;;  %v31259_v10 = vld [vmem:[#allocation109_spill] sm:$0xff] }
 0x3e2   :  { %19332 = vmatmul.mubr.msk.f32.gmra.mrb[10].mxu0 %vm33_vm1, %v31247_v54  ;;  %v31260_v54 = vld [vmem:[#allocation110_spill] sm:$0xff] }
 0x3e3   :  { %19334 = vmatprep.mubr.msk.f32.mxu0 %vm33_vm1, %v31248_v35  ;;  %v31261_v35 = vld [vmem:[#allocation111_spill] sm:$0xff] }
 0x3e6   :  { %19335 = vmatmul.mubr.msk.f32.gmra.mrb[12].mxu0 %vm33_vm1, %v31249_v40  ;;  %v31262_v40 = vld [vmem:[#allocation112_spill] sm:$0xff] }
 0x3e7   :  { %19337 = vmatprep.mubr.msk.f32.mxu0 %vm33_vm1, %v31250_v53  ;;  %v31263_v53 = vld [vmem:[#allocation113_spill] sm:$0xff] }
 0x3ea   :  { %19338 = vmatmul.mubr.msk.f32.gmra.mrb[14].mxu0 %vm33_vm1, %v31251_v0  ;;  %v31264_v0 = vld [vmem:[#allocation114_spill] sm:$0xff] }
 0x3eb   :  { %19340 = vmatprep.mubr.msk.f32.mxu0 %vm33_vm1, %v31252_v13  ;;  %v31265_v13 = vld [vmem:[#allocation115_spill] sm:$0xff] }
 0x3ee   :  { %19341 = vmatmul.mubr.msk.f32.gmra.mrb[16].mxu0 %vm33_vm1, %v31253_v55  ;;  %v31266_v55 = vld [vmem:[#allocation116_spill] sm:$0xff] }
 0x3ef   :  { %19343 = vmatprep.mubr.msk.f32.mxu0 %vm33_vm1, %v31254_v24  ;;  %v31269_v24 = vld [vmem:[#allocation119_spill] sm:$0xff] }
 0x3f2   :  { %19344 = vmatmul.mubr.msk.f32.gmra.mrb[18].mxu0 %vm33_vm1, %v31255_v25  ;;  %v31270_v25 = vld [vmem:[#allocation120_spill] sm:$0xff] }
 0x3f3   :  { %19346 = vmatprep.mubr.msk.f32.mxu0 %vm33_vm1, %v31256_v60  ;;  %v31272_v60 = vld [vmem:[#allocation122_spill] sm:$0xff] }
 0x3f6   :  { %19347 = vmatmul.mubr.msk.f32.gmra.mrb[20].mxu0 %vm33_vm1, %v31257_v31  ;;  %v31273_v31 = vld [vmem:[#allocation123_spill] sm:$0xff] }
 0x3f7   :  { %19349 = vmatprep.mubr.msk.f32.mxu0 %vm33_vm1, %v31258_v6  ;;  %v31274_v6 = vld [vmem:[#allocation124_spill] sm:$0xff] }
 0x3fa   :  { %19350 = vmatmul.mubr.msk.f32.gmra.mrb[22].mxu0 %vm33_vm1, %v31259_v10  ;;  %v31275_v10 = vld [vmem:[#allocation125_spill] sm:$0xff] }
 0x3fb   :  { %19352 = vmatprep.mubr.msk.f32.mxu0 %vm33_vm1, %v31260_v54  ;;  %v31276_v54 = vld [vmem:[#allocation126_spill] sm:$0xff] }
 0x3fe   :  { %19353 = vmatmul.mubr.msk.f32.gmra.mrb[24].mxu0 %vm33_vm1, %v31261_v35  ;;  %v31277_v35 = vld [vmem:[#allocation127_spill] sm:$0xff] }
 0x3ff   :  { %19355 = vmatprep.mubr.msk.f32.mxu0 %vm33_vm1, %v31262_v40  ;;  %v31278_v40 = vld [vmem:[#allocation128_spill] sm:$0xff] }
 0x402   :  { %19356 = vmatmul.mubr.msk.f32.gmra.mrb[26].mxu0 %vm33_vm1, %v31263_v53  ;;  %v31279_v53 = vld [vmem:[#allocation129_spill] sm:$0xff] }
 0x403   :  { %19358 = vmatprep.mubr.msk.f32.mxu0 %vm33_vm1, %v24038_v26  ;;  %v31267_v26 = vld [vmem:[#allocation117_spill] sm:$0xff] }
 0x406   :  { %19359 = vmatmul.mubr.msk.f32.gmra.mrb[28].mxu0 %vm33_vm1, %v24045_v58  ;;  %v31268_v58 = vld [vmem:[#allocation118_spill] sm:$0xff] }
 0x407   :  { %19361 = vmatprep.mubr.msk.f32.mxu0 %vm33_vm1, %v24595_v50 }
 0x40a   :  { %19362 = vmatmul.mubr.msk.f32.gmra.mrb[30].mxu0 %vm33_vm1, %v24602_v21 }
 0x40b   :  { %19364 = vmatprep.mubr.msk.f32.mxu0 %vm33_vm1, %v24269_v17  ;;  %v31271_v17 = vld [vmem:[#allocation121_spill] sm:$0xff] }
 0x40e   :  { %19365 = vmatmul.mubr.msk.f32.gmra.mrb[32].mxu0 %vm33_vm1, %v31264_v0  ;;  %v31280_v0 = vld [vmem:[#allocation130_spill] sm:$0xff] }
 0x40f   :  { %19367 = vmatprep.mubr.msk.f32.mxu0 %vm33_vm1, %v31265_v13  ;;  %v31281_v13 = vld [vmem:[#allocation131_spill] sm:$0xff] }
 0x412   :  { %19368 = vmatmul.mubr.msk.f32.gmra.mrb[34].mxu0 %vm33_vm1, %v31266_v55  ;;  %v31282_v55 = vld [vmem:[#allocation132_spill] sm:$0xff] }
 0x413   :  { %19370 = vmatprep.mubr.msk.f32.mxu0 %vm33_vm1, %v31267_v26  ;;  %v31283_v26 = vld [vmem:[#allocation133_spill] sm:$0xff] }
 0x416   :  { %19371 = vmatmul.mubr.msk.f32.gmra.mrb[36].mxu0 %vm33_vm1, %v31268_v58  ;;  %v31284_v58 = vld [vmem:[#allocation134_spill] sm:$0xff] }
 0x417   :  { %19373 = vmatprep.mubr.msk.f32.mxu0 %vm33_vm1, %v31269_v24  ;;  %v31285_v24 = vld [vmem:[#allocation135_spill] sm:$0xff] }
 0x41a   :  { %19374 = vmatmul.mubr.msk.f32.gmra.mrb[38].mxu0 %vm33_vm1, %v31270_v25 }
 0x41b   :  { %19376 = vmatprep.mubr.msk.f32.mxu0 %vm33_vm1, %v31271_v17 }
 0x41e   :  { %19377 = vmatmul.mubr.msk.f32.gmra.mrb[40].mxu0 %vm33_vm1, %v31272_v60 }
 0x41f   :  { %19379 = vmatprep.mubr.msk.f32.mxu0 %vm33_vm1, %v31273_v31 }
 0x422   :  { %19380 = vmatmul.mubr.msk.f32.gmra.mrb[42].mxu0 %vm33_vm1, %v31274_v6 }
 0x423   :  { %19382 = vmatprep.mubr.msk.f32.mxu0 %vm33_vm1, %v31275_v10 }
 0x426   :  { %19383 = vmatmul.mubr.msk.f32.gmra.mrb[44].mxu0 %vm33_vm1, %v31276_v54 }
 0x427   :  { %19385 = vmatprep.mubr.msk.f32.mxu0 %vm33_vm1, %v31277_v35 }
 0x42a   :  { %19386 = vmatmul.mubr.msk.f32.gmra.mrb[46].mxu0 %vm33_vm1, %v31278_v40 }
 0x42b   :  { %19388 = vmatprep.mubr.msk.f32.mxu0 %vm33_vm1, %v31279_v53 }
 0x42e   :  { %19389 = vmatmul.mubr.msk.f32.gmra.mrb[48].mxu0 %vm33_vm1, %v31280_v0 }
 0x42f   :  { %19391 = vmatprep.mubr.msk.f32.mxu0 %vm33_vm1, %v31281_v13 }
 0x432   :  { %19392 = vmatmul.mubr.msk.f32.gmra.mrb[50].mxu0 %vm33_vm1, %v31282_v55 }
 0x433   :  { %19394 = vmatprep.mubr.msk.f32.mxu0 %vm33_vm1, %v31283_v26 }
 0x436   :  { %19395 = vmatmul.mubr.msk.f32.gmra.mrb[52].mxu0 %vm33_vm1, %v31284_v58 }
 0x437   :  { %19397 = vmatprep.mubr.msk.f32.mxu0 %vm33_vm1, %v24357_v46 }
 0x43a   :  { %19398 = vmatmul.mubr.msk.f32.gmra.mrb[54].mxu0 %vm33_vm1, %v24361_v56  ;;  %v25238_v56 = vld [vmem:[%s30350_s2] ss:$0 sm:$0xff] }
 0x43b   :  { %19400 = vmatprep.mubr.msk.f32.mxu0 %vm33_vm1, %v24365_v43 }
 0x43e   :  { %19401 = vmatmul.mubr.msk.f32.gmra.mrb[56].mxu0 %vm33_vm1, %v31285_v24 }
 0x43f   :  { %19403 = vmatprep.mubr.msk.f32.mxu0 %vm33_vm1, %v23956_v30 }
 0x442   :  { %19404 = vmatmul.mubr.msk.f32.gmra.mrb[58].mxu0 %vm33_vm1, %v24375_v22 }
 0x443   :  { %19406 = vmatprep.mubr.msk.f32.mxu0 %vm33_vm1, %v24114_v7 }
 0x446   :  { %19407 = vmatmul.mubr.msk.f32.gmra.mrb[60].mxu0 %vm33_vm1, %v24121_v5 }
 0x447   :  { %19409 = vmatprep.mubr.msk.f32.mxu0 %vm33_vm1, %v24665_v32 }
 0x44a   :  { %19410 = vmatmul.mubr.msk.f32.gmra.mrb[62].mxu0 %vm33_vm1, %v24672_v8 }
 0x44b   :  { %19414 = vmatprep.mubr.msk.f32.mxu0 %vm33_vm1, %v23606_v33  ;;  %v31286_v33 = vld [vmem:[#allocation7_spill] sm:$0xff] }
 0x44e   :  { %19415 = vmatmul.mubr.msk.f32.vlgmr.msra.gmra.mrb[0].mxu0 %vm33_vm1, %v23617_v52  ;;  %v31287_v52 = vld [vmem:[#allocation78_spill] sm:$0xff] }
 0x44f   :  { %19417 = vmatprep.mubr.msk.f32.mxu0 %vm33_vm1, %v23620_v29  ;;  %v31288_v29 = vld [vmem:[#allocation79_spill] sm:$0xff] }
 0x452   :  { %19418 = vmatmul.mubr.msk.f32.gmra.mrb[2].mxu0 %vm33_vm1, %v23629_v2  ;;  %v4875_v2 = vrot.slane %v24595_v50, 1 }
 0x453   :  { %19420 = vmatprep.mubr.msk.f32.mxu0 %vm33_vm1, %v23632_v11  ;;  %v4876_v11 = vrot.slane %v24602_v21, 1 }
 0x456   :  { %19421 = vmatmul.mubr.msk.f32.gmra.mrb[4].mxu0 %vm33_vm1, %v23641_v47  ;;  %v378_v47 = vld [vmem:[#allocation2 + $0x238] sm:$0xff] }
 0x457   :  { %19423 = vmatprep.mubr.msk.f32.mxu0 %vm33_vm1, %v23644_v18  ;;  %v4878_v18 = vrot.slane %v378_v47, 1 }
 0x45a   :  { %19424 = vmatmul.mubr.msk.f32.gmra.mrb[6].mxu0 %vm33_vm1, %v23653_v61  ;;  %v4877_v61 = vsel %vm1776_vm3, %v4875_v2, %v4876_v11 }
 0x45b   :  { %19426 = vmatprep.mubr.msk.f32.mxu0 %vm33_vm1, %v23656_v34  ;;  %v4879_v34 = vsel %vm1776_vm3, %v4876_v11, %v4878_v18 }
 0x45e   :  { %19427 = vmatmul.mubr.msk.f32.gmra.mrb[8].mxu0 %vm33_vm1, %v23665_v1  ;;  %v31289_v1 = vld [vmem:[#allocation8_spill] sm:$0xff] }
 0x45f   :  { %19429 = vmatprep.mubr.msk.f32.mxu0 %vm33_vm1, %v23668_v16  ;;  %v31290_v16 = vld [vmem:[#allocation9_spill] sm:$0xff] }
 0x462   :  { %19430 = vmatmul.mubr.msk.f32.gmra.mrb[10].mxu0 %vm33_vm1, %v23677_v9  ;;  %v31291_v9 = vld [vmem:[#allocation10_spill] sm:$0xff] }
 0x463   :  { %19432 = vmatprep.mubr.msk.f32.mxu0 %vm33_vm1, %v23680_v14  ;;  %v31292_v14 = vmov 0.0  }
 0x464   :  { %5953 = vst.msk [vmem:[#allocation3 + $0x30] sm:$0xff] %vm5418_vm4, %v31292_v14  ;;  %5947 = vst.msk [vmem:[#allocation3] sm:$0xff] %vm5418_vm4, %v31292_v14 }
 0x465   :  { %5948 = vst.msk [vmem:[#allocation3 + $0x8] sm:$0xff] %vm5418_vm4, %v31292_v14  ;;  %5949 = vst.msk [vmem:[#allocation3 + $0x10] sm:$0xff] %vm5418_vm4, %v31292_v14 }
 0x466   :  { %19433 = vmatmul.mubr.msk.f32.gmra.mrb[12].mxu0 %vm33_vm1, %v23689_v20  ;;  %5950 = vst.msk [vmem:[#allocation3 + $0x18] sm:$0xff] %vm5418_vm4, %v31292_v14  ;;  %5951 = vst.msk [vmem:[#allocation3 + $0x20] sm:$0xff] %vm5418_vm4, %v31292_v14  ;;  %v31293_v20 = vld [vmem:[#allocation11_spill] sm:$0xff] }
 0x467   :  { %19435 = vmatprep.mubr.msk.f32.mxu0 %vm33_vm1, %v23692_v41  ;;  %5952 = vst.msk [vmem:[#allocation3 + $0x28] sm:$0xff] %vm5418_vm4, %v31292_v14  ;;  %5954 = vst.msk [vmem:[#allocation3 + $0x38] sm:$0xff] %vm5418_vm4, %v31292_v14  ;;  %v31294_v41 = vld [vmem:[#allocation12_spill] sm:$0xff] }
 0x468   :  { %5955 = vst.msk [vmem:[#allocation3 + $0x40] sm:$0xff] %vm5418_vm4, %v31292_v14  ;;  %5956 = vst.msk [vmem:[#allocation3 + $0x48] sm:$0xff] %vm5418_vm4, %v31292_v14 }
 0x469   :  { %5957 = vst.msk [vmem:[#allocation3 + $0x50] sm:$0xff] %vm5418_vm4, %v31292_v14  ;;  %5958 = vst.msk [vmem:[#allocation3 + $0x58] sm:$0xff] %vm5418_vm4, %v31292_v14 }
 0x46a   :  { %19436 = vmatmul.mubr.msk.f32.gmra.mrb[14].mxu0 %vm33_vm1, %v23701_v23  ;;  %5959 = vst.msk [vmem:[#allocation3 + $0x60] sm:$0xff] %vm5418_vm4, %v31292_v14  ;;  %5960 = vst.msk [vmem:[#allocation3 + $0x68] sm:$0xff] %vm5418_vm4, %v31292_v14  ;;  %v31295_v23 = vld [vmem:[#allocation13_spill] sm:$0xff] }
 0x46b   :  { %19438 = vmatprep.mubr.msk.f32.mxu0 %vm33_vm1, %v23704_v44  ;;  %5961 = vst.msk [vmem:[#allocation3 + $0x70] sm:$0xff] %vm5418_vm4, %v31292_v14  ;;  %5962 = vst.msk [vmem:[#allocation3 + $0x78] sm:$0xff] %vm5418_vm4, %v31292_v14  ;;  %v31296_v44 = vld [vmem:[#allocation14_spill] sm:$0xff] }
 0x46c   :  { %5963 = vst.msk [vmem:[#allocation3 + $0x80] sm:$0xff] %vm5418_vm4, %v31292_v14  ;;  %5964 = vst.msk [vmem:[#allocation3 + $0x88] sm:$0xff] %vm5418_vm4, %v31292_v14 }
 0x46d   :  { %5965 = vst.msk [vmem:[#allocation3 + $0x90] sm:$0xff] %vm5418_vm4, %v31292_v14  ;;  %5966 = vst.msk [vmem:[#allocation3 + $0x98] sm:$0xff] %vm5418_vm4, %v31292_v14 }
 0x46e   :  { %19439 = vmatmul.mubr.msk.f32.gmra.mrb[16].mxu0 %vm33_vm1, %v23713_v28  ;;  %5967 = vst.msk [vmem:[#allocation3 + $0xa0] sm:$0xff] %vm5418_vm4, %v31292_v14  ;;  %5968 = vst.msk [vmem:[#allocation3 + $0xa8] sm:$0xff] %vm5418_vm4, %v31292_v14  ;;  %v31297_v28 = vld [vmem:[#allocation15_spill] sm:$0xff] }
 0x46f   :  { %19441 = vmatprep.mubr.msk.f32.mxu0 %vm33_vm1, %v23716_v51  ;;  %5969 = vst.msk [vmem:[#allocation3 + $0xb0] sm:$0xff] %vm5418_vm4, %v31292_v14  ;;  %5970 = vst.msk [vmem:[#allocation3 + $0xb8] sm:$0xff] %vm5418_vm4, %v31292_v14  ;;  %v31298_v51 = vld [vmem:[#allocation16_spill] sm:$0xff] }
 0x470   :  { %5971 = vst.msk [vmem:[#allocation3 + $0xc0] sm:$0xff] %vm5418_vm4, %v31292_v14  ;;  %5972 = vst.msk [vmem:[#allocation3 + $0xc8] sm:$0xff] %vm5418_vm4, %v31292_v14 }
 0x471   :  { %5973 = vst.msk [vmem:[#allocation3 + $0xd0] sm:$0xff] %vm5418_vm4, %v31292_v14  ;;  %5974 = vst.msk [vmem:[#allocation3 + $0xd8] sm:$0xff] %vm5418_vm4, %v31292_v14 }
 0x472   :  { %19442 = vmatmul.mubr.msk.f32.gmra.mrb[18].mxu0 %vm33_vm1, %v23725_v36  ;;  %5975 = vst.msk [vmem:[#allocation3 + $0xe0] sm:$0xff] %vm5418_vm4, %v31292_v14  ;;  %5976 = vst.msk [vmem:[#allocation3 + $0xe8] sm:$0xff] %vm5418_vm4, %v31292_v14  ;;  %v31299_v36 = vld [vmem:[#allocation17_spill] sm:$0xff] }
 0x473   :  { %19444 = vmatprep.mubr.msk.f32.mxu0 %vm33_vm1, %v23728_v63  ;;  %5977 = vst.msk [vmem:[#allocation3 + $0xf0] sm:$0xff] %vm5418_vm4, %v31292_v14  ;;  %5978 = vst.msk [vmem:[#allocation3 + $0xf8] sm:$0xff] %vm5418_vm4, %v31292_v14  ;;  %v31300_v63 = vld [vmem:[#allocation18_spill] sm:$0xff] }
 0x474   :  { %5979 = vst.msk [vmem:[#allocation3 + $0x100] sm:$0xff] %vm5418_vm4, %v31292_v14  ;;  %5980 = vst.msk [vmem:[#allocation3 + $0x108] sm:$0xff] %vm5418_vm4, %v31292_v14 }
 0x475   :  { %5981 = vst.msk [vmem:[#allocation3 + $0x110] sm:$0xff] %vm5418_vm4, %v31292_v14  ;;  %5982 = vst.msk [vmem:[#allocation3 + $0x118] sm:$0xff] %vm5418_vm4, %v31292_v14 }
 0x476   :  { %19445 = vmatmul.mubr.msk.f32.gmra.mrb[20].mxu0 %vm33_vm1, %v31286_v33  ;;  %5983 = vst.msk [vmem:[#allocation3 + $0x120] sm:$0xff] %vm5418_vm4, %v31292_v14  ;;  %5984 = vst.msk [vmem:[#allocation3 + $0x128] sm:$0xff] %vm5418_vm4, %v31292_v14 }
 0x477   :  { %19447 = vmatprep.mubr.msk.f32.mxu0 %vm33_vm1, %v31287_v52  ;;  %5985 = vst.msk [vmem:[#allocation3 + $0x130] sm:$0xff] %vm5418_vm4, %v31292_v14  ;;  %5986 = vst.msk [vmem:[#allocation3 + $0x138] sm:$0xff] %vm5418_vm4, %v31292_v14 }
 0x478   :  { %5987 = vst.msk [vmem:[#allocation3 + $0x140] sm:$0xff] %vm5418_vm4, %v31292_v14  ;;  %5988 = vst.msk [vmem:[#allocation3 + $0x148] sm:$0xff] %vm5418_vm4, %v31292_v14 }
 0x479   :  { %5989 = vst.msk [vmem:[#allocation3 + $0x150] sm:$0xff] %vm5418_vm4, %v31292_v14  ;;  %5990 = vst.msk [vmem:[#allocation3 + $0x158] sm:$0xff] %vm5418_vm4, %v31292_v14 }
 0x47a   :  { %19448 = vmatmul.mubr.msk.f32.gmra.mrb[22].mxu0 %vm33_vm1, %v23756_v42  ;;  %5991 = vst.msk [vmem:[#allocation3 + $0x160] sm:$0xff] %vm5418_vm4, %v31292_v14  ;;  %5992 = vst.msk [vmem:[#allocation3 + $0x168] sm:$0xff] %vm5418_vm4, %v31292_v14  ;;  %v31302_v42 = vld [vmem:[#allocation82_spill] sm:$0xff] }
 0x47b   :  { %19450 = vmatprep.mubr.msk.f32.mxu0 %vm33_vm1, %v31288_v29  ;;  %5993 = vst.msk [vmem:[#allocation3 + $0x170] sm:$0xff] %vm5418_vm4, %v31292_v14  ;;  %5994 = vst.msk [vmem:[#allocation3 + $0x178] sm:$0xff] %vm5418_vm4, %v31292_v14 }
 0x47c   :  { %5995 = vst.msk [vmem:[#allocation3 + $0x180] sm:$0xff] %vm5418_vm4, %v31292_v14  ;;  %5996 = vst.msk [vmem:[#allocation3 + $0x188] sm:$0xff] %vm5418_vm4, %v31292_v14 }
 0x47d   :  { %5997 = vst.msk [vmem:[#allocation3 + $0x190] sm:$0xff] %vm5418_vm4, %v31292_v14  ;;  %5998 = vst.msk [vmem:[#allocation3 + $0x198] sm:$0xff] %vm5418_vm4, %v31292_v14 }
 0x47e   :  { %19451 = vmatmul.mubr.msk.f32.gmra.mrb[24].mxu0 %vm33_vm1, %v23769_v37  ;;  %5999 = vst.msk [vmem:[#allocation3 + $0x1a0] sm:$0xff] %vm5418_vm4, %v31292_v14  ;;  %6000 = vst.msk [vmem:[#allocation3 + $0x1a8] sm:$0xff] %vm5418_vm4, %v31292_v14  ;;  %v31304_v37 = vld [vmem:[#allocation84_spill] sm:$0xff] }
 0x47f   :  { %19453 = vmatprep.mubr.msk.f32.mxu0 %vm33_vm1, %v23772_v19  ;;  %6001 = vst.msk [vmem:[#allocation3 + $0x1b0] sm:$0xff] %vm5418_vm4, %v31292_v14  ;;  %6002 = vst.msk [vmem:[#allocation3 + $0x1b8] sm:$0xff] %vm5418_vm4, %v31292_v14  ;;  %v31305_v19 = vld [vmem:[#allocation85_spill] sm:$0xff] }
 0x480   :  { %6003 = vst.msk [vmem:[#allocation3 + $0x1c0] sm:$0xff] %vm5418_vm4, %v31292_v14  ;;  %6004 = vst.msk [vmem:[#allocation3 + $0x1c8] sm:$0xff] %vm5418_vm4, %v31292_v14 }
 0x481   :  { %6005 = vst.msk [vmem:[#allocation3 + $0x1d0] sm:$0xff] %vm5418_vm4, %v31292_v14  ;;  %6006 = vst.msk [vmem:[#allocation3 + $0x1d8] sm:$0xff] %vm5418_vm4, %v31292_v14 }
 0x482   :  { %19454 = vmatmul.mubr.msk.f32.gmra.mrb[26].mxu0 %vm33_vm1, %v23779_v49  ;;  %6007 = vst.msk [vmem:[#allocation3 + $0x1e0] sm:$0xff] %vm5418_vm4, %v31292_v14  ;;  %6008 = vst.msk [vmem:[#allocation3 + $0x1e8] sm:$0xff] %vm5418_vm4, %v31292_v14  ;;  %v31306_v49 = vld [vmem:[#allocation86_spill] sm:$0xff] }
 0x483   :  { %19456 = vmatprep.mubr.msk.f32.mxu0 %vm33_vm1, %v24453_v3  ;;  %6009 = vst.msk [vmem:[#allocation3 + $0x1f0] sm:$0xff] %vm5418_vm4, %v31292_v14  ;;  %6010 = vst.msk [vmem:[#allocation3 + $0x1f8] sm:$0xff] %vm5418_vm4, %v31292_v14  ;;  %v31301_v3 = vld [vmem:[#allocation20_spill] sm:$0xff] }
 0x484   :  { %6011 = vst.msk [vmem:[#allocation3 + $0x200] sm:$0xff] %vm5418_vm4, %v31292_v14  ;;  %6012 = vst.msk [vmem:[#allocation3 + $0x208] sm:$0xff] %vm5418_vm4, %v31292_v14 }
 0x485   :  { %6013 = vst.msk [vmem:[#allocation3 + $0x210] sm:$0xff] %vm5418_vm4, %v31292_v14  ;;  %6014 = vst.msk [vmem:[#allocation3 + $0x218] sm:$0xff] %vm5418_vm4, %v31292_v14 }
 0x486   :  { %19457 = vmatmul.mubr.msk.f32.gmra.mrb[28].mxu0 %vm33_vm1, %v24460_v12  ;;  %6015 = vst.msk [vmem:[#allocation3 + $0x220] sm:$0xff] %vm5418_vm4, %v31292_v14  ;;  %6016 = vst.msk [vmem:[#allocation3 + $0x228] sm:$0xff] %vm5418_vm4, %v31292_v14  ;;  %v31303_v12 = vld [vmem:[#allocation83_spill] sm:$0xff] }
 0x487   :  { %19459 = vmatprep.mubr.msk.f32.mxu0 %vm33_vm1, %v4877_v61  ;;  %6017 = vst.msk [vmem:[#allocation3 + $0x230] sm:$0xff] %vm5418_vm4, %v31292_v14  ;;  %6018 = vst.msk [vmem:[#allocation3 + $0x238] sm:$0xff] %vm5418_vm4, %v31292_v14 }
 0x488   :  { %6019 = vst.msk [vmem:[#allocation3 + $0x240] sm:$0xff] %vm5418_vm4, %v31292_v14  ;;  %6020 = vst.msk [vmem:[#allocation3 + $0x248] sm:$0xff] %vm5418_vm4, %v31292_v14 }
 0x489   :  { %6021 = vst.msk [vmem:[#allocation3 + $0x250] sm:$0xff] %vm5418_vm4, %v31292_v14  ;;  %6022 = vst.msk [vmem:[#allocation3 + $0x258] sm:$0xff] %vm5418_vm4, %v31292_v14 }
 0x48a   :  { %19460 = vmatmul.mubr.msk.f32.gmra.mrb[30].mxu0 %vm33_vm1, %v4879_v34  ;;  %6023 = vst.msk [vmem:[#allocation3 + $0x260] sm:$0xff] %vm5418_vm4, %v31292_v14  ;;  %6024 = vst.msk [vmem:[#allocation3 + $0x268] sm:$0xff] %vm5418_vm4, %v31292_v14 }
 0x48b   :  { %19462 = vmatprep.mubr.msk.f32.mxu0 %vm33_vm1, %v23802_v45  ;;  %6025 = vst.msk [vmem:[#allocation3 + $0x270] sm:$0xff] %vm5418_vm4, %v31292_v14  ;;  %6026 = vst.msk [vmem:[#allocation3 + $0x278] sm:$0xff] %vm5418_vm4, %v31292_v14  ;;  %v4880_v45 = vrot.slane %v24665_v32, 1 }
 0x48c   :  { %6027 = vst.msk [vmem:[#allocation3 + $0x280] sm:$0xff] %vm5418_vm4, %v31292_v14  ;;  %6028 = vst.msk [vmem:[#allocation3 + $0x288] sm:$0xff] %vm5418_vm4, %v31292_v14 }
 0x48d   :  { %6029 = vst.msk [vmem:[#allocation3 + $0x290] sm:$0xff] %vm5418_vm4, %v31292_v14  ;;  %6030 = vst.msk [vmem:[#allocation3 + $0x298] sm:$0xff] %vm5418_vm4, %v31292_v14 }
 0x48e   :  { %19463 = vmatmul.mubr.msk.f32.gmra.mrb[32].mxu0 %vm33_vm1, %v23811_v57  ;;  %6031 = vst.msk [vmem:[#allocation3 + $0x2a0] sm:$0xff] %vm5418_vm4, %v31292_v14  ;;  %6032 = vst.msk [vmem:[#allocation3 + $0x2a8] sm:$0xff] %vm5418_vm4, %v31292_v14  ;;  %v4881_v57 = vrot.slane %v24672_v8, 1 }
 0x48f   :  { %19465 = vmatprep.mubr.msk.f32.mxu0 %vm33_vm1, %v23814_v39  ;;  %6033 = vst.msk [vmem:[#allocation3 + $0x2b0] sm:$0xff] %vm5418_vm4, %v31292_v14  ;;  %6034 = vst.msk [vmem:[#allocation3 + $0x2b8] sm:$0xff] %vm5418_vm4, %v31292_v14  ;;  %v450_v39 = vld [vmem:[#allocation2 + $0x478] sm:$0xff] }
 0x490   :  { %6035 = vst.msk [vmem:[#allocation3 + $0x2c0] sm:$0xff] %vm5418_vm4, %v31292_v14  ;;  %6036 = vst.msk [vmem:[#allocation3 + $0x2c8] sm:$0xff] %vm5418_vm4, %v31292_v14 }
 0x491   :  { %6037 = vst.msk [vmem:[#allocation3 + $0x2d0] sm:$0xff] %vm5418_vm4, %v31292_v14  ;;  %6038 = vst.msk [vmem:[#allocation3 + $0x2d8] sm:$0xff] %vm5418_vm4, %v31292_v14 }
 0x492   :  { %19466 = vmatmul.mubr.msk.f32.gmra.mrb[34].mxu0 %vm33_vm1, %v23823_v59  ;;  %6039 = vst.msk [vmem:[#allocation3 + $0x2e0] sm:$0xff] %vm5418_vm4, %v31292_v14  ;;  %6040 = vst.msk [vmem:[#allocation3 + $0x2e8] sm:$0xff] %vm5418_vm4, %v31292_v14  ;;  %v31307_v59 = vld [vmem:[#allocation87_spill] sm:$0xff] }
 0x493   :  { %19468 = vmatprep.mubr.msk.f32.mxu0 %vm33_vm1, %v23826_v15  ;;  %6041 = vst.msk [vmem:[#allocation3 + $0x2f0] sm:$0xff] %vm5418_vm4, %v31292_v14  ;;  %6042 = vst.msk [vmem:[#allocation3 + $0x2f8] sm:$0xff] %vm5418_vm4, %v31292_v14  ;;  %v31308_v15 = vld [vmem:[#allocation80_spill] sm:$0xff] }
 0x494   :  { %6043 = vst.msk [vmem:[#allocation3 + $0x300] sm:$0xff] %vm5418_vm4, %v31292_v14  ;;  %6044 = vst.msk [vmem:[#allocation3 + $0x308] sm:$0xff] %vm5418_vm4, %v31292_v14 }
 0x495   :  { %6045 = vst.msk [vmem:[#allocation3 + $0x310] sm:$0xff] %vm5418_vm4, %v31292_v14  ;;  %6046 = vst.msk [vmem:[#allocation3 + $0x318] sm:$0xff] %vm5418_vm4, %v31292_v14 }
 0x496   :  { %19469 = vmatmul.mubr.msk.f32.gmra.mrb[36].mxu0 %vm33_vm1, %v23835_v62  ;;  %6047 = vst.msk [vmem:[#allocation3 + $0x320] sm:$0xff] %vm5418_vm4, %v31292_v14  ;;  %6048 = vst.msk [vmem:[#allocation3 + $0x328] sm:$0xff] %vm5418_vm4, %v31292_v14  ;;  %v4883_v62 = vrot.slane %v450_v39, 1 }
 0x497   :  { %19471 = vmatprep.mubr.msk.f32.mxu0 %vm33_vm1, %v23838_v48  ;;  %6049 = vst.msk [vmem:[#allocation3 + $0x330] sm:$0xff] %vm5418_vm4, %v31292_v14  ;;  %6050 = vst.msk [vmem:[#allocation3 + $0x338] sm:$0xff] %vm5418_vm4, %v31292_v14  ;;  %v4882_v48 = vsel %vm1776_vm3, %v4880_v45, %v4881_v57 }
 0x498   :  { %6051 = vst.msk [vmem:[#allocation3 + $0x340] sm:$0xff] %vm5418_vm4, %v31292_v14  ;;  %6052 = vst.msk [vmem:[#allocation3 + $0x348] sm:$0xff] %vm5418_vm4, %v31292_v14  ;;  %v4884_v21 = vsel %vm1776_vm3, %v4881_v57, %v4883_v62 }
 0x499   :  { %6053 = vst.msk [vmem:[#allocation3 + $0x350] sm:$0xff] %vm5418_vm4, %v31292_v14  ;;  %6054 = vst.msk [vmem:[#allocation3 + $0x358] sm:$0xff] %vm5418_vm4, %v31292_v14 }
 0x49a   :  { %19472 = vmatmul.mubr.msk.f32.gmra.mrb[38].mxu0 %vm33_vm1, %v23847_v4  ;;  %6055 = vst.msk [vmem:[#allocation3 + $0x360] sm:$0xff] %vm5418_vm4, %v31292_v14  ;;  %6056 = vst.msk [vmem:[#allocation3 + $0x368] sm:$0xff] %vm5418_vm4, %v31292_v14  ;;  %v31309_v4 = vld [vmem:[#allocation81_spill] sm:$0xff] }
 0x49b   :  { %19474 = vmatprep.mubr.msk.f32.mxu0 %vm33_vm1, %v31289_v1  ;;  %6057 = vst.msk [vmem:[#allocation3 + $0x370] sm:$0xff] %vm5418_vm4, %v31292_v14  ;;  %6058 = vst.msk [vmem:[#allocation3 + $0x378] sm:$0xff] %vm5418_vm4, %v31292_v14 }
 0x49c   :  { %6059 = vst.msk [vmem:[#allocation3 + $0x380] sm:$0xff] %vm5418_vm4, %v31292_v14  ;;  %6060 = vst.msk [vmem:[#allocation3 + $0x388] sm:$0xff] %vm5418_vm4, %v31292_v14 }
 0x49d   :  { %6061 = vst.msk [vmem:[#allocation3 + $0x390] sm:$0xff] %vm5418_vm4, %v31292_v14  ;;  %6062 = vst.msk [vmem:[#allocation3 + $0x398] sm:$0xff] %vm5418_vm4, %v31292_v14 }
 0x49e   :  { %19475 = vmatmul.mubr.msk.f32.gmra.mrb[40].mxu0 %vm33_vm1, %v31166_v38  ;;  %6063 = vst.msk [vmem:[#allocation3 + $0x3a0] sm:$0xff] %vm5418_vm4, %v31292_v14  ;;  %6064 = vst.msk [vmem:[#allocation3 + $0x3a8] sm:$0xff] %vm5418_vm4, %v31292_v14 }
 0x49f   :  { %19477 = vmatprep.mubr.msk.f32.mxu0 %vm33_vm1, %v31167_v27  ;;  %6065 = vst.msk [vmem:[#allocation3 + $0x3b0] sm:$0xff] %vm5418_vm4, %v31292_v14  ;;  %6066 = vst.msk [vmem:[#allocation3 + $0x3b8] sm:$0xff] %vm5418_vm4, %v31292_v14 }
 0x4a0   :  { %6067 = vst.msk [vmem:[#allocation3 + $0x3c0] sm:$0xff] %vm5418_vm4, %v31292_v14  ;;  %6068 = vst.msk [vmem:[#allocation3 + $0x3c8] sm:$0xff] %vm5418_vm4, %v31292_v14 }
 0x4a1   :  { %6069 = vst.msk [vmem:[#allocation3 + $0x3d0] sm:$0xff] %vm5418_vm4, %v31292_v14  ;;  %6070 = vst.msk [vmem:[#allocation3 + $0x3d8] sm:$0xff] %vm5418_vm4, %v31292_v14 }
 0x4a2   :  { %19478 = vmatmul.mubr.msk.f32.gmra.mrb[42].mxu0 %vm33_vm1, %v31290_v16  ;;  %6071 = vst.msk [vmem:[#allocation3 + $0x3e0] sm:$0xff] %vm5418_vm4, %v31292_v14  ;;  %6072 = vst.msk [vmem:[#allocation3 + $0x3e8] sm:$0xff] %vm5418_vm4, %v31292_v14 }
 0x4a3   :  { %19480 = vmatprep.mubr.msk.f32.mxu0 %vm33_vm1, %v31291_v9  ;;  %6073 = vst.msk [vmem:[#allocation3 + $0x3f0] sm:$0xff] %vm5418_vm4, %v31292_v14  ;;  %6074 = vst.msk [vmem:[#allocation3 + $0x3f8] sm:$0xff] %vm5418_vm4, %v31292_v14 }
 0x4a4   :  { %6075 = vst.msk [vmem:[#allocation3 + $0x400] sm:$0xff] %vm5418_vm4, %v31292_v14  ;;  %6076 = vst.msk [vmem:[#allocation3 + $0x408] sm:$0xff] %vm5418_vm4, %v31292_v14 }
 0x4a5   :  { %6077 = vst.msk [vmem:[#allocation3 + $0x410] sm:$0xff] %vm5418_vm4, %v31292_v14  ;;  %6078 = vst.msk [vmem:[#allocation3 + $0x418] sm:$0xff] %vm5418_vm4, %v31292_v14 }
 0x4a6   :  { %6079 = vst.msk [vmem:[#allocation3 + $0x420] sm:$0xff] %vm5418_vm4, %v31292_v14  ;;  %6080 = vst.msk [vmem:[#allocation3 + $0x428] sm:$0xff] %vm5418_vm4, %v31292_v14  ;;  %19481 = vmatmul.mubr.msk.f32.gmra.mrb[44].mxu0 %vm33_vm1, %v31293_v20 }
 0x4a7   :  { %6081 = vst.msk [vmem:[#allocation3 + $0x430] sm:$0xff] %vm5418_vm4, %v31292_v14  ;;  %6082 = vst.msk [vmem:[#allocation3 + $0x438] sm:$0xff] %vm5418_vm4, %v31292_v14  ;;  %19483 = vmatprep.mubr.msk.f32.mxu0 %vm33_vm1, %v31294_v41 }
 0x4a8   :  { %6083 = vst.msk [vmem:[#allocation3 + $0x440] sm:$0xff] %vm5418_vm4, %v31292_v14  ;;  %6084 = vst.msk [vmem:[#allocation3 + $0x448] sm:$0xff] %vm5418_vm4, %v31292_v14 }
 0x4a9   :  { %6085 = vst.msk [vmem:[#allocation3 + $0x450] sm:$0xff] %vm5418_vm4, %v31292_v14  ;;  %6086 = vst.msk [vmem:[#allocation3 + $0x458] sm:$0xff] %vm5418_vm4, %v31292_v14 }
 0x4aa   :  { %6087 = vst.msk [vmem:[#allocation3 + $0x460] sm:$0xff] %vm5418_vm4, %v31292_v14  ;;  %6088 = vst.msk [vmem:[#allocation3 + $0x468] sm:$0xff] %vm5418_vm4, %v31292_v14  ;;  %19484 = vmatmul.mubr.msk.f32.gmra.mrb[46].mxu0 %vm33_vm1, %v31295_v23 }
 0x4ab   :  { %6089 = vst.msk [vmem:[#allocation3 + $0x470] sm:$0xff] %vm5418_vm4, %v31292_v14  ;;  %6090 = vst.msk [vmem:[#allocation3 + $0x478] sm:$0xff] %vm5418_vm4, %v31292_v14  ;;  %19486 = vmatprep.mubr.msk.f32.mxu0 %vm33_vm1, %v31296_v44 }
 0x4ae   :  { %19487 = vmatmul.mubr.msk.f32.gmra.mrb[48].mxu0 %vm33_vm1, %v31297_v28 }
 0x4af   :  { %19489 = vmatprep.mubr.msk.f32.mxu0 %vm33_vm1, %v31298_v51 }
 0x4b2   :  { %19490 = vmatmul.mubr.msk.f32.gmra.mrb[50].mxu0 %vm33_vm1, %v31299_v36 }
 0x4b3   :  { %19492 = vmatprep.mubr.msk.f32.mxu0 %vm33_vm1, %v31300_v63 }
 0x4b6   :  { %19493 = vmatmul.mubr.msk.f32.gmra.mrb[52].mxu0 %vm33_vm1, %v31301_v3 }
 0x4b7   :  { %19495 = vmatprep.mubr.msk.f32.mxu0 %vm33_vm1, %v31302_v42 }
 0x4ba   :  { %19496 = vmatmul.mubr.msk.f32.gmra.mrb[54].mxu0 %vm33_vm1, %v31303_v12 }
 0x4bb   :  { %19498 = vmatprep.mubr.msk.f32.mxu0 %vm33_vm1, %v31304_v37 }
 0x4be   :  { %19499 = vmatmul.mubr.msk.f32.gmra.mrb[56].mxu0 %vm33_vm1, %v31305_v19 }
 0x4bf   :  { %19501 = vmatprep.mubr.msk.f32.mxu0 %vm33_vm1, %v31306_v49 }
 0x4c2   :  { %19502 = vmatmul.mubr.msk.f32.gmra.mrb[58].mxu0 %vm33_vm1, %v31307_v59 }
 0x4c3   :  { %19504 = vmatprep.mubr.msk.f32.mxu0 %vm33_vm1, %v31308_v15 }
 0x4c6   :  { %19505 = vmatmul.mubr.msk.f32.gmra.mrb[60].mxu0 %vm33_vm1, %v31309_v4 }
 0x4c7   :  { %19507 = vmatprep.mubr.msk.f32.mxu0 %vm33_vm1, %v4882_v48 }
 0x4ca   :  { %19508 = vmatmul.mubr.msk.f32.gmra.mrb[62].mxu0 %vm33_vm1, %v4884_v21 }
 0x521   :  { %v19416_v30 = vpop.f32.mrb[0].mxu0 }
 0x522   :  { %v25241_v5 = vadd.f32 %v19416_v30, %v25238_v56  ;;  %v4964_v7 = vpop.f32.mrb[1].mxu0 }
 0x523   :  { %v25244_v22 = vadd.f32 %v25238_v56, %v4964_v7 }
 0x524   :  { %v5554_v46 = vmul.f32 %v25241_v5, %v25241_v5  ;;  %v5420_v43 = vsel %vm5418_vm4, %v25241_v5, 0.0 }
 0x525   :  { %v5419_v38 = vsel %vm5418_vm4, %v25244_v22, 0.0  ;;  %v5553_v27 = vmul.f32 %v25244_v22, %v25244_v22  ;;  %v19419_v50 = vpop.f32.mrb[2].mxu0 }
 0x526   :  { %v25255_v32 = vadd.f32 %v19419_v50, %v25238_v56  ;;  %v4974_v8 = vpop.f32.mrb[3].mxu0  ;;  %v5618_v25 = vsel %vm5418_vm4, %v5554_v46, 0.0  ;;  %v5421_v31 = vadd.f32 %v5420_v43, %v5419_v38 }
 0x527   :  { %v5617_v17 = vsel %vm5418_vm4, %v5553_v27, 0.0  ;;  %v25260_v60 = vadd.f32 %v25238_v56, %v4974_v8 }
 0x528   :  { %v5556_v6 = vmul.f32 %v25255_v32, %v25255_v32  ;;  %v5619_v40 = vadd.f32 %v5618_v25, %v5617_v17  ;;  %v5424_v55 = vsel %vm5418_vm4, %v25255_v32, 0.0 }
 0x529   :  { %v5422_v10 = vsel %vm5418_vm4, %v25260_v60, 0.0  ;;  %v5555_v54 = vmul.f32 %v25260_v60, %v25260_v60  ;;  %v19422_v35 = vpop.f32.mrb[4].mxu0 }
 0x52a   :  { %v5423_v53 = vadd.f32 %v5422_v10, %v5421_v31  ;;  %v25269_v0 = vadd.f32 %v19422_v35, %v25238_v56  ;;  %v4984_v13 = vpop.f32.mrb[5].mxu0  ;;  %v5622_v52 = vsel %vm5418_vm4, %v5556_v6, 0.0 }
 0x52b   :  { %v5620_v26 = vsel %vm5418_vm4, %v5555_v54, 0.0  ;;  %v25275_v58 = vadd.f32 %v25238_v56, %v4984_v13 }
 0x52c   :  { %v5425_v24 = vadd.f32 %v5424_v55, %v5423_v53  ;;  %v5621_v33 = vadd.f32 %v5620_v26, %v5619_v40  ;;  %v5558_v29 = vmul.f32 %v25269_v0, %v25269_v0  ;;  %v5428_v16 = vsel %vm5418_vm4, %v25269_v0, 0.0 }
 0x52d   :  { %v5426_v2 = vsel %vm5418_vm4, %v25275_v58, 0.0  ;;  %v5557_v11 = vmul.f32 %v25275_v58, %v25275_v58  ;;  %v19425_v47 = vpop.f32.mrb[6].mxu0 }
 0x52e   :  { %v5623_v18 = vadd.f32 %v5622_v52, %v5621_v33  ;;  %v5427_v61 = vadd.f32 %v5426_v2, %v5425_v24  ;;  %v25285_v34 = vadd.f32 %v19425_v47, %v25238_v56  ;;  %v4994_v1 = vpop.f32.mrb[7].mxu0  ;;  %v5626_v44 = vsel %vm5418_vm4, %v5558_v29, 0.0 }
 0x52f   :  { %v5624_v9 = vsel %vm5418_vm4, %v5557_v11, 0.0  ;;  %v25291_v20 = vadd.f32 %v25238_v56, %v4994_v1 }
 0x530   :  { %v5625_v41 = vadd.f32 %v5624_v9, %v5623_v18  ;;  %v5429_v23 = vadd.f32 %v5428_v16, %v5427_v61  ;;  %v5560_v28 = vmul.f32 %v25285_v34, %v25285_v34  ;;  %v5432_v19 = vsel %vm5418_vm4, %v25285_v34, 0.0 }
 0x531   :  { %v5430_v51 = vsel %vm5418_vm4, %v25291_v20, 0.0  ;;  %v5559_v36 = vmul.f32 %v25291_v20, %v25291_v20  ;;  %v19428_v63 = vpop.f32.mrb[8].mxu0 }
 0x532   :  { %v5431_v3 = vadd.f32 %v5430_v51, %v5429_v23  ;;  %v5627_v42 = vadd.f32 %v5626_v44, %v5625_v41  ;;  %v25301_v12 = vadd.f32 %v19428_v63, %v25238_v56  ;;  %v5004_v37 = vpop.f32.mrb[9].mxu0  ;;  %v5630_v59 = vsel %vm5418_vm4, %v5560_v28, 0.0 }
 0x533   :  { %v5628_v49 = vsel %vm5418_vm4, %v5559_v36, 0.0  ;;  %v25307_v45 = vadd.f32 %v25238_v56, %v5004_v37 }
 0x534   :  { %v5629_v57 = vadd.f32 %v5628_v49, %v5627_v42  ;;  %v5433_v39 = vadd.f32 %v5432_v19, %v5431_v3  ;;  %v5562_v15 = vmul.f32 %v25301_v12, %v25301_v12  ;;  %v5436_v43 = vsel %vm5418_vm4, %v25301_v12, 0.0 }
 0x535   :  { %v5434_v62 = vsel %vm5418_vm4, %v25307_v45, 0.0  ;;  %v5561_v48 = vmul.f32 %v25307_v45, %v25307_v45  ;;  %v19431_v4 = vpop.f32.mrb[10].mxu0 }
 0x536   :  { %v5435_v21 = vadd.f32 %v5434_v62, %v5433_v39  ;;  %v5631_v30 = vadd.f32 %v5630_v59, %v5629_v57  ;;  %v25317_v7 = vadd.f32 %v19431_v4, %v25238_v56  ;;  %v5014_v46 = vpop.f32.mrb[11].mxu0  ;;  %v5634_v25 = vsel %vm5418_vm4, %v5562_v15, 0.0 }
 0x537   :  { %v5632_v38 = vsel %vm5418_vm4, %v5561_v48, 0.0  ;;  %v25323_v27 = vadd.f32 %v25238_v56, %v5014_v46 }
 0x538   :  { %v5633_v50 = vadd.f32 %v5632_v38, %v5631_v30  ;;  %v5437_v8 = vadd.f32 %v5436_v43, %v5435_v21  ;;  %v5564_v17 = vmul.f32 %v25317_v7, %v25317_v7  ;;  %v5440_v13 = vsel %vm5418_vm4, %v25317_v7, 0.0 }
 0x539   :  { %v5438_v31 = vsel %vm5418_vm4, %v25323_v27, 0.0  ;;  %v5563_v6 = vmul.f32 %v25323_v27, %v25323_v27  ;;  %v19434_v10 = vpop.f32.mrb[12].mxu0 }
 0x53a   :  { %v5439_v54 = vadd.f32 %v5438_v31, %v5437_v8  ;;  %v5635_v35 = vadd.f32 %v5634_v25, %v5633_v50  ;;  %v25333_v40 = vadd.f32 %v19434_v10, %v25238_v56  ;;  %v5024_v53 = vpop.f32.mrb[13].mxu0  ;;  %v5638_v52 = vsel %vm5418_vm4, %v5564_v17, 0.0 }
 0x53b   :  { %v5636_v55 = vsel %vm5418_vm4, %v5563_v6, 0.0  ;;  %v25339_v26 = vadd.f32 %v25238_v56, %v5024_v53 }
 0x53c   :  { %v5637_v24 = vadd.f32 %v5636_v55, %v5635_v35  ;;  %v5441_v33 = vadd.f32 %v5440_v13, %v5439_v54  ;;  %v5566_v29 = vmul.f32 %v25333_v40, %v25333_v40  ;;  %v5444_v9 = vsel %vm5418_vm4, %v25333_v40, 0.0 }
 0x53d   :  { %v5442_v2 = vsel %vm5418_vm4, %v25339_v26, 0.0  ;;  %v5565_v11 = vmul.f32 %v25339_v26, %v25339_v26  ;;  %v19437_v47 = vpop.f32.mrb[14].mxu0 }
 0x53e   :  { %v5443_v18 = vadd.f32 %v5442_v2, %v5441_v33  ;;  %v5639_v61 = vadd.f32 %v5638_v52, %v5637_v24  ;;  %v25349_v1 = vadd.f32 %v19437_v47, %v25238_v56  ;;  %v5034_v16 = vpop.f32.mrb[15].mxu0  ;;  %v5642_v51 = vsel %vm5418_vm4, %v5566_v29, 0.0 }
 0x53f   :  { %v5640_v41 = vsel %vm5418_vm4, %v5565_v11, 0.0  ;;  %v25355_v23 = vadd.f32 %v25238_v56, %v5034_v16 }
 0x540   :  { %v5641_v44 = vadd.f32 %v5640_v41, %v5639_v61  ;;  %v5445_v28 = vadd.f32 %v5444_v9, %v5443_v18  ;;  %v5568_v36 = vmul.f32 %v25349_v1, %v25349_v1  ;;  %v5448_v39 = vsel %vm5418_vm4, %v25349_v1, 0.0 }
 0x541   :  { %v5446_v63 = vsel %vm5418_vm4, %v25355_v23, 0.0  ;;  %v5567_v3 = vmul.f32 %v25355_v23, %v25355_v23  ;;  %v19440_v42 = vpop.f32.mrb[16].mxu0 }
 0x542   :  { %v5447_v37 = vadd.f32 %v5446_v63, %v5445_v28  ;;  %v5643_v19 = vadd.f32 %v5642_v51, %v5641_v44  ;;  %v25365_v49 = vadd.f32 %v19440_v42, %v25238_v56  ;;  %v5044_v57 = vpop.f32.mrb[17].mxu0  ;;  %v5646_v4 = vsel %vm5418_vm4, %v5568_v36, 0.0 }
 0x543   :  { %v5644_v59 = vsel %vm5418_vm4, %v5567_v3, 0.0  ;;  %v25371_v15 = vadd.f32 %v25238_v56, %v5044_v57 }
 0x544   :  { %v5645_v62 = vadd.f32 %v5644_v59, %v5643_v19  ;;  %v5449_v48 = vadd.f32 %v5448_v39, %v5447_v37  ;;  %v5570_v21 = vmul.f32 %v25365_v49, %v25365_v49  ;;  %v5452_v17 = vsel %vm5418_vm4, %v25365_v49, 0.0 }
 0x545   :  { %v5450_v30 = vsel %vm5418_vm4, %v25371_v15, 0.0  ;;  %v5569_v46 = vmul.f32 %v25371_v15, %v25371_v15  ;;  %v19443_v43 = vpop.f32.mrb[18].mxu0 }
 0x546   :  { %v5451_v38 = vadd.f32 %v5450_v30, %v5449_v48  ;;  %v5647_v50 = vadd.f32 %v5646_v4, %v5645_v62  ;;  %v25381_v8 = vadd.f32 %v19443_v43, %v25238_v56  ;;  %v5054_v25 = vpop.f32.mrb[19].mxu0  ;;  %v5650_v35 = vsel %vm5418_vm4, %v5570_v21, 0.0 }
 0x547   :  { %v5648_v31 = vsel %vm5418_vm4, %v5569_v46, 0.0  ;;  %v25387_v6 = vadd.f32 %v25238_v56, %v5054_v25 }
 0x548   :  { %v5649_v10 = vadd.f32 %v5648_v31, %v5647_v50  ;;  %v5453_v54 = vadd.f32 %v5452_v17, %v5451_v38  ;;  %v5572_v53 = vmul.f32 %v25381_v8, %v25381_v8  ;;  %v5456_v11 = vsel %vm5418_vm4, %v25381_v8, 0.0 }
 0x549   :  { %v5454_v13 = vsel %vm5418_vm4, %v25387_v6, 0.0  ;;  %v5571_v55 = vmul.f32 %v25387_v6, %v25387_v6  ;;  %v19446_v24 = vpop.f32.mrb[20].mxu0 }
 0x54a   :  { %v5455_v33 = vadd.f32 %v5454_v13, %v5453_v54  ;;  %v5651_v52 = vadd.f32 %v5650_v35, %v5649_v10  ;;  %v25397_v29 = vadd.f32 %v19446_v24, %v25238_v56  ;;  %v5064_v2 = vpop.f32.mrb[21].mxu0  ;;  %v5654_v9 = vsel %vm5418_vm4, %v5572_v53, 0.0 }
 0x54b   :  { %v5652_v47 = vsel %vm5418_vm4, %v5571_v55, 0.0  ;;  %v25403_v18 = vadd.f32 %v25238_v56, %v5064_v2 }
 0x54c   :  { %v5653_v61 = vadd.f32 %v5652_v47, %v5651_v52  ;;  %v5457_v16 = vadd.f32 %v5456_v11, %v5455_v33  ;;  %v5574_v41 = vmul.f32 %v25397_v29, %v25397_v29  ;;  %v5460_v37 = vsel %vm5418_vm4, %v25397_v29, 0.0 }
 0x54d   :  { %v5458_v44 = vsel %vm5418_vm4, %v25403_v18, 0.0  ;;  %v5573_v28 = vmul.f32 %v25403_v18, %v25403_v18  ;;  %v19449_v51 = vpop.f32.mrb[22].mxu0 }
 0x54e   :  { %v5459_v36 = vadd.f32 %v5458_v44, %v5457_v16  ;;  %v5655_v63 = vadd.f32 %v5654_v9, %v5653_v61  ;;  %v25413_v3 = vadd.f32 %v19449_v51, %v25238_v56  ;;  %v5074_v42 = vpop.f32.mrb[23].mxu0  ;;  %v5658_v62 = vsel %vm5418_vm4, %v5574_v41, 0.0 }
 0x54f   :  { %v5656_v19 = vsel %vm5418_vm4, %v5573_v28, 0.0  ;;  %v25419_v57 = vadd.f32 %v25238_v56, %v5074_v42 }
 0x550   :  { %v5657_v39 = vadd.f32 %v5656_v19, %v5655_v63  ;;  %v5461_v59 = vadd.f32 %v5460_v37, %v5459_v36  ;;  %v5576_v48 = vmul.f32 %v25413_v3, %v25413_v3  ;;  %v5464_v25 = vsel %vm5418_vm4, %v25413_v3, 0.0 }
 0x551   :  { %v5462_v4 = vsel %vm5418_vm4, %v25419_v57, 0.0  ;;  %v5575_v21 = vmul.f32 %v25419_v57, %v25419_v57  ;;  %v19452_v30 = vpop.f32.mrb[24].mxu0 }
 0x552   :  { %v5463_v46 = vadd.f32 %v5462_v4, %v5461_v59  ;;  %v5659_v43 = vadd.f32 %v5658_v62, %v5657_v39  ;;  %v25429_v38 = vadd.f32 %v19452_v30, %v25238_v56  ;;  %v5084_v50 = vpop.f32.mrb[25].mxu0  ;;  %v5662_v35 = vsel %vm5418_vm4, %v5576_v48, 0.0 }
 0x553   :  { %v5660_v17 = vsel %vm5418_vm4, %v5575_v21, 0.0  ;;  %v25435_v31 = vadd.f32 %v25238_v56, %v5084_v50 }
 0x554   :  { %v5661_v10 = vadd.f32 %v5660_v17, %v5659_v43  ;;  %v5465_v54 = vadd.f32 %v5464_v25, %v5463_v46  ;;  %v5578_v53 = vmul.f32 %v25429_v38, %v25429_v38  ;;  %v5468_v47 = vsel %vm5418_vm4, %v25429_v38, 0.0 }
 0x555   :  { %v5466_v13 = vsel %vm5418_vm4, %v25435_v31, 0.0  ;;  %v5577_v55 = vmul.f32 %v25435_v31, %v25435_v31  ;;  %v19455_v24 = vpop.f32.mrb[26].mxu0 }
 0x556   :  { %v5467_v33 = vadd.f32 %v5466_v13, %v5465_v54  ;;  %v5663_v52 = vadd.f32 %v5662_v35, %v5661_v10  ;;  %v25445_v2 = vadd.f32 %v19455_v24, %v25238_v56  ;;  %v5094_v11 = vpop.f32.mrb[27].mxu0  ;;  %v5666_v44 = vsel %vm5418_vm4, %v5578_v53, 0.0 }
 0x557   :  { %v5664_v61 = vsel %vm5418_vm4, %v5577_v55, 0.0  ;;  %v25451_v16 = vadd.f32 %v25238_v56, %v5094_v11 }
 0x558   :  { %v5665_v9 = vadd.f32 %v5664_v61, %v5663_v52  ;;  %v5469_v41 = vadd.f32 %v5468_v47, %v5467_v33  ;;  %v5580_v28 = vmul.f32 %v25445_v2, %v25445_v2  ;;  %v5472_v59 = vsel %vm5418_vm4, %v25445_v2, 0.0 }
 0x559   :  { %v5470_v51 = vsel %vm5418_vm4, %v25451_v16, 0.0  ;;  %v5579_v36 = vmul.f32 %v25451_v16, %v25451_v16  ;;  %v19458_v63 = vpop.f32.mrb[28].mxu0 }
 0x55a   :  { %v5471_v42 = vadd.f32 %v5470_v51, %v5469_v41  ;;  %v5667_v37 = vadd.f32 %v5666_v44, %v5665_v9  ;;  %v25461_v19 = vadd.f32 %v19458_v63, %v25238_v56  ;;  %v5104_v39 = vpop.f32.mrb[29].mxu0  ;;  %v5670_v30 = vsel %vm5418_vm4, %v5580_v28, 0.0  ;;  %v14951_v41 = vld [vmem:[%s30351_s3 + $0x20] sm:$0xff]  ;;  %v14952_v44 = vld [vmem:[%s30351_s3 + $0x28] sm:$0xff] }
 0x55b   :  { %v5668_v62 = vsel %vm5418_vm4, %v5579_v36, 0.0  ;;  %v25467_v48 = vadd.f32 %v25238_v56, %v5104_v39 }
 0x55c   :  { %v5669_v4 = vadd.f32 %v5668_v62, %v5667_v37  ;;  %v5473_v21 = vadd.f32 %v5472_v59, %v5471_v42  ;;  %v5582_v46 = vmul.f32 %v25461_v19, %v25461_v19  ;;  %v5476_v53 = vsel %vm5418_vm4, %v25461_v19, 0.0 }
 0x55d   :  { %v5474_v43 = vsel %vm5418_vm4, %v25467_v48, 0.0  ;;  %v5581_v50 = vmul.f32 %v25467_v48, %v25467_v48  ;;  %v19461_v25 = vpop.f32.mrb[30].mxu0  ;;  %v20457_v59 = vpack.c.bf16 %v14952_v44, %v14951_v41  ;;  %v6556_v41 = vld [vmem:[%s30351_s3] sm:$0xff]  ;;  %v6557_v44 = vld [vmem:[%s30351_s3 + $0x8] sm:$0xff] }
 0x55e   :  { %v5475_v17 = vadd.f32 %v5474_v43, %v5473_v21  ;;  %v5671_v10 = vadd.f32 %v5670_v30, %v5669_v4  ;;  %v25477_v54 = vadd.f32 %v19461_v25, %v25238_v56  ;;  %v5114_v35 = vpop.f32.mrb[31].mxu0  ;;  %v5674_v52 = vsel %vm5418_vm4, %v5582_v46, 0.0  ;;  %v14953_v25 = vld [vmem:[%s30351_s3 + $0x30] sm:$0xff] }
 0x55f   :  { %v5672_v13 = vsel %vm5418_vm4, %v5581_v50, 0.0  ;;  %v25483_v55 = vadd.f32 %v25238_v56, %v5114_v35  ;;  %20458 = vmatprep.subr.bf16.mxu1 %v20457_v59 }
 0x560   :  { %v5673_v24 = vadd.f32 %v5672_v13, %v5671_v10  ;;  %v5477_v33 = vadd.f32 %v5476_v53, %v5475_v17  ;;  %v5584_v11 = vmul.f32 %v25477_v54, %v25477_v54  ;;  %v5480_v42 = vsel %vm5418_vm4, %v25477_v54, 0.0  ;;  %v14954_v17 = vld [vmem:[%s30351_s3 + $0x38] sm:$0xff]  ;;  %20460 = vmatpush3.bf16.msra.mxu1 %v20457_v59 }
 0x561   :  { %v5478_v47 = vsel %vm5418_vm4, %v25483_v55, 0.0  ;;  %v5583_v61 = vmul.f32 %v25483_v55, %v25483_v55  ;;  %v19464_v9 = vpop.f32.mrb[32].mxu0 }
 0x562   :  { %v5479_v28 = vadd.f32 %v5478_v47, %v5477_v33  ;;  %v5675_v51 = vadd.f32 %v5674_v52, %v5673_v24  ;;  %v25499_v36 = vadd.f32 %v19464_v9, %v25238_v56  ;;  %v5124_v63 = vpop.f32.mrb[33].mxu0  ;;  %v5678_v21 = vsel %vm5418_vm4, %v5584_v11, 0.0  ;;  %v25529_v47 = vld [vmem:[#allocation3 + $0x8] sm:$0xff] }
 0x563   :  { %v5676_v37 = vsel %vm5418_vm4, %v5583_v61, 0.0  ;;  %v25505_v39 = vadd.f32 %v25238_v56, %v5124_v63  ;;  %v20461_v11 = vpack.c.bf16 %v14954_v17, %v14953_v25  ;;  %31310 = vst [vmem:[#allocation26_spill] sm:$0xff] %v25529_v47  ;;  %19518 = vmatprep.mubr.msk.f32.mxu1 %vm5418_vm4, %v25529_v47  ;;  %v20465_v25 = vpack.c.bf16 %v6557_v44, %v6556_v41 }
 0x564   :  { %v5677_v62 = vadd.f32 %v5676_v37, %v5675_v51  ;;  %v5481_v4 = vadd.f32 %v5480_v42, %v5479_v28  ;;  %v5586_v30 = vmul.f32 %v25499_v36, %v25499_v36  ;;  %v5484_v24 = vsel %vm5418_vm4, %v25499_v36, 0.0 }
 0x565   :  { %v5482_v46 = vsel %vm5418_vm4, %v25505_v39, 0.0  ;;  %v5585_v43 = vmul.f32 %v25505_v39, %v25505_v39  ;;  %v19467_v50 = vpop.f32.mrb[34].mxu0  ;;  %20462 = vmatprep.subr.bf16.mxu1 %v20461_v11 }
 0x566   :  { %v5483_v10 = vadd.f32 %v5482_v46, %v5481_v4  ;;  %v5679_v35 = vadd.f32 %v5678_v21, %v5677_v62  ;;  %v25521_v53 = vadd.f32 %v19467_v50, %v25238_v56  ;;  %v5134_v13 = vpop.f32.mrb[35].mxu0  ;;  %v5682_v28 = vsel %vm5418_vm4, %v5586_v30, 0.0  ;;  %20464 = vmatpush3.bf16.msra.mxu1 %v20461_v11  ;;  %v25549_v46 = vld [vmem:[#allocation3 + $0x10] sm:$0xff] }
 0x567   :  { %v5680_v33 = vsel %vm5418_vm4, %v5585_v43, 0.0  ;;  %v25527_v52 = vadd.f32 %v25238_v56, %v5134_v13  ;;  %31311 = vst [vmem:[#allocation27_spill] sm:$0xff] %v25549_v46  ;;  %20466 = vmatprep.subr.bf16.mxu1 %v20465_v25 }
 0x568   :  { %v5681_v61 = vadd.f32 %v5680_v33, %v5679_v35  ;;  %v5485_v9 = vadd.f32 %v5484_v24, %v5483_v10  ;;  %v5588_v51 = vmul.f32 %v25521_v53, %v25521_v53  ;;  %v5488_v30 = vsel %vm5418_vm4, %v25521_v53, 0.0 }
 0x569   :  { %v5486_v63 = vsel %vm5418_vm4, %v25527_v52, 0.0  ;;  %v5587_v42 = vmul.f32 %v25527_v52, %v25527_v52  ;;  %v19470_v37 = vpop.f32.mrb[36].mxu0  ;;  %19519 = vmatmul.mubr.msk.f32.vlgmr.msra.gmra.mrb[0].mxu1 %vm5418_vm4, %v25549_v46 }
 0x56a   :  { %v5487_v59 = vadd.f32 %v5486_v63, %v5485_v9  ;;  %v5683_v62 = vadd.f32 %v5682_v28, %v5681_v61  ;;  %v25547_v4 = vadd.f32 %v19470_v37, %v25238_v56  ;;  %v5144_v21 = vpop.f32.mrb[37].mxu0  ;;  %v5686_v35 = vsel %vm5418_vm4, %v5588_v51, 0.0  ;;  %20468 = vmatpush3.bf16.msra.mxu1 %v20465_v25 }
 0x56b   :  { %v5684_v43 = vsel %vm5418_vm4, %v5587_v42, 0.0  ;;  %v25555_v50 = vadd.f32 %v25238_v56, %v5144_v21 }
 0x56c   :  { %v5685_v17 = vadd.f32 %v5684_v43, %v5683_v62  ;;  %v5489_v10 = vadd.f32 %v5488_v30, %v5487_v59  ;;  %v5590_v13 = vmul.f32 %v25547_v4, %v25547_v4  ;;  %v5492_v28 = vsel %vm5418_vm4, %v25547_v4, 0.0 }
 0x56d   :  { %v5490_v24 = vsel %vm5418_vm4, %v25555_v50, 0.0  ;;  %v5589_v33 = vmul.f32 %v25555_v50, %v25555_v50  ;;  %v19473_v11 = vpop.f32.mrb[38].mxu0 }
 0x56e   :  { %v5491_v61 = vadd.f32 %v5490_v24, %v5489_v10  ;;  %v5687_v9 = vadd.f32 %v5686_v35, %v5685_v17  ;;  %v25567_v41 = vadd.f32 %v19473_v11, %v25238_v56  ;;  %v5154_v44 = vpop.f32.mrb[39].mxu0  ;;  %v5690_v59 = vsel %vm5418_vm4, %v5590_v13, 0.0 }
 0x56f   :  { %v5688_v51 = vsel %vm5418_vm4, %v5589_v33, 0.0  ;;  %v25573_v63 = vadd.f32 %v25238_v56, %v5154_v44 }
 0x570   :  { %31312 = vst [vmem:[#allocation28_spill] sm:$0xff] %v25567_v41  ;;  %v5689_v42 = vadd.f32 %v5688_v51, %v5687_v9  ;;  %v5493_v37 = vadd.f32 %v5492_v28, %v5491_v61  ;;  %v5592_v62 = vmul.f32 %v25567_v41, %v25567_v41  ;;  %v5496_v24 = vsel %vm5418_vm4, %v25567_v41, 0.0 }
 0x571   :  { %31313 = vst [vmem:[#allocation29_spill] sm:$0xff] %v25573_v63  ;;  %v5494_v21 = vsel %vm5418_vm4, %v25573_v63, 0.0  ;;  %v5591_v30 = vmul.f32 %v25573_v63, %v25573_v63  ;;  %v19476_v43 = vpop.f32.mrb[40].mxu0 }
 0x572   :  { %v5495_v25 = vadd.f32 %v5494_v21, %v5493_v37  ;;  %v5691_v17 = vadd.f32 %v5690_v59, %v5689_v42  ;;  %v25583_v10 = vadd.f32 %v19476_v43, %v25238_v56  ;;  %v5164_v35 = vpop.f32.mrb[41].mxu0  ;;  %v5694_v9 = vsel %vm5418_vm4, %v5592_v62, 0.0 }
 0x573   :  { %v5692_v13 = vsel %vm5418_vm4, %v5591_v30, 0.0  ;;  %v25589_v33 = vadd.f32 %v25238_v56, %v5164_v35 }
 0x574   :  { %31314 = vst [vmem:[#allocation30_spill] sm:$0xff] %v25583_v10  ;;  %v5693_v11 = vadd.f32 %v5692_v13, %v5691_v17  ;;  %v5497_v61 = vadd.f32 %v5496_v24, %v5495_v25  ;;  %v5594_v44 = vmul.f32 %v25583_v10, %v25583_v10  ;;  %v5500_v43 = vsel %vm5418_vm4, %v25583_v10, 0.0 }
 0x575   :  { %31315 = vst [vmem:[#allocation31_spill] sm:$0xff] %v25589_v33  ;;  %v5498_v28 = vsel %vm5418_vm4, %v25589_v33, 0.0  ;;  %v5593_v51 = vmul.f32 %v25589_v33, %v25589_v33  ;;  %v19479_v42 = vpop.f32.mrb[42].mxu0 }
 0x576   :  { %v5499_v37 = vadd.f32 %v5498_v28, %v5497_v61  ;;  %v5695_v59 = vadd.f32 %v5694_v9, %v5693_v11  ;;  %v25599_v21 = vadd.f32 %v19479_v42, %v25238_v56  ;;  %v5174_v30 = vpop.f32.mrb[43].mxu0  ;;  %v5698_v24 = vsel %vm5418_vm4, %v5594_v44, 0.0 }
 0x577   :  { %v5696_v62 = vsel %vm5418_vm4, %v5593_v51, 0.0  ;;  %v25605_v25 = vadd.f32 %v25238_v56, %v5174_v30 }
 0x578   :  { %31316 = vst [vmem:[#allocation32_spill] sm:$0xff] %v25599_v21  ;;  %v5697_v17 = vadd.f32 %v5696_v62, %v5695_v59  ;;  %v5501_v35 = vadd.f32 %v5500_v43, %v5499_v37  ;;  %v5596_v13 = vmul.f32 %v25599_v21, %v25599_v21  ;;  %v5504_v37 = vsel %vm5418_vm4, %v25599_v21, 0.0 }
 0x579   :  { %31317 = vst [vmem:[#allocation33_spill] sm:$0xff] %v25605_v25  ;;  %v5502_v11 = vsel %vm5418_vm4, %v25605_v25, 0.0  ;;  %v5595_v61 = vmul.f32 %v25605_v25, %v25605_v25  ;;  %v19482_v9 = vpop.f32.mrb[44].mxu0 }
 0x57a   :  { %v5503_v28 = vadd.f32 %v5502_v11, %v5501_v35  ;;  %v5699_v42 = vadd.f32 %v5698_v24, %v5697_v17  ;;  %v25615_v51 = vadd.f32 %v19482_v9, %v25238_v56  ;;  %v5184_v30 = vpop.f32.mrb[45].mxu0  ;;  %v5702_v14 = vsel %vm5418_vm4, %v5596_v13, 0.0 }
 0x57b   :  { %v5700_v44 = vsel %vm5418_vm4, %v5595_v61, 0.0  ;;  %v25621_v59 = vadd.f32 %v25238_v56, %v5184_v30 }
 0x57c   :  { %31318 = vst [vmem:[#allocation34_spill] sm:$0xff] %v25615_v51  ;;  %v5701_v43 = vadd.f32 %v5700_v44, %v5699_v42  ;;  %v5505_v62 = vadd.f32 %v5504_v37, %v5503_v28  ;;  %v5598_v35 = vmul.f32 %v25615_v51, %v25615_v51  ;;  %v5508_v28 = vsel %vm5418_vm4, %v25615_v51, 0.0 }
 0x57d   :  { %31319 = vst [vmem:[#allocation35_spill] sm:$0xff] %v25621_v59  ;;  %v5506_v17 = vsel %vm5418_vm4, %v25621_v59, 0.0  ;;  %v5597_v24 = vmul.f32 %v25621_v59, %v25621_v59  ;;  %v19485_v11 = vpop.f32.mrb[46].mxu0 }
 0x57e   :  { %v5507_v9 = vadd.f32 %v5506_v17, %v5505_v62  ;;  %v5703_v21 = vadd.f32 %v5702_v14, %v5701_v43  ;;  %v25631_v61 = vadd.f32 %v19485_v11, %v25238_v56  ;;  %v5194_v30 = vpop.f32.mrb[47].mxu0  ;;  %v5706_v25 = vsel %vm5418_vm4, %v5598_v35, 0.0 }
 0x57f   :  { %v5704_v13 = vsel %vm5418_vm4, %v5597_v24, 0.0  ;;  %v25637_v42 = vadd.f32 %v25238_v56, %v5194_v30 }
 0x580   :  { %31320 = vst [vmem:[#allocation36_spill] sm:$0xff] %v25631_v61  ;;  %v5705_v37 = vadd.f32 %v5704_v13, %v5703_v21  ;;  %v5509_v44 = vadd.f32 %v5508_v28, %v5507_v9  ;;  %v5600_v62 = vmul.f32 %v25631_v61, %v25631_v61  ;;  %v5512_v21 = vsel %vm5418_vm4, %v25631_v61, 0.0 }
 0x581   :  { %31321 = vst [vmem:[#allocation37_spill] sm:$0xff] %v25637_v42  ;;  %v5510_v14 = vsel %vm5418_vm4, %v25637_v42, 0.0  ;;  %v5599_v43 = vmul.f32 %v25637_v42, %v25637_v42  ;;  %v19488_v17 = vpop.f32.mrb[48].mxu0 }
 0x582   :  { %v5511_v11 = vadd.f32 %v5510_v14, %v5509_v44  ;;  %v5707_v51 = vadd.f32 %v5706_v25, %v5705_v37  ;;  %v25647_v24 = vadd.f32 %v19488_v17, %v25238_v56  ;;  %v5204_v30 = vpop.f32.mrb[49].mxu0  ;;  %v5710_v59 = vsel %vm5418_vm4, %v5600_v62, 0.0 }
 0x583   :  { %v5708_v35 = vsel %vm5418_vm4, %v5599_v43, 0.0  ;;  %v25653_v9 = vadd.f32 %v25238_v56, %v5204_v30 }
 0x584   :  { %31322 = vst [vmem:[#allocation38_spill] sm:$0xff] %v25647_v24  ;;  %v5709_v28 = vadd.f32 %v5708_v35, %v5707_v51  ;;  %v5513_v13 = vadd.f32 %v5512_v21, %v5511_v11  ;;  %v5602_v44 = vmul.f32 %v25647_v24, %v25647_v24  ;;  %v5516_v51 = vsel %vm5418_vm4, %v25647_v24, 0.0 }
 0x585   :  { %31323 = vst [vmem:[#allocation39_spill] sm:$0xff] %v25653_v9  ;;  %v5514_v25 = vsel %vm5418_vm4, %v25653_v9, 0.0  ;;  %v5601_v37 = vmul.f32 %v25653_v9, %v25653_v9  ;;  %v19491_v14 = vpop.f32.mrb[50].mxu0 }
 0x586   :  { %v5515_v17 = vadd.f32 %v5514_v25, %v5513_v13  ;;  %v5711_v61 = vadd.f32 %v5710_v59, %v5709_v28  ;;  %v25663_v43 = vadd.f32 %v19491_v14, %v25238_v56  ;;  %v5214_v30 = vpop.f32.mrb[51].mxu0  ;;  %v5714_v42 = vsel %vm5418_vm4, %v5602_v44, 0.0 }
 0x587   :  { %v5712_v62 = vsel %vm5418_vm4, %v5601_v37, 0.0  ;;  %v25669_v11 = vadd.f32 %v25238_v56, %v5214_v30 }
 0x588   :  { %31324 = vst [vmem:[#allocation40_spill] sm:$0xff] %v25663_v43  ;;  %v5713_v21 = vadd.f32 %v5712_v62, %v5711_v61  ;;  %v5517_v35 = vadd.f32 %v5516_v51, %v5515_v17  ;;  %v5604_v13 = vmul.f32 %v25663_v43, %v25663_v43  ;;  %v5520_v61 = vsel %vm5418_vm4, %v25663_v43, 0.0 }
 0x589   :  { %31325 = vst [vmem:[#allocation41_spill] sm:$0xff] %v25669_v11  ;;  %v5518_v59 = vsel %vm5418_vm4, %v25669_v11, 0.0  ;;  %v5603_v28 = vmul.f32 %v25669_v11, %v25669_v11  ;;  %v19494_v25 = vpop.f32.mrb[52].mxu0 }
 0x58a   :  { %v5519_v14 = vadd.f32 %v5518_v59, %v5517_v35  ;;  %v5715_v24 = vadd.f32 %v5714_v42, %v5713_v21  ;;  %v25679_v37 = vadd.f32 %v19494_v25, %v25238_v56  ;;  %v5224_v30 = vpop.f32.mrb[53].mxu0  ;;  %v5718_v9 = vsel %vm5418_vm4, %v5604_v13, 0.0 }
 0x58b   :  { %v5716_v44 = vsel %vm5418_vm4, %v5603_v28, 0.0  ;;  %v25685_v17 = vadd.f32 %v25238_v56, %v5224_v30 }
 0x58c   :  { %31326 = vst [vmem:[#allocation42_spill] sm:$0xff] %v25679_v37  ;;  %v5717_v51 = vadd.f32 %v5716_v44, %v5715_v24  ;;  %v5521_v62 = vadd.f32 %v5520_v61, %v5519_v14  ;;  %v5606_v35 = vmul.f32 %v25679_v37, %v25679_v37  ;;  %v5524_v24 = vsel %vm5418_vm4, %v25679_v37, 0.0 }
 0x58d   :  { %31327 = vst [vmem:[#allocation43_spill] sm:$0xff] %v25685_v17  ;;  %v5522_v42 = vsel %vm5418_vm4, %v25685_v17, 0.0  ;;  %v5605_v21 = vmul.f32 %v25685_v17, %v25685_v17  ;;  %v19497_v59 = vpop.f32.mrb[54].mxu0 }
 0x58e   :  { %v5523_v25 = vadd.f32 %v5522_v42, %v5521_v62  ;;  %v5719_v43 = vadd.f32 %v5718_v9, %v5717_v51  ;;  %v25695_v28 = vadd.f32 %v19497_v59, %v25238_v56  ;;  %v5234_v30 = vpop.f32.mrb[55].mxu0  ;;  %v5722_v11 = vsel %vm5418_vm4, %v5606_v35, 0.0 }
 0x58f   :  { %v5720_v13 = vsel %vm5418_vm4, %v5605_v21, 0.0  ;;  %v25701_v14 = vadd.f32 %v25238_v56, %v5234_v30 }
 0x590   :  { %31328 = vst [vmem:[#allocation44_spill] sm:$0xff] %v25695_v28  ;;  %v5721_v61 = vadd.f32 %v5720_v13, %v5719_v43  ;;  %v5525_v44 = vadd.f32 %v5524_v24, %v5523_v25  ;;  %v5608_v62 = vmul.f32 %v25695_v28, %v25695_v28  ;;  %v5528_v43 = vsel %vm5418_vm4, %v25695_v28, 0.0 }
 0x591   :  { %31329 = vst [vmem:[#allocation45_spill] sm:$0xff] %v25701_v14  ;;  %v5526_v9 = vsel %vm5418_vm4, %v25701_v14, 0.0  ;;  %v5607_v51 = vmul.f32 %v25701_v14, %v25701_v14  ;;  %v19500_v42 = vpop.f32.mrb[56].mxu0 }
 0x592   :  { %v5527_v59 = vadd.f32 %v5526_v9, %v5525_v44  ;;  %v5723_v37 = vadd.f32 %v5722_v11, %v5721_v61  ;;  %v25711_v21 = vadd.f32 %v19500_v42, %v25238_v56  ;;  %v5244_v30 = vpop.f32.mrb[57].mxu0  ;;  %v5726_v17 = vsel %vm5418_vm4, %v5608_v62, 0.0 }
 0x593   :  { %v5724_v35 = vsel %vm5418_vm4, %v5607_v51, 0.0  ;;  %v25717_v25 = vadd.f32 %v25238_v56, %v5244_v30 }
 0x594   :  { %31330 = vst [vmem:[#allocation46_spill] sm:$0xff] %v25711_v21  ;;  %v5725_v24 = vadd.f32 %v5724_v35, %v5723_v37  ;;  %v5529_v13 = vadd.f32 %v5528_v43, %v5527_v59  ;;  %v5610_v44 = vmul.f32 %v25711_v21, %v25711_v21  ;;  %v5532_v37 = vsel %vm5418_vm4, %v25711_v21, 0.0 }
 0x595   :  { %31331 = vst [vmem:[#allocation47_spill] sm:$0xff] %v25717_v25  ;;  %v5530_v11 = vsel %vm5418_vm4, %v25717_v25, 0.0  ;;  %v5609_v61 = vmul.f32 %v25717_v25, %v25717_v25  ;;  %v19503_v9 = vpop.f32.mrb[58].mxu0 }
 0x596   :  { %v5531_v42 = vadd.f32 %v5530_v11, %v5529_v13  ;;  %v5727_v28 = vadd.f32 %v5726_v17, %v5725_v24  ;;  %v25727_v51 = vadd.f32 %v19503_v9, %v25238_v56  ;;  %v5254_v30 = vpop.f32.mrb[59].mxu0  ;;  %v5730_v14 = vsel %vm5418_vm4, %v5610_v44, 0.0 }
 0x597   :  { %v5728_v62 = vsel %vm5418_vm4, %v5609_v61, 0.0  ;;  %v25733_v59 = vadd.f32 %v25238_v56, %v5254_v30  ;;  %v6558_v61 = vld [vmem:[%s30351_s3 + $0x10] sm:$0xff] }
 0x598   :  { %31332 = vst [vmem:[#allocation48_spill] sm:$0xff] %v25727_v51  ;;  %v5729_v43 = vadd.f32 %v5728_v62, %v5727_v28  ;;  %v5533_v35 = vadd.f32 %v5532_v37, %v5531_v42  ;;  %v5612_v13 = vmul.f32 %v25727_v51, %v25727_v51  ;;  %v6559_v28 = vld [vmem:[%s30351_s3 + $0x18] sm:$0xff]  ;;  %v5536_v37 = vsel %vm5418_vm4, %v25727_v51, 0.0 }
 0x599   :  { %31333 = vst [vmem:[#allocation49_spill] sm:$0xff] %v25733_v59  ;;  %v5534_v17 = vsel %vm5418_vm4, %v25733_v59, 0.0  ;;  %v5611_v24 = vmul.f32 %v25733_v59, %v25733_v59  ;;  %v19506_v11 = vpop.f32.mrb[60].mxu0  ;;  %v20469_v21 = vpack.c.bf16 %v6559_v28, %v6558_v61 }
 0x59a   :  { %v5535_v9 = vadd.f32 %v5534_v17, %v5533_v35  ;;  %v5731_v44 = vadd.f32 %v5730_v14, %v5729_v43  ;;  %v25749_v42 = vadd.f32 %v19506_v11, %v25238_v56  ;;  %v5264_v30 = vpop.f32.mrb[61].mxu0  ;;  %v5734_v33 = vsel %vm5418_vm4, %v5612_v13, 0.0 }
 0x59b   :  { %v5732_v62 = vsel %vm5418_vm4, %v5611_v24, 0.0  ;;  %v25755_v59 = vadd.f32 %v25238_v56, %v5264_v30  ;;  %20470 = vmatprep.subr.bf16.mxu1 %v20469_v21 }
 0x59c   :  { %31334 = vst [vmem:[#allocation50_spill] sm:$0xff] %v25749_v42  ;;  %v5733_v25 = vadd.f32 %v5732_v62, %v5731_v44  ;;  %v5537_v10 = vadd.f32 %v5536_v37, %v5535_v9  ;;  %v5614_v14 = vmul.f32 %v25749_v42, %v25749_v42  ;;  %20472 = vmatpush3.bf16.msra.mxu1 %v20469_v21  ;;  %v5540_v13 = vsel %vm5418_vm4, %v25749_v42, 0.0 }
 0x59d   :  { %31335 = vst [vmem:[#allocation51_spill] sm:$0xff] %v25755_v59  ;;  %v5538_v43 = vsel %vm5418_vm4, %v25755_v59, 0.0  ;;  %v5613_v35 = vmul.f32 %v25755_v59, %v25755_v59  ;;  %v19509_v17 = vpop.f32.mrb[62].mxu0 }
 0x59e   :  { %v5539_v24 = vadd.f32 %v5538_v43, %v5537_v10  ;;  %v5735_v11 = vadd.f32 %v5734_v33, %v5733_v25  ;;  %v25765_v30 = vadd.f32 %v19509_v17, %v25238_v56  ;;  %v5274_v61 = vpop.f32.mrb[63].mxu0  ;;  %v5738_v62 = vsel %vm5418_vm4, %v5614_v14, 0.0 }
 0x59f   :  { %v5736_v28 = vsel %vm5418_vm4, %v5613_v35, 0.0  ;;  %v25771_v9 = vadd.f32 %v25238_v56, %v5274_v61 }
 0x5a0   :  { %31336 = vst [vmem:[#allocation52_spill] sm:$0xff] %v25765_v30  ;;  %v5737_v44 = vadd.f32 %v5736_v28, %v5735_v11  ;;  %v5541_v37 = vadd.f32 %v5540_v13, %v5539_v24  ;;  %v5616_v10 = vmul.f32 %v25765_v30, %v25765_v30  ;;  %v5544_v35 = vsel %vm5418_vm4, %v25765_v30, 0.0 }
 0x5a1   :  { %v5542_v33 = vsel %vm5418_vm4, %v25771_v9, 0.0  ;;  %v5615_v21 = vmul.f32 %v25771_v9, %v25771_v9 }
 0x5a2   :  { %v5543_v25 = vadd.f32 %v5542_v33, %v5541_v37  ;;  %v5739_v43 = vadd.f32 %v5738_v62, %v5737_v44  ;;  %v5742_v14 = vsel %vm5418_vm4, %v5616_v10, 0.0 }
 0x5a3   :  { %v5740_v56 = vsel %vm5418_vm4, %v5615_v21, 0.0  ;;  %v31337_v21 = vld [vmem:[#allocation29_spill] sm:$0xff] }
 0x5a4   :  { %v5545_v17 = vadd.f32 %v5544_v35, %v5543_v25  ;;  %v5741_v24 = vadd.f32 %v5740_v56, %v5739_v43  ;;  %v31339_v25 = vld [vmem:[#allocation31_spill] sm:$0xff] }
 0x5a5   :  { %v31359_v56 = vld [vmem:[#allocation51_spill] sm:$0xff] }
 0x5a6   :  { %v5546_v11 = vrot.slane %v5545_v17, 4  ;;  %v5743_v61 = vadd.f32 %v5742_v14, %v5741_v24  ;;  %v31350_v24 = vld [vmem:[#allocation40_spill] sm:$0xff] }
 0x5a7   :  { %v31362_v14 = vld [vmem:[#allocation52_spill] sm:$0xff] }
 0x5a8   :  { %v5547_v13 = vadd.f32 %v5546_v11, %v5545_v17  ;;  %v5744_v28 = vrot.slane %v5743_v61, 4  ;;  %v31358_v17 = vld [vmem:[#allocation48_spill] sm:$0xff] }
 0x5aa   :  { %v5548_v42 = vrot.slane %v5547_v13, 2  ;;  %v5745_v59 = vadd.f32 %v5744_v28, %v5743_v61 }
 0x5ac   :  { %v5549_v51 = vadd.f32 %v5548_v42, %v5547_v13  ;;  %v5746_v41 = vrot.slane %v5745_v59, 2 }
 0x5ae   :  { %v5550_v63 = vrot.slane %v5549_v51, 1  ;;  %v5747_v37 = vadd.f32 %v5746_v41, %v5745_v59  ;;  %v31360_v59 = vld [vmem:[#allocation50_spill] sm:$0xff] }
 0x5b0   :  { %v5551_v44 = vadd.f32 %v5550_v63, %v5549_v51  ;;  %v5748_v62 = vrot.slane %v5747_v37, 1  ;;  %v31354_v51 = vld [vmem:[#allocation44_spill] sm:$0xff] }
 0x5b2   :  { %v25784_v33 = vmul.f32 0.001953125, %v5551_v44  ;;  %v5749_v30 = vadd.f32 %v5748_v62, %v5747_v37  ;;  %v31340_v44 = vld [vmem:[#allocation30_spill] sm:$0xff]  ;;  %v31341_v62 = vld [vmem:[#allocation33_spill] sm:$0xff] }
 0x5b3   :  { %v31345_v37 = vld [vmem:[#allocation37_spill] sm:$0xff] }
 0x5b4   :  { %v5750_v10 = vmul.f32 0.001953125, %v5749_v30  ;;  %v5751_v43 = vmul.f32 %v25784_v33, %v25784_v33  ;;  %v31361_v11 = vsub.f32 %v25771_v9, %v25784_v33  ;;  %v31363_v35 = vsub.f32 %v25244_v22, %v25784_v33 }
 0x5b5   :  { %v31364_v46 = vsub.f32 %v25241_v5, %v25784_v33  ;;  %v31365_v9 = vsub.f32 %v25260_v60, %v25784_v33  ;;  %v31366_v41 = vsub.f32 %v25255_v32, %v25784_v33  ;;  %v31369_v61 = vsub.f32 %v25291_v20, %v25784_v33 }
 0x5b6   :  { %v5752_v30 = vsub.f32 %v5750_v10, %v5751_v43  ;;  %v31342_v10 = vld [vmem:[#allocation32_spill] sm:$0xff]  ;;  %v31343_v43 = vld [vmem:[#allocation35_spill] sm:$0xff] }
 0x5b8   :  { %v5817_v28 = vadd.f32 1e-05, %v5752_v30  ;;  %v31344_v30 = vld [vmem:[#allocation34_spill] sm:$0xff] }
 0x5ba   :  { %22159 = vrsqrt.f32 %v5817_v28  ;;  %v31338_v28 = vld [vmem:[#allocation28_spill] sm:$0xff] }
 0x5c4   :  { %v25908_v13 = vpop.eup %22159 }
 0x5c5   :  { %v5881_v63 = vmul.f32 %v25908_v13, %v31361_v11  ;;  %v25928_v42 = vmul.f32 %v25908_v13, %v31363_v35  ;;  %v25934_v47 = vmul.f32 %v25908_v13, %v31364_v46  ;;  %v25940_v11 = vmul.f32 %v25908_v13, %v31365_v9 }
 0x5c6   :  { %v25946_v22 = vmul.f32 %v25908_v13, %v31366_v41  ;;  %v31367_v35 = vsub.f32 %v25275_v58, %v25784_v33  ;;  %v31368_v46 = vsub.f32 %v25269_v0, %v25784_v33  ;;  %v25964_v32 = vmul.f32 %v25908_v13, %v31369_v61 }
 0x5c7   :  { %v5945_v9 = vmax.f32 %v5881_v63, 0.0  ;;  %v31370_v41 = vsub.f32 %v25285_v34, %v25784_v33  ;;  %v31372_v63 = vsub.f32 %v25301_v12, %v25784_v33  ;;  %v31373_v61 = vsub.f32 %v25323_v27, %v25784_v33 }
 0x5c8   :  { %v25952_v5 = vmul.f32 %v25908_v13, %v31367_v35  ;;  %v25958_v60 = vmul.f32 %v25908_v13, %v31368_v46  ;;  %v31371_v35 = vsub.f32 %v25307_v45, %v25784_v33  ;;  %v31374_v46 = vsub.f32 %v25317_v7, %v25784_v33 }
 0x5c9   :  { %v25970_v58 = vmul.f32 %v25908_v13, %v31370_v41  ;;  %v25982_v20 = vmul.f32 %v25908_v13, %v31372_v63  ;;  %v25988_v34 = vmul.f32 %v25908_v13, %v31373_v61  ;;  %v31375_v41 = vsub.f32 %v25339_v26, %v25784_v33  ;;  %6154 = vst.msk [vmem:[#allocation3 + $0x448] sm:$0xff] %vm5418_vm4, %v5945_v9 }
 0x5ca   :  { %v25976_v0 = vmul.f32 %v25908_v13, %v31371_v35  ;;  %v25994_v45 = vmul.f32 %v25908_v13, %v31374_v46  ;;  %v31376_v27 = vsub.f32 %v25333_v40, %v25784_v33  ;;  %v31377_v7 = vsub.f32 %v25355_v23, %v25784_v33 }
 0x5cb   :  { %v26000_v12 = vmul.f32 %v25908_v13, %v31375_v41  ;;  %v31378_v26 = vsub.f32 %v25349_v1, %v25784_v33  ;;  %v31379_v9 = vsub.f32 %v25371_v15, %v25784_v33  ;;  %v31380_v46 = vsub.f32 %v25365_v49, %v25784_v33 }
 0x5cc   :  { %v26007_v35 = vmul.f32 %v25908_v13, %v31376_v27  ;;  %v26013_v63 = vmul.f32 %v25908_v13, %v31377_v7  ;;  %v31381_v41 = vsub.f32 %v25387_v6, %v25784_v33  ;;  %v31382_v27 = vsub.f32 %v25381_v8, %v25784_v33 }
 0x5cd   :  { %v26019_v61 = vmul.f32 %v25908_v13, %v31378_v26  ;;  %v26025_v40 = vmul.f32 %v25908_v13, %v31379_v9  ;;  %v26031_v23 = vmul.f32 %v25908_v13, %v31380_v46  ;;  %v31383_v7 = vsub.f32 %v25403_v18, %v25784_v33 }
 0x5ce   :  { %v26037_v1 = vmul.f32 %v25908_v13, %v31381_v41  ;;  %v26043_v15 = vmul.f32 %v25908_v13, %v31382_v27  ;;  %v31384_v26 = vsub.f32 %v25397_v29, %v25784_v33  ;;  %v31385_v9 = vsub.f32 %v25419_v57, %v25784_v33 }
 0x5cf   :  { %v26049_v49 = vmul.f32 %v25908_v13, %v31383_v7  ;;  %v31386_v46 = vsub.f32 %v25413_v3, %v25784_v33  ;;  %v31387_v41 = vsub.f32 %v25435_v31, %v25784_v33  ;;  %v31388_v27 = vsub.f32 %v25429_v38, %v25784_v33 }
 0x5d0   :  { %v26055_v6 = vmul.f32 %v25908_v13, %v31384_v26  ;;  %v26061_v8 = vmul.f32 %v25908_v13, %v31385_v9  ;;  %v31389_v7 = vsub.f32 %v25451_v16, %v25784_v33  ;;  %v31390_v26 = vsub.f32 %v25445_v2, %v25784_v33 }
 0x5d1   :  { %v26067_v18 = vmul.f32 %v25908_v13, %v31386_v46  ;;  %v26073_v29 = vmul.f32 %v25908_v13, %v31387_v41  ;;  %v26079_v57 = vmul.f32 %v25908_v13, %v31388_v27  ;;  %v31391_v9 = vsub.f32 %v25467_v48, %v25784_v33 }
 0x5d2   :  { %v26085_v3 = vmul.f32 %v25908_v13, %v31389_v7  ;;  %v26091_v31 = vmul.f32 %v25908_v13, %v31390_v26  ;;  %v31392_v46 = vsub.f32 %v25461_v19, %v25784_v33  ;;  %v31393_v41 = vsub.f32 %v25483_v55, %v25784_v33 }
 0x5d3   :  { %v26097_v38 = vmul.f32 %v25908_v13, %v31391_v9  ;;  %v31394_v27 = vsub.f32 %v25477_v54, %v25784_v33  ;;  %v31395_v7 = vsub.f32 %v25505_v39, %v25784_v33  ;;  %v31396_v26 = vsub.f32 %v25499_v36, %v25784_v33 }
 0x5d4   :  { %v26103_v16 = vmul.f32 %v25908_v13, %v31392_v46  ;;  %v26109_v2 = vmul.f32 %v25908_v13, %v31393_v41  ;;  %v31397_v9 = vsub.f32 %v25527_v52, %v25784_v33  ;;  %v31398_v46 = vsub.f32 %v25521_v53, %v25784_v33 }
 0x5d5   :  { %v26115_v48 = vmul.f32 %v25908_v13, %v31394_v27  ;;  %v26121_v19 = vmul.f32 %v25908_v13, %v31395_v7  ;;  %v26127_v55 = vmul.f32 %v25908_v13, %v31396_v26  ;;  %v31399_v41 = vsub.f32 %v25555_v50, %v25784_v33 }
 0x5d6   :  { %v26133_v54 = vmul.f32 %v25908_v13, %v31397_v9  ;;  %v26139_v39 = vmul.f32 %v25908_v13, %v31398_v46  ;;  %v31400_v27 = vsub.f32 %v25547_v4, %v25784_v33  ;;  %v31401_v7 = vsub.f32 %v31337_v21, %v25784_v33 }
 0x5d7   :  { %v26145_v36 = vmul.f32 %v25908_v13, %v31399_v41  ;;  %v31402_v26 = vsub.f32 %v31338_v28, %v25784_v33  ;;  %v31403_v9 = vsub.f32 %v31339_v25, %v25784_v33  ;;  %v31404_v46 = vsub.f32 %v31340_v44, %v25784_v33 }
 0x5d8   :  { %v26151_v52 = vmul.f32 %v25908_v13, %v31400_v27  ;;  %v26157_v53 = vmul.f32 %v25908_v13, %v31401_v7  ;;  %v31405_v41 = vsub.f32 %v31341_v62, %v25784_v33  ;;  %v31406_v27 = vsub.f32 %v31342_v10, %v25784_v33 }
 0x5d9   :  { %v26163_v50 = vmul.f32 %v25908_v13, %v31402_v26  ;;  %v26169_v4 = vmul.f32 %v25908_v13, %v31403_v9  ;;  %v26175_v21 = vmul.f32 %v25908_v13, %v31404_v46  ;;  %v31407_v7 = vsub.f32 %v31343_v43, %v25784_v33  ;;  %v31412_v46 = vld [vmem:[#allocation36_spill] sm:$0xff] }
 0x5da   :  { %v26181_v28 = vmul.f32 %v25908_v13, %v31405_v41  ;;  %v26187_v25 = vmul.f32 %v25908_v13, %v31406_v27  ;;  %v31408_v26 = vsub.f32 %v31344_v30, %v25784_v33  ;;  %v31410_v9 = vsub.f32 %v31345_v37, %v25784_v33  ;;  %v31414_v27 = vld [vmem:[#allocation39_spill] sm:$0xff] }
 0x5db   :  { %v26193_v44 = vmul.f32 %v25908_v13, %v31407_v7  ;;  %v31413_v41 = vsub.f32 %v31412_v46, %v25784_v33  ;;  %v31415_v7 = vsub.f32 %v31414_v27, %v25784_v33 }
 0x5dc   :  { %v26199_v62 = vmul.f32 %v25908_v13, %v31408_v26  ;;  %v26205_v10 = vmul.f32 %v25908_v13, %v31410_v9  ;;  %v31417_v26 = vld [vmem:[#allocation38_spill] sm:$0xff]  ;;  %v31420_v9 = vld [vmem:[#allocation41_spill] sm:$0xff] }
 0x5dd   :  { %v26211_v43 = vmul.f32 %v25908_v13, %v31413_v41  ;;  %v26217_v30 = vmul.f32 %v25908_v13, %v31415_v7  ;;  %v31423_v41 = vsub.f32 %v31350_v24, %v25784_v33  ;;  %v31424_v7 = vld [vmem:[#allocation43_spill] sm:$0xff] }
 0x5de   :  { %31409 = vst [vmem:[#allocation53_spill] sm:$0xff] %v26199_v62  ;;  %31411 = vst [vmem:[#allocation24_spill] sm:$0xff] %v26205_v10  ;;  %v31418_v62 = vsub.f32 %v31417_v26, %v25784_v33  ;;  %v31421_v10 = vsub.f32 %v31420_v9, %v25784_v33 }
 0x5df   :  { %31416 = vst [vmem:[#allocation25_spill] sm:$0xff] %v26217_v30  ;;  %v26235_v27 = vmul.f32 %v25908_v13, %v31423_v41  ;;  %v31425_v30 = vsub.f32 %v31424_v7, %v25784_v33  ;;  %v31433_v41 = vsub.f32 %v31354_v51, %v25784_v33 }
 0x5e0   :  { %v26223_v37 = vmul.f32 %v25908_v13, %v31418_v62  ;;  %v26229_v46 = vmul.f32 %v25908_v13, %v31421_v10  ;;  %v31427_v62 = vld [vmem:[#allocation42_spill] sm:$0xff]  ;;  %v31430_v10 = vld [vmem:[#allocation45_spill] sm:$0xff] }
 0x5e1   :  { %v26241_v26 = vmul.f32 %v25908_v13, %v31425_v30  ;;  %v26259_v7 = vmul.f32 %v25908_v13, %v31433_v41  ;;  %v31434_v30 = vld [vmem:[#allocation47_spill] sm:$0xff]  ;;  %v31440_v41 = vsub.f32 %v31358_v17, %v25784_v33 }
 0x5e2   :  { %31419 = vst [vmem:[#allocation56_spill] sm:$0xff] %v26223_v37  ;;  %31422 = vst [vmem:[#allocation57_spill] sm:$0xff] %v26229_v46  ;;  %v31428_v37 = vsub.f32 %v31427_v62, %v25784_v33  ;;  %v31431_v46 = vsub.f32 %v31430_v10, %v25784_v33 }
 0x5e3   :  { %31426 = vst [vmem:[#allocation58_spill] sm:$0xff] %v26241_v26  ;;  %v31435_v26 = vsub.f32 %v31434_v30, %v25784_v33  ;;  %v26283_v30 = vmul.f32 %v25908_v13, %v31440_v41  ;;  %v5883_v41 = vmax.f32 %v25928_v42, 0.0  ;;  %v5894_v42 = vmax.f32 %v25994_v45, 0.0 }
 0x5e4   :  { %v26247_v9 = vmul.f32 %v25908_v13, %v31428_v37  ;;  %v26253_v24 = vmul.f32 %v25908_v13, %v31431_v46  ;;  %v31436_v37 = vld [vmem:[#allocation46_spill] sm:$0xff]  ;;  %v31438_v46 = vld [vmem:[#allocation49_spill] sm:$0xff]  ;;  %v5905_v45 = vmax.f32 %v26061_v8, 0.0  ;;  %v5916_v8 = vmax.f32 %v26127_v55, 0.0 }
 0x5e5   :  { %v26265_v62 = vmul.f32 %v25908_v13, %v31435_v26  ;;  %31441 = vst [vmem:[#allocation61_spill] sm:$0xff] %v26283_v30  ;;  %v31442_v26 = vsub.f32 %v31359_v56, %v25784_v33  ;;  %v5884_v30 = vmax.f32 %v25934_v47, 0.0  ;;  %v5885_v56 = vmax.f32 %v25940_v11, 0.0  ;;  %6092 = vst.msk [vmem:[#allocation3 + $0x28] sm:$0xff] %vm5418_vm4, %v5883_v41 }
 0x5e6   :  { %31429 = vst [vmem:[#allocation59_spill] sm:$0xff] %v26247_v9  ;;  %31432 = vst [vmem:[#allocation60_spill] sm:$0xff] %v26253_v24  ;;  %v31437_v9 = vsub.f32 %v31436_v37, %v25784_v33  ;;  %v31439_v24 = vsub.f32 %v31438_v46, %v25784_v33  ;;  %v5893_v47 = vmax.f32 %v25988_v34, 0.0  ;;  %v5896_v11 = vmax.f32 %v26007_v35, 0.0 }
 0x5e7   :  { %v26289_v37 = vmul.f32 %v25908_v13, %v31442_v26  ;;  %v5886_v26 = vmax.f32 %v25946_v22, 0.0  ;;  %6093 = vst.msk [vmem:[#allocation3 + $0x30] sm:$0xff] %vm5418_vm4, %v5884_v30  ;;  %6094 = vst.msk [vmem:[#allocation3 + $0x48] sm:$0xff] %vm5418_vm4, %v5885_v56  ;;  %v5897_v22 = vmax.f32 %v26013_v63, 0.0  ;;  %v5904_v34 = vmax.f32 %v26055_v6, 0.0 }
 0x5e8   :  { %v26271_v10 = vmul.f32 %v25908_v13, %v31437_v9  ;;  %v26277_v51 = vmul.f32 %v25908_v13, %v31439_v24  ;;  %v31444_v9 = vsub.f32 %v31360_v59, %v25784_v33  ;;  %v31446_v24 = vsub.f32 %v31362_v14, %v25784_v33  ;;  %6102 = vst.msk [vmem:[#allocation3 + $0xc8] sm:$0xff] %vm5418_vm4, %v5893_v47 }
 0x5e9   :  { %31443 = vst [vmem:[#allocation62_spill] sm:$0xff] %v26289_v37  ;;  %v5887_v37 = vmax.f32 %v25952_v5, 0.0  ;;  %v5888_v59 = vmax.f32 %v25958_v60, 0.0  ;;  %v5891_v33 = vmax.f32 %v25976_v0, 0.0  ;;  %v5892_v14 = vmax.f32 %v25982_v20, 0.0  ;;  %6095 = vst.msk [vmem:[#allocation3 + $0x50] sm:$0xff] %vm5418_vm4, %v5886_v26 }
 0x5ea   :  { %v26295_v46 = vmul.f32 %v25908_v13, %v31444_v9  ;;  %v26301_v17 = vmul.f32 %v25908_v13, %v31446_v24  ;;  %v5889_v9 = vmax.f32 %v25964_v32, 0.0  ;;  %v5895_v13 = vmax.f32 %v26000_v12, 0.0  ;;  %6103 = vst.msk [vmem:[#allocation3 + $0xd0] sm:$0xff] %vm5418_vm4, %v5894_v42  ;;  %6105 = vst.msk [vmem:[#allocation3 + $0xf0] sm:$0xff] %vm5418_vm4, %v5896_v11 }
 0x5eb   :  { %6096 = vst.msk [vmem:[#allocation3 + $0x68] sm:$0xff] %vm5418_vm4, %v5887_v37  ;;  %6097 = vst.msk [vmem:[#allocation3 + $0x70] sm:$0xff] %vm5418_vm4, %v5888_v59  ;;  %v5898_v5 = vmax.f32 %v26019_v61, 0.0  ;;  %v5899_v60 = vmax.f32 %v26025_v40, 0.0  ;;  %v5900_v32 = vmax.f32 %v26031_v23, 0.0  ;;  %v5902_v0 = vmax.f32 %v26043_v15, 0.0 }
 0x5ec   :  { %31445 = vst [vmem:[#allocation63_spill] sm:$0xff] %v26295_v46  ;;  %v5890_v46 = vmax.f32 %v25970_v58, 0.0  ;;  %6098 = vst.msk [vmem:[#allocation3 + $0x88] sm:$0xff] %vm5418_vm4, %v5889_v9  ;;  %v5901_v58 = vmax.f32 %v26037_v1, 0.0  ;;  %v5903_v20 = vmax.f32 %v26049_v49, 0.0  ;;  %v5906_v12 = vmax.f32 %v26067_v18, 0.0 }
 0x5ed   :  { %6100 = vst.msk [vmem:[#allocation3 + $0xa8] sm:$0xff] %vm5418_vm4, %v5891_v33  ;;  %6101 = vst.msk [vmem:[#allocation3 + $0xb0] sm:$0xff] %vm5418_vm4, %v5892_v14  ;;  %v5907_v35 = vmax.f32 %v26073_v29, 0.0  ;;  %v5908_v63 = vmax.f32 %v26079_v57, 0.0  ;;  %v5909_v61 = vmax.f32 %v26085_v3, 0.0  ;;  %v5910_v40 = vmax.f32 %v26091_v31, 0.0 }
 0x5ee   :  { %6099 = vst.msk [vmem:[#allocation3 + $0x90] sm:$0xff] %vm5418_vm4, %v5890_v46  ;;  %6104 = vst.msk [vmem:[#allocation3 + $0xe8] sm:$0xff] %vm5418_vm4, %v5895_v13  ;;  %v5911_v23 = vmax.f32 %v26097_v38, 0.0  ;;  %v5912_v1 = vmax.f32 %v26103_v16, 0.0  ;;  %v5913_v15 = vmax.f32 %v26109_v2, 0.0  ;;  %v5914_v49 = vmax.f32 %v26115_v48, 0.0 }
 0x5ef   :  { %6106 = vst.msk [vmem:[#allocation3 + $0x108] sm:$0xff] %vm5418_vm4, %v5897_v22  ;;  %6107 = vst.msk [vmem:[#allocation3 + $0x110] sm:$0xff] %vm5418_vm4, %v5898_v5  ;;  %v5915_v6 = vmax.f32 %v26121_v19, 0.0  ;;  %v5917_v18 = vmax.f32 %v26133_v54, 0.0  ;;  %v5918_v29 = vmax.f32 %v26139_v39, 0.0  ;;  %v5919_v57 = vmax.f32 %v26145_v36, 0.0 }
 0x5f0   :  { %6108 = vst.msk [vmem:[#allocation3 + $0x128] sm:$0xff] %vm5418_vm4, %v5899_v60  ;;  %6109 = vst.msk [vmem:[#allocation3 + $0x130] sm:$0xff] %vm5418_vm4, %v5900_v32  ;;  %v5920_v3 = vmax.f32 %v26151_v52, 0.0  ;;  %v26371_v31 = vld [vmem:[#allocation3 + $0x28] sm:$0xff]  ;;  %v26373_v38 = vld [vmem:[#allocation3 + $0x30] sm:$0xff]  ;;  %v5921_v16 = vmax.f32 %v26157_v53, 0.0 }
 0x5f1   :  { %6110 = vst.msk [vmem:[#allocation3 + $0x148] sm:$0xff] %vm5418_vm4, %v5901_v58  ;;  %6111 = vst.msk [vmem:[#allocation3 + $0x150] sm:$0xff] %vm5418_vm4, %v5902_v0  ;;  %v5922_v2 = vmax.f32 %v26163_v50, 0.0  ;;  %v5923_v48 = vmax.f32 %v26169_v4, 0.0  ;;  %v5924_v19 = vmax.f32 %v26175_v21, 0.0  ;;  %19521 = vmatprep.mubr.msk.f32.mxu1 %vm5418_vm4, %v26371_v31  ;;  %v5925_v55 = vmax.f32 %v26181_v28, 0.0 }
 0x5f2   :  { %6112 = vst.msk [vmem:[#allocation3 + $0x168] sm:$0xff] %vm5418_vm4, %v5903_v20  ;;  %6113 = vst.msk [vmem:[#allocation3 + $0x170] sm:$0xff] %vm5418_vm4, %v5904_v34  ;;  %v5926_v54 = vmax.f32 %v26187_v25, 0.0  ;;  %v5927_v39 = vmax.f32 %v26193_v44, 0.0  ;;  %v31448_v36 = vld [vmem:[#allocation53_spill] sm:$0xff]  ;;  %19522 = vmatmul.mubr.msk.f32.gmra.mrb[2].mxu1 %vm5418_vm4, %v26373_v38  ;;  %v26395_v53 = vld [vmem:[#allocation3 + $0x48] sm:$0xff] }
 0x5f3   :  { %6114 = vst.msk [vmem:[#allocation3 + $0x188] sm:$0xff] %vm5418_vm4, %v5905_v45  ;;  %6115 = vst.msk [vmem:[#allocation3 + $0x190] sm:$0xff] %vm5418_vm4, %v5906_v12  ;;  %v5928_v52 = vmax.f32 %v31448_v36, 0.0  ;;  %v31449_v50 = vld [vmem:[#allocation24_spill] sm:$0xff]  ;;  %v5930_v21 = vmax.f32 %v26211_v43, 0.0  ;;  %v31450_v28 = vld [vmem:[#allocation25_spill] sm:$0xff]  ;;  %19524 = vmatprep.mubr.msk.f32.mxu1 %vm5418_vm4, %v26395_v53 }
 0x5f4   :  { %6116 = vst.msk [vmem:[#allocation3 + $0x1a8] sm:$0xff] %vm5418_vm4, %v5907_v35  ;;  %6117 = vst.msk [vmem:[#allocation3 + $0x1b0] sm:$0xff] %vm5418_vm4, %v5908_v63  ;;  %v5929_v4 = vmax.f32 %v31449_v50, 0.0  ;;  %v5931_v25 = vmax.f32 %v31450_v28, 0.0  ;;  %v31451_v44 = vld [vmem:[#allocation56_spill] sm:$0xff]  ;;  %v31452_v37 = vld [vmem:[#allocation57_spill] sm:$0xff] }
 0x5f5   :  { %6118 = vst.msk [vmem:[#allocation3 + $0x1c8] sm:$0xff] %vm5418_vm4, %v5909_v61  ;;  %6119 = vst.msk [vmem:[#allocation3 + $0x1d0] sm:$0xff] %vm5418_vm4, %v5910_v40  ;;  %v5932_v30 = vmax.f32 %v31451_v44, 0.0  ;;  %v5933_v46 = vmax.f32 %v31452_v37, 0.0  ;;  %v5934_v24 = vmax.f32 %v26235_v27, 0.0  ;;  %v31453_v43 = vld [vmem:[#allocation58_spill] sm:$0xff] }
 0x5f6   :  { %6120 = vst.msk [vmem:[#allocation3 + $0x1e8] sm:$0xff] %vm5418_vm4, %v5911_v23  ;;  %6121 = vst.msk [vmem:[#allocation3 + $0x1f0] sm:$0xff] %vm5418_vm4, %v5912_v1  ;;  %v5935_v41 = vmax.f32 %v31453_v43, 0.0  ;;  %v31454_v56 = vld [vmem:[#allocation59_spill] sm:$0xff]  ;;  %v31455_v9 = vld [vmem:[#allocation60_spill] sm:$0xff]  ;;  %v5938_v27 = vmax.f32 %v26259_v7, 0.0 }
 0x5f7   :  { %31447 = vst [vmem:[#allocation64_spill] sm:$0xff] %v26371_v31  ;;  %6122 = vst.msk [vmem:[#allocation3 + $0x208] sm:$0xff] %vm5418_vm4, %v5913_v15  ;;  %v5936_v26 = vmax.f32 %v31454_v56, 0.0  ;;  %v15083_v59 = vld [vmem:[%s30351_s3 + $0x40] sm:$0xff]  ;;  %v5937_v33 = vmax.f32 %v31455_v9, 0.0  ;;  %v5939_v14 = vmax.f32 %v26265_v62, 0.0 }
 0x5f8   :  { %6123 = vst.msk [vmem:[#allocation3 + $0x210] sm:$0xff] %vm5418_vm4, %v5914_v49  ;;  %6124 = vst.msk [vmem:[#allocation3 + $0x268] sm:$0xff] %vm5418_vm4, %v5915_v6  ;;  %v5940_v47 = vmax.f32 %v26271_v10, 0.0  ;;  %v26426_v42 = vld [vmem:[#allocation3 + $0x50] sm:$0xff]  ;;  %v15084_v13 = vld [vmem:[%s30351_s3 + $0x48] sm:$0xff]  ;;  %v5941_v7 = vmax.f32 %v26277_v51, 0.0 }
 0x5f9   :  { %6125 = vst.msk [vmem:[#allocation3 + $0x270] sm:$0xff] %vm5418_vm4, %v5916_v8  ;;  %6126 = vst.msk [vmem:[#allocation3 + $0x288] sm:$0xff] %vm5418_vm4, %v5917_v18  ;;  %v31456_v11 = vld [vmem:[#allocation61_spill] sm:$0xff]  ;;  %v31457_v22 = vld [vmem:[#allocation62_spill] sm:$0xff]  ;;  %19525 = vmatmul.mubr.msk.f32.gmra.mrb[4].mxu1 %vm5418_vm4, %v26426_v42  ;;  %v5946_v51 = vmax.f32 %v26301_v17, 0.0  ;;  %v26454_v17 = vpack.c.bf16 %v15084_v13, %v15083_v59 }
 0x5fa   :  { %6127 = vst.msk [vmem:[#allocation3 + $0x290] sm:$0xff] %vm5418_vm4, %v5918_v29  ;;  %6128 = vst.msk [vmem:[#allocation3 + $0x2a8] sm:$0xff] %vm5418_vm4, %v5919_v57  ;;  %v5942_v62 = vmax.f32 %v31456_v11, 0.0  ;;  %v5943_v10 = vmax.f32 %v31457_v22, 0.0  ;;  %v31458_v5 = vld [vmem:[#allocation63_spill] sm:$0xff]  ;;  %v31461_v20 = vld [vmem:[#allocation26_spill] sm:$0xff] }
 0x5fb   :  { %6129 = vst.msk [vmem:[#allocation3 + $0x2b0] sm:$0xff] %vm5418_vm4, %v5920_v3  ;;  %6130 = vst.msk [vmem:[#allocation3 + $0x2c8] sm:$0xff] %vm5418_vm4, %v5921_v16  ;;  %v5944_v60 = vmax.f32 %v31458_v5, 0.0  ;;  %v26441_v32 = vld [vmem:[#allocation3 + $0x68] sm:$0xff]  ;;  %v31462_v34 = vrot.slane %v31461_v20, 7  ;;  %v26464_v12 = vld [vmem:[#allocation3 + $0x70] sm:$0xff]  ;;  %20474 = vmatprep.subr.bf16.mxu1 %v26454_v17 }
 0x5fc   :  { %6131 = vst.msk [vmem:[#allocation3 + $0x2d0] sm:$0xff] %vm5418_vm4, %v5922_v2  ;;  %6132 = vst.msk [vmem:[#allocation3 + $0x2e8] sm:$0xff] %vm5418_vm4, %v5923_v48  ;;  %19527 = vmatprep.mubr.msk.f32.mxu1 %vm5418_vm4, %v26441_v32  ;;  %v31459_v58 = vld [vmem:[#allocation27_spill] sm:$0xff]  ;;  %v26473_v63 = vld [vmem:[#allocation3 + $0x90] sm:$0xff] }
 0x5fd   :  { %6133 = vst.msk [vmem:[#allocation3 + $0x2f0] sm:$0xff] %vm5418_vm4, %v5924_v19  ;;  %6134 = vst.msk [vmem:[#allocation3 + $0x308] sm:$0xff] %vm5418_vm4, %v5925_v55  ;;  %v31460_v0 = vrot.slane %v31459_v58, 7  ;;  %19528 = vmatmul.mubr.msk.f32.gmra.mrb[6].mxu1 %vm5418_vm4, %v26464_v12  ;;  %v26468_v35 = vld [vmem:[#allocation3 + $0x88] sm:$0xff]  ;;  %v26481_v40 = vld [vmem:[#allocation3 + $0xb0] sm:$0xff] }
 0x5fe   :  { %6135 = vst.msk [vmem:[#allocation3 + $0x310] sm:$0xff] %vm5418_vm4, %v5926_v54  ;;  %6136 = vst.msk [vmem:[#allocation3 + $0x328] sm:$0xff] %vm5418_vm4, %v5927_v39  ;;  %19530 = vmatprep.mubr.msk.f32.mxu1 %vm5418_vm4, %v26468_v35  ;;  %v26477_v61 = vld [vmem:[#allocation3 + $0xa8] sm:$0xff]  ;;  %v26489_v1 = vld [vmem:[#allocation3 + $0xd0] sm:$0xff] }
 0x5ff   :  { %6137 = vst.msk [vmem:[#allocation3 + $0x330] sm:$0xff] %vm5418_vm4, %v5928_v52  ;;  %6138 = vst.msk [vmem:[#allocation3 + $0x348] sm:$0xff] %vm5418_vm4, %v5929_v4  ;;  %v26461_v45 = vsel %vm547_vm2, %v31462_v34, %v31460_v0  ;;  %v26485_v23 = vld [vmem:[#allocation3 + $0xc8] sm:$0xff]  ;;  %v26497_v49 = vld [vmem:[#allocation3 + $0xf0] sm:$0xff] }
 0x600   :  { %6139 = vst.msk [vmem:[#allocation3 + $0x350] sm:$0xff] %vm5418_vm4, %v5930_v21  ;;  %6140 = vst.msk [vmem:[#allocation3 + $0x368] sm:$0xff] %vm5418_vm4, %v5931_v25  ;;  %v26493_v15 = vld [vmem:[#allocation3 + $0xe8] sm:$0xff]  ;;  %v26505_v8 = vld [vmem:[#allocation3 + $0x110] sm:$0xff] }
 0x601   :  { %6141 = vst.msk [vmem:[#allocation3 + $0x370] sm:$0xff] %vm5418_vm4, %v5932_v30  ;;  %6142 = vst.msk [vmem:[#allocation3 + $0x388] sm:$0xff] %vm5418_vm4, %v5933_v46  ;;  %19531 = vmatmul.mubr.msk.f32.gmra.mrb[8].mxu1 %vm5418_vm4, %v26473_v63  ;;  %v26501_v6 = vld [vmem:[#allocation3 + $0x108] sm:$0xff]  ;;  %v26513_v29 = vld [vmem:[#allocation3 + $0x130] sm:$0xff] }
 0x602   :  { %6143 = vst.msk [vmem:[#allocation3 + $0x390] sm:$0xff] %vm5418_vm4, %v5934_v24  ;;  %6144 = vst.msk [vmem:[#allocation3 + $0x3a8] sm:$0xff] %vm5418_vm4, %v5935_v41  ;;  %19533 = vmatprep.mubr.msk.f32.mxu1 %vm5418_vm4, %v26477_v61  ;;  %v26509_v18 = vld [vmem:[#allocation3 + $0x128] sm:$0xff]  ;;  %v26521_v3 = vld [vmem:[#allocation3 + $0x150] sm:$0xff] }
 0x603   :  { %6145 = vst.msk [vmem:[#allocation3 + $0x3b0] sm:$0xff] %vm5418_vm4, %v5936_v26  ;;  %6146 = vst.msk [vmem:[#allocation3 + $0x3c8] sm:$0xff] %vm5418_vm4, %v5937_v33  ;;  %v26517_v57 = vld [vmem:[#allocation3 + $0x148] sm:$0xff]  ;;  %v26529_v2 = vld [vmem:[#allocation3 + $0x170] sm:$0xff] }
 0x604   :  { %6147 = vst.msk [vmem:[#allocation3 + $0x3d0] sm:$0xff] %vm5418_vm4, %v5938_v27  ;;  %6148 = vst.msk [vmem:[#allocation3 + $0x3e8] sm:$0xff] %vm5418_vm4, %v5939_v14  ;;  %v26525_v16 = vld [vmem:[#allocation3 + $0x168] sm:$0xff]  ;;  %v26537_v19 = vld [vmem:[#allocation3 + $0x190] sm:$0xff] }
 0x605   :  { %6149 = vst.msk [vmem:[#allocation3 + $0x3f0] sm:$0xff] %vm5418_vm4, %v5940_v47  ;;  %6150 = vst.msk [vmem:[#allocation3 + $0x408] sm:$0xff] %vm5418_vm4, %v5941_v7  ;;  %19534 = vmatmul.mubr.msk.f32.gmra.mrb[10].mxu1 %vm5418_vm4, %v26481_v40  ;;  %v26533_v48 = vld [vmem:[#allocation3 + $0x188] sm:$0xff]  ;;  %v26545_v54 = vld [vmem:[#allocation3 + $0x1b0] sm:$0xff] }
 0x606   :  { %6151 = vst.msk [vmem:[#allocation3 + $0x410] sm:$0xff] %vm5418_vm4, %v5942_v62  ;;  %6152 = vst.msk [vmem:[#allocation3 + $0x428] sm:$0xff] %vm5418_vm4, %v5943_v10  ;;  %19536 = vmatprep.mubr.msk.f32.mxu1 %vm5418_vm4, %v26485_v23  ;;  %v26541_v55 = vld [vmem:[#allocation3 + $0x1a8] sm:$0xff]  ;;  %v26553_v36 = vld [vmem:[#allocation3 + $0x1d0] sm:$0xff] }
 0x607   :  { %6153 = vst.msk [vmem:[#allocation3 + $0x430] sm:$0xff] %vm5418_vm4, %v5944_v60  ;;  %6155 = vst.msk [vmem:[#allocation3 + $0x450] sm:$0xff] %vm5418_vm4, %v5946_v51  ;;  %v26549_v39 = vld [vmem:[#allocation3 + $0x1c8] sm:$0xff]  ;;  %v26563_v4 = vld [vmem:[#allocation3 + $0x1f0] sm:$0xff] }
 0x608   :  { %v26557_v52 = vld [vmem:[#allocation3 + $0x1e8] sm:$0xff]  ;;  %v26569_v21 = vld [vmem:[#allocation3 + $0x250] sm:$0xff]  ;;  %v6156_v58 = vld [vmem:[#allocation3] sm:$0xff] }
 0x609   :  { %19537 = vmatmul.mubr.msk.f32.gmra.mrb[12].mxu1 %vm5418_vm4, %v26489_v1  ;;  %v26561_v50 = vld [vmem:[#allocation3 + $0x248] sm:$0xff]  ;;  %v26577_v25 = vld [vmem:[#allocation3 + $0x270] sm:$0xff]  ;;  %v6396_v34 = vrot.slane %v6156_v58, 7 }
 0x60a   :  { %19539 = vmatprep.mubr.msk.f32.mxu1 %vm5418_vm4, %v26493_v15  ;;  %v26573_v28 = vld [vmem:[#allocation3 + $0x268] sm:$0xff]  ;;  %v26585_v30 = vld [vmem:[#allocation3 + $0x290] sm:$0xff] }
 0x60b   :  { %v26581_v44 = vld [vmem:[#allocation3 + $0x288] sm:$0xff]  ;;  %v26593_v46 = vld [vmem:[#allocation3 + $0x2b0] sm:$0xff] }
 0x60c   :  { %v26589_v37 = vld [vmem:[#allocation3 + $0x2a8] sm:$0xff]  ;;  %v26601_v43 = vld [vmem:[#allocation3 + $0x2d0] sm:$0xff] }
 0x60d   :  { %19540 = vmatmul.mubr.msk.f32.gmra.mrb[14].mxu1 %vm5418_vm4, %v26497_v49  ;;  %v26597_v24 = vld [vmem:[#allocation3 + $0x2c8] sm:$0xff]  ;;  %v26609_v56 = vld [vmem:[#allocation3 + $0x2f0] sm:$0xff] }
 0x60e   :  { %19542 = vmatprep.mubr.msk.f32.mxu1 %vm5418_vm4, %v26501_v6  ;;  %v26605_v41 = vld [vmem:[#allocation3 + $0x2e8] sm:$0xff]  ;;  %v26617_v59 = vld [vmem:[#allocation3 + $0x310] sm:$0xff] }
 0x60f   :  { %v26613_v26 = vld [vmem:[#allocation3 + $0x308] sm:$0xff]  ;;  %v26625_v33 = vld [vmem:[#allocation3 + $0x330] sm:$0xff] }
 0x610   :  { %v26621_v9 = vld [vmem:[#allocation3 + $0x328] sm:$0xff]  ;;  %v26633_v14 = vld [vmem:[#allocation3 + $0x350] sm:$0xff] }
 0x611   :  { %19543 = vmatmul.mubr.msk.f32.gmra.mrb[16].mxu1 %vm5418_vm4, %v26505_v8  ;;  %v26629_v27 = vld [vmem:[#allocation3 + $0x348] sm:$0xff]  ;;  %31463 = vst [vmem:[#allocation65_spill] sm:$0xff] %v26633_v14  ;;  %v26641_v13 = vld [vmem:[#allocation3 + $0x370] sm:$0xff] }
 0x612   :  { %19545 = vmatprep.mubr.msk.f32.mxu1 %vm5418_vm4, %v26509_v18  ;;  %v26637_v47 = vld [vmem:[#allocation3 + $0x368] sm:$0xff]  ;;  %31465 = vst [vmem:[#allocation67_spill] sm:$0xff] %v26641_v13  ;;  %v26649_v11 = vld [vmem:[#allocation3 + $0x390] sm:$0xff] }
 0x613   :  { %31464 = vst [vmem:[#allocation66_spill] sm:$0xff] %v26637_v47  ;;  %v26645_v7 = vld [vmem:[#allocation3 + $0x388] sm:$0xff]  ;;  %31467 = vst [vmem:[#allocation69_spill] sm:$0xff] %v26649_v11  ;;  %v26657_v22 = vld [vmem:[#allocation3 + $0x3b0] sm:$0xff] }
 0x614   :  { %31466 = vst [vmem:[#allocation68_spill] sm:$0xff] %v26645_v7  ;;  %v26653_v62 = vld [vmem:[#allocation3 + $0x3a8] sm:$0xff]  ;;  %31469 = vst [vmem:[#allocation71_spill] sm:$0xff] %v26657_v22  ;;  %v26665_v5 = vld [vmem:[#allocation3 + $0x3d0] sm:$0xff] }
 0x615   :  { %19546 = vmatmul.mubr.msk.f32.gmra.mrb[18].mxu1 %vm5418_vm4, %v26513_v29  ;;  %31468 = vst [vmem:[#allocation70_spill] sm:$0xff] %v26653_v62  ;;  %v26661_v10 = vld [vmem:[#allocation3 + $0x3c8] sm:$0xff]  ;;  %31471 = vst [vmem:[#allocation73_spill] sm:$0xff] %v26665_v5  ;;  %v26673_v51 = vld [vmem:[#allocation3 + $0x3f0] sm:$0xff] }
 0x616   :  { %19548 = vmatprep.mubr.msk.f32.mxu1 %vm5418_vm4, %v26517_v57  ;;  %31470 = vst [vmem:[#allocation72_spill] sm:$0xff] %v26661_v10  ;;  %v26669_v60 = vld [vmem:[#allocation3 + $0x3e8] sm:$0xff]  ;;  %31473 = vst [vmem:[#allocation75_spill] sm:$0xff] %v26673_v51 }
 0x617   :  { %31472 = vst [vmem:[#allocation74_spill] sm:$0xff] %v26669_v60  ;;  %v26677_v0 = vld [vmem:[#allocation3 + $0x408] sm:$0xff] }
 0x618   :  { %31474 = vst [vmem:[#allocation76_spill] sm:$0xff] %v26677_v0 }
 0x619   :  { %19549 = vmatmul.mubr.msk.f32.gmra.mrb[20].mxu1 %vm5418_vm4, %v26521_v3 }
 0x61a   :  { %19551 = vmatprep.mubr.msk.f32.mxu1 %vm5418_vm4, %v26525_v16 }
 0x61d   :  { %19552 = vmatmul.mubr.msk.f32.gmra.mrb[22].mxu1 %vm5418_vm4, %v26529_v2 }
 0x61e   :  { %19554 = vmatprep.mubr.msk.f32.mxu1 %vm5418_vm4, %v26533_v48 }
 0x621   :  { %19555 = vmatmul.mubr.msk.f32.gmra.mrb[24].mxu1 %vm5418_vm4, %v26537_v19 }
 0x622   :  { %19557 = vmatprep.mubr.msk.f32.mxu1 %vm5418_vm4, %v26541_v55 }
 0x625   :  { %19558 = vmatmul.mubr.msk.f32.gmra.mrb[26].mxu1 %vm5418_vm4, %v26545_v54 }
 0x626   :  { %19560 = vmatprep.mubr.msk.f32.mxu1 %vm5418_vm4, %v26549_v39 }
 0x629   :  { %19561 = vmatmul.mubr.msk.f32.gmra.mrb[28].mxu1 %vm5418_vm4, %v26553_v36 }
 0x62a   :  { %19563 = vmatprep.mubr.msk.f32.mxu1 %vm5418_vm4, %v26557_v52 }
 0x62d   :  { %19564 = vmatmul.mubr.msk.f32.gmra.mrb[30].mxu1 %vm5418_vm4, %v26563_v4 }
 0x62e   :  { %19566 = vmatprep.mubr.msk.f32.mxu1 %vm5418_vm4, %v26561_v50 }
 0x631   :  { %19567 = vmatmul.mubr.msk.f32.gmra.mrb[32].mxu1 %vm5418_vm4, %v26569_v21 }
 0x632   :  { %19569 = vmatprep.mubr.msk.f32.mxu1 %vm5418_vm4, %v26573_v28 }
 0x635   :  { %19570 = vmatmul.mubr.msk.f32.gmra.mrb[34].mxu1 %vm5418_vm4, %v26577_v25 }
 0x636   :  { %19572 = vmatprep.mubr.msk.f32.mxu1 %vm5418_vm4, %v26581_v44 }
 0x639   :  { %19573 = vmatmul.mubr.msk.f32.gmra.mrb[36].mxu1 %vm5418_vm4, %v26585_v30 }
 0x63a   :  { %19575 = vmatprep.mubr.msk.f32.mxu1 %vm5418_vm4, %v26589_v37 }
 0x63d   :  { %19576 = vmatmul.mubr.msk.f32.gmra.mrb[38].mxu1 %vm5418_vm4, %v26593_v46 }
 0x63e   :  { %19578 = vmatprep.mubr.msk.f32.mxu1 %vm5418_vm4, %v26597_v24 }
 0x641   :  { %19579 = vmatmul.mubr.msk.f32.gmra.mrb[40].mxu1 %vm5418_vm4, %v26601_v43 }
 0x642   :  { %19581 = vmatprep.mubr.msk.f32.mxu1 %vm5418_vm4, %v26605_v41 }
 0x645   :  { %19582 = vmatmul.mubr.msk.f32.gmra.mrb[42].mxu1 %vm5418_vm4, %v26609_v56 }
 0x646   :  { %19584 = vmatprep.mubr.msk.f32.mxu1 %vm5418_vm4, %v26613_v26 }
 0x649   :  { %19585 = vmatmul.mubr.msk.f32.gmra.mrb[44].mxu1 %vm5418_vm4, %v26617_v59 }
 0x64a   :  { %19587 = vmatprep.mubr.msk.f32.mxu1 %vm5418_vm4, %v26621_v9 }
 0x64d   :  { %19588 = vmatmul.mubr.msk.f32.gmra.mrb[46].mxu1 %vm5418_vm4, %v26625_v33 }
 0x64e   :  { %19590 = vmatprep.mubr.msk.f32.mxu1 %vm5418_vm4, %v26629_v27 }
 0x651   :  { %19591 = vmatmul.mubr.msk.f32.gmra.mrb[48].mxu1 %vm5418_vm4, %v26633_v14  ;;  %v15151_v14 = vld [vmem:[%s30351_s3 + $0x60] sm:$0xff] }
 0x652   :  { %19593 = vmatprep.mubr.msk.f32.mxu1 %vm5418_vm4, %v26637_v47  ;;  %v6404_v47 = vrot.slane %v26373_v38, 7 }
 0x655   :  { %19594 = vmatmul.mubr.msk.f32.gmra.mrb[50].mxu1 %vm5418_vm4, %v26641_v13 }
 0x656   :  { %19596 = vmatprep.mubr.msk.f32.mxu1 %vm5418_vm4, %v26645_v7  ;;  %v26695_v7 = vld [vmem:[#allocation3 + $0x430] sm:$0xff] }
 0x659   :  { %19597 = vmatmul.mubr.msk.f32.gmra.mrb[52].mxu1 %vm5418_vm4, %v26649_v11  ;;  %v26688_v11 = vld [vmem:[#allocation3 + $0x428] sm:$0xff] }
 0x65a   :  { %19599 = vmatprep.mubr.msk.f32.mxu1 %vm5418_vm4, %v26653_v62  ;;  %v26683_v62 = vld [vmem:[#allocation3 + $0x10] sm:$0xff]  ;;  %31476 = vst [vmem:[#allocation77_spill] sm:$0xff] %v26688_v11 }
 0x65d   :  { %19600 = vmatmul.mubr.msk.f32.gmra.mrb[54].mxu1 %vm5418_vm4, %v26657_v22 }
 0x65e   :  { %19602 = vmatprep.mubr.msk.f32.mxu1 %vm5418_vm4, %v26661_v10  ;;  %v26681_v10 = vld [vmem:[#allocation3 + $0x410] sm:$0xff] }
 0x65f   :  { %31475 = vst [vmem:[#allocation19_spill] sm:$0xff] %v26681_v10 }
 0x661   :  { %19603 = vmatmul.mubr.msk.f32.gmra.mrb[56].mxu1 %vm5418_vm4, %v26665_v5  ;;  %v22223_v5 = vld [vmem:[#allocation3 + $0x8] sm:$0xff] }
 0x662   :  { %19605 = vmatprep.mubr.msk.f32.mxu1 %vm5418_vm4, %v26669_v60  ;;  %v7623_v22 = vrot.slane %v22223_v5, 1  ;;  %v15085_v5 = vld [vmem:[%s30351_s3 + $0x50] sm:$0xff]  ;;  %v15086_v60 = vld [vmem:[%s30351_s3 + $0x58] sm:$0xff] }
 0x663   :  { %v20477_v13 = vpack.c.bf16 %v15086_v60, %v15085_v5  ;;  %v6168_v60 = vld [vmem:[#allocation3 + $0x60] sm:$0xff] }
 0x665   :  { %19606 = vmatmul.mubr.msk.f32.gmra.mrb[58].mxu1 %vm5418_vm4, %v26673_v51  ;;  %v6160_v51 = vld [vmem:[#allocation3 + $0x20] sm:$0xff] }
 0x666   :  { %19608 = vmatprep.mubr.msk.f32.mxu1 %vm5418_vm4, %v26677_v0  ;;  %v31477_v0 = vrot.slane %v31461_v20, 7  ;;  %v31478_v20 = vrot.slane %v26683_v62, 1 }
 0x668   :  { %v6398_v58 = vsel %vm547_vm2, %v6396_v34, %v31477_v0  ;;  %v26709_v0 = vsel %vm1776_vm3, %v7623_v22, %v31478_v20  ;;  %v6164_v34 = vld [vmem:[#allocation3 + $0x40] sm:$0xff] }
 0x669   :  { %19609 = vmatmul.mubr.msk.f32.gmra.mrb[60].mxu1 %vm5418_vm4, %v26681_v10  ;;  %v6402_v10 = vrot.slane %v26371_v31, 7  ;;  %v15152_v31 = vld [vmem:[%s30351_s3 + $0x68] sm:$0xff] }
 0x66a   :  { %19611 = vmatprep.mubr.msk.f32.mxu1 %vm5418_vm4, %v26688_v11  ;;  %v6401_v11 = vrot.slane %v6160_v51, 7  ;;  %v6406_v51 = vrot.slane %v6164_v34, 7  ;;  %v26728_v5 = vpack.c.bf16 %v15152_v31, %v15151_v14  ;;  %v6411_v34 = vrot.slane %v6168_v60, 7 }
 0x66b   :  { %v26731_v20 = vsel %vm547_vm2, %v6402_v10, %v6404_v47  ;;  %v6414_v14 = vrot.slane %v26464_v12, 7 }
 0x66c   :  { %v26722_v22 = vsel %vm547_vm2, %v6401_v11, %v6402_v10  ;;  %31480 = vst [vmem:[#allocation23_spill] sm:$0xff] %v26731_v20 }
 0x66d   :  { %19612 = vmatmul.mubr.msk.f32.gmra.mrb[62].mxu1 %vm5418_vm4, %v26695_v7  ;;  %31479 = vst [vmem:[#allocation22_spill] sm:$0xff] %v26722_v22 }
 0x66e   :  { %19622 = vmatprep.mubr.msk.f32.mxu1 %vm5418_vm4, %v6398_v58  ;;  %v6407_v58 = vrot.slane %v26395_v53, 7 }
 0x670   :  { %v26737_v11 = vsel %vm547_vm2, %v6406_v51, %v6407_v58  ;;  %v6417_v51 = vrot.slane %v26468_v35, 7 }
 0x671   :  { %19623 = vmatmul.mubr.msk.f32.vlgmr.msra.gmra.mrb[0].mxu1 %vm5418_vm4, %v26461_v45  ;;  %v6409_v45 = vrot.slane %v26426_v42, 7  ;;  %31481 = vst [vmem:[#allocation54_spill] sm:$0xff] %v26737_v11 }
 0x672   :  { %20476 = vmatpush3.bf16.msra.mxu1 %v26454_v17  ;;  %19625 = vmatprep.mubr.msk.f32.mxu1 %vm5418_vm4, %v26722_v22  ;;  %v6412_v17 = vrot.slane %v26441_v32, 7  ;;  %v6172_v22 = vld [vmem:[#allocation3 + $0x80] sm:$0xff] }
 0x673   :  { %20478 = vmatprep.subr.bf16.mxu1 %v20477_v13  ;;  %v26744_v31 = vsel %vm547_vm2, %v6407_v58, %v6409_v45  ;;  %v6416_v10 = vrot.slane %v6172_v22, 7  ;;  %v6419_v58 = vrot.slane %v26473_v63, 7  ;;  %v6422_v22 = vrot.slane %v26477_v61, 7 }
 0x674   :  { %31482 = vst [vmem:[#allocation55_spill] sm:$0xff] %v26744_v31  ;;  %v26750_v47 = vsel %vm547_vm2, %v6411_v34, %v6412_v17  ;;  %v26756_v60 = vsel %vm547_vm2, %v6412_v17, %v6414_v14  ;;  %v6424_v17 = vrot.slane %v26481_v40, 7 }
 0x675   :  { %19626 = vmatmul.mubr.msk.f32.gmra.mrb[2].mxu1 %vm5418_vm4, %v26731_v20  ;;  %31483 = vst [vmem:[#allocation21_spill] sm:$0xff] %v26750_v47  ;;  %31484 = vst [vmem:[#allocation88_spill] sm:$0xff] %v26756_v60  ;;  %v26762_v45 = vsel %vm547_vm2, %v6416_v10, %v6417_v51  ;;  %v6484_v20 = vrot.slane %v26577_v25, 7 }
 0x676   :  { %19628 = vmatprep.mubr.msk.f32.mxu1 %vm5418_vm4, %v26737_v11  ;;  %20480 = vmatpush3.bf16.msra.mxu1 %v20477_v13  ;;  %v6176_v13 = vld [vmem:[#allocation3 + $0xa0] sm:$0xff]  ;;  %31485 = vst [vmem:[#allocation89_spill] sm:$0xff] %v26762_v45 }
 0x677   :  { %20482 = vmatprep.subr.bf16.mxu1 %v26728_v5  ;;  %v6421_v34 = vrot.slane %v6176_v13, 7  ;;  %v6427_v13 = vrot.slane %v26485_v23, 7 }
 0x679   :  { %19629 = vmatmul.mubr.msk.f32.gmra.mrb[4].mxu1 %vm5418_vm4, %v26744_v31  ;;  %v6180_v31 = vld [vmem:[#allocation3 + $0xc0] sm:$0xff]  ;;  %v26774_v14 = vsel %vm547_vm2, %v6421_v34, %v6422_v22 }
 0x67a   :  { %19631 = vmatprep.mubr.msk.f32.mxu1 %vm5418_vm4, %v26750_v47  ;;  %v26768_v47 = vsel %vm547_vm2, %v6417_v51, %v6419_v58  ;;  %31487 = vst [vmem:[#allocation91_spill] sm:$0xff] %v26774_v14  ;;  %v6426_v10 = vrot.slane %v6180_v31, 7  ;;  %v6429_v51 = vrot.slane %v26489_v1, 7  ;;  %v6432_v31 = vrot.slane %v26493_v15, 7 }
 0x67b   :  { %31486 = vst [vmem:[#allocation90_spill] sm:$0xff] %v26768_v47 }
 0x67c   :  { %v26786_v58 = vsel %vm547_vm2, %v6426_v10, %v6427_v13 }
 0x67d   :  { %19632 = vmatmul.mubr.msk.f32.gmra.mrb[6].mxu1 %vm5418_vm4, %v26756_v60  ;;  %v6184_v60 = vld [vmem:[#allocation3 + $0xe0] sm:$0xff]  ;;  %31489 = vst [vmem:[#allocation93_spill] sm:$0xff] %v26786_v58 }
 0x67e   :  { %19634 = vmatprep.mubr.msk.f32.mxu1 %vm5418_vm4, %v26762_v45  ;;  %v26780_v45 = vsel %vm547_vm2, %v6422_v22, %v6424_v17  ;;  %v6431_v34 = vrot.slane %v6184_v60, 7  ;;  %v6434_v22 = vrot.slane %v26497_v49, 7  ;;  %v6437_v60 = vrot.slane %v26501_v6, 7 }
 0x67f   :  { %31488 = vst [vmem:[#allocation92_spill] sm:$0xff] %v26780_v45 }
 0x680   :  { %v26798_v17 = vsel %vm547_vm2, %v6431_v34, %v6432_v31 }
 0x681   :  { %19635 = vmatmul.mubr.msk.f32.gmra.mrb[8].mxu1 %vm5418_vm4, %v26768_v47  ;;  %v6188_v47 = vld [vmem:[#allocation3 + $0x100] sm:$0xff]  ;;  %31491 = vst [vmem:[#allocation95_spill] sm:$0xff] %v26798_v17 }
 0x682   :  { %19637 = vmatprep.mubr.msk.f32.mxu1 %vm5418_vm4, %v26774_v14  ;;  %v26792_v14 = vsel %vm547_vm2, %v6427_v13, %v6429_v51  ;;  %v6436_v10 = vrot.slane %v6188_v47, 7  ;;  %v6439_v13 = vrot.slane %v26505_v8, 7  ;;  %v6442_v47 = vrot.slane %v26509_v18, 7 }
 0x683   :  { %31490 = vst [vmem:[#allocation94_spill] sm:$0xff] %v26792_v14 }
 0x684   :  { %v26810_v51 = vsel %vm547_vm2, %v6436_v10, %v6437_v60 }
 0x685   :  { %19638 = vmatmul.mubr.msk.f32.gmra.mrb[10].mxu1 %vm5418_vm4, %v26780_v45  ;;  %v6192_v45 = vld [vmem:[#allocation3 + $0x120] sm:$0xff]  ;;  %31493 = vst [vmem:[#allocation97_spill] sm:$0xff] %v26810_v51 }
 0x686   :  { %19640 = vmatprep.mubr.msk.f32.mxu1 %vm5418_vm4, %v26786_v58  ;;  %v26804_v58 = vsel %vm547_vm2, %v6432_v31, %v6434_v22  ;;  %v6441_v34 = vrot.slane %v6192_v45, 7  ;;  %v6444_v31 = vrot.slane %v26513_v29, 7  ;;  %v6447_v45 = vrot.slane %v26517_v57, 7 }
 0x687   :  { %31492 = vst [vmem:[#allocation96_spill] sm:$0xff] %v26804_v58 }
 0x688   :  { %v26822_v22 = vsel %vm547_vm2, %v6441_v34, %v6442_v47 }
 0x689   :  { %19641 = vmatmul.mubr.msk.f32.gmra.mrb[12].mxu1 %vm5418_vm4, %v26792_v14  ;;  %v6196_v14 = vld [vmem:[#allocation3 + $0x140] sm:$0xff]  ;;  %31495 = vst [vmem:[#allocation99_spill] sm:$0xff] %v26822_v22 }
 0x68a   :  { %19643 = vmatprep.mubr.msk.f32.mxu1 %vm5418_vm4, %v26798_v17  ;;  %v26816_v17 = vsel %vm547_vm2, %v6437_v60, %v6439_v13  ;;  %v6446_v10 = vrot.slane %v6196_v14, 7  ;;  %v6449_v60 = vrot.slane %v26521_v3, 7  ;;  %v6452_v14 = vrot.slane %v26525_v16, 7 }
 0x68b   :  { %31494 = vst [vmem:[#allocation98_spill] sm:$0xff] %v26816_v17 }
 0x68c   :  { %v26834_v13 = vsel %vm547_vm2, %v6446_v10, %v6447_v45 }
 0x68d   :  { %19644 = vmatmul.mubr.msk.f32.gmra.mrb[14].mxu1 %vm5418_vm4, %v26804_v58  ;;  %v6200_v58 = vld [vmem:[#allocation3 + $0x160] sm:$0xff]  ;;  %31497 = vst [vmem:[#allocation101_spill] sm:$0xff] %v26834_v13 }
 0x68e   :  { %19646 = vmatprep.mubr.msk.f32.mxu1 %vm5418_vm4, %v26810_v51  ;;  %v26828_v51 = vsel %vm547_vm2, %v6442_v47, %v6444_v31  ;;  %v6451_v34 = vrot.slane %v6200_v58, 7  ;;  %v6454_v47 = vrot.slane %v26529_v2, 7  ;;  %v6457_v58 = vrot.slane %v26533_v48, 7 }
 0x68f   :  { %31496 = vst [vmem:[#allocation100_spill] sm:$0xff] %v26828_v51 }
 0x690   :  { %v26846_v31 = vsel %vm547_vm2, %v6451_v34, %v6452_v14 }
 0x691   :  { %19647 = vmatmul.mubr.msk.f32.gmra.mrb[16].mxu1 %vm5418_vm4, %v26816_v17  ;;  %v6204_v17 = vld [vmem:[#allocation3 + $0x180] sm:$0xff]  ;;  %31499 = vst [vmem:[#allocation103_spill] sm:$0xff] %v26846_v31 }
 0x692   :  { %19649 = vmatprep.mubr.msk.f32.mxu1 %vm5418_vm4, %v26822_v22  ;;  %v26840_v22 = vsel %vm547_vm2, %v6447_v45, %v6449_v60  ;;  %v6456_v10 = vrot.slane %v6204_v17, 7  ;;  %v6459_v45 = vrot.slane %v26537_v19, 7  ;;  %v6462_v17 = vrot.slane %v26541_v55, 7 }
 0x693   :  { %31498 = vst [vmem:[#allocation102_spill] sm:$0xff] %v26840_v22 }
 0x694   :  { %v26858_v60 = vsel %vm547_vm2, %v6456_v10, %v6457_v58 }
 0x695   :  { %19650 = vmatmul.mubr.msk.f32.gmra.mrb[18].mxu1 %vm5418_vm4, %v26828_v51  ;;  %v6208_v51 = vld [vmem:[#allocation3 + $0x1a0] sm:$0xff]  ;;  %31501 = vst [vmem:[#allocation105_spill] sm:$0xff] %v26858_v60 }
 0x696   :  { %19652 = vmatprep.mubr.msk.f32.mxu1 %vm5418_vm4, %v26834_v13  ;;  %v26852_v13 = vsel %vm547_vm2, %v6452_v14, %v6454_v47  ;;  %v6461_v34 = vrot.slane %v6208_v51, 7  ;;  %v6464_v14 = vrot.slane %v26545_v54, 7  ;;  %v6467_v51 = vrot.slane %v26549_v39, 7 }
 0x697   :  { %31500 = vst [vmem:[#allocation104_spill] sm:$0xff] %v26852_v13 }
 0x698   :  { %v26870_v47 = vsel %vm547_vm2, %v6461_v34, %v6462_v17 }
 0x699   :  { %19653 = vmatmul.mubr.msk.f32.gmra.mrb[20].mxu1 %vm5418_vm4, %v26840_v22  ;;  %v6212_v22 = vld [vmem:[#allocation3 + $0x1c0] sm:$0xff]  ;;  %31503 = vst [vmem:[#allocation107_spill] sm:$0xff] %v26870_v47 }
 0x69a   :  { %19655 = vmatprep.mubr.msk.f32.mxu1 %vm5418_vm4, %v26846_v31  ;;  %v26864_v31 = vsel %vm547_vm2, %v6457_v58, %v6459_v45  ;;  %v6466_v10 = vrot.slane %v6212_v22, 7  ;;  %v6469_v58 = vrot.slane %v26553_v36, 7  ;;  %v6228_v45 = vld [vmem:[#allocation3 + $0x240] sm:$0xff]  ;;  %v6472_v22 = vrot.slane %v26557_v52, 7 }
 0x69b   :  { %31502 = vst [vmem:[#allocation106_spill] sm:$0xff] %v26864_v31  ;;  %v6476_v11 = vrot.slane %v6228_v45, 7 }
 0x69d   :  { %19656 = vmatmul.mubr.msk.f32.gmra.mrb[22].mxu1 %vm5418_vm4, %v26852_v13  ;;  %v6216_v13 = vld [vmem:[#allocation3 + $0x1e0] sm:$0xff] }
 0x69e   :  { %19658 = vmatprep.mubr.msk.f32.mxu1 %vm5418_vm4, %v26858_v60  ;;  %v26876_v60 = vsel %vm547_vm2, %v6462_v17, %v6464_v14  ;;  %v6471_v34 = vrot.slane %v6216_v13, 7  ;;  %v26889_v17 = vsel %vm547_vm2, %v6467_v51, %v6469_v58  ;;  %v6474_v14 = vrot.slane %v26563_v4, 7 }
 0x69f   :  { %31504 = vst [vmem:[#allocation108_spill] sm:$0xff] %v26876_v60  ;;  %31506 = vst [vmem:[#allocation110_spill] sm:$0xff] %v26889_v17  ;;  %v6479_v13 = vrot.slane %v26569_v21, 7 }
 0x6a0   :  { %v26902_v45 = vsel %vm547_vm2, %v6472_v22, %v6474_v14  ;;  %v6487_v14 = vrot.slane %v26581_v44, 7 }
 0x6a1   :  { %19659 = vmatmul.mubr.msk.f32.gmra.mrb[24].mxu1 %vm5418_vm4, %v26864_v31  ;;  %v26882_v31 = vsel %vm547_vm2, %v6466_v10, %v6467_v51  ;;  %v26895_v10 = vsel %vm547_vm2, %v6471_v34, %v6472_v22  ;;  %31508 = vst [vmem:[#allocation112_spill] sm:$0xff] %v26902_v45  ;;  %v6482_v51 = vrot.slane %v26573_v28, 7 }
 0x6a2   :  { %19661 = vmatprep.mubr.msk.f32.mxu1 %vm5418_vm4, %v26870_v47  ;;  %31505 = vst [vmem:[#allocation109_spill] sm:$0xff] %v26882_v31  ;;  %v6477_v47 = vrot.slane %v26561_v50, 7  ;;  %31507 = vst [vmem:[#allocation111_spill] sm:$0xff] %v26895_v10 }
 0x6a4   :  { %v6480_v34 = vsel %vm547_vm2, %v6477_v47, %v6479_v13 }
 0x6a5   :  { %19662 = vmatmul.mubr.msk.f32.gmra.mrb[26].mxu1 %vm5418_vm4, %v26876_v60  ;;  %v6478_v60 = vsel %vm547_vm2, %v6476_v11, %v6477_v47 }
 0x6a6   :  { %19664 = vmatprep.mubr.msk.f32.mxu1 %vm5418_vm4, %v26882_v31  ;;  %v6232_v31 = vld [vmem:[#allocation3 + $0x260] sm:$0xff] }
 0x6a7   :  { %v6481_v58 = vrot.slane %v6232_v31, 7  ;;  %v26918_v31 = vsel %vm547_vm2, %v6482_v51, %v6484_v20  ;;  %v6494_v20 = vrot.slane %v26593_v46, 7 }
 0x6a8   :  { %31510 = vst [vmem:[#allocation114_spill] sm:$0xff] %v26918_v31 }
 0x6a9   :  { %19665 = vmatmul.mubr.msk.f32.gmra.mrb[28].mxu1 %vm5418_vm4, %v26889_v17  ;;  %v6236_v17 = vld [vmem:[#allocation3 + $0x280] sm:$0xff]  ;;  %v26912_v11 = vsel %vm547_vm2, %v6481_v58, %v6482_v51 }
 0x6aa   :  { %19667 = vmatprep.mubr.msk.f32.mxu1 %vm5418_vm4, %v26895_v10  ;;  %31509 = vst [vmem:[#allocation113_spill] sm:$0xff] %v26912_v11  ;;  %v6486_v22 = vrot.slane %v6236_v17, 7  ;;  %v6492_v17 = vrot.slane %v26589_v37, 7  ;;  %v6244_v58 = vld [vmem:[#allocation3 + $0x2c0] sm:$0xff] }
 0x6ab   :  { %v6268_v10 = vld [vmem:[#allocation3 + $0x380] sm:$0xff] }
 0x6ac   :  { %v26924_v47 = vsel %vm547_vm2, %v6486_v22, %v6487_v14  ;;  %v6496_v22 = vrot.slane %v6244_v58, 7  ;;  %v6502_v58 = vrot.slane %v26605_v41, 7 }
 0x6ad   :  { %19668 = vmatmul.mubr.msk.f32.gmra.mrb[30].mxu1 %vm5418_vm4, %v26902_v45  ;;  %v6240_v45 = vld [vmem:[#allocation3 + $0x2a0] sm:$0xff]  ;;  %31511 = vst [vmem:[#allocation115_spill] sm:$0xff] %v26924_v47 }
 0x6ae   :  { %19670 = vmatprep.mubr.msk.f32.mxu1 %vm5418_vm4, %v6478_v60  ;;  %v6489_v60 = vrot.slane %v26585_v30, 7  ;;  %v6491_v13 = vrot.slane %v6240_v45, 7  ;;  %v6497_v45 = vrot.slane %v26597_v24, 7 }
 0x6b0   :  { %v26936_v51 = vsel %vm547_vm2, %v6491_v13, %v6492_v17 }
 0x6b1   :  { %19671 = vmatmul.mubr.msk.f32.gmra.mrb[32].mxu1 %vm5418_vm4, %v6480_v34  ;;  %v26930_v34 = vsel %vm547_vm2, %v6487_v14, %v6489_v60  ;;  %31513 = vst [vmem:[#allocation117_spill] sm:$0xff] %v26936_v51  ;;  %v6499_v14 = vrot.slane %v26601_v43, 7  ;;  %v26948_v60 = vsel %vm547_vm2, %v6496_v22, %v6497_v45 }
 0x6b2   :  { %19673 = vmatprep.mubr.msk.f32.mxu1 %vm5418_vm4, %v26912_v11  ;;  %31512 = vst [vmem:[#allocation116_spill] sm:$0xff] %v26930_v34  ;;  %31515 = vst [vmem:[#allocation119_spill] sm:$0xff] %v26948_v60  ;;  %v31525_v11 = vld [vmem:[#allocation66_spill] sm:$0xff] }
 0x6b5   :  { %19674 = vmatmul.mubr.msk.f32.gmra.mrb[34].mxu1 %vm5418_vm4, %v26918_v31  ;;  %v6248_v31 = vld [vmem:[#allocation3 + $0x2e0] sm:$0xff] }
 0x6b6   :  { %19676 = vmatprep.mubr.msk.f32.mxu1 %vm5418_vm4, %v26924_v47  ;;  %v26942_v47 = vsel %vm547_vm2, %v6492_v17, %v6494_v20  ;;  %v6501_v13 = vrot.slane %v6248_v31, 7  ;;  %v6504_v17 = vrot.slane %v26609_v56, 7  ;;  %v6507_v31 = vrot.slane %v26613_v26, 7 }
 0x6b7   :  { %31514 = vst [vmem:[#allocation118_spill] sm:$0xff] %v26942_v47 }
 0x6b8   :  { %v26960_v20 = vsel %vm547_vm2, %v6501_v13, %v6502_v58 }
 0x6b9   :  { %19677 = vmatmul.mubr.msk.f32.gmra.mrb[36].mxu1 %vm5418_vm4, %v26930_v34  ;;  %v6252_v34 = vld [vmem:[#allocation3 + $0x300] sm:$0xff]  ;;  %31517 = vst [vmem:[#allocation121_spill] sm:$0xff] %v26960_v20 }
 0x6ba   :  { %19679 = vmatprep.mubr.msk.f32.mxu1 %vm5418_vm4, %v26936_v51  ;;  %v26954_v51 = vsel %vm547_vm2, %v6497_v45, %v6499_v14  ;;  %v6506_v22 = vrot.slane %v6252_v34, 7  ;;  %v6509_v45 = vrot.slane %v26617_v59, 7  ;;  %v6512_v34 = vrot.slane %v26621_v9, 7 }
 0x6bb   :  { %31516 = vst [vmem:[#allocation120_spill] sm:$0xff] %v26954_v51 }
 0x6bc   :  { %v26972_v14 = vsel %vm547_vm2, %v6506_v22, %v6507_v31 }
 0x6bd   :  { %19680 = vmatmul.mubr.msk.f32.gmra.mrb[38].mxu1 %vm5418_vm4, %v26942_v47  ;;  %v6256_v47 = vld [vmem:[#allocation3 + $0x320] sm:$0xff]  ;;  %31519 = vst [vmem:[#allocation123_spill] sm:$0xff] %v26972_v14 }
 0x6be   :  { %19682 = vmatprep.mubr.msk.f32.mxu1 %vm5418_vm4, %v26948_v60  ;;  %v26966_v60 = vsel %vm547_vm2, %v6502_v58, %v6504_v17  ;;  %v6511_v13 = vrot.slane %v6256_v47, 7  ;;  %v6514_v58 = vrot.slane %v26625_v33, 7  ;;  %v6517_v47 = vrot.slane %v26629_v27, 7 }
 0x6bf   :  { %31518 = vst [vmem:[#allocation122_spill] sm:$0xff] %v26966_v60 }
 0x6c0   :  { %v26984_v17 = vsel %vm547_vm2, %v6511_v13, %v6512_v34 }
 0x6c1   :  { %19683 = vmatmul.mubr.msk.f32.gmra.mrb[40].mxu1 %vm5418_vm4, %v26954_v51  ;;  %v6260_v51 = vld [vmem:[#allocation3 + $0x340] sm:$0xff]  ;;  %31521 = vst [vmem:[#allocation125_spill] sm:$0xff] %v26984_v17 }
 0x6c2   :  { %19685 = vmatprep.mubr.msk.f32.mxu1 %vm5418_vm4, %v26960_v20  ;;  %v26978_v20 = vsel %vm547_vm2, %v6507_v31, %v6509_v45  ;;  %v6516_v22 = vrot.slane %v6260_v51, 7  ;;  %v31523_v31 = vld [vmem:[#allocation65_spill] sm:$0xff]  ;;  %v6522_v51 = vrot.slane %v31525_v11, 7  ;;  %v6272_v11 = vld [vmem:[#allocation3 + $0x3a0] sm:$0xff] }
 0x6c3   :  { %31520 = vst [vmem:[#allocation124_spill] sm:$0xff] %v26978_v20  ;;  %v6519_v45 = vrot.slane %v31523_v31, 7  ;;  %v31529_v31 = vld [vmem:[#allocation68_spill] sm:$0xff] }
 0x6c5   :  { %19686 = vmatmul.mubr.msk.f32.gmra.mrb[42].mxu1 %vm5418_vm4, %v26966_v60  ;;  %v6264_v60 = vld [vmem:[#allocation3 + $0x360] sm:$0xff] }
 0x6c6   :  { %19688 = vmatprep.mubr.msk.f32.mxu1 %vm5418_vm4, %v26972_v14  ;;  %v26990_v14 = vsel %vm547_vm2, %v6512_v34, %v6514_v58  ;;  %v6521_v13 = vrot.slane %v6264_v60, 7  ;;  %v31527_v34 = vld [vmem:[#allocation67_spill] sm:$0xff]  ;;  %v6527_v60 = vrot.slane %v31529_v31, 7 }
 0x6c7   :  { %31522 = vst [vmem:[#allocation126_spill] sm:$0xff] %v26990_v14  ;;  %v6524_v58 = vrot.slane %v31527_v34, 7  ;;  %v31533_v34 = vld [vmem:[#allocation70_spill] sm:$0xff] }
 0x6c8   :  { %v6276_v31 = vld [vmem:[#allocation3 + $0x3c0] sm:$0xff] }
 0x6c9   :  { %19689 = vmatmul.mubr.msk.f32.gmra.mrb[44].mxu1 %vm5418_vm4, %v26978_v20  ;;  %v26996_v20 = vsel %vm547_vm2, %v6516_v22, %v6517_v47  ;;  %v6526_v22 = vrot.slane %v6268_v10, 7  ;;  %v6532_v10 = vrot.slane %v31533_v34, 7  ;;  %v6280_v34 = vld [vmem:[#allocation3 + $0x3e0] sm:$0xff] }
 0x6ca   :  { %19691 = vmatprep.mubr.msk.f32.mxu1 %vm5418_vm4, %v26984_v17  ;;  %31524 = vst [vmem:[#allocation127_spill] sm:$0xff] %v26996_v20  ;;  %v27002_v17 = vsel %vm547_vm2, %v6517_v47, %v6519_v45  ;;  %v31531_v47 = vld [vmem:[#allocation69_spill] sm:$0xff] }
 0x6cb   :  { %31526 = vst [vmem:[#allocation128_spill] sm:$0xff] %v27002_v17  ;;  %v6529_v45 = vrot.slane %v31531_v47, 7  ;;  %v31537_v47 = vld [vmem:[#allocation72_spill] sm:$0xff] }
 0x6cd   :  { %19692 = vmatmul.mubr.msk.f32.gmra.mrb[46].mxu1 %vm5418_vm4, %v26990_v14  ;;  %v27008_v14 = vsel %vm547_vm2, %v6521_v13, %v6522_v51  ;;  %v6531_v13 = vrot.slane %v6272_v11, 7  ;;  %v6537_v11 = vrot.slane %v31537_v47, 7  ;;  %v6284_v47 = vld [vmem:[#allocation3 + $0x400] sm:$0xff] }
 0x6ce   :  { %19694 = vmatprep.mubr.msk.f32.mxu1 %vm5418_vm4, %v26996_v20  ;;  %31528 = vst [vmem:[#allocation129_spill] sm:$0xff] %v27008_v14  ;;  %v27014_v20 = vsel %vm547_vm2, %v6522_v51, %v6524_v58  ;;  %v31535_v51 = vld [vmem:[#allocation71_spill] sm:$0xff] }
 0x6cf   :  { %31530 = vst [vmem:[#allocation130_spill] sm:$0xff] %v27014_v20  ;;  %v6534_v58 = vrot.slane %v31535_v51, 7  ;;  %v31541_v51 = vld [vmem:[#allocation74_spill] sm:$0xff] }
 0x6d1   :  { %19695 = vmatmul.mubr.msk.f32.gmra.mrb[48].mxu1 %vm5418_vm4, %v27002_v17  ;;  %v27020_v17 = vsel %vm547_vm2, %v6526_v22, %v6527_v60  ;;  %v6536_v22 = vrot.slane %v6276_v31, 7  ;;  %v6542_v31 = vrot.slane %v31541_v51, 7  ;;  %v6288_v51 = vld [vmem:[#allocation3 + $0x420] sm:$0xff] }
 0x6d2   :  { %19697 = vmatprep.mubr.msk.f32.mxu1 %vm5418_vm4, %v27008_v14  ;;  %31532 = vst [vmem:[#allocation131_spill] sm:$0xff] %v27020_v17  ;;  %v27026_v14 = vsel %vm547_vm2, %v6527_v60, %v6529_v45  ;;  %v31539_v60 = vld [vmem:[#allocation73_spill] sm:$0xff] }
 0x6d3   :  { %31534 = vst [vmem:[#allocation132_spill] sm:$0xff] %v27026_v14  ;;  %v6539_v45 = vrot.slane %v31539_v60, 7  ;;  %v31545_v60 = vld [vmem:[#allocation76_spill] sm:$0xff] }
 0x6d5   :  { %19698 = vmatmul.mubr.msk.f32.gmra.mrb[50].mxu1 %vm5418_vm4, %v27014_v20  ;;  %v27032_v20 = vsel %vm547_vm2, %v6531_v13, %v6532_v10  ;;  %v6541_v13 = vrot.slane %v6280_v34, 7  ;;  %v6547_v34 = vrot.slane %v31545_v60, 7  ;;  %v6159_v60 = vld [vmem:[#allocation3 + $0x18] sm:$0xff] }
 0x6d6   :  { %19700 = vmatprep.mubr.msk.f32.mxu1 %vm5418_vm4, %v27020_v17  ;;  %31536 = vst [vmem:[#allocation133_spill] sm:$0xff] %v27032_v20  ;;  %v27038_v17 = vsel %vm547_vm2, %v6532_v10, %v6534_v58  ;;  %v31543_v10 = vld [vmem:[#allocation75_spill] sm:$0xff] }
 0x6d7   :  { %31538 = vst [vmem:[#allocation134_spill] sm:$0xff] %v27038_v17  ;;  %v6544_v58 = vrot.slane %v31543_v10, 7 }
 0x6d9   :  { %19701 = vmatmul.mubr.msk.f32.gmra.mrb[52].mxu1 %vm5418_vm4, %v27026_v14  ;;  %v27044_v14 = vsel %vm547_vm2, %v6536_v22, %v6537_v11  ;;  %v6546_v22 = vrot.slane %v6284_v47, 7 }
 0x6da   :  { %19703 = vmatprep.mubr.msk.f32.mxu1 %vm5418_vm4, %v27032_v20  ;;  %31540 = vst [vmem:[#allocation135_spill] sm:$0xff] %v27044_v14  ;;  %v27050_v20 = vsel %vm547_vm2, %v6537_v11, %v6539_v45  ;;  %v31547_v11 = vld [vmem:[#allocation19_spill] sm:$0xff] }
 0x6db   :  { %31542 = vst [vmem:[#allocation7_spill] sm:$0xff] %v27050_v20  ;;  %v6549_v45 = vrot.slane %v31547_v11, 7  ;;  %v27068_v10 = vsel %vm547_vm2, %v6546_v22, %v6547_v34  ;;  %v7626_v22 = vrot.slane %v6159_v60, 1 }
 0x6dc   :  { %31548 = vst [vmem:[#allocation8_spill] sm:$0xff] %v27068_v10 }
 0x6dd   :  { %19704 = vmatmul.mubr.msk.f32.gmra.mrb[54].mxu1 %vm5418_vm4, %v27038_v17  ;;  %v27056_v17 = vsel %vm547_vm2, %v6541_v13, %v6542_v31  ;;  %v6551_v13 = vrot.slane %v6288_v51, 7  ;;  %v31553_v51 = vld [vmem:[#allocation64_spill] sm:$0xff] }
 0x6de   :  { %19706 = vmatprep.mubr.msk.f32.mxu1 %vm5418_vm4, %v27044_v14  ;;  %31544 = vst [vmem:[#allocation78_spill] sm:$0xff] %v27056_v17  ;;  %v27062_v14 = vsel %vm547_vm2, %v6542_v31, %v6544_v58  ;;  %v6554_v31 = vrot.slane %v26695_v7, 7  ;;  %v15154_v7 = vld [vmem:[%s30351_s3 + $0x78] sm:$0xff]  ;;  %v7628_v11 = vrot.slane %v31553_v51, 1 }
 0x6df   :  { %31546 = vst [vmem:[#allocation79_spill] sm:$0xff] %v27062_v14 }
 0x6e1   :  { %19707 = vmatmul.mubr.msk.f32.gmra.mrb[56].mxu1 %vm5418_vm4, %v27050_v20  ;;  %v31549_v20 = vld [vmem:[#allocation77_spill] sm:$0xff] }
 0x6e2   :  { %19709 = vmatprep.mubr.msk.f32.mxu1 %vm5418_vm4, %v27056_v17  ;;  %v6552_v47 = vrot.slane %v31549_v20, 7  ;;  %v27074_v17 = vsel %vm547_vm2, %v6547_v34, %v6549_v45  ;;  %v15153_v34 = vld [vmem:[%s30351_s3 + $0x70] sm:$0xff]  ;;  %v7629_v45 = vrot.slane %v26373_v38, 1  ;;  %v15220_v38 = vld [vmem:[%s30351_s3 + $0x88] sm:$0xff] }
 0x6e3   :  { %31550 = vst [vmem:[#allocation9_spill] sm:$0xff] %v27074_v17 }
 0x6e4   :  { %v27080_v58 = vsel %vm547_vm2, %v6551_v13, %v6552_v47  ;;  %v27085_v20 = vsel %vm547_vm2, %v6552_v47, %v6554_v31  ;;  %v6163_v13 = vld [vmem:[#allocation3 + $0x38] sm:$0xff]  ;;  %v31554_v47 = vrot.slane %v26683_v62, 1  ;;  %v20485_v31 = vpack.c.bf16 %v15154_v7, %v15153_v34 }
 0x6e5   :  { %19710 = vmatmul.mubr.msk.f32.gmra.mrb[58].mxu1 %vm5418_vm4, %v27062_v14  ;;  %31551 = vst [vmem:[#allocation10_spill] sm:$0xff] %v27080_v58  ;;  %31552 = vst [vmem:[#allocation11_spill] sm:$0xff] %v27085_v20  ;;  %v27110_v51 = vsel %vm1776_vm3, %v7628_v11, %v7629_v45  ;;  %v7634_v62 = vrot.slane %v26426_v42, 1  ;;  %v7638_v42 = vrot.slane %v26441_v32, 1  ;;  %v6171_v11 = vld [vmem:[#allocation3 + $0x78] sm:$0xff]  ;;  %v7643_v32 = vrot.slane %v26468_v35, 1 }
 0x6e6   :  { %19712 = vmatprep.mubr.msk.f32.mxu1 %vm5418_vm4, %v27068_v10  ;;  %v7627_v60 = vsel %vm1776_vm3, %v31554_v47, %v7626_v22  ;;  %v6167_v22 = vld [vmem:[#allocation3 + $0x58] sm:$0xff]  ;;  %v7649_v35 = vrot.slane %v26481_v40, 1 }
 0x6e7   :  { %v6175_v47 = vld [vmem:[#allocation3 + $0x98] sm:$0xff] }
 0x6e9   :  { %19713 = vmatmul.mubr.msk.f32.gmra.mrb[60].mxu1 %vm5418_vm4, %v27074_v17  ;;  %v15219_v17 = vld [vmem:[%s30351_s3 + $0x80] sm:$0xff] }
 0x6ea   :  { %19715 = vmatprep.mubr.msk.f32.mxu1 %vm5418_vm4, %v27080_v58  ;;  %v7631_v58 = vrot.slane %v6163_v13, 1  ;;  %v27117_v34 = vpack.c.bf16 %v15220_v38, %v15219_v17  ;;  %v7636_v13 = vrot.slane %v6167_v22, 1 }
 0x6ec   :  { %v27120_v7 = vsel %vm1776_vm3, %v7629_v45, %v7631_v58  ;;  %v27133_v17 = vsel %vm1776_vm3, %v7634_v62, %v7636_v13  ;;  %v7641_v58 = vrot.slane %v6171_v11, 1 }
 0x6ed   :  { %19716 = vmatmul.mubr.msk.f32.gmra.mrb[62].mxu1 %vm5418_vm4, %v27085_v20 }
 0x6ee   :  { %19726 = vmatprep.mubr.msk.f32.mxu1 %vm5418_vm4, %v26709_v0  ;;  %v7633_v0 = vrot.slane %v26395_v53, 1 }
 0x6f0   :  { %v27125_v53 = vsel %vm1776_vm3, %v7633_v0, %v7634_v62  ;;  %v7648_v0 = vrot.slane %v26477_v61, 1  ;;  %v6179_v62 = vld [vmem:[#allocation3 + $0xb8] sm:$0xff]  ;;  %v7654_v61 = vrot.slane %v26489_v1, 1 }
 0x6f1   :  { %19727 = vmatmul.mubr.msk.f32.vlgmr.msra.gmra.mrb[0].mxu1 %vm5418_vm4, %v7627_v60  ;;  %v7651_v22 = vrot.slane %v6179_v62, 1 }
 0x6f2   :  { %20484 = vmatpush3.bf16.msra.mxu1 %v26728_v5  ;;  %19729 = vmatprep.mubr.msk.f32.mxu1 %vm5418_vm4, %v27110_v51  ;;  %v7639_v5 = vrot.slane %v26464_v12, 1  ;;  %v7644_v12 = vrot.slane %v26473_v63, 1  ;;  %v27162_v13 = vsel %vm1776_vm3, %v7648_v0, %v7649_v35  ;;  %v7663_v0 = vrot.slane %v26501_v6, 1 }
 0x6f3   :  { %20486 = vmatprep.subr.bf16.mxu1 %v20485_v31  ;;  %v27169_v40 = vsel %vm1776_vm3, %v7649_v35, %v7651_v22  ;;  %v6191_v35 = vld [vmem:[#allocation3 + $0x118] sm:$0xff]  ;;  %v7669_v6 = vrot.slane %v26513_v29, 1 }
 0x6f4   :  { %v27138_v45 = vsel %vm1776_vm3, %v7638_v42, %v7639_v5  ;;  %v27145_v60 = vsel %vm1776_vm3, %v7639_v5, %v7641_v58  ;;  %v27150_v38 = vsel %vm1776_vm3, %v7643_v32, %v7644_v12  ;;  %v7653_v42 = vrot.slane %v26485_v23, 1  ;;  %v6183_v5 = vld [vmem:[#allocation3 + $0xd8] sm:$0xff] }
 0x6f5   :  { %19730 = vmatmul.mubr.msk.f32.gmra.mrb[2].mxu1 %vm5418_vm4, %v27120_v7  ;;  %v7656_v11 = vrot.slane %v6183_v5, 1  ;;  %v7658_v32 = vrot.slane %v26493_v15, 1  ;;  %v7659_v23 = vrot.slane %v26497_v49, 1  ;;  %v7664_v15 = vrot.slane %v26505_v8, 1 }
 0x6f6   :  { %19732 = vmatprep.mubr.msk.f32.mxu1 %vm5418_vm4, %v27125_v53  ;;  %20488 = vmatpush3.bf16.msra.mxu1 %v20485_v31  ;;  %v7646_v31 = vrot.slane %v6175_v47, 1  ;;  %v27174_v58 = vsel %vm1776_vm3, %v7653_v42, %v7654_v61  ;;  %v7666_v62 = vrot.slane %v6191_v35, 1  ;;  %v7668_v42 = vrot.slane %v26509_v18, 1 }
 0x6f7   :  { %20490 = vmatprep.subr.bf16.mxu1 %v27117_v34  ;;  %v27181_v1 = vsel %vm1776_vm3, %v7654_v61, %v7656_v11  ;;  %v27198_v22 = vsel %vm1776_vm3, %v7663_v0, %v7664_v15  ;;  %v6195_v61 = vld [vmem:[#allocation3 + $0x138] sm:$0xff]  ;;  %v7674_v18 = vrot.slane %v26521_v3, 1  ;;  %v7678_v0 = vrot.slane %v26525_v16, 1 }
 0x6f8   :  { %v27157_v63 = vsel %vm1776_vm3, %v7644_v12, %v7646_v31  ;;  %v6187_v12 = vld [vmem:[#allocation3 + $0xf8] sm:$0xff]  ;;  %v27186_v31 = vsel %vm1776_vm3, %v7658_v32, %v7659_v23  ;;  %v27205_v8 = vsel %vm1776_vm3, %v7664_v15, %v7666_v62  ;;  %v7671_v5 = vrot.slane %v6195_v61, 1 }
 0x6f9   :  { %19733 = vmatmul.mubr.msk.f32.gmra.mrb[4].mxu1 %vm5418_vm4, %v27133_v17  ;;  %v7661_v47 = vrot.slane %v6187_v12, 1  ;;  %v27210_v11 = vsel %vm1776_vm3, %v7668_v42, %v7669_v6  ;;  %v7673_v32 = vrot.slane %v26517_v57, 1  ;;  %v7679_v57 = vrot.slane %v26529_v2, 1  ;;  %v6203_v15 = vld [vmem:[#allocation3 + $0x178] sm:$0xff] }
 0x6fa   :  { %19735 = vmatprep.mubr.msk.f32.mxu1 %vm5418_vm4, %v27138_v45  ;;  %v27217_v29 = vsel %vm1776_vm3, %v7669_v6, %v7671_v5  ;;  %v7681_v35 = vrot.slane %v6203_v15, 1  ;;  %v7683_v42 = vrot.slane %v26533_v48, 1  ;;  %v7684_v16 = vrot.slane %v26537_v19, 1  ;;  %v6207_v6 = vld [vmem:[#allocation3 + $0x198] sm:$0xff] }
 0x6fb   :  { %v27193_v49 = vsel %vm1776_vm3, %v7659_v23, %v7661_v47  ;;  %v6199_v23 = vld [vmem:[#allocation3 + $0x158] sm:$0xff]  ;;  %v27222_v47 = vsel %vm1776_vm3, %v7673_v32, %v7674_v18  ;;  %v27234_v62 = vsel %vm1776_vm3, %v7678_v0, %v7679_v57  ;;  %v7686_v61 = vrot.slane %v6207_v6, 1 }
 0x6fc   :  { %v7676_v12 = vrot.slane %v6199_v23, 1  ;;  %v27241_v2 = vsel %vm1776_vm3, %v7679_v57, %v7681_v35  ;;  %v27246_v5 = vsel %vm1776_vm3, %v7683_v42, %v7684_v16  ;;  %v7688_v32 = vrot.slane %v26541_v55, 1  ;;  %v6215_v57 = vld [vmem:[#allocation3 + $0x1d8] sm:$0xff] }
 0x6fd   :  { %19736 = vmatmul.mubr.msk.f32.gmra.mrb[6].mxu1 %vm5418_vm4, %v27145_v60  ;;  %v7689_v48 = vrot.slane %v26545_v54, 1  ;;  %v27253_v19 = vsel %vm1776_vm3, %v7684_v16, %v7686_v61  ;;  %v7693_v0 = vrot.slane %v26549_v39, 1  ;;  %v7694_v55 = vrot.slane %v26553_v36, 1  ;;  %v6219_v16 = vld [vmem:[#allocation3 + $0x1f8] sm:$0xff] }
 0x6fe   :  { %19738 = vmatprep.mubr.msk.f32.mxu1 %vm5418_vm4, %v27150_v38  ;;  %v27229_v3 = vsel %vm1776_vm3, %v7674_v18, %v7676_v12  ;;  %v6211_v18 = vld [vmem:[#allocation3 + $0x1b8] sm:$0xff]  ;;  %v7696_v15 = vrot.slane %v6215_v57, 1  ;;  %v7698_v42 = vrot.slane %v26557_v52, 1  ;;  %v7699_v39 = vrot.slane %v26563_v4, 1 }
 0x6ff   :  { %v7691_v23 = vrot.slane %v6211_v18, 1  ;;  %v27258_v12 = vsel %vm1776_vm3, %v7688_v32, %v7689_v48  ;;  %v27270_v35 = vsel %vm1776_vm3, %v7693_v0, %v7694_v55  ;;  %v7703_v36 = vrot.slane %v26561_v50, 1  ;;  %v6231_v61 = vld [vmem:[#allocation3 + $0x258] sm:$0xff] }
 0x700   :  { %v7704_v6 = vrot.slane %v26569_v21, 1  ;;  %v27279_v32 = vsel %vm1776_vm3, %v7694_v55, %v7696_v15  ;;  %v27284_v52 = vsel %vm1776_vm3, %v7698_v42, %v7699_v39  ;;  %v7706_v4 = vrot.slane %v6231_v61, 1  ;;  %v6235_v0 = vld [vmem:[#allocation3 + $0x278] sm:$0xff] }
 0x701   :  { %19739 = vmatmul.mubr.msk.f32.gmra.mrb[8].mxu1 %vm5418_vm4, %v27157_v63  ;;  %v27265_v54 = vsel %vm1776_vm3, %v7689_v48, %v7691_v23  ;;  %v7701_v48 = vrot.slane %v6219_v16, 1  ;;  %v7708_v21 = vrot.slane %v26573_v28, 1  ;;  %v7709_v23 = vrot.slane %v26577_v25, 1  ;;  %v6243_v61 = vld [vmem:[#allocation3 + $0x2b8] sm:$0xff] }
 0x702   :  { %19741 = vmatprep.mubr.msk.f32.mxu1 %vm5418_vm4, %v27162_v13  ;;  %v7705_v18 = vsel %vm1776_vm3, %v7703_v36, %v7704_v6  ;;  %v7707_v55 = vsel %vm1776_vm3, %v7704_v6, %v7706_v4  ;;  %v7711_v57 = vrot.slane %v6235_v0, 1  ;;  %v7713_v42 = vrot.slane %v26581_v44, 1 }
 0x703   :  { %v27290_v50 = vsel %vm1776_vm3, %v7699_v39, %v7701_v48  ;;  %v27300_v15 = vsel %vm1776_vm3, %v7708_v21, %v7709_v23  ;;  %v7714_v28 = vrot.slane %v26585_v30, 1  ;;  %v6239_v39 = vld [vmem:[#allocation3 + $0x298] sm:$0xff]  ;;  %v7718_v6 = vrot.slane %v26589_v37, 1 }
 0x704   :  { %v27307_v25 = vsel %vm1776_vm3, %v7709_v23, %v7711_v57  ;;  %v7716_v16 = vrot.slane %v6239_v39, 1  ;;  %v7719_v44 = vrot.slane %v26593_v46, 1  ;;  %v7721_v48 = vrot.slane %v6243_v61, 1  ;;  %v6247_v21 = vld [vmem:[#allocation3 + $0x2d8] sm:$0xff] }
 0x705   :  { %19742 = vmatmul.mubr.msk.f32.gmra.mrb[10].mxu1 %vm5418_vm4, %v27169_v40  ;;  %v27312_v36 = vsel %vm1776_vm3, %v7713_v42, %v7714_v28  ;;  %v7724_v37 = vrot.slane %v26601_v43, 1  ;;  %v7726_v23 = vrot.slane %v6247_v21, 1  ;;  %v6251_v57 = vld [vmem:[#allocation3 + $0x2f8] sm:$0xff]  ;;  %v7733_v39 = vrot.slane %v26613_v26, 1 }
 0x706   :  { %19744 = vmatprep.mubr.msk.f32.mxu1 %vm5418_vm4, %v27174_v58  ;;  %v27319_v30 = vsel %vm1776_vm3, %v7714_v28, %v7716_v16  ;;  %v27324_v4 = vsel %vm1776_vm3, %v7718_v6, %v7719_v44  ;;  %v27331_v46 = vsel %vm1776_vm3, %v7719_v44, %v7721_v48  ;;  %v7731_v42 = vrot.slane %v6251_v57, 1  ;;  %v6255_v16 = vld [vmem:[#allocation3 + $0x318] sm:$0xff] }
 0x707   :  { %v27343_v43 = vsel %vm1776_vm3, %v7724_v37, %v7726_v23  ;;  %v7736_v6 = vrot.slane %v6255_v16, 1  ;;  %v7738_v61 = vrot.slane %v26621_v9, 1  ;;  %v7739_v26 = vrot.slane %v26625_v33, 1  ;;  %v6259_v48 = vld [vmem:[#allocation3 + $0x338] sm:$0xff] }
 0x708   :  { %v7743_v21 = vrot.slane %v26629_v27, 1  ;;  %v31559_v23 = vld [vmem:[#allocation65_spill] sm:$0xff] }
 0x709   :  { %19745 = vmatmul.mubr.msk.f32.gmra.mrb[12].mxu1 %vm5418_vm4, %v27181_v1  ;;  %v7744_v9 = vrot.slane %v31559_v23, 1  ;;  %v6267_v16 = vld [vmem:[#allocation3 + $0x378] sm:$0xff] }
 0x70a   :  { %19747 = vmatprep.mubr.msk.f32.mxu1 %vm5418_vm4, %v27186_v31 }
 0x70b   :  { %v27384_v57 = vsel %vm1776_vm3, %v7743_v21, %v7744_v9  ;;  %v31567_v21 = vld [vmem:[#allocation69_spill] sm:$0xff] }
 0x70c   :  { %31561 = vst [vmem:[#allocation17_spill] sm:$0xff] %v27384_v57  ;;  %v7754_v23 = vrot.slane %v31567_v21, 1 }
 0x70d   :  { %19748 = vmatmul.mubr.msk.f32.gmra.mrb[14].mxu1 %vm5418_vm4, %v27193_v49 }
 0x70e   :  { %19750 = vmatprep.mubr.msk.f32.mxu1 %vm5418_vm4, %v27198_v22 }
 0x711   :  { %19751 = vmatmul.mubr.msk.f32.gmra.mrb[16].mxu1 %vm5418_vm4, %v27205_v8 }
 0x712   :  { %19753 = vmatprep.mubr.msk.f32.mxu1 %vm5418_vm4, %v27210_v11 }
 0x715   :  { %19754 = vmatmul.mubr.msk.f32.gmra.mrb[18].mxu1 %vm5418_vm4, %v27217_v29 }
 0x716   :  { %19756 = vmatprep.mubr.msk.f32.mxu1 %vm5418_vm4, %v27222_v47 }
 0x719   :  { %19757 = vmatmul.mubr.msk.f32.gmra.mrb[20].mxu1 %vm5418_vm4, %v27229_v3 }
 0x71a   :  { %19759 = vmatprep.mubr.msk.f32.mxu1 %vm5418_vm4, %v27234_v62 }
 0x71d   :  { %19760 = vmatmul.mubr.msk.f32.gmra.mrb[22].mxu1 %vm5418_vm4, %v27241_v2 }
 0x71e   :  { %19762 = vmatprep.mubr.msk.f32.mxu1 %vm5418_vm4, %v27246_v5 }
 0x721   :  { %19763 = vmatmul.mubr.msk.f32.gmra.mrb[24].mxu1 %vm5418_vm4, %v27253_v19 }
 0x722   :  { %19765 = vmatprep.mubr.msk.f32.mxu1 %vm5418_vm4, %v27258_v12 }
 0x725   :  { %19766 = vmatmul.mubr.msk.f32.gmra.mrb[26].mxu1 %vm5418_vm4, %v27265_v54 }
 0x726   :  { %19768 = vmatprep.mubr.msk.f32.mxu1 %vm5418_vm4, %v27270_v35 }
 0x729   :  { %19769 = vmatmul.mubr.msk.f32.gmra.mrb[28].mxu1 %vm5418_vm4, %v27279_v32 }
 0x72a   :  { %19771 = vmatprep.mubr.msk.f32.mxu1 %vm5418_vm4, %v27284_v52 }
 0x72d   :  { %19772 = vmatmul.mubr.msk.f32.gmra.mrb[30].mxu1 %vm5418_vm4, %v27290_v50 }
 0x72e   :  { %19774 = vmatprep.mubr.msk.f32.mxu1 %vm5418_vm4, %v7705_v18  ;;  %v7723_v18 = vrot.slane %v26597_v24, 1  ;;  %v7729_v24 = vrot.slane %v26609_v56, 1 }
 0x730   :  { %v27336_v0 = vsel %vm1776_vm3, %v7723_v18, %v7724_v37  ;;  %v27355_v56 = vsel %vm1776_vm3, %v7729_v24, %v7731_v42  ;;  %v7741_v18 = vrot.slane %v6259_v48, 1  ;;  %v27372_v37 = vsel %vm1776_vm3, %v7738_v61, %v7739_v26  ;;  %v31562_v42 = vld [vmem:[#allocation66_spill] sm:$0xff]  ;;  %v31566_v48 = vld [vmem:[#allocation68_spill] sm:$0xff] }
 0x731   :  { %19775 = vmatmul.mubr.msk.f32.gmra.mrb[32].mxu1 %vm5418_vm4, %v7707_v55  ;;  %v7728_v55 = vrot.slane %v26605_v41, 1  ;;  %v7734_v41 = vrot.slane %v26617_v59, 1  ;;  %31555 = vst [vmem:[#allocation12_spill] sm:$0xff] %v27355_v56  ;;  %31558 = vst [vmem:[#allocation15_spill] sm:$0xff] %v27372_v37  ;;  %v7751_v61 = vrot.slane %v6267_v16, 1  ;;  %v31571_v16 = vld [vmem:[#allocation71_spill] sm:$0xff] }
 0x732   :  { %19777 = vmatprep.mubr.msk.f32.mxu1 %vm5418_vm4, %v27300_v15  ;;  %v27379_v33 = vsel %vm1776_vm3, %v7739_v26, %v7741_v18  ;;  %v7753_v18 = vrot.slane %v31566_v48, 1  ;;  %v7759_v48 = vrot.slane %v31571_v16, 1 }
 0x733   :  { %v27348_v28 = vsel %vm1776_vm3, %v7728_v55, %v7729_v24  ;;  %v27360_v44 = vsel %vm1776_vm3, %v7733_v39, %v7734_v41  ;;  %v27367_v59 = vsel %vm1776_vm3, %v7734_v41, %v7736_v6  ;;  %v6263_v55 = vld [vmem:[#allocation3 + $0x358] sm:$0xff]  ;;  %31560 = vst [vmem:[#allocation16_spill] sm:$0xff] %v27379_v33  ;;  %v7748_v39 = vrot.slane %v31562_v42, 1  ;;  %v31563_v41 = vld [vmem:[#allocation67_spill] sm:$0xff] }
 0x734   :  { %31556 = vst [vmem:[#allocation13_spill] sm:$0xff] %v27360_v44  ;;  %31557 = vst [vmem:[#allocation14_spill] sm:$0xff] %v27367_v59  ;;  %v7746_v24 = vrot.slane %v6263_v55, 1  ;;  %v7749_v27 = vrot.slane %v31563_v41, 1  ;;  %v6271_v55 = vld [vmem:[#allocation3 + $0x398] sm:$0xff] }
 0x735   :  { %19778 = vmatmul.mubr.msk.f32.gmra.mrb[34].mxu1 %vm5418_vm4, %v27307_v25 }
 0x736   :  { %19780 = vmatprep.mubr.msk.f32.mxu1 %vm5418_vm4, %v27312_v36  ;;  %v27391_v6 = vsel %vm1776_vm3, %v7744_v9, %v7746_v24  ;;  %v27396_v26 = vsel %vm1776_vm3, %v7748_v39, %v7749_v27  ;;  %v27403_v42 = vsel %vm1776_vm3, %v7749_v27, %v7751_v61  ;;  %v7756_v9 = vrot.slane %v6271_v55, 1  ;;  %v31570_v39 = vld [vmem:[#allocation70_spill] sm:$0xff] }
 0x737   :  { %31564 = vst [vmem:[#allocation18_spill] sm:$0xff] %v27391_v6  ;;  %31565 = vst [vmem:[#allocation20_spill] sm:$0xff] %v27396_v26  ;;  %v27408_v24 = vsel %vm1776_vm3, %v7753_v18, %v7754_v23  ;;  %v7758_v41 = vrot.slane %v31570_v39, 1  ;;  %v31574_v18 = vld [vmem:[#allocation72_spill] sm:$0xff] }
 0x738   :  { %31568 = vst [vmem:[#allocation82_spill] sm:$0xff] %v27403_v42  ;;  %31569 = vst [vmem:[#allocation83_spill] sm:$0xff] %v27408_v24  ;;  %v27415_v21 = vsel %vm1776_vm3, %v7754_v23, %v7756_v9  ;;  %v7763_v55 = vrot.slane %v31574_v18, 1  ;;  %v27434_v9 = vld [vmem:[#allocation3 + $0x3e8] sm:$0xff]  ;;  %v27437_v18 = vld [vmem:[#allocation3 + $0x3f0] sm:$0xff] }
 0x739   :  { %19781 = vmatmul.mubr.msk.f32.gmra.mrb[36].mxu1 %vm5418_vm4, %v27319_v30  ;;  %31572 = vst [vmem:[#allocation84_spill] sm:$0xff] %v27415_v21  ;;  %v27420_v61 = vsel %vm1776_vm3, %v7758_v41, %v7759_v48  ;;  %31578 = vst [vmem:[#allocation80_spill] sm:$0xff] %v27434_v9  ;;  %v7768_v41 = vrot.slane %v27434_v9, 1 }
 0x73a   :  { %19783 = vmatprep.mubr.msk.f32.mxu1 %vm5418_vm4, %v27324_v4  ;;  %31573 = vst [vmem:[#allocation85_spill] sm:$0xff] %v27420_v61  ;;  %31579 = vst [vmem:[#allocation81_spill] sm:$0xff] %v27437_v18 }
 0x73d   :  { %19784 = vmatmul.mubr.msk.f32.gmra.mrb[38].mxu1 %vm5418_vm4, %v27331_v46 }
 0x73e   :  { %19786 = vmatprep.mubr.msk.f32.mxu1 %vm5418_vm4, %v27336_v0 }
 0x741   :  { %19787 = vmatmul.mubr.msk.f32.gmra.mrb[40].mxu1 %vm5418_vm4, %v27343_v43 }
 0x742   :  { %19789 = vmatprep.mubr.msk.f32.mxu1 %vm5418_vm4, %v27348_v28 }
 0x745   :  { %19790 = vmatmul.mubr.msk.f32.gmra.mrb[42].mxu1 %vm5418_vm4, %v27355_v56 }
 0x746   :  { %19792 = vmatprep.mubr.msk.f32.mxu1 %vm5418_vm4, %v27360_v44 }
 0x749   :  { %19793 = vmatmul.mubr.msk.f32.gmra.mrb[44].mxu1 %vm5418_vm4, %v27367_v59 }
 0x74a   :  { %19795 = vmatprep.mubr.msk.f32.mxu1 %vm5418_vm4, %v27372_v37  ;;  %v6291_v37 = vld [vmem:[#allocation3 + $0x438] sm:$0xff] }
 0x74d   :  { %19796 = vmatmul.mubr.msk.f32.gmra.mrb[46].mxu1 %vm5418_vm4, %v27379_v33 }
 0x74e   :  { %19798 = vmatprep.mubr.msk.f32.mxu1 %vm5418_vm4, %v27384_v57  ;;  %v6287_v57 = vld [vmem:[#allocation3 + $0x418] sm:$0xff] }
 0x751   :  { %19799 = vmatmul.mubr.msk.f32.gmra.mrb[48].mxu1 %vm5418_vm4, %v27391_v6  ;;  %v6275_v6 = vld [vmem:[#allocation3 + $0x3b8] sm:$0xff] }
 0x752   :  { %19801 = vmatprep.mubr.msk.f32.mxu1 %vm5418_vm4, %v27396_v26  ;;  %v7761_v27 = vrot.slane %v6275_v6, 1  ;;  %v6279_v26 = vld [vmem:[#allocation3 + $0x3d8] sm:$0xff] }
 0x753   :  { %v7766_v23 = vrot.slane %v6279_v26, 1 }
 0x754   :  { %v27427_v16 = vsel %vm1776_vm3, %v7759_v48, %v7761_v27 }
 0x755   :  { %19802 = vmatmul.mubr.msk.f32.gmra.mrb[50].mxu1 %vm5418_vm4, %v27403_v42  ;;  %v31575_v42 = vld [vmem:[#allocation73_spill] sm:$0xff]  ;;  %31576 = vst [vmem:[#allocation86_spill] sm:$0xff] %v27427_v16 }
 0x756   :  { %19804 = vmatprep.mubr.msk.f32.mxu1 %vm5418_vm4, %v27408_v24  ;;  %v7764_v39 = vrot.slane %v31575_v42, 1  ;;  %v7769_v42 = vrot.slane %v27437_v18, 1 }
 0x758   :  { %v27432_v6 = vsel %vm1776_vm3, %v7763_v55, %v7764_v39  ;;  %v27443_v26 = vsel %vm1776_vm3, %v7764_v39, %v7766_v23  ;;  %v27448_v27 = vsel %vm1776_vm3, %v7768_v41, %v7769_v42  ;;  %v27450_v55 = vld [vmem:[#allocation3 + $0x408] sm:$0xff]  ;;  %v7776_v39 = vrot.slane %v6287_v57, 1 }
 0x759   :  { %19805 = vmatmul.mubr.msk.f32.gmra.mrb[52].mxu1 %vm5418_vm4, %v27415_v21  ;;  %31577 = vst [vmem:[#allocation87_spill] sm:$0xff] %v27432_v6  ;;  %v6283_v21 = vld [vmem:[#allocation3 + $0x3f8] sm:$0xff]  ;;  %31580 = vst [vmem:[#allocation29_spill] sm:$0xff] %v27443_v26  ;;  %v27466_v41 = vld [vmem:[#allocation3 + $0x428] sm:$0xff] }
 0x75a   :  { %19807 = vmatprep.mubr.msk.f32.mxu1 %vm5418_vm4, %v27420_v61  ;;  %v7771_v48 = vrot.slane %v6283_v21, 1  ;;  %31581 = vst [vmem:[#allocation28_spill] sm:$0xff] %v27448_v27  ;;  %31582 = vst [vmem:[#allocation31_spill] sm:$0xff] %v27450_v55  ;;  %v27453_v61 = vld [vmem:[#allocation3 + $0x410] sm:$0xff] }
 0x75b   :  { %31583 = vst [vmem:[#allocation30_spill] sm:$0xff] %v27453_v61  ;;  %v7774_v24 = vrot.slane %v27453_v61, 1  ;;  %31586 = vst [vmem:[#allocation35_spill] sm:$0xff] %v27466_v41 }
 0x75c   :  { %v27459_v21 = vsel %vm1776_vm3, %v7769_v42, %v7771_v48  ;;  %v7781_v42 = vrot.slane %v6291_v37, 1  ;;  %v15222_v37 = vld [vmem:[%s30351_s3 + $0x98] sm:$0xff] }
 0x75d   :  { %19808 = vmatmul.mubr.msk.f32.gmra.mrb[54].mxu1 %vm5418_vm4, %v27427_v16  ;;  %v7773_v16 = vrot.slane %v27450_v55, 1  ;;  %31584 = vst [vmem:[#allocation33_spill] sm:$0xff] %v27459_v21  ;;  %v27475_v57 = vsel %vm1776_vm3, %v7774_v24, %v7776_v39  ;;  %v15288_v39 = vld [vmem:[%s30351_s3 + $0xa8] sm:$0xff] }
 0x75e   :  { %19810 = vmatprep.mubr.msk.f32.mxu1 %vm5418_vm4, %v27432_v6  ;;  %v27469_v6 = vld [vmem:[#allocation3 + $0x430] sm:$0xff]  ;;  %31588 = vst [vmem:[#allocation37_spill] sm:$0xff] %v27475_v57 }
 0x75f   :  { %v27464_v23 = vsel %vm1776_vm3, %v7773_v16, %v7774_v24  ;;  %31587 = vst [vmem:[#allocation34_spill] sm:$0xff] %v27469_v6  ;;  %v7779_v33 = vrot.slane %v27469_v6, 1  ;;  %v31591_v24 = vld [vmem:[#allocation22_spill] sm:$0xff] }
 0x760   :  { %31585 = vst [vmem:[#allocation32_spill] sm:$0xff] %v27464_v23 }
 0x761   :  { %19811 = vmatmul.mubr.msk.f32.gmra.mrb[56].mxu1 %vm5418_vm4, %v27443_v26  ;;  %v7778_v26 = vrot.slane %v27466_v41, 1  ;;  %v27485_v48 = vsel %vm1776_vm3, %v7779_v33, %v7781_v42  ;;  %v31592_v42 = vld [vmem:[#allocation23_spill] sm:$0xff] }
 0x762   :  { %19813 = vmatprep.mubr.msk.f32.mxu1 %vm5418_vm4, %v27448_v27  ;;  %31590 = vst [vmem:[#allocation44_spill] sm:$0xff] %v27485_v48 }
 0x763   :  { %v27480_v16 = vsel %vm1776_vm3, %v7778_v26, %v7779_v33  ;;  %v15287_v33 = vld [vmem:[%s30351_s3 + $0xa0] sm:$0xff] }
 0x764   :  { %31589 = vst [vmem:[#allocation40_spill] sm:$0xff] %v27480_v16 }
 0x765   :  { %19814 = vmatmul.mubr.msk.f32.gmra.mrb[58].mxu1 %vm5418_vm4, %v27459_v21  ;;  %v31624_v21 = vld [vmem:[#allocation115_spill] sm:$0xff] }
 0x766   :  { %19816 = vmatprep.mubr.msk.f32.mxu1 %vm5418_vm4, %v27464_v23  ;;  %v15221_v23 = vld [vmem:[%s30351_s3 + $0x90] sm:$0xff] }
 0x767   :  { %v20493_v26 = vpack.c.bf16 %v15222_v37, %v15221_v23  ;;  %v31594_v23 = vld [vmem:[#allocation55_spill] sm:$0xff]  ;;  %v31595_v37 = vld [vmem:[#allocation21_spill] sm:$0xff] }
 0x769   :  { %19817 = vmatmul.mubr.msk.f32.gmra.mrb[60].mxu1 %vm5418_vm4, %v27475_v57  ;;  %v27564_v57 = vld [vmem:[#allocation3 + $0x210] sm:$0xff] }
 0x76a   :  { %19819 = vmatprep.mubr.msk.f32.mxu1 %vm5418_vm4, %v27480_v16  ;;  %v31593_v16 = vld [vmem:[#allocation54_spill] sm:$0xff] }
 0x76d   :  { %19820 = vmatmul.mubr.msk.f32.gmra.mrb[62].mxu1 %vm5418_vm4, %v27485_v48  ;;  %v27508_v48 = vpack.c.bf16 %v15288_v39, %v15287_v33  ;;  %v31599_v33 = vld [vmem:[#allocation91_spill] sm:$0xff]  ;;  %v31600_v39 = vld [vmem:[#allocation92_spill] sm:$0xff] }
 0x76e   :  { %19830 = vmatprep.mubr.msk.f32.mxu1 %vm5418_vm4, %v31591_v24  ;;  %v31596_v24 = vld [vmem:[#allocation88_spill] sm:$0xff] }
 0x771   :  { %19831 = vmatmul.mubr.msk.f32.vlgmr.msra.gmra.mrb[0].mxu1 %vm5418_vm4, %v31592_v42  ;;  %v31597_v42 = vld [vmem:[#allocation89_spill] sm:$0xff] }
 0x772   :  { %20492 = vmatpush3.bf16.msra.mxu1 %v27117_v34  ;;  %19833 = vmatprep.mubr.msk.f32.mxu1 %vm5418_vm4, %v31593_v16  ;;  %v31598_v34 = vld [vmem:[#allocation90_spill] sm:$0xff] }
 0x773   :  { %20494 = vmatprep.subr.bf16.mxu1 %v20493_v26  ;;  %v31618_v16 = vld [vmem:[#allocation110_spill] sm:$0xff] }
 0x775   :  { %19834 = vmatmul.mubr.msk.f32.gmra.mrb[2].mxu1 %vm5418_vm4, %v31594_v23  ;;  %v31601_v23 = vld [vmem:[#allocation93_spill] sm:$0xff] }
 0x776   :  { %19836 = vmatprep.mubr.msk.f32.mxu1 %vm5418_vm4, %v31595_v37  ;;  %20496 = vmatpush3.bf16.msra.mxu1 %v20493_v26  ;;  %v31602_v26 = vld [vmem:[#allocation94_spill] sm:$0xff]  ;;  %v31603_v37 = vld [vmem:[#allocation95_spill] sm:$0xff] }
 0x777   :  { %20498 = vmatprep.subr.bf16.mxu1 %v27508_v48 }
 0x779   :  { %19837 = vmatmul.mubr.msk.f32.gmra.mrb[4].mxu1 %vm5418_vm4, %v31596_v24  ;;  %v31604_v24 = vld [vmem:[#allocation96_spill] sm:$0xff] }
 0x77a   :  { %19839 = vmatprep.mubr.msk.f32.mxu1 %vm5418_vm4, %v31597_v42  ;;  %v31605_v42 = vld [vmem:[#allocation97_spill] sm:$0xff] }
 0x77d   :  { %19840 = vmatmul.mubr.msk.f32.gmra.mrb[6].mxu1 %vm5418_vm4, %v31598_v34  ;;  %v31606_v34 = vld [vmem:[#allocation98_spill] sm:$0xff] }
 0x77e   :  { %19842 = vmatprep.mubr.msk.f32.mxu1 %vm5418_vm4, %v31599_v33  ;;  %v31607_v33 = vld [vmem:[#allocation99_spill] sm:$0xff] }
 0x781   :  { %19843 = vmatmul.mubr.msk.f32.gmra.mrb[8].mxu1 %vm5418_vm4, %v31600_v39  ;;  %v31608_v39 = vld [vmem:[#allocation100_spill] sm:$0xff] }
 0x782   :  { %19845 = vmatprep.mubr.msk.f32.mxu1 %vm5418_vm4, %v31601_v23  ;;  %v31609_v23 = vld [vmem:[#allocation101_spill] sm:$0xff] }
 0x785   :  { %19846 = vmatmul.mubr.msk.f32.gmra.mrb[10].mxu1 %vm5418_vm4, %v31602_v26  ;;  %v31610_v26 = vld [vmem:[#allocation102_spill] sm:$0xff] }
 0x786   :  { %19848 = vmatprep.mubr.msk.f32.mxu1 %vm5418_vm4, %v31603_v37  ;;  %v31611_v37 = vld [vmem:[#allocation103_spill] sm:$0xff] }
 0x789   :  { %19849 = vmatmul.mubr.msk.f32.gmra.mrb[12].mxu1 %vm5418_vm4, %v31604_v24  ;;  %v31612_v24 = vld [vmem:[#allocation104_spill] sm:$0xff] }
 0x78a   :  { %19851 = vmatprep.mubr.msk.f32.mxu1 %vm5418_vm4, %v31605_v42  ;;  %v31613_v42 = vld [vmem:[#allocation105_spill] sm:$0xff] }
 0x78d   :  { %19852 = vmatmul.mubr.msk.f32.gmra.mrb[14].mxu1 %vm5418_vm4, %v31606_v34  ;;  %v31614_v34 = vld [vmem:[#allocation106_spill] sm:$0xff] }
 0x78e   :  { %19854 = vmatprep.mubr.msk.f32.mxu1 %vm5418_vm4, %v31607_v33  ;;  %v31615_v33 = vld [vmem:[#allocation107_spill] sm:$0xff] }
 0x791   :  { %19855 = vmatmul.mubr.msk.f32.gmra.mrb[16].mxu1 %vm5418_vm4, %v31608_v39  ;;  %v31616_v39 = vld [vmem:[#allocation108_spill] sm:$0xff] }
 0x792   :  { %19857 = vmatprep.mubr.msk.f32.mxu1 %vm5418_vm4, %v31609_v23  ;;  %v31617_v23 = vld [vmem:[#allocation109_spill] sm:$0xff] }
 0x795   :  { %19858 = vmatmul.mubr.msk.f32.gmra.mrb[18].mxu1 %vm5418_vm4, %v31610_v26  ;;  %v6220_v26 = vld [vmem:[#allocation3 + $0x200] sm:$0xff] }
 0x796   :  { %19860 = vmatprep.mubr.msk.f32.mxu1 %vm5418_vm4, %v31611_v37  ;;  %v27559_v37 = vld [vmem:[#allocation3 + $0x208] sm:$0xff] }
 0x799   :  { %19861 = vmatmul.mubr.msk.f32.gmra.mrb[20].mxu1 %vm5418_vm4, %v31612_v24  ;;  %v8371_v24 = vrot.slane %v6220_v26, 7 }
 0x79a   :  { %19863 = vmatprep.mubr.msk.f32.mxu1 %vm5418_vm4, %v31613_v42  ;;  %v8372_v42 = vrot.slane %v27559_v37, 7 }
 0x79d   :  { %19864 = vmatmul.mubr.msk.f32.gmra.mrb[22].mxu1 %vm5418_vm4, %v31614_v34  ;;  %v31619_v34 = vld [vmem:[#allocation111_spill] sm:$0xff] }
 0x79e   :  { %19866 = vmatprep.mubr.msk.f32.mxu1 %vm5418_vm4, %v31615_v33  ;;  %v8374_v33 = vrot.slane %v27564_v57, 7 }
 0x7a0   :  { %v27577_v26 = vsel %vm547_vm2, %v8372_v42, %v8374_v33  ;;  %v31628_v33 = vld [vmem:[#allocation119_spill] sm:$0xff] }
 0x7a1   :  { %19867 = vmatmul.mubr.msk.f32.gmra.mrb[24].mxu1 %vm5418_vm4, %v31616_v39  ;;  %v31620_v39 = vld [vmem:[#allocation112_spill] sm:$0xff]  ;;  %31621 = vst [vmem:[#allocation48_spill] sm:$0xff] %v27577_v26 }
 0x7a2   :  { %19869 = vmatprep.mubr.msk.f32.mxu1 %vm5418_vm4, %v31617_v23  ;;  %v27572_v23 = vsel %vm547_vm2, %v8371_v24, %v8372_v42  ;;  %v31625_v24 = vld [vmem:[#allocation116_spill] sm:$0xff]  ;;  %v31627_v42 = vld [vmem:[#allocation118_spill] sm:$0xff] }
 0x7a5   :  { %19870 = vmatmul.mubr.msk.f32.gmra.mrb[26].mxu1 %vm5418_vm4, %v31618_v16  ;;  %v31622_v16 = vld [vmem:[#allocation113_spill] sm:$0xff] }
 0x7a6   :  { %19872 = vmatprep.mubr.msk.f32.mxu1 %vm5418_vm4, %v31619_v34  ;;  %v31623_v34 = vld [vmem:[#allocation114_spill] sm:$0xff] }
 0x7a9   :  { %19873 = vmatmul.mubr.msk.f32.gmra.mrb[28].mxu1 %vm5418_vm4, %v31620_v39  ;;  %v31626_v39 = vld [vmem:[#allocation117_spill] sm:$0xff] }
 0x7aa   :  { %19875 = vmatprep.mubr.msk.f32.mxu1 %vm5418_vm4, %v27572_v23 }
 0x7ad   :  { %19876 = vmatmul.mubr.msk.f32.gmra.mrb[30].mxu1 %vm5418_vm4, %v27577_v26  ;;  %v31629_v26 = vld [vmem:[#allocation120_spill] sm:$0xff] }
 0x7ae   :  { %19878 = vmatprep.mubr.msk.f32.mxu1 %vm5418_vm4, %v31622_v16  ;;  %v31630_v16 = vld [vmem:[#allocation121_spill] sm:$0xff] }
 0x7b1   :  { %19879 = vmatmul.mubr.msk.f32.gmra.mrb[32].mxu1 %vm5418_vm4, %v31623_v34  ;;  %v31631_v34 = vld [vmem:[#allocation122_spill] sm:$0xff] }
 0x7b2   :  { %19881 = vmatprep.mubr.msk.f32.mxu1 %vm5418_vm4, %v31624_v21  ;;  %v31632_v21 = vld [vmem:[#allocation123_spill] sm:$0xff] }
 0x7b5   :  { %19882 = vmatmul.mubr.msk.f32.gmra.mrb[34].mxu1 %vm5418_vm4, %v31625_v24  ;;  %v31633_v24 = vld [vmem:[#allocation124_spill] sm:$0xff] }
 0x7b6   :  { %19884 = vmatprep.mubr.msk.f32.mxu1 %vm5418_vm4, %v31626_v39  ;;  %v31634_v39 = vld [vmem:[#allocation125_spill] sm:$0xff] }
 0x7b9   :  { %19885 = vmatmul.mubr.msk.f32.gmra.mrb[36].mxu1 %vm5418_vm4, %v31627_v42  ;;  %v31635_v42 = vld [vmem:[#allocation126_spill] sm:$0xff] }
 0x7ba   :  { %19887 = vmatprep.mubr.msk.f32.mxu1 %vm5418_vm4, %v31628_v33  ;;  %v31636_v33 = vld [vmem:[#allocation127_spill] sm:$0xff] }
 0x7bd   :  { %19888 = vmatmul.mubr.msk.f32.gmra.mrb[38].mxu1 %vm5418_vm4, %v31629_v26  ;;  %v31637_v26 = vld [vmem:[#allocation128_spill] sm:$0xff] }
 0x7be   :  { %19890 = vmatprep.mubr.msk.f32.mxu1 %vm5418_vm4, %v31630_v16  ;;  %v31638_v16 = vld [vmem:[#allocation129_spill] sm:$0xff] }
 0x7c1   :  { %19891 = vmatmul.mubr.msk.f32.gmra.mrb[40].mxu1 %vm5418_vm4, %v31631_v34  ;;  %v31639_v34 = vld [vmem:[#allocation130_spill] sm:$0xff] }
 0x7c2   :  { %19893 = vmatprep.mubr.msk.f32.mxu1 %vm5418_vm4, %v31632_v21  ;;  %v31640_v21 = vld [vmem:[#allocation131_spill] sm:$0xff] }
 0x7c5   :  { %19894 = vmatmul.mubr.msk.f32.gmra.mrb[42].mxu1 %vm5418_vm4, %v31633_v24  ;;  %v31641_v24 = vld [vmem:[#allocation132_spill] sm:$0xff] }
 0x7c6   :  { %19896 = vmatprep.mubr.msk.f32.mxu1 %vm5418_vm4, %v31634_v39  ;;  %v31642_v39 = vld [vmem:[#allocation133_spill] sm:$0xff] }
 0x7c9   :  { %19897 = vmatmul.mubr.msk.f32.gmra.mrb[44].mxu1 %vm5418_vm4, %v31635_v42  ;;  %v31643_v42 = vld [vmem:[#allocation134_spill] sm:$0xff] }
 0x7ca   :  { %19899 = vmatprep.mubr.msk.f32.mxu1 %vm5418_vm4, %v31636_v33  ;;  %v31644_v33 = vld [vmem:[#allocation135_spill] sm:$0xff] }
 0x7cd   :  { %19900 = vmatmul.mubr.msk.f32.gmra.mrb[46].mxu1 %vm5418_vm4, %v31637_v26  ;;  %v31645_v26 = vld [vmem:[#allocation7_spill] sm:$0xff] }
 0x7ce   :  { %19902 = vmatprep.mubr.msk.f32.mxu1 %vm5418_vm4, %v31638_v16  ;;  %v31646_v16 = vld [vmem:[#allocation78_spill] sm:$0xff] }
 0x7d1   :  { %19903 = vmatmul.mubr.msk.f32.gmra.mrb[48].mxu1 %vm5418_vm4, %v31639_v34  ;;  %v27640_v34 = vld [vmem:[#allocation3 + $0x450] sm:$0xff] }
 0x7d2   :  { %19905 = vmatprep.mubr.msk.f32.mxu1 %vm5418_vm4, %v31640_v21  ;;  %v31647_v21 = vld [vmem:[#allocation9_spill] sm:$0xff] }
 0x7d5   :  { %19906 = vmatmul.mubr.msk.f32.gmra.mrb[50].mxu1 %vm5418_vm4, %v31641_v24  ;;  %v6292_v24 = vld [vmem:[#allocation3 + $0x440] sm:$0xff] }
 0x7d6   :  { %19908 = vmatprep.mubr.msk.f32.mxu1 %vm5418_vm4, %v31642_v39  ;;  %v27635_v39 = vld [vmem:[#allocation3 + $0x448] sm:$0xff] }
 0x7d9   :  { %19909 = vmatmul.mubr.msk.f32.gmra.mrb[52].mxu1 %vm5418_vm4, %v31643_v42  ;;  %v8376_v42 = vrot.slane %v6292_v24, 7 }
 0x7da   :  { %19911 = vmatprep.mubr.msk.f32.mxu1 %vm5418_vm4, %v31644_v33  ;;  %v8377_v33 = vrot.slane %v27635_v39, 7 }
 0x7dd   :  { %19912 = vmatmul.mubr.msk.f32.gmra.mrb[54].mxu1 %vm5418_vm4, %v31645_v26  ;;  %v31648_v26 = vld [vmem:[#allocation10_spill] sm:$0xff] }
 0x7de   :  { %19914 = vmatprep.mubr.msk.f32.mxu1 %vm5418_vm4, %v31646_v16  ;;  %v8379_v16 = vrot.slane %v27640_v34, 7 }
 0x7e0   :  { %v27653_v24 = vsel %vm547_vm2, %v8377_v33, %v8379_v16  ;;  %v15356_v16 = vld [vmem:[%s30351_s3 + $0xc8] sm:$0xff] }
 0x7e1   :  { %19915 = vmatmul.mubr.msk.f32.gmra.mrb[56].mxu1 %vm5418_vm4, %v27062_v14  ;;  %v27672_v14 = vld [vmem:[#allocation3 + $0x48] sm:$0xff] }
 0x7e2   :  { %19917 = vmatprep.mubr.msk.f32.mxu1 %vm5418_vm4, %v27068_v10  ;;  %v27648_v10 = vsel %vm547_vm2, %v8376_v42, %v8377_v33  ;;  %v15355_v33 = vld [vmem:[%s30351_s3 + $0xc0] sm:$0xff] }
 0x7e3   :  { %31649 = vst [vmem:[#allocation51_spill] sm:$0xff] %v27648_v10 }
 0x7e5   :  { %19918 = vmatmul.mubr.msk.f32.gmra.mrb[58].mxu1 %vm5418_vm4, %v31647_v21  ;;  %v15289_v21 = vld [vmem:[%s30351_s3 + $0xb0] sm:$0xff] }
 0x7e6   :  { %19920 = vmatprep.mubr.msk.f32.mxu1 %vm5418_vm4, %v31648_v26  ;;  %v15290_v26 = vld [vmem:[%s30351_s3 + $0xb8] sm:$0xff] }
 0x7e7   :  { %v20501_v42 = vpack.c.bf16 %v15290_v26, %v15289_v21  ;;  %v27678_v21 = vld [vmem:[#allocation3 + $0x50] sm:$0xff]  ;;  %v27682_v26 = vld [vmem:[#allocation3 + $0x68] sm:$0xff] }
 0x7e8   :  { %31650 = vst [vmem:[#allocation50_spill] sm:$0xff] %v27682_v26 }
 0x7e9   :  { %19921 = vmatmul.mubr.msk.f32.gmra.mrb[60].mxu1 %vm5418_vm4, %v27085_v20  ;;  %v22231_v20 = vld [vmem:[#allocation3 + $0x28] sm:$0xff] }
 0x7ea   :  { %19923 = vmatprep.mubr.msk.f32.mxu1 %vm5418_vm4, %v27648_v10  ;;  %v22232_v10 = vld [vmem:[#allocation3 + $0x30] sm:$0xff] }
 0x7ed   :  { %19924 = vmatmul.mubr.msk.f32.gmra.mrb[62].mxu1 %vm5418_vm4, %v27653_v24 }
 0x7ee   :  { %19934 = vmatprep.mubr.msk.f32.mxu1 %vm5418_vm4, %v22231_v20  ;;  %v27676_v20 = vpack.c.bf16 %v15356_v16, %v15355_v33  ;;  %v27695_v33 = vld [vmem:[#allocation3 + $0x90] sm:$0xff]  ;;  %v27699_v16 = vld [vmem:[#allocation3 + $0xa8] sm:$0xff] }
 0x7ef   :  { %31653 = vst [vmem:[#allocation39_spill] sm:$0xff] %v27695_v33  ;;  %31654 = vst [vmem:[#allocation38_spill] sm:$0xff] %v27699_v16 }
 0x7f1   :  { %19935 = vmatmul.mubr.msk.f32.vlgmr.msra.gmra.mrb[0].mxu1 %vm5418_vm4, %v22232_v10  ;;  %v27687_v10 = vld [vmem:[#allocation3 + $0x70] sm:$0xff] }
 0x7f2   :  { %20500 = vmatpush3.bf16.msra.mxu1 %v27508_v48  ;;  %19937 = vmatprep.mubr.msk.f32.mxu1 %vm5418_vm4, %v27672_v14  ;;  %31651 = vst [vmem:[#allocation52_spill] sm:$0xff] %v27687_v10  ;;  %v27691_v48 = vld [vmem:[#allocation3 + $0x88] sm:$0xff] }
 0x7f3   :  { %20502 = vmatprep.subr.bf16.mxu1 %v20501_v42  ;;  %31652 = vst [vmem:[#allocation36_spill] sm:$0xff] %v27691_v48 }
 0x7f5   :  { %19938 = vmatmul.mubr.msk.f32.gmra.mrb[2].mxu1 %vm5418_vm4, %v27678_v21 }
 0x7f6   :  { %19940 = vmatprep.mubr.msk.f32.mxu1 %vm5418_vm4, %v27682_v26  ;;  %20504 = vmatpush3.bf16.msra.mxu1 %v20501_v42  ;;  %v27703_v42 = vld [vmem:[#allocation3 + $0xb0] sm:$0xff] }
 0x7f7   :  { %20506 = vmatprep.subr.bf16.mxu1 %v27676_v20  ;;  %31655 = vst [vmem:[#allocation41_spill] sm:$0xff] %v27703_v42  ;;  %v27805_v26 = vld [vmem:[#allocation3 + $0x2b0] sm:$0xff] }
 0x7f8   :  { %31678 = vst [vmem:[#allocation19_spill] sm:$0xff] %v27805_v26 }
 0x7f9   :  { %19941 = vmatmul.mubr.msk.f32.gmra.mrb[4].mxu1 %vm5418_vm4, %v27687_v10  ;;  %v27707_v10 = vld [vmem:[#allocation3 + $0xc8] sm:$0xff] }
 0x7fa   :  { %19943 = vmatprep.mubr.msk.f32.mxu1 %vm5418_vm4, %v27691_v48  ;;  %31656 = vst [vmem:[#allocation43_spill] sm:$0xff] %v27707_v10  ;;  %v27711_v48 = vld [vmem:[#allocation3 + $0xd0] sm:$0xff] }
 0x7fb   :  { %31657 = vst [vmem:[#allocation42_spill] sm:$0xff] %v27711_v48 }
 0x7fd   :  { %19944 = vmatmul.mubr.msk.f32.gmra.mrb[6].mxu1 %vm5418_vm4, %v27695_v33  ;;  %v27715_v33 = vld [vmem:[#allocation3 + $0xe8] sm:$0xff] }
 0x7fe   :  { %19946 = vmatprep.mubr.msk.f32.mxu1 %vm5418_vm4, %v27699_v16  ;;  %31658 = vst [vmem:[#allocation45_spill] sm:$0xff] %v27715_v33  ;;  %v27719_v16 = vld [vmem:[#allocation3 + $0xf0] sm:$0xff] }
 0x7ff   :  { %31659 = vst [vmem:[#allocation47_spill] sm:$0xff] %v27719_v16 }
 0x801   :  { %19947 = vmatmul.mubr.msk.f32.gmra.mrb[8].mxu1 %vm5418_vm4, %v27703_v42  ;;  %v27723_v42 = vld [vmem:[#allocation3 + $0x108] sm:$0xff] }
 0x802   :  { %19949 = vmatprep.mubr.msk.f32.mxu1 %vm5418_vm4, %v27707_v10  ;;  %31660 = vst [vmem:[#allocation46_spill] sm:$0xff] %v27723_v42  ;;  %v27727_v10 = vld [vmem:[#allocation3 + $0x110] sm:$0xff] }
 0x803   :  { %31661 = vst [vmem:[#allocation49_spill] sm:$0xff] %v27727_v10 }
 0x805   :  { %19950 = vmatmul.mubr.msk.f32.gmra.mrb[10].mxu1 %vm5418_vm4, %v27711_v48  ;;  %v27731_v48 = vld [vmem:[#allocation3 + $0x128] sm:$0xff] }
 0x806   :  { %19952 = vmatprep.mubr.msk.f32.mxu1 %vm5418_vm4, %v27715_v33  ;;  %31662 = vst [vmem:[#allocation53_spill] sm:$0xff] %v27731_v48  ;;  %v27735_v33 = vld [vmem:[#allocation3 + $0x130] sm:$0xff] }
 0x807   :  { %31663 = vst [vmem:[#allocation24_spill] sm:$0xff] %v27735_v33 }
 0x809   :  { %19953 = vmatmul.mubr.msk.f32.gmra.mrb[12].mxu1 %vm5418_vm4, %v27719_v16  ;;  %v27739_v16 = vld [vmem:[#allocation3 + $0x148] sm:$0xff] }
 0x80a   :  { %19955 = vmatprep.mubr.msk.f32.mxu1 %vm5418_vm4, %v27723_v42  ;;  %31664 = vst [vmem:[#allocation25_spill] sm:$0xff] %v27739_v16  ;;  %v27743_v42 = vld [vmem:[#allocation3 + $0x150] sm:$0xff] }
 0x80b   :  { %31665 = vst [vmem:[#allocation56_spill] sm:$0xff] %v27743_v42 }
 0x80d   :  { %19956 = vmatmul.mubr.msk.f32.gmra.mrb[14].mxu1 %vm5418_vm4, %v27727_v10  ;;  %v27747_v10 = vld [vmem:[#allocation3 + $0x168] sm:$0xff] }
 0x80e   :  { %19958 = vmatprep.mubr.msk.f32.mxu1 %vm5418_vm4, %v27731_v48  ;;  %31666 = vst [vmem:[#allocation57_spill] sm:$0xff] %v27747_v10  ;;  %v27751_v48 = vld [vmem:[#allocation3 + $0x170] sm:$0xff] }
 0x80f   :  { %31667 = vst [vmem:[#allocation58_spill] sm:$0xff] %v27751_v48 }
 0x811   :  { %19959 = vmatmul.mubr.msk.f32.gmra.mrb[16].mxu1 %vm5418_vm4, %v27735_v33  ;;  %v27755_v33 = vld [vmem:[#allocation3 + $0x188] sm:$0xff] }
 0x812   :  { %19961 = vmatprep.mubr.msk.f32.mxu1 %vm5418_vm4, %v27739_v16  ;;  %31668 = vst [vmem:[#allocation59_spill] sm:$0xff] %v27755_v33  ;;  %v27759_v16 = vld [vmem:[#allocation3 + $0x190] sm:$0xff] }
 0x813   :  { %31669 = vst [vmem:[#allocation60_spill] sm:$0xff] %v27759_v16 }
 0x815   :  { %19962 = vmatmul.mubr.msk.f32.gmra.mrb[18].mxu1 %vm5418_vm4, %v27743_v42  ;;  %v27763_v42 = vld [vmem:[#allocation3 + $0x1a8] sm:$0xff] }
 0x816   :  { %19964 = vmatprep.mubr.msk.f32.mxu1 %vm5418_vm4, %v27747_v10  ;;  %31670 = vst [vmem:[#allocation61_spill] sm:$0xff] %v27763_v42  ;;  %v27767_v10 = vld [vmem:[#allocation3 + $0x1b0] sm:$0xff] }
 0x817   :  { %31671 = vst [vmem:[#allocation62_spill] sm:$0xff] %v27767_v10 }
 0x819   :  { %19965 = vmatmul.mubr.msk.f32.gmra.mrb[20].mxu1 %vm5418_vm4, %v27751_v48  ;;  %v27771_v48 = vld [vmem:[#allocation3 + $0x1c8] sm:$0xff] }
 0x81a   :  { %19967 = vmatprep.mubr.msk.f32.mxu1 %vm5418_vm4, %v27755_v33  ;;  %31672 = vst [vmem:[#allocation63_spill] sm:$0xff] %v27771_v48  ;;  %v27775_v33 = vld [vmem:[#allocation3 + $0x1d0] sm:$0xff] }
 0x81b   :  { %31673 = vst [vmem:[#allocation27_spill] sm:$0xff] %v27775_v33 }
 0x81d   :  { %19968 = vmatmul.mubr.msk.f32.gmra.mrb[22].mxu1 %vm5418_vm4, %v27759_v16  ;;  %v27779_v16 = vld [vmem:[#allocation3 + $0x1e8] sm:$0xff] }
 0x81e   :  { %19970 = vmatprep.mubr.msk.f32.mxu1 %vm5418_vm4, %v27763_v42  ;;  %31674 = vst [vmem:[#allocation26_spill] sm:$0xff] %v27779_v16  ;;  %v27783_v42 = vld [vmem:[#allocation3 + $0x1f0] sm:$0xff] }
 0x81f   :  { %31675 = vst [vmem:[#allocation74_spill] sm:$0xff] %v27783_v42 }
 0x821   :  { %19971 = vmatmul.mubr.msk.f32.gmra.mrb[24].mxu1 %vm5418_vm4, %v27767_v10  ;;  %v27793_v10 = vld [vmem:[#allocation3 + $0x288] sm:$0xff] }
 0x822   :  { %19973 = vmatprep.mubr.msk.f32.mxu1 %vm5418_vm4, %v27771_v48  ;;  %v22261_v48 = vld [vmem:[#allocation3 + $0x268] sm:$0xff] }
 0x825   :  { %19974 = vmatmul.mubr.msk.f32.gmra.mrb[26].mxu1 %vm5418_vm4, %v27775_v33  ;;  %v22262_v33 = vld [vmem:[#allocation3 + $0x270] sm:$0xff] }
 0x826   :  { %19976 = vmatprep.mubr.msk.f32.mxu1 %vm5418_vm4, %v27779_v16  ;;  %v27797_v16 = vld [vmem:[#allocation3 + $0x290] sm:$0xff] }
 0x827   :  { %31676 = vst [vmem:[#allocation75_spill] sm:$0xff] %v27797_v16 }
 0x829   :  { %19977 = vmatmul.mubr.msk.f32.gmra.mrb[28].mxu1 %vm5418_vm4, %v27783_v42  ;;  %v27801_v42 = vld [vmem:[#allocation3 + $0x2a8] sm:$0xff] }
 0x82a   :  { %19979 = vmatprep.mubr.msk.f32.mxu1 %vm5418_vm4, %v27559_v37  ;;  %31677 = vst [vmem:[#allocation76_spill] sm:$0xff] %v27801_v42 }
 0x82d   :  { %19980 = vmatmul.mubr.msk.f32.gmra.mrb[30].mxu1 %vm5418_vm4, %v27564_v57 }
 0x82e   :  { %19982 = vmatprep.mubr.msk.f32.mxu1 %vm5418_vm4, %v22261_v48  ;;  %v27809_v48 = vld [vmem:[#allocation3 + $0x2c8] sm:$0xff] }
 0x82f   :  { %31679 = vst [vmem:[#allocation77_spill] sm:$0xff] %v27809_v48 }
 0x831   :  { %19983 = vmatmul.mubr.msk.f32.gmra.mrb[32].mxu1 %vm5418_vm4, %v22262_v33  ;;  %v27813_v33 = vld [vmem:[#allocation3 + $0x2d0] sm:$0xff] }
 0x832   :  { %19985 = vmatprep.mubr.msk.f32.mxu1 %vm5418_vm4, %v27793_v10  ;;  %31680 = vst [vmem:[#allocation64_spill] sm:$0xff] %v27813_v33 }
 0x835   :  { %19986 = vmatmul.mubr.msk.f32.gmra.mrb[34].mxu1 %vm5418_vm4, %v27797_v16  ;;  %v27817_v16 = vld [vmem:[#allocation3 + $0x2e8] sm:$0xff] }
 0x836   :  { %19988 = vmatprep.mubr.msk.f32.mxu1 %vm5418_vm4, %v27801_v42  ;;  %31681 = vst [vmem:[#allocation65_spill] sm:$0xff] %v27817_v16  ;;  %v27821_v42 = vld [vmem:[#allocation3 + $0x2f0] sm:$0xff] }
 0x837   :  { %31682 = vst [vmem:[#allocation66_spill] sm:$0xff] %v27821_v42 }
 0x839   :  { %19989 = vmatmul.mubr.msk.f32.gmra.mrb[36].mxu1 %vm5418_vm4, %v27805_v26  ;;  %v27825_v26 = vld [vmem:[#allocation3 + $0x308] sm:$0xff] }
 0x83a   :  { %19991 = vmatprep.mubr.msk.f32.mxu1 %vm5418_vm4, %v27809_v48  ;;  %31683 = vst [vmem:[#allocation67_spill] sm:$0xff] %v27825_v26  ;;  %v27829_v48 = vld [vmem:[#allocation3 + $0x310] sm:$0xff] }
 0x83b   :  { %31684 = vst [vmem:[#allocation68_spill] sm:$0xff] %v27829_v48 }
 0x83d   :  { %19992 = vmatmul.mubr.msk.f32.gmra.mrb[38].mxu1 %vm5418_vm4, %v27813_v33  ;;  %v27833_v33 = vld [vmem:[#allocation3 + $0x328] sm:$0xff] }
 0x83e   :  { %19994 = vmatprep.mubr.msk.f32.mxu1 %vm5418_vm4, %v27817_v16  ;;  %31685 = vst [vmem:[#allocation69_spill] sm:$0xff] %v27833_v33  ;;  %v27837_v16 = vld [vmem:[#allocation3 + $0x330] sm:$0xff] }
 0x83f   :  { %31686 = vst [vmem:[#allocation70_spill] sm:$0xff] %v27837_v16 }
 0x841   :  { %19995 = vmatmul.mubr.msk.f32.gmra.mrb[40].mxu1 %vm5418_vm4, %v27821_v42  ;;  %v27841_v42 = vld [vmem:[#allocation3 + $0x348] sm:$0xff] }
 0x842   :  { %19997 = vmatprep.mubr.msk.f32.mxu1 %vm5418_vm4, %v27825_v26  ;;  %31687 = vst [vmem:[#allocation71_spill] sm:$0xff] %v27841_v42  ;;  %v27845_v26 = vld [vmem:[#allocation3 + $0x350] sm:$0xff] }
 0x843   :  { %31688 = vst [vmem:[#allocation72_spill] sm:$0xff] %v27845_v26 }
 0x845   :  { %19998 = vmatmul.mubr.msk.f32.gmra.mrb[42].mxu1 %vm5418_vm4, %v27829_v48  ;;  %v27849_v48 = vld [vmem:[#allocation3 + $0x368] sm:$0xff] }
 0x846   :  { %20000 = vmatprep.mubr.msk.f32.mxu1 %vm5418_vm4, %v27833_v33  ;;  %31689 = vst [vmem:[#allocation73_spill] sm:$0xff] %v27849_v48  ;;  %v27853_v33 = vld [vmem:[#allocation3 + $0x370] sm:$0xff] }
 0x847   :  { %31690 = vst [vmem:[#allocation22_spill] sm:$0xff] %v27853_v33 }
 0x849   :  { %20001 = vmatmul.mubr.msk.f32.gmra.mrb[44].mxu1 %vm5418_vm4, %v27837_v16  ;;  %v27857_v16 = vld [vmem:[#allocation3 + $0x388] sm:$0xff] }
 0x84a   :  { %20003 = vmatprep.mubr.msk.f32.mxu1 %vm5418_vm4, %v27841_v42  ;;  %31691 = vst [vmem:[#allocation23_spill] sm:$0xff] %v27857_v16  ;;  %v27861_v42 = vld [vmem:[#allocation3 + $0x390] sm:$0xff] }
 0x84d   :  { %20004 = vmatmul.mubr.msk.f32.gmra.mrb[46].mxu1 %vm5418_vm4, %v27845_v26  ;;  %v27865_v26 = vld [vmem:[#allocation3 + $0x3a8] sm:$0xff] }
 0x84e   :  { %20006 = vmatprep.mubr.msk.f32.mxu1 %vm5418_vm4, %v27849_v48  ;;  %v27869_v48 = vld [vmem:[#allocation3 + $0x3b0] sm:$0xff] }
 0x851   :  { %20007 = vmatmul.mubr.msk.f32.gmra.mrb[48].mxu1 %vm5418_vm4, %v27853_v33  ;;  %v27873_v33 = vld [vmem:[#allocation3 + $0x3c8] sm:$0xff] }
 0x852   :  { %20009 = vmatprep.mubr.msk.f32.mxu1 %vm5418_vm4, %v27857_v16  ;;  %v27877_v16 = vld [vmem:[#allocation3 + $0x3d0] sm:$0xff] }
 0x855   :  { %20010 = vmatmul.mubr.msk.f32.gmra.mrb[50].mxu1 %vm5418_vm4, %v27861_v42 }
 0x856   :  { %20012 = vmatprep.mubr.msk.f32.mxu1 %vm5418_vm4, %v27865_v26 }
 0x859   :  { %20013 = vmatmul.mubr.msk.f32.gmra.mrb[52].mxu1 %vm5418_vm4, %v27869_v48 }
 0x85a   :  { %20015 = vmatprep.mubr.msk.f32.mxu1 %vm5418_vm4, %v27873_v33 }
 0x85d   :  { %20016 = vmatmul.mubr.msk.f32.gmra.mrb[54].mxu1 %vm5418_vm4, %v27877_v16 }
 0x85e   :  { %20018 = vmatprep.mubr.msk.f32.mxu1 %vm5418_vm4, %v27434_v9  ;;  %v15357_v9 = vld [vmem:[%s30351_s3 + $0xd0] sm:$0xff] }
 0x861   :  { %20019 = vmatmul.mubr.msk.f32.gmra.mrb[56].mxu1 %vm5418_vm4, %v27437_v18 }
 0x862   :  { %20021 = vmatprep.mubr.msk.f32.mxu1 %vm5418_vm4, %v27450_v55  ;;  %v15358_v55 = vld [vmem:[%s30351_s3 + $0xd8] sm:$0xff] }
 0x865   :  { %20022 = vmatmul.mubr.msk.f32.gmra.mrb[58].mxu1 %vm5418_vm4, %v27453_v61  ;;  %v15424_v61 = vld [vmem:[%s30351_s3 + $0xe8] sm:$0xff] }
 0x866   :  { %20024 = vmatprep.mubr.msk.f32.mxu1 %vm5418_vm4, %v27466_v41  ;;  %v20509_v41 = vpack.c.bf16 %v15358_v55, %v15357_v9 }
 0x869   :  { %20025 = vmatmul.mubr.msk.f32.gmra.mrb[60].mxu1 %vm5418_vm4, %v27469_v6  ;;  %v15423_v6 = vld [vmem:[%s30351_s3 + $0xe0] sm:$0xff] }
 0x86a   :  { %20027 = vmatprep.mubr.msk.f32.mxu1 %vm5418_vm4, %v27635_v39  ;;  %v27916_v18 = vpack.c.bf16 %v15424_v61, %v15423_v6  ;;  %v6223_v61 = vld [vmem:[#allocation3 + $0x218] sm:$0xff] }
 0x86b   :  { %v9310_v6 = vrot.slane %v6223_v61, 1  ;;  %v31698_v61 = vld [vmem:[#allocation83_spill] sm:$0xff] }
 0x86d   :  { %20028 = vmatmul.mubr.msk.f32.gmra.mrb[62].mxu1 %vm5418_vm4, %v27640_v34 }
 0x86e   :  { %20038 = vmatprep.mubr.msk.f32.mxu1 %vm5418_vm4, %v27110_v51  ;;  %v9307_v51 = vrot.slane %v27559_v37, 1 }
 0x871   :  { %20039 = vmatmul.mubr.msk.f32.vlgmr.msra.gmra.mrb[0].mxu1 %vm5418_vm4, %v27120_v7  ;;  %v9308_v7 = vrot.slane %v27564_v57, 1 }
 0x872   :  { %20508 = vmatpush3.bf16.msra.mxu1 %v27676_v20  ;;  %20041 = vmatprep.mubr.msk.f32.mxu1 %vm5418_vm4, %v27125_v53  ;;  %v31695_v20 = vld [vmem:[#allocation18_spill] sm:$0xff] }
 0x873   :  { %20510 = vmatprep.subr.bf16.mxu1 %v20509_v41  ;;  %v27976_v9 = vsel %vm1776_vm3, %v9307_v51, %v9308_v7  ;;  %v27981_v55 = vsel %vm1776_vm3, %v9308_v7, %v9310_v6  ;;  %v31696_v51 = vld [vmem:[#allocation20_spill] sm:$0xff]  ;;  %v31697_v7 = vld [vmem:[#allocation82_spill] sm:$0xff] }
 0x874   :  { %v31699_v6 = vld [vmem:[#allocation84_spill] sm:$0xff] }
 0x875   :  { %20042 = vmatmul.mubr.msk.f32.gmra.mrb[2].mxu1 %vm5418_vm4, %v27133_v17 }
 0x876   :  { %20044 = vmatprep.mubr.msk.f32.mxu1 %vm5418_vm4, %v27138_v45  ;;  %20512 = vmatpush3.bf16.msra.mxu1 %v20509_v41  ;;  %v31694_v41 = vld [vmem:[#allocation17_spill] sm:$0xff] }
 0x877   :  { %20514 = vmatprep.subr.bf16.mxu1 %v27916_v18 }
 0x879   :  { %20045 = vmatmul.mubr.msk.f32.gmra.mrb[4].mxu1 %vm5418_vm4, %v27145_v60 }
 0x87a   :  { %20047 = vmatprep.mubr.msk.f32.mxu1 %vm5418_vm4, %v27150_v38 }
 0x87d   :  { %20048 = vmatmul.mubr.msk.f32.gmra.mrb[6].mxu1 %vm5418_vm4, %v27157_v63 }
 0x87e   :  { %20050 = vmatprep.mubr.msk.f32.mxu1 %vm5418_vm4, %v27162_v13 }
 0x881   :  { %20051 = vmatmul.mubr.msk.f32.gmra.mrb[8].mxu1 %vm5418_vm4, %v27169_v40 }
 0x882   :  { %20053 = vmatprep.mubr.msk.f32.mxu1 %vm5418_vm4, %v27174_v58 }
 0x885   :  { %20054 = vmatmul.mubr.msk.f32.gmra.mrb[10].mxu1 %vm5418_vm4, %v27181_v1 }
 0x886   :  { %20056 = vmatprep.mubr.msk.f32.mxu1 %vm5418_vm4, %v27186_v31 }
 0x889   :  { %20057 = vmatmul.mubr.msk.f32.gmra.mrb[12].mxu1 %vm5418_vm4, %v27193_v49 }
 0x88a   :  { %20059 = vmatprep.mubr.msk.f32.mxu1 %vm5418_vm4, %v27198_v22 }
 0x88d   :  { %20060 = vmatmul.mubr.msk.f32.gmra.mrb[14].mxu1 %vm5418_vm4, %v27205_v8 }
 0x88e   :  { %20062 = vmatprep.mubr.msk.f32.mxu1 %vm5418_vm4, %v27210_v11 }
 0x891   :  { %20063 = vmatmul.mubr.msk.f32.gmra.mrb[16].mxu1 %vm5418_vm4, %v27217_v29 }
 0x892   :  { %20065 = vmatprep.mubr.msk.f32.mxu1 %vm5418_vm4, %v27222_v47 }
 0x895   :  { %20066 = vmatmul.mubr.msk.f32.gmra.mrb[18].mxu1 %vm5418_vm4, %v27229_v3 }
 0x896   :  { %20068 = vmatprep.mubr.msk.f32.mxu1 %vm5418_vm4, %v27234_v62 }
 0x899   :  { %20069 = vmatmul.mubr.msk.f32.gmra.mrb[20].mxu1 %vm5418_vm4, %v27241_v2 }
 0x89a   :  { %20071 = vmatprep.mubr.msk.f32.mxu1 %vm5418_vm4, %v27246_v5 }
 0x89d   :  { %20072 = vmatmul.mubr.msk.f32.gmra.mrb[22].mxu1 %vm5418_vm4, %v27253_v19 }
 0x89e   :  { %20074 = vmatprep.mubr.msk.f32.mxu1 %vm5418_vm4, %v27258_v12 }
 0x8a1   :  { %20075 = vmatmul.mubr.msk.f32.gmra.mrb[24].mxu1 %vm5418_vm4, %v27265_v54 }
 0x8a2   :  { %20077 = vmatprep.mubr.msk.f32.mxu1 %vm5418_vm4, %v27270_v35 }
 0x8a5   :  { %20078 = vmatmul.mubr.msk.f32.gmra.mrb[26].mxu1 %vm5418_vm4, %v27279_v32 }
 0x8a6   :  { %20080 = vmatprep.mubr.msk.f32.mxu1 %vm5418_vm4, %v27284_v52 }
 0x8a9   :  { %20081 = vmatmul.mubr.msk.f32.gmra.mrb[28].mxu1 %vm5418_vm4, %v27290_v50 }
 0x8aa   :  { %20083 = vmatprep.mubr.msk.f32.mxu1 %vm5418_vm4, %v27976_v9 }
 0x8ad   :  { %20084 = vmatmul.mubr.msk.f32.gmra.mrb[30].mxu1 %vm5418_vm4, %v27981_v55 }
 0x8ae   :  { %20086 = vmatprep.mubr.msk.f32.mxu1 %vm5418_vm4, %v27300_v15  ;;  %v31692_v15 = vld [vmem:[#allocation15_spill] sm:$0xff] }
 0x8b1   :  { %20087 = vmatmul.mubr.msk.f32.gmra.mrb[32].mxu1 %vm5418_vm4, %v27307_v25  ;;  %v31693_v25 = vld [vmem:[#allocation16_spill] sm:$0xff] }
 0x8b2   :  { %20089 = vmatprep.mubr.msk.f32.mxu1 %vm5418_vm4, %v27312_v36 }
 0x8b5   :  { %20090 = vmatmul.mubr.msk.f32.gmra.mrb[34].mxu1 %vm5418_vm4, %v27319_v30 }
 0x8b6   :  { %20092 = vmatprep.mubr.msk.f32.mxu1 %vm5418_vm4, %v27324_v4 }
 0x8b9   :  { %20093 = vmatmul.mubr.msk.f32.gmra.mrb[36].mxu1 %vm5418_vm4, %v27331_v46 }
 0x8ba   :  { %20095 = vmatprep.mubr.msk.f32.mxu1 %vm5418_vm4, %v27336_v0 }
 0x8bd   :  { %20096 = vmatmul.mubr.msk.f32.gmra.mrb[38].mxu1 %vm5418_vm4, %v27343_v43 }
 0x8be   :  { %20098 = vmatprep.mubr.msk.f32.mxu1 %vm5418_vm4, %v27348_v28 }
 0x8c1   :  { %20099 = vmatmul.mubr.msk.f32.gmra.mrb[40].mxu1 %vm5418_vm4, %v27355_v56 }
 0x8c2   :  { %20101 = vmatprep.mubr.msk.f32.mxu1 %vm5418_vm4, %v27360_v44  ;;  %v31739_v44 = vld [vmem:[#allocation48_spill] sm:$0xff] }
 0x8c5   :  { %20102 = vmatmul.mubr.msk.f32.gmra.mrb[42].mxu1 %vm5418_vm4, %v27367_v59  ;;  %v31708_v59 = vld [vmem:[#allocation44_spill] sm:$0xff] }
 0x8c6   :  { %20104 = vmatprep.mubr.msk.f32.mxu1 %vm5418_vm4, %v31692_v15  ;;  %v31700_v15 = vld [vmem:[#allocation85_spill] sm:$0xff] }
 0x8c9   :  { %20105 = vmatmul.mubr.msk.f32.gmra.mrb[44].mxu1 %vm5418_vm4, %v31693_v25  ;;  %v31701_v25 = vld [vmem:[#allocation86_spill] sm:$0xff] }
 0x8ca   :  { %20107 = vmatprep.mubr.msk.f32.mxu1 %vm5418_vm4, %v31694_v41  ;;  %v31702_v41 = vld [vmem:[#allocation87_spill] sm:$0xff] }
 0x8cd   :  { %20108 = vmatmul.mubr.msk.f32.gmra.mrb[46].mxu1 %vm5418_vm4, %v31695_v20  ;;  %v31703_v20 = vld [vmem:[#allocation29_spill] sm:$0xff] }
 0x8ce   :  { %20110 = vmatprep.mubr.msk.f32.mxu1 %vm5418_vm4, %v31696_v51  ;;  %v31707_v51 = vld [vmem:[#allocation40_spill] sm:$0xff] }
 0x8d1   :  { %20111 = vmatmul.mubr.msk.f32.gmra.mrb[48].mxu1 %vm5418_vm4, %v31697_v7  ;;  %v31704_v7 = vld [vmem:[#allocation33_spill] sm:$0xff] }
 0x8d2   :  { %20113 = vmatprep.mubr.msk.f32.mxu1 %vm5418_vm4, %v31698_v61  ;;  %v31705_v61 = vld [vmem:[#allocation32_spill] sm:$0xff] }
 0x8d5   :  { %20114 = vmatmul.mubr.msk.f32.gmra.mrb[50].mxu1 %vm5418_vm4, %v31699_v6  ;;  %v31706_v6 = vld [vmem:[#allocation37_spill] sm:$0xff] }
 0x8d6   :  { %20116 = vmatprep.mubr.msk.f32.mxu1 %vm5418_vm4, %v31700_v15  ;;  %v9313_v15 = vrot.slane %v27640_v34, 1 }
 0x8d9   :  { %20117 = vmatmul.mubr.msk.f32.gmra.mrb[52].mxu1 %vm5418_vm4, %v31701_v25  ;;  %v9312_v25 = vrot.slane %v27635_v39, 1 }
 0x8da   :  { %20119 = vmatprep.mubr.msk.f32.mxu1 %vm5418_vm4, %v31702_v41  ;;  %v6295_v41 = vld [vmem:[#allocation3 + $0x458] sm:$0xff] }
 0x8dd   :  { %20120 = vmatmul.mubr.msk.f32.gmra.mrb[54].mxu1 %vm5418_vm4, %v31703_v20  ;;  %v9315_v20 = vrot.slane %v6295_v41, 1  ;;  %v15426_v41 = vld [vmem:[%s30351_s3 + $0xf8] sm:$0xff] }
 0x8de   :  { %20122 = vmatprep.mubr.msk.f32.mxu1 %vm5418_vm4, %v27448_v27  ;;  %v28130_v27 = vld [vmem:[#allocation3 + $0x230] sm:$0xff] }
 0x8e1   :  { %20123 = vmatmul.mubr.msk.f32.gmra.mrb[56].mxu1 %vm5418_vm4, %v31704_v7  ;;  %v28048_v7 = vsel %vm1776_vm3, %v9312_v25, %v9313_v15 }
 0x8e2   :  { %20125 = vmatprep.mubr.msk.f32.mxu1 %vm5418_vm4, %v31705_v61  ;;  %31709 = vst [vmem:[#allocation113_spill] sm:$0xff] %v28048_v7  ;;  %v15425_v61 = vld [vmem:[%s30351_s3 + $0xf0] sm:$0xff] }
 0x8e3   :  { %v20517_v25 = vpack.c.bf16 %v15426_v41, %v15425_v61  ;;  %v31715_v61 = vld [vmem:[#allocation89_spill] sm:$0xff]  ;;  %v31716_v41 = vld [vmem:[#allocation90_spill] sm:$0xff] }
 0x8e5   :  { %20126 = vmatmul.mubr.msk.f32.gmra.mrb[58].mxu1 %vm5418_vm4, %v31706_v6  ;;  %v28053_v6 = vsel %vm1776_vm3, %v9313_v15, %v9315_v20  ;;  %v15491_v15 = vld [vmem:[%s30351_s3 + $0x100] sm:$0xff]  ;;  %v15492_v20 = vld [vmem:[%s30351_s3 + $0x108] sm:$0xff] }
 0x8e6   :  { %20128 = vmatprep.mubr.msk.f32.mxu1 %vm5418_vm4, %v31707_v51  ;;  %31710 = vst [vmem:[#allocation114_spill] sm:$0xff] %v28053_v6  ;;  %v31713_v51 = vld [vmem:[#allocation21_spill] sm:$0xff] }
 0x8e9   :  { %20129 = vmatmul.mubr.msk.f32.gmra.mrb[60].mxu1 %vm5418_vm4, %v31708_v59  ;;  %v31711_v59 = vld [vmem:[#allocation54_spill] sm:$0xff] }
 0x8ea   :  { %20131 = vmatprep.mubr.msk.f32.mxu1 %vm5418_vm4, %v28048_v7  ;;  %v31712_v7 = vld [vmem:[#allocation55_spill] sm:$0xff] }
 0x8ed   :  { %20132 = vmatmul.mubr.msk.f32.gmra.mrb[62].mxu1 %vm5418_vm4, %v28053_v6  ;;  %v28076_v6 = vpack.c.bf16 %v15492_v20, %v15491_v15  ;;  %v31720_v15 = vld [vmem:[#allocation94_spill] sm:$0xff]  ;;  %v31721_v20 = vld [vmem:[#allocation95_spill] sm:$0xff] }
 0x8ee   :  { %20142 = vmatprep.mubr.msk.f32.mxu1 %vm5418_vm4, %v31711_v59  ;;  %v31714_v59 = vld [vmem:[#allocation88_spill] sm:$0xff] }
 0x8f1   :  { %20143 = vmatmul.mubr.msk.f32.vlgmr.msra.gmra.mrb[0].mxu1 %vm5418_vm4, %v31712_v7  ;;  %v31717_v7 = vld [vmem:[#allocation91_spill] sm:$0xff] }
 0x8f2   :  { %20516 = vmatpush3.bf16.msra.mxu1 %v27916_v18  ;;  %20145 = vmatprep.mubr.msk.f32.mxu1 %vm5418_vm4, %v31713_v51  ;;  %v31718_v18 = vld [vmem:[#allocation92_spill] sm:$0xff]  ;;  %v31719_v51 = vld [vmem:[#allocation93_spill] sm:$0xff] }
 0x8f3   :  { %20518 = vmatprep.subr.bf16.mxu1 %v20517_v25 }
 0x8f5   :  { %20146 = vmatmul.mubr.msk.f32.gmra.mrb[2].mxu1 %vm5418_vm4, %v31714_v59  ;;  %v31723_v59 = vld [vmem:[#allocation97_spill] sm:$0xff] }
 0x8f6   :  { %20148 = vmatprep.mubr.msk.f32.mxu1 %vm5418_vm4, %v31715_v61  ;;  %20520 = vmatpush3.bf16.msra.mxu1 %v20517_v25  ;;  %v31722_v25 = vld [vmem:[#allocation96_spill] sm:$0xff]  ;;  %v31724_v61 = vld [vmem:[#allocation98_spill] sm:$0xff] }
 0x8f7   :  { %20522 = vmatprep.subr.bf16.mxu1 %v28076_v6 }
 0x8f9   :  { %20149 = vmatmul.mubr.msk.f32.gmra.mrb[4].mxu1 %vm5418_vm4, %v31716_v41  ;;  %v31725_v41 = vld [vmem:[#allocation99_spill] sm:$0xff] }
 0x8fa   :  { %20151 = vmatprep.mubr.msk.f32.mxu1 %vm5418_vm4, %v31717_v7  ;;  %v31726_v7 = vld [vmem:[#allocation100_spill] sm:$0xff] }
 0x8fd   :  { %20152 = vmatmul.mubr.msk.f32.gmra.mrb[6].mxu1 %vm5418_vm4, %v31718_v18  ;;  %v31727_v18 = vld [vmem:[#allocation101_spill] sm:$0xff] }
 0x8fe   :  { %20154 = vmatprep.mubr.msk.f32.mxu1 %vm5418_vm4, %v31719_v51  ;;  %v31728_v51 = vld [vmem:[#allocation102_spill] sm:$0xff] }
 0x901   :  { %20155 = vmatmul.mubr.msk.f32.gmra.mrb[8].mxu1 %vm5418_vm4, %v31720_v15  ;;  %v31729_v15 = vld [vmem:[#allocation103_spill] sm:$0xff] }
 0x902   :  { %20157 = vmatprep.mubr.msk.f32.mxu1 %vm5418_vm4, %v31721_v20  ;;  %v31730_v20 = vld [vmem:[#allocation104_spill] sm:$0xff] }
 0x905   :  { %20158 = vmatmul.mubr.msk.f32.gmra.mrb[10].mxu1 %vm5418_vm4, %v31722_v25  ;;  %v31731_v25 = vld [vmem:[#allocation105_spill] sm:$0xff] }
 0x906   :  { %20160 = vmatprep.mubr.msk.f32.mxu1 %vm5418_vm4, %v31723_v59  ;;  %v31732_v59 = vld [vmem:[#allocation106_spill] sm:$0xff] }
 0x909   :  { %20161 = vmatmul.mubr.msk.f32.gmra.mrb[12].mxu1 %vm5418_vm4, %v31724_v61  ;;  %v31733_v61 = vld [vmem:[#allocation107_spill] sm:$0xff] }
 0x90a   :  { %20163 = vmatprep.mubr.msk.f32.mxu1 %vm5418_vm4, %v31725_v41  ;;  %v31734_v41 = vld [vmem:[#allocation108_spill] sm:$0xff] }
 0x90d   :  { %20164 = vmatmul.mubr.msk.f32.gmra.mrb[14].mxu1 %vm5418_vm4, %v31726_v7  ;;  %v31735_v7 = vld [vmem:[#allocation109_spill] sm:$0xff] }
 0x90e   :  { %20166 = vmatprep.mubr.msk.f32.mxu1 %vm5418_vm4, %v31727_v18  ;;  %v6224_v18 = vld [vmem:[#allocation3 + $0x220] sm:$0xff] }
 0x911   :  { %20167 = vmatmul.mubr.msk.f32.gmra.mrb[16].mxu1 %vm5418_vm4, %v31728_v51  ;;  %v28123_v51 = vld [vmem:[#allocation3 + $0x228] sm:$0xff] }
 0x912   :  { %20169 = vmatprep.mubr.msk.f32.mxu1 %vm5418_vm4, %v31729_v15  ;;  %v31736_v15 = vld [vmem:[#allocation110_spill] sm:$0xff] }
 0x915   :  { %20170 = vmatmul.mubr.msk.f32.gmra.mrb[18].mxu1 %vm5418_vm4, %v31730_v20  ;;  %v31737_v20 = vld [vmem:[#allocation111_spill] sm:$0xff] }
 0x916   :  { %20172 = vmatprep.mubr.msk.f32.mxu1 %vm5418_vm4, %v31731_v25  ;;  %v9785_v25 = vrot.slane %v6224_v18, 7 }
 0x919   :  { %20173 = vmatmul.mubr.msk.f32.gmra.mrb[20].mxu1 %vm5418_vm4, %v31732_v59  ;;  %v9786_v59 = vrot.slane %v28123_v51, 7 }
 0x91a   :  { %20175 = vmatprep.mubr.msk.f32.mxu1 %vm5418_vm4, %v31733_v61  ;;  %v31738_v61 = vld [vmem:[#allocation112_spill] sm:$0xff] }
 0x91d   :  { %20176 = vmatmul.mubr.msk.f32.gmra.mrb[22].mxu1 %vm5418_vm4, %v31734_v41  ;;  %v9788_v41 = vrot.slane %v28130_v27, 7 }
 0x91e   :  { %20178 = vmatprep.mubr.msk.f32.mxu1 %vm5418_vm4, %v31735_v7  ;;  %v9787_v7 = vsel %vm547_vm2, %v9785_v25, %v9786_v59  ;;  %v31744_v25 = vld [vmem:[#allocation119_spill] sm:$0xff] }
 0x91f   :  { %v9789_v18 = vsel %vm547_vm2, %v9786_v59, %v9788_v41  ;;  %v31746_v59 = vld [vmem:[#allocation121_spill] sm:$0xff]  ;;  %v31747_v41 = vld [vmem:[#allocation122_spill] sm:$0xff] }
 0x921   :  { %20179 = vmatmul.mubr.msk.f32.gmra.mrb[24].mxu1 %vm5418_vm4, %v31736_v15  ;;  %v31740_v15 = vld [vmem:[#allocation115_spill] sm:$0xff] }
 0x922   :  { %20181 = vmatprep.mubr.msk.f32.mxu1 %vm5418_vm4, %v31737_v20  ;;  %v31741_v20 = vld [vmem:[#allocation116_spill] sm:$0xff] }
 0x925   :  { %20182 = vmatmul.mubr.msk.f32.gmra.mrb[26].mxu1 %vm5418_vm4, %v31738_v61  ;;  %v31743_v61 = vld [vmem:[#allocation118_spill] sm:$0xff] }
 0x926   :  { %20184 = vmatprep.mubr.msk.f32.mxu1 %vm5418_vm4, %v27572_v23  ;;  %v31742_v23 = vld [vmem:[#allocation117_spill] sm:$0xff] }
 0x929   :  { %20185 = vmatmul.mubr.msk.f32.gmra.mrb[28].mxu1 %vm5418_vm4, %v31739_v44  ;;  %v31745_v44 = vld [vmem:[#allocation120_spill] sm:$0xff] }
 0x92a   :  { %20187 = vmatprep.mubr.msk.f32.mxu1 %vm5418_vm4, %v9787_v7  ;;  %v31748_v7 = vld [vmem:[#allocation123_spill] sm:$0xff] }
 0x92d   :  { %20188 = vmatmul.mubr.msk.f32.gmra.mrb[30].mxu1 %vm5418_vm4, %v9789_v18  ;;  %v31749_v18 = vld [vmem:[#allocation124_spill] sm:$0xff] }
 0x92e   :  { %20190 = vmatprep.mubr.msk.f32.mxu1 %vm5418_vm4, %v31740_v15  ;;  %v31750_v15 = vld [vmem:[#allocation125_spill] sm:$0xff] }
 0x931   :  { %20191 = vmatmul.mubr.msk.f32.gmra.mrb[32].mxu1 %vm5418_vm4, %v31741_v20  ;;  %v31751_v20 = vld [vmem:[#allocation126_spill] sm:$0xff] }
 0x932   :  { %20193 = vmatprep.mubr.msk.f32.mxu1 %vm5418_vm4, %v31742_v23  ;;  %v31752_v23 = vld [vmem:[#allocation127_spill] sm:$0xff] }
 0x935   :  { %20194 = vmatmul.mubr.msk.f32.gmra.mrb[34].mxu1 %vm5418_vm4, %v31743_v61  ;;  %v31753_v61 = vld [vmem:[#allocation128_spill] sm:$0xff] }
 0x936   :  { %20196 = vmatprep.mubr.msk.f32.mxu1 %vm5418_vm4, %v31744_v25  ;;  %v31754_v25 = vld [vmem:[#allocation129_spill] sm:$0xff] }
 0x939   :  { %20197 = vmatmul.mubr.msk.f32.gmra.mrb[36].mxu1 %vm5418_vm4, %v31745_v44  ;;  %v31755_v44 = vld [vmem:[#allocation130_spill] sm:$0xff] }
 0x93a   :  { %20199 = vmatprep.mubr.msk.f32.mxu1 %vm5418_vm4, %v31746_v59  ;;  %v31756_v59 = vld [vmem:[#allocation131_spill] sm:$0xff] }
 0x93d   :  { %20200 = vmatmul.mubr.msk.f32.gmra.mrb[38].mxu1 %vm5418_vm4, %v31747_v41  ;;  %v31757_v41 = vld [vmem:[#allocation132_spill] sm:$0xff] }
 0x93e   :  { %20202 = vmatprep.mubr.msk.f32.mxu1 %vm5418_vm4, %v31748_v7  ;;  %v31758_v7 = vld [vmem:[#allocation133_spill] sm:$0xff] }
 0x941   :  { %20203 = vmatmul.mubr.msk.f32.gmra.mrb[40].mxu1 %vm5418_vm4, %v31749_v18  ;;  %v31759_v18 = vld [vmem:[#allocation134_spill] sm:$0xff] }
 0x942   :  { %20205 = vmatprep.mubr.msk.f32.mxu1 %vm5418_vm4, %v31750_v15  ;;  %v31760_v15 = vld [vmem:[#allocation135_spill] sm:$0xff] }
 0x945   :  { %20206 = vmatmul.mubr.msk.f32.gmra.mrb[42].mxu1 %vm5418_vm4, %v31751_v20  ;;  %v31761_v20 = vld [vmem:[#allocation7_spill] sm:$0xff] }
 0x946   :  { %20208 = vmatprep.mubr.msk.f32.mxu1 %vm5418_vm4, %v31752_v23  ;;  %v31762_v23 = vld [vmem:[#allocation78_spill] sm:$0xff] }
 0x949   :  { %20209 = vmatmul.mubr.msk.f32.gmra.mrb[44].mxu1 %vm5418_vm4, %v31753_v61  ;;  %v31763_v61 = vld [vmem:[#allocation79_spill] sm:$0xff] }
 0x94a   :  { %20211 = vmatprep.mubr.msk.f32.mxu1 %vm5418_vm4, %v31754_v25  ;;  %v31764_v25 = vld [vmem:[#allocation8_spill] sm:$0xff] }
 0x94d   :  { %20212 = vmatmul.mubr.msk.f32.gmra.mrb[46].mxu1 %vm5418_vm4, %v31755_v44  ;;  %v6296_v44 = vld [vmem:[#allocation3 + $0x460] sm:$0xff] }
 0x94e   :  { %20214 = vmatprep.mubr.msk.f32.mxu1 %vm5418_vm4, %v31756_v59  ;;  %v28193_v59 = vld [vmem:[#allocation3 + $0x468] sm:$0xff] }
 0x951   :  { %20215 = vmatmul.mubr.msk.f32.gmra.mrb[48].mxu1 %vm5418_vm4, %v31757_v41  ;;  %v31765_v41 = vld [vmem:[#allocation9_spill] sm:$0xff] }
 0x952   :  { %20217 = vmatprep.mubr.msk.f32.mxu1 %vm5418_vm4, %v31758_v7  ;;  %v31766_v7 = vld [vmem:[#allocation10_spill] sm:$0xff] }
 0x955   :  { %20218 = vmatmul.mubr.msk.f32.gmra.mrb[50].mxu1 %vm5418_vm4, %v31759_v18  ;;  %v9790_v18 = vrot.slane %v6296_v44, 7 }
 0x956   :  { %20220 = vmatprep.mubr.msk.f32.mxu1 %vm5418_vm4, %v31760_v15  ;;  %v9791_v15 = vrot.slane %v28193_v59, 7 }
 0x958   :  { %v9792_v56 = vsel %vm547_vm2, %v9790_v18, %v9791_v15 }
 0x959   :  { %20221 = vmatmul.mubr.msk.f32.gmra.mrb[52].mxu1 %vm5418_vm4, %v31761_v20  ;;  %v28200_v20 = vld [vmem:[#allocation3 + $0x470] sm:$0xff] }
 0x95a   :  { %20223 = vmatprep.mubr.msk.f32.mxu1 %vm5418_vm4, %v31762_v23  ;;  %v31767_v23 = vld [vmem:[#allocation11_spill] sm:$0xff] }
 0x95d   :  { %20224 = vmatmul.mubr.msk.f32.gmra.mrb[54].mxu1 %vm5418_vm4, %v31763_v61  ;;  %v31768_v61 = vld [vmem:[#allocation51_spill] sm:$0xff] }
 0x95e   :  { %20226 = vmatprep.mubr.msk.f32.mxu1 %vm5418_vm4, %v31764_v25  ;;  %v9793_v25 = vrot.slane %v28200_v20, 7 }
 0x960   :  { %v9794_v44 = vsel %vm547_vm2, %v9791_v15, %v9793_v25  ;;  %v31771_v15 = vld [vmem:[#allocation36_spill] sm:$0xff]  ;;  %v31777_v25 = vld [vmem:[#allocation45_spill] sm:$0xff] }
 0x961   :  { %20227 = vmatmul.mubr.msk.f32.gmra.mrb[56].mxu1 %vm5418_vm4, %v31765_v41  ;;  %v15493_v41 = vld [vmem:[%s30351_s3 + $0x110] sm:$0xff] }
 0x962   :  { %20229 = vmatprep.mubr.msk.f32.mxu1 %vm5418_vm4, %v31766_v7  ;;  %v15494_v7 = vld [vmem:[%s30351_s3 + $0x118] sm:$0xff] }
 0x963   :  { %v20525_v18 = vpack.c.bf16 %v15494_v7, %v15493_v41  ;;  %v31779_v41 = vld [vmem:[#allocation46_spill] sm:$0xff]  ;;  %v31780_v7 = vld [vmem:[#allocation49_spill] sm:$0xff] }
 0x965   :  { %20230 = vmatmul.mubr.msk.f32.gmra.mrb[58].mxu1 %vm5418_vm4, %v31767_v23  ;;  %v31772_v23 = vld [vmem:[#allocation39_spill] sm:$0xff] }
 0x966   :  { %20232 = vmatprep.mubr.msk.f32.mxu1 %vm5418_vm4, %v31768_v61  ;;  %v31776_v61 = vld [vmem:[#allocation42_spill] sm:$0xff] }
 0x969   :  { %20233 = vmatmul.mubr.msk.f32.gmra.mrb[60].mxu1 %vm5418_vm4, %v27653_v24  ;;  %v31770_v24 = vld [vmem:[#allocation52_spill] sm:$0xff] }
 0x96a   :  { %20235 = vmatprep.mubr.msk.f32.mxu1 %vm5418_vm4, %v9792_v56  ;;  %v31769_v56 = vld [vmem:[#allocation50_spill] sm:$0xff] }
 0x96d   :  { %20236 = vmatmul.mubr.msk.f32.gmra.mrb[62].mxu1 %vm5418_vm4, %v9794_v44  ;;  %v31778_v44 = vld [vmem:[#allocation47_spill] sm:$0xff] }
 0x96e   :  { %20246 = vmatprep.mubr.msk.f32.mxu1 %vm5418_vm4, %v27672_v14  ;;  %v31773_v14 = vld [vmem:[#allocation38_spill] sm:$0xff] }
 0x971   :  { %20247 = vmatmul.mubr.msk.f32.vlgmr.msra.gmra.mrb[0].mxu1 %vm5418_vm4, %v27678_v21  ;;  %v31774_v21 = vld [vmem:[#allocation41_spill] sm:$0xff] }
 0x972   :  { %20524 = vmatpush3.bf16.msra.mxu1 %v28076_v6  ;;  %20249 = vmatprep.mubr.msk.f32.mxu1 %vm5418_vm4, %v31769_v56  ;;  %v31775_v6 = vld [vmem:[#allocation43_spill] sm:$0xff]  ;;  %v31782_v56 = vld [vmem:[#allocation24_spill] sm:$0xff] }
 0x973   :  { %20526 = vmatprep.subr.bf16.mxu1 %v20525_v18 }
 0x975   :  { %20250 = vmatmul.mubr.msk.f32.gmra.mrb[2].mxu1 %vm5418_vm4, %v31770_v24  ;;  %v31783_v24 = vld [vmem:[#allocation25_spill] sm:$0xff] }
 0x976   :  { %20252 = vmatprep.mubr.msk.f32.mxu1 %vm5418_vm4, %v31771_v15  ;;  %20528 = vmatpush3.bf16.msra.mxu1 %v20525_v18  ;;  %v31781_v18 = vld [vmem:[#allocation53_spill] sm:$0xff]  ;;  %v31784_v15 = vld [vmem:[#allocation56_spill] sm:$0xff] }
 0x979   :  { %20253 = vmatmul.mubr.msk.f32.gmra.mrb[4].mxu1 %vm5418_vm4, %v31772_v23  ;;  %v31785_v23 = vld [vmem:[#allocation57_spill] sm:$0xff] }
 0x97a   :  { %20255 = vmatprep.mubr.msk.f32.mxu1 %vm5418_vm4, %v31773_v14  ;;  %v31786_v14 = vld [vmem:[#allocation58_spill] sm:$0xff] }
 0x97d   :  { %20256 = vmatmul.mubr.msk.f32.gmra.mrb[6].mxu1 %vm5418_vm4, %v31774_v21  ;;  %v31787_v21 = vld [vmem:[#allocation59_spill] sm:$0xff] }
 0x97e   :  { %20258 = vmatprep.mubr.msk.f32.mxu1 %vm5418_vm4, %v31775_v6  ;;  %v31788_v6 = vld [vmem:[#allocation60_spill] sm:$0xff] }
 0x981   :  { %20259 = vmatmul.mubr.msk.f32.gmra.mrb[8].mxu1 %vm5418_vm4, %v31776_v61  ;;  %v31789_v61 = vld [vmem:[#allocation61_spill] sm:$0xff] }
 0x982   :  { %20261 = vmatprep.mubr.msk.f32.mxu1 %vm5418_vm4, %v31777_v25  ;;  %v31790_v25 = vld [vmem:[#allocation62_spill] sm:$0xff] }
 0x985   :  { %20262 = vmatmul.mubr.msk.f32.gmra.mrb[10].mxu1 %vm5418_vm4, %v31778_v44  ;;  %v31791_v44 = vld [vmem:[#allocation63_spill] sm:$0xff] }
 0x986   :  { %20264 = vmatprep.mubr.msk.f32.mxu1 %vm5418_vm4, %v31779_v41  ;;  %v31792_v41 = vld [vmem:[#allocation27_spill] sm:$0xff] }
 0x989   :  { %20265 = vmatmul.mubr.msk.f32.gmra.mrb[12].mxu1 %vm5418_vm4, %v31780_v7  ;;  %v31793_v7 = vld [vmem:[#allocation26_spill] sm:$0xff] }
 0x98a   :  { %20267 = vmatprep.mubr.msk.f32.mxu1 %vm5418_vm4, %v31781_v18  ;;  %v31794_v18 = vld [vmem:[#allocation74_spill] sm:$0xff] }
 0x98d   :  { %20268 = vmatmul.mubr.msk.f32.gmra.mrb[14].mxu1 %vm5418_vm4, %v31782_v56  ;;  %v31795_v56 = vld [vmem:[#allocation75_spill] sm:$0xff] }
 0x98e   :  { %20270 = vmatprep.mubr.msk.f32.mxu1 %vm5418_vm4, %v31783_v24  ;;  %v31796_v24 = vld [vmem:[#allocation76_spill] sm:$0xff] }
 0x991   :  { %20271 = vmatmul.mubr.msk.f32.gmra.mrb[16].mxu1 %vm5418_vm4, %v31784_v15  ;;  %v31797_v15 = vld [vmem:[#allocation19_spill] sm:$0xff] }
 0x992   :  { %20273 = vmatprep.mubr.msk.f32.mxu1 %vm5418_vm4, %v31785_v23  ;;  %v31800_v23 = vld [vmem:[#allocation65_spill] sm:$0xff] }
 0x995   :  { %20274 = vmatmul.mubr.msk.f32.gmra.mrb[18].mxu1 %vm5418_vm4, %v31786_v14  ;;  %v31801_v14 = vld [vmem:[#allocation66_spill] sm:$0xff] }
 0x996   :  { %20276 = vmatprep.mubr.msk.f32.mxu1 %vm5418_vm4, %v31787_v21  ;;  %v31803_v21 = vld [vmem:[#allocation68_spill] sm:$0xff] }
 0x999   :  { %20277 = vmatmul.mubr.msk.f32.gmra.mrb[20].mxu1 %vm5418_vm4, %v31788_v6  ;;  %v31804_v6 = vld [vmem:[#allocation69_spill] sm:$0xff] }
 0x99a   :  { %20279 = vmatprep.mubr.msk.f32.mxu1 %vm5418_vm4, %v31789_v61  ;;  %v31805_v61 = vld [vmem:[#allocation70_spill] sm:$0xff] }
 0x99d   :  { %20280 = vmatmul.mubr.msk.f32.gmra.mrb[22].mxu1 %vm5418_vm4, %v31790_v25  ;;  %v31806_v25 = vld [vmem:[#allocation71_spill] sm:$0xff] }
 0x99e   :  { %20282 = vmatprep.mubr.msk.f32.mxu1 %vm5418_vm4, %v31791_v44  ;;  %v31807_v44 = vld [vmem:[#allocation72_spill] sm:$0xff] }
 0x9a1   :  { %20283 = vmatmul.mubr.msk.f32.gmra.mrb[24].mxu1 %vm5418_vm4, %v31792_v41  ;;  %v31808_v41 = vld [vmem:[#allocation73_spill] sm:$0xff] }
 0x9a2   :  { %20285 = vmatprep.mubr.msk.f32.mxu1 %vm5418_vm4, %v31793_v7  ;;  %v31809_v7 = vld [vmem:[#allocation22_spill] sm:$0xff] }
 0x9a5   :  { %20286 = vmatmul.mubr.msk.f32.gmra.mrb[26].mxu1 %vm5418_vm4, %v31794_v18  ;;  %v31810_v18 = vld [vmem:[#allocation23_spill] sm:$0xff] }
 0x9a6   :  { %20288 = vmatprep.mubr.msk.f32.mxu1 %vm5418_vm4, %v27559_v37  ;;  %v31798_v37 = vld [vmem:[#allocation77_spill] sm:$0xff] }
 0x9a9   :  { %20289 = vmatmul.mubr.msk.f32.gmra.mrb[28].mxu1 %vm5418_vm4, %v27564_v57  ;;  %v31799_v57 = vld [vmem:[#allocation64_spill] sm:$0xff] }
 0x9aa   :  { %20291 = vmatprep.mubr.msk.f32.mxu1 %vm5418_vm4, %v28123_v51 }
 0x9ad   :  { %20292 = vmatmul.mubr.msk.f32.gmra.mrb[30].mxu1 %vm5418_vm4, %v28130_v27 }
 0x9ae   :  { %20294 = vmatprep.mubr.msk.f32.mxu1 %vm5418_vm4, %v27793_v10  ;;  %v31802_v10 = vld [vmem:[#allocation67_spill] sm:$0xff] }
 0x9b1   :  { %20295 = vmatmul.mubr.msk.f32.gmra.mrb[32].mxu1 %vm5418_vm4, %v31795_v56  ;;  %v31811_v56 = vld [vmem:[#allocation80_spill] sm:$0xff] }
 0x9b2   :  { %20297 = vmatprep.mubr.msk.f32.mxu1 %vm5418_vm4, %v31796_v24  ;;  %v31812_v24 = vld [vmem:[#allocation81_spill] sm:$0xff] }
 0x9b5   :  { %20298 = vmatmul.mubr.msk.f32.gmra.mrb[34].mxu1 %vm5418_vm4, %v31797_v15  ;;  %v31813_v15 = vld [vmem:[#allocation31_spill] sm:$0xff] }
 0x9b6   :  { %20300 = vmatprep.mubr.msk.f32.mxu1 %vm5418_vm4, %v31798_v37 }
 0x9b9   :  { %20301 = vmatmul.mubr.msk.f32.gmra.mrb[36].mxu1 %vm5418_vm4, %v31799_v57 }
 0x9ba   :  { %20303 = vmatprep.mubr.msk.f32.mxu1 %vm5418_vm4, %v31800_v23 }
 0x9bd   :  { %20304 = vmatmul.mubr.msk.f32.gmra.mrb[38].mxu1 %vm5418_vm4, %v31801_v14 }
 0x9be   :  { %20306 = vmatprep.mubr.msk.f32.mxu1 %vm5418_vm4, %v31802_v10 }
 0x9c1   :  { %20307 = vmatmul.mubr.msk.f32.gmra.mrb[40].mxu1 %vm5418_vm4, %v31803_v21 }
 0x9c2   :  { %20309 = vmatprep.mubr.msk.f32.mxu1 %vm5418_vm4, %v31804_v6 }
 0x9c5   :  { %20310 = vmatmul.mubr.msk.f32.gmra.mrb[42].mxu1 %vm5418_vm4, %v31805_v61 }
 0x9c6   :  { %20312 = vmatprep.mubr.msk.f32.mxu1 %vm5418_vm4, %v31806_v25 }
 0x9c9   :  { %20313 = vmatmul.mubr.msk.f32.gmra.mrb[44].mxu1 %vm5418_vm4, %v31807_v44 }
 0x9ca   :  { %20315 = vmatprep.mubr.msk.f32.mxu1 %vm5418_vm4, %v31808_v41 }
 0x9cd   :  { %20316 = vmatmul.mubr.msk.f32.gmra.mrb[46].mxu1 %vm5418_vm4, %v31809_v7 }
 0x9ce   :  { %20318 = vmatprep.mubr.msk.f32.mxu1 %vm5418_vm4, %v31810_v18 }
 0x9d1   :  { %20319 = vmatmul.mubr.msk.f32.gmra.mrb[48].mxu1 %vm5418_vm4, %v27861_v42  ;;  %v31814_v42 = vld [vmem:[#allocation30_spill] sm:$0xff] }
 0x9d2   :  { %20321 = vmatprep.mubr.msk.f32.mxu1 %vm5418_vm4, %v27865_v26  ;;  %v31815_v26 = vld [vmem:[#allocation35_spill] sm:$0xff] }
 0x9d5   :  { %20322 = vmatmul.mubr.msk.f32.gmra.mrb[50].mxu1 %vm5418_vm4, %v27869_v48  ;;  %v31816_v48 = vld [vmem:[#allocation34_spill] sm:$0xff] }
 0x9d6   :  { %20324 = vmatprep.mubr.msk.f32.mxu1 %vm5418_vm4, %v27873_v33 }
 0x9d9   :  { %20325 = vmatmul.mubr.msk.f32.gmra.mrb[52].mxu1 %vm5418_vm4, %v27877_v16 }
 0x9da   :  { %20327 = vmatprep.mubr.msk.f32.mxu1 %vm5418_vm4, %v31811_v56 }
 0x9dd   :  { %20328 = vmatmul.mubr.msk.f32.gmra.mrb[54].mxu1 %vm5418_vm4, %v31812_v24 }
 0x9de   :  { %20330 = vmatprep.mubr.msk.f32.mxu1 %vm5418_vm4, %v31813_v15 }
 0x9e1   :  { %20331 = vmatmul.mubr.msk.f32.gmra.mrb[56].mxu1 %vm5418_vm4, %v31814_v42 }
 0x9e2   :  { %20333 = vmatprep.mubr.msk.f32.mxu1 %vm5418_vm4, %v31815_v26 }
 0x9e5   :  { %20334 = vmatmul.mubr.msk.f32.gmra.mrb[58].mxu1 %vm5418_vm4, %v31816_v48 }
 0x9e6   :  { %20336 = vmatprep.mubr.msk.f32.mxu1 %vm5418_vm4, %v27635_v39 }
 0x9e9   :  { %20337 = vmatmul.mubr.msk.f32.gmra.mrb[60].mxu1 %vm5418_vm4, %v27640_v34 }
 0x9ea   :  { %20339 = vmatprep.mubr.msk.f32.mxu1 %vm5418_vm4, %v28193_v59 }
 0x9ed   :  { %20340 = vmatmul.mubr.msk.f32.gmra.mrb[62].mxu1 %vm5418_vm4, %v28200_v20 }
 0x9ee   :  { %20350 = vmatprep.mubr.msk.f32.mxu1 %vm5418_vm4, %v27125_v53  ;;  %v10721_v53 = vrot.slane %v28123_v51, 1 }
 0x9f1   :  { %20351 = vmatmul.mubr.msk.f32.vlgmr.msra.gmra.mrb[0].mxu1 %vm5418_vm4, %v27133_v17  ;;  %v10722_v17 = vrot.slane %v28130_v27, 1  ;;  %v28483_v27 = vld [vmem:[%s30352_s4] ss:$0 sm:$0xff] }
 0x9f2   :  { %20353 = vmatprep.mubr.msk.f32.mxu1 %vm5418_vm4, %v27138_v45  ;;  %v6227_v45 = vld [vmem:[#allocation3 + $0x238] sm:$0xff] }
 0x9f5   :  { %20354 = vmatmul.mubr.msk.f32.gmra.mrb[2].mxu1 %vm5418_vm4, %v27145_v60  ;;  %v10724_v60 = vrot.slane %v6227_v45, 1 }
 0x9f6   :  { %20356 = vmatprep.mubr.msk.f32.mxu1 %vm5418_vm4, %v27150_v38  ;;  %v10723_v38 = vsel %vm1776_vm3, %v10721_v53, %v10722_v17 }
 0x9f9   :  { %20357 = vmatmul.mubr.msk.f32.gmra.mrb[4].mxu1 %vm5418_vm4, %v27157_v63  ;;  %v10725_v63 = vsel %vm1776_vm3, %v10722_v17, %v10724_v60 }
 0x9fa   :  { %20359 = vmatprep.mubr.msk.f32.mxu1 %vm5418_vm4, %v27162_v13  ;;  %v31817_v13 = vld [vmem:[#allocation12_spill] sm:$0xff] }
 0x9fd   :  { %20360 = vmatmul.mubr.msk.f32.gmra.mrb[6].mxu1 %vm5418_vm4, %v27169_v40  ;;  %v31818_v40 = vld [vmem:[#allocation13_spill] sm:$0xff] }
 0x9fe   :  { %20362 = vmatprep.mubr.msk.f32.mxu1 %vm5418_vm4, %v27174_v58  ;;  %v31819_v58 = vld [vmem:[#allocation14_spill] sm:$0xff] }
 0xa01   :  { %20363 = vmatmul.mubr.msk.f32.gmra.mrb[8].mxu1 %vm5418_vm4, %v27181_v1  ;;  %v31820_v1 = vld [vmem:[#allocation15_spill] sm:$0xff] }
 0xa02   :  { %20365 = vmatprep.mubr.msk.f32.mxu1 %vm5418_vm4, %v27186_v31  ;;  %v31821_v31 = vld [vmem:[#allocation16_spill] sm:$0xff] }
 0xa05   :  { %20366 = vmatmul.mubr.msk.f32.gmra.mrb[10].mxu1 %vm5418_vm4, %v27193_v49  ;;  %v31822_v49 = vld [vmem:[#allocation17_spill] sm:$0xff] }
 0xa06   :  { %20368 = vmatprep.mubr.msk.f32.mxu1 %vm5418_vm4, %v27198_v22  ;;  %v31823_v22 = vld [vmem:[#allocation18_spill] sm:$0xff] }
 0xa09   :  { %20369 = vmatmul.mubr.msk.f32.gmra.mrb[12].mxu1 %vm5418_vm4, %v27205_v8  ;;  %v31824_v8 = vld [vmem:[#allocation20_spill] sm:$0xff] }
 0xa0a   :  { %20371 = vmatprep.mubr.msk.f32.mxu1 %vm5418_vm4, %v27210_v11  ;;  %v31825_v11 = vld [vmem:[#allocation82_spill] sm:$0xff] }
 0xa0d   :  { %20372 = vmatmul.mubr.msk.f32.gmra.mrb[14].mxu1 %vm5418_vm4, %v27217_v29  ;;  %v31826_v29 = vld [vmem:[#allocation83_spill] sm:$0xff] }
 0xa0e   :  { %20374 = vmatprep.mubr.msk.f32.mxu1 %vm5418_vm4, %v27222_v47  ;;  %v31827_v47 = vld [vmem:[#allocation84_spill] sm:$0xff] }
 0xa11   :  { %20375 = vmatmul.mubr.msk.f32.gmra.mrb[16].mxu1 %vm5418_vm4, %v27229_v3  ;;  %v31828_v3 = vld [vmem:[#allocation85_spill] sm:$0xff] }
 0xa12   :  { %20377 = vmatprep.mubr.msk.f32.mxu1 %vm5418_vm4, %v27234_v62  ;;  %v31829_v62 = vld [vmem:[#allocation86_spill] sm:$0xff] }
 0xa15   :  { %20378 = vmatmul.mubr.msk.f32.gmra.mrb[18].mxu1 %vm5418_vm4, %v27241_v2  ;;  %v31830_v2 = vld [vmem:[#allocation87_spill] sm:$0xff] }
 0xa16   :  { %20380 = vmatprep.mubr.msk.f32.mxu1 %vm5418_vm4, %v27246_v5  ;;  %v31831_v5 = vld [vmem:[#allocation29_spill] sm:$0xff] }
 0xa19   :  { %20381 = vmatmul.mubr.msk.f32.gmra.mrb[20].mxu1 %vm5418_vm4, %v27253_v19  ;;  %v31832_v19 = vld [vmem:[#allocation28_spill] sm:$0xff] }
 0xa1a   :  { %20383 = vmatprep.mubr.msk.f32.mxu1 %vm5418_vm4, %v27258_v12  ;;  %v31833_v12 = vld [vmem:[#allocation33_spill] sm:$0xff] }
 0xa1d   :  { %20384 = vmatmul.mubr.msk.f32.gmra.mrb[22].mxu1 %vm5418_vm4, %v27265_v54  ;;  %v31834_v54 = vld [vmem:[#allocation32_spill] sm:$0xff] }
 0xa1e   :  { %20386 = vmatprep.mubr.msk.f32.mxu1 %vm5418_vm4, %v27270_v35  ;;  %v31835_v35 = vld [vmem:[#allocation37_spill] sm:$0xff] }
 0xa21   :  { %20387 = vmatmul.mubr.msk.f32.gmra.mrb[24].mxu1 %vm5418_vm4, %v27279_v32  ;;  %v31836_v32 = vld [vmem:[#allocation40_spill] sm:$0xff] }
 0xa22   :  { %20389 = vmatprep.mubr.msk.f32.mxu1 %vm5418_vm4, %v27284_v52  ;;  %v10726_v52 = vrot.slane %v28193_v59, 1 }
 0xa25   :  { %20390 = vmatmul.mubr.msk.f32.gmra.mrb[26].mxu1 %vm5418_vm4, %v27290_v50  ;;  %v10727_v50 = vrot.slane %v28200_v20, 1 }
 0xa26   :  { %20392 = vmatprep.mubr.msk.f32.mxu1 %vm5418_vm4, %v27976_v9 }
 0xa29   :  { %20393 = vmatmul.mubr.msk.f32.gmra.mrb[28].mxu1 %vm5418_vm4, %v27981_v55 }
 0xa2a   :  { %20395 = vmatprep.mubr.msk.f32.mxu1 %vm5418_vm4, %v10723_v38 }
 0xa2d   :  { %20396 = vmatmul.mubr.msk.f32.gmra.mrb[30].mxu1 %vm5418_vm4, %v10725_v63 }
 0xa2e   :  { %20398 = vmatprep.mubr.msk.f32.mxu1 %vm5418_vm4, %v27312_v36  ;;  %v6299_v36 = vld [vmem:[#allocation3 + $0x478] sm:$0xff] }
 0xa31   :  { %20399 = vmatmul.mubr.msk.f32.gmra.mrb[32].mxu1 %vm5418_vm4, %v27319_v30  ;;  %v31837_v30 = vld [vmem:[#allocation44_spill] sm:$0xff] }
 0xa32   :  { %20401 = vmatprep.mubr.msk.f32.mxu1 %vm5418_vm4, %v27324_v4  ;;  %v31838_v4 = vld [vmem:[#allocation113_spill] sm:$0xff] }
 0xa35   :  { %20402 = vmatmul.mubr.msk.f32.gmra.mrb[34].mxu1 %vm5418_vm4, %v27331_v46  ;;  %v10729_v46 = vrot.slane %v6299_v36, 1 }
 0xa36   :  { %20404 = vmatprep.mubr.msk.f32.mxu1 %vm5418_vm4, %v27336_v0  ;;  %v10728_v0 = vsel %vm1776_vm3, %v10726_v52, %v10727_v50 }
 0xa39   :  { %20405 = vmatmul.mubr.msk.f32.gmra.mrb[36].mxu1 %vm5418_vm4, %v27343_v43  ;;  %v31839_v43 = vld [vmem:[#allocation114_spill] sm:$0xff] }
 0xa3a   :  { %20407 = vmatprep.mubr.msk.f32.mxu1 %vm5418_vm4, %v27348_v28  ;;  %v10730_v28 = vsel %vm1776_vm3, %v10727_v50, %v10729_v46 }
 0xa3d   :  { %20408 = vmatmul.mubr.msk.f32.gmra.mrb[38].mxu1 %vm5418_vm4, %v31817_v13 }
 0xa3e   :  { %20410 = vmatprep.mubr.msk.f32.mxu1 %vm5418_vm4, %v31818_v40 }
 0xa41   :  { %20411 = vmatmul.mubr.msk.f32.gmra.mrb[40].mxu1 %vm5418_vm4, %v31819_v58 }
 0xa42   :  { %20413 = vmatprep.mubr.msk.f32.mxu1 %vm5418_vm4, %v31820_v1 }
 0xa45   :  { %20414 = vmatmul.mubr.msk.f32.gmra.mrb[42].mxu1 %vm5418_vm4, %v31821_v31 }
 0xa46   :  { %20416 = vmatprep.mubr.msk.f32.mxu1 %vm5418_vm4, %v31822_v49 }
 0xa49   :  { %20417 = vmatmul.mubr.msk.f32.gmra.mrb[44].mxu1 %vm5418_vm4, %v31823_v22 }
 0xa4a   :  { %20419 = vmatprep.mubr.msk.f32.mxu1 %vm5418_vm4, %v31824_v8 }
 0xa4d   :  { %20420 = vmatmul.mubr.msk.f32.gmra.mrb[46].mxu1 %vm5418_vm4, %v31825_v11 }
 0xa4e   :  { %20422 = vmatprep.mubr.msk.f32.mxu1 %vm5418_vm4, %v31826_v29 }
 0xa51   :  { %20423 = vmatmul.mubr.msk.f32.gmra.mrb[48].mxu1 %vm5418_vm4, %v31827_v47 }
 0xa52   :  { %20425 = vmatprep.mubr.msk.f32.mxu1 %vm5418_vm4, %v31828_v3 }
 0xa55   :  { %20426 = vmatmul.mubr.msk.f32.gmra.mrb[50].mxu1 %vm5418_vm4, %v31829_v62 }
 0xa56   :  { %20428 = vmatprep.mubr.msk.f32.mxu1 %vm5418_vm4, %v31830_v2 }
 0xa59   :  { %20429 = vmatmul.mubr.msk.f32.gmra.mrb[52].mxu1 %vm5418_vm4, %v31831_v5 }
 0xa5a   :  { %20431 = vmatprep.mubr.msk.f32.mxu1 %vm5418_vm4, %v31832_v19 }
 0xa5d   :  { %20432 = vmatmul.mubr.msk.f32.gmra.mrb[54].mxu1 %vm5418_vm4, %v31833_v12 }
 0xa5e   :  { %20434 = vmatprep.mubr.msk.f32.mxu1 %vm5418_vm4, %v31834_v54 }
 0xa61   :  { %20435 = vmatmul.mubr.msk.f32.gmra.mrb[56].mxu1 %vm5418_vm4, %v31835_v35 }
 0xa62   :  { %20437 = vmatprep.mubr.msk.f32.mxu1 %vm5418_vm4, %v31836_v32 }
 0xa65   :  { %20438 = vmatmul.mubr.msk.f32.gmra.mrb[58].mxu1 %vm5418_vm4, %v31837_v30 }
 0xa66   :  { %20440 = vmatprep.mubr.msk.f32.mxu1 %vm5418_vm4, %v31838_v4 }
 0xa69   :  { %20441 = vmatmul.mubr.msk.f32.gmra.mrb[60].mxu1 %vm5418_vm4, %v31839_v43 }
 0xa6a   :  { %20443 = vmatprep.mubr.msk.f32.mxu1 %vm5418_vm4, %v10728_v0 }
 0xa6d   :  { %20444 = vmatmul.mubr.msk.f32.gmra.mrb[62].mxu1 %vm5418_vm4, %v10730_v28 }
 0xac4   :  { %v20352_v39 = vpop.f32.mrb[0].mxu1 }
 0xac5   :  { %v28486_v34 = vadd.f32 %v20352_v39, %v28483_v27  ;;  %v10810_v16 = vpop.f32.mrb[1].mxu1 }
 0xac6   :  { %v28489_v33 = vadd.f32 %v28483_v27, %v10810_v16 }
 0xac7   :  { %v11400_v9 = vmul.f32 %v28486_v34, %v28486_v34  ;;  %v11266_v55 = vsel %vm11264_vm5, %v28486_v34, 0.0 }
 0xac8   :  { %31840 = vst [vmem:[#allocation54_spill] sm:$0xff] %v28489_v33  ;;  %v11265_v51 = vsel %vm11264_vm5, %v28489_v33, 0.0  ;;  %v11399_v59 = vmul.f32 %v28489_v33, %v28489_v33  ;;  %v20355_v20 = vpop.f32.mrb[2].mxu1 }
 0xac9   :  { %v28500_v37 = vadd.f32 %v20355_v20, %v28483_v27  ;;  %v10820_v57 = vpop.f32.mrb[3].mxu1  ;;  %v11464_v23 = vsel %vm11264_vm5, %v11400_v9, 0.0  ;;  %v11267_v21 = vadd.f32 %v11266_v55, %v11265_v51 }
 0xaca   :  { %v11463_v14 = vsel %vm11264_vm5, %v11399_v59, 0.0  ;;  %v28505_v10 = vadd.f32 %v28483_v27, %v10820_v57 }
 0xacb   :  { %v11402_v6 = vmul.f32 %v28500_v37, %v28500_v37  ;;  %v11465_v41 = vadd.f32 %v11464_v23, %v11463_v14  ;;  %v11270_v24 = vsel %vm11264_vm5, %v28500_v37, 0.0 }
 0xacc   :  { %v11268_v61 = vsel %vm11264_vm5, %v28505_v10, 0.0  ;;  %v11401_v25 = vmul.f32 %v28505_v10, %v28505_v10  ;;  %v20358_v44 = vpop.f32.mrb[4].mxu1 }
 0xacd   :  { %v11269_v7 = vadd.f32 %v11268_v61, %v11267_v21  ;;  %v28514_v18 = vadd.f32 %v20358_v44, %v28483_v27  ;;  %v10830_v56 = vpop.f32.mrb[5].mxu1  ;;  %v11468_v53 = vsel %vm11264_vm5, %v11402_v6, 0.0 }
 0xace   :  { %v11466_v15 = vsel %vm11264_vm5, %v11401_v25, 0.0  ;;  %v28520_v42 = vadd.f32 %v28483_v27, %v10830_v56 }
 0xacf   :  { %v11271_v26 = vadd.f32 %v11270_v24, %v11269_v7  ;;  %v11467_v48 = vadd.f32 %v11466_v15, %v11465_v41  ;;  %v11404_v17 = vmul.f32 %v28514_v18, %v28514_v18  ;;  %v11274_v1 = vsel %vm11264_vm5, %v28514_v18, 0.0 }
 0xad0   :  { %v11272_v45 = vsel %vm11264_vm5, %v28520_v42, 0.0  ;;  %v11403_v60 = vmul.f32 %v28520_v42, %v28520_v42  ;;  %v20361_v38 = vpop.f32.mrb[6].mxu1 }
 0xad1   :  { %v11469_v63 = vadd.f32 %v11468_v53, %v11467_v48  ;;  %v11273_v13 = vadd.f32 %v11272_v45, %v11271_v26  ;;  %v28530_v40 = vadd.f32 %v20361_v38, %v28483_v27  ;;  %v10840_v58 = vpop.f32.mrb[7].mxu1  ;;  %v11472_v11 = vsel %vm11264_vm5, %v11404_v17, 0.0 }
 0xad2   :  { %v11470_v31 = vsel %vm11264_vm5, %v11403_v60, 0.0  ;;  %v28536_v49 = vadd.f32 %v28483_v27, %v10840_v58 }
 0xad3   :  { %v11471_v22 = vadd.f32 %v11470_v31, %v11469_v63  ;;  %v11275_v8 = vadd.f32 %v11274_v1, %v11273_v13  ;;  %v11406_v29 = vmul.f32 %v28530_v40, %v28530_v40  ;;  %v11278_v54 = vsel %vm11264_vm5, %v28530_v40, 0.0 }
 0xad4   :  { %v11276_v47 = vsel %vm11264_vm5, %v28536_v49, 0.0  ;;  %v11405_v3 = vmul.f32 %v28536_v49, %v28536_v49  ;;  %v20364_v62 = vpop.f32.mrb[8].mxu1 }
 0xad5   :  { %v11277_v2 = vadd.f32 %v11276_v47, %v11275_v8  ;;  %v11473_v5 = vadd.f32 %v11472_v11, %v11471_v22  ;;  %v28546_v19 = vadd.f32 %v20364_v62, %v28483_v27  ;;  %v10850_v12 = vpop.f32.mrb[9].mxu1  ;;  %v11476_v36 = vsel %vm11264_vm5, %v11406_v29, 0.0 }
 0xad6   :  { %v11474_v35 = vsel %vm11264_vm5, %v11405_v3, 0.0  ;;  %v28552_v32 = vadd.f32 %v28483_v27, %v10850_v12 }
 0xad7   :  { %v11475_v52 = vadd.f32 %v11474_v35, %v11473_v5  ;;  %v11279_v50 = vadd.f32 %v11278_v54, %v11277_v2  ;;  %v11408_v30 = vmul.f32 %v28546_v19, %v28546_v19  ;;  %v11282_v9 = vsel %vm11264_vm5, %v28546_v19, 0.0 }
 0xad8   :  { %v11280_v4 = vsel %vm11264_vm5, %v28552_v32, 0.0  ;;  %v11407_v46 = vmul.f32 %v28552_v32, %v28552_v32  ;;  %v20367_v0 = vpop.f32.mrb[10].mxu1 }
 0xad9   :  { %v11281_v43 = vadd.f32 %v11280_v4, %v11279_v50  ;;  %v11477_v28 = vadd.f32 %v11476_v36, %v11475_v52  ;;  %v28562_v39 = vadd.f32 %v20367_v0, %v28483_v27  ;;  %v10860_v16 = vpop.f32.mrb[11].mxu1  ;;  %v11480_v57 = vsel %vm11264_vm5, %v11408_v30, 0.0 }
 0xada   :  { %v11478_v55 = vsel %vm11264_vm5, %v11407_v46, 0.0  ;;  %v28568_v51 = vadd.f32 %v28483_v27, %v10860_v16 }
 0xadb   :  { %31841 = vst [vmem:[#allocation55_spill] sm:$0xff] %v28562_v39  ;;  %v11479_v59 = vadd.f32 %v11478_v55, %v11477_v28  ;;  %v11283_v20 = vadd.f32 %v11282_v9, %v11281_v43  ;;  %v11410_v23 = vmul.f32 %v28562_v39, %v28562_v39  ;;  %v11286_v7 = vsel %vm11264_vm5, %v28562_v39, 0.0 }
 0xadc   :  { %v11284_v14 = vsel %vm11264_vm5, %v28568_v51, 0.0  ;;  %v11409_v21 = vmul.f32 %v28568_v51, %v28568_v51  ;;  %v20370_v6 = vpop.f32.mrb[12].mxu1 }
 0xadd   :  { %v11285_v61 = vadd.f32 %v11284_v14, %v11283_v20  ;;  %v11481_v25 = vadd.f32 %v11480_v57, %v11479_v59  ;;  %v28578_v44 = vadd.f32 %v20370_v6, %v28483_v27  ;;  %v10870_v41 = vpop.f32.mrb[13].mxu1  ;;  %v11484_v48 = vsel %vm11264_vm5, %v11410_v23, 0.0 }
 0xade   :  { %v11482_v56 = vsel %vm11264_vm5, %v11409_v21, 0.0  ;;  %v28584_v24 = vadd.f32 %v28483_v27, %v10870_v41 }
 0xadf   :  { %31842 = vst [vmem:[#allocation21_spill] sm:$0xff] %v28578_v44  ;;  %v11483_v15 = vadd.f32 %v11482_v56, %v11481_v25  ;;  %v11287_v26 = vadd.f32 %v11286_v7, %v11285_v61  ;;  %v11412_v53 = vmul.f32 %v28578_v44, %v28578_v44  ;;  %v11290_v1 = vsel %vm11264_vm5, %v28578_v44, 0.0 }
 0xae0   :  { %31843 = vst [vmem:[#allocation88_spill] sm:$0xff] %v28584_v24  ;;  %v11288_v17 = vsel %vm11264_vm5, %v28584_v24, 0.0  ;;  %v11411_v45 = vmul.f32 %v28584_v24, %v28584_v24  ;;  %v20373_v60 = vpop.f32.mrb[14].mxu1 }
 0xae1   :  { %v11289_v38 = vadd.f32 %v11288_v17, %v11287_v26  ;;  %v11485_v63 = vadd.f32 %v11484_v48, %v11483_v15  ;;  %v28594_v13 = vadd.f32 %v20373_v60, %v28483_v27  ;;  %v10880_v58 = vpop.f32.mrb[15].mxu1  ;;  %v11488_v29 = vsel %vm11264_vm5, %v11412_v53, 0.0 }
 0xae2   :  { %v11486_v31 = vsel %vm11264_vm5, %v11411_v45, 0.0  ;;  %v28600_v22 = vadd.f32 %v28483_v27, %v10880_v58 }
 0xae3   :  { %31844 = vst [vmem:[#allocation89_spill] sm:$0xff] %v28594_v13  ;;  %v11487_v8 = vadd.f32 %v11486_v31, %v11485_v63  ;;  %v11291_v11 = vadd.f32 %v11290_v1, %v11289_v38  ;;  %v11414_v47 = vmul.f32 %v28594_v13, %v28594_v13  ;;  %v11294_v52 = vsel %vm11264_vm5, %v28594_v13, 0.0 }
 0xae4   :  { %31845 = vst [vmem:[#allocation90_spill] sm:$0xff] %v28600_v22  ;;  %v11292_v3 = vsel %vm11264_vm5, %v28600_v22, 0.0  ;;  %v11413_v62 = vmul.f32 %v28600_v22, %v28600_v22  ;;  %v20376_v2 = vpop.f32.mrb[16].mxu1 }
 0xae5   :  { %v11293_v5 = vadd.f32 %v11292_v3, %v11291_v11  ;;  %v11489_v12 = vadd.f32 %v11488_v29, %v11487_v8  ;;  %v28610_v54 = vadd.f32 %v20376_v2, %v28483_v27  ;;  %v10890_v35 = vpop.f32.mrb[17].mxu1  ;;  %v11492_v46 = vsel %vm11264_vm5, %v11414_v47, 0.0 }
 0xae6   :  { %v11490_v50 = vsel %vm11264_vm5, %v11413_v62, 0.0  ;;  %v28616_v36 = vadd.f32 %v28483_v27, %v10890_v35 }
 0xae7   :  { %v11491_v30 = vadd.f32 %v11490_v50, %v11489_v12  ;;  %v11295_v4 = vadd.f32 %v11294_v52, %v11293_v5  ;;  %v11416_v0 = vmul.f32 %v28610_v54, %v28610_v54  ;;  %v11298_v57 = vsel %vm11264_vm5, %v28610_v54, 0.0 }
 0xae8   :  { %31846 = vst [vmem:[#allocation91_spill] sm:$0xff] %v28616_v36  ;;  %v11296_v43 = vsel %vm11264_vm5, %v28616_v36, 0.0  ;;  %v11415_v28 = vmul.f32 %v28616_v36, %v28616_v36  ;;  %v20379_v16 = vpop.f32.mrb[18].mxu1 }
 0xae9   :  { %v11297_v9 = vadd.f32 %v11296_v43, %v11295_v4  ;;  %v11493_v55 = vadd.f32 %v11492_v46, %v11491_v30  ;;  %v28626_v59 = vadd.f32 %v20379_v16, %v28483_v27  ;;  %v10900_v20 = vpop.f32.mrb[19].mxu1  ;;  %v11496_v61 = vsel %vm11264_vm5, %v11416_v0, 0.0  ;;  %v16618_v43 = vld [vmem:[%s30353_s5 + $0x40] sm:$0xff]  }
 0xaea   :  { %v11494_v23 = vsel %vm11264_vm5, %v11415_v28, 0.0  ;;  %v28632_v14 = vadd.f32 %v28483_v27, %v10900_v20  ;;  %v15588_v28 = vld [vmem:[%s30353_s5] sm:$0xff]   ;;  %20530 = vmatprep.subr.bf16.mxu0 %v16618_v43 }
 0xaeb   :  { %v11495_v21 = vadd.f32 %v11494_v23, %v11493_v55  ;;  %v11299_v6 = vadd.f32 %v11298_v57, %v11297_v9  ;;  %v11418_v25 = vmul.f32 %v28626_v59, %v28626_v59  ;;  %v11302_v17 = vsel %vm11264_vm5, %v28626_v59, 0.0  ;;  %v16634_v16 = vld [vmem:[%s30353_s5 + $0xc0] sm:$0xff]   ;;  %20532 = vmatpush3.bf16.msra.mxu0 %v15588_v28 }
 0xaec   :  { %v11300_v41 = vsel %vm11264_vm5, %v28632_v14, 0.0  ;;  %v11417_v7 = vmul.f32 %v28632_v14, %v28632_v14  ;;  %v20382_v56 = vpop.f32.mrb[20].mxu1  ;;  %20562 = vmatprep.subr.bf16.mxu1 %v16634_v16 }
 0xaed   :  { %v11301_v15 = vadd.f32 %v11300_v41, %v11299_v6  ;;  %v11497_v26 = vadd.f32 %v11496_v61, %v11495_v21  ;;  %v28642_v48 = vadd.f32 %v20382_v56, %v28483_v27  ;;  %v10910_v53 = vpop.f32.mrb[21].mxu1  ;;  %v11500_v58 = vsel %vm11264_vm5, %v11418_v25, 0.0 }
 0xaee   :  { %v11498_v45 = vsel %vm11264_vm5, %v11417_v7, 0.0  ;;  %v28648_v60 = vadd.f32 %v28483_v27, %v10910_v53  ;;  %v16626_v53 = vld [vmem:[%s30353_s5 + $0x80] sm:$0xff]  }
 0xaef   :  { %v11499_v38 = vadd.f32 %v11498_v45, %v11497_v26  ;;  %v11303_v63 = vadd.f32 %v11302_v17, %v11301_v15  ;;  %v11420_v1 = vmul.f32 %v28642_v48, %v28642_v48  ;;  %v11306_v2 = vsel %vm11264_vm5, %v28642_v48, 0.0  ;;  %20564 = vmatpush3.bf16.msra.mxu1 %v16626_v53 }
 0xaf0   :  { %v11304_v31 = vsel %vm11264_vm5, %v28648_v60, 0.0  ;;  %v11419_v8 = vmul.f32 %v28648_v60, %v28648_v60  ;;  %v20385_v11 = vpop.f32.mrb[22].mxu1 }
 0xaf1   :  { %v11305_v29 = vadd.f32 %v11304_v31, %v11303_v63  ;;  %v11501_v47 = vadd.f32 %v11500_v58, %v11499_v38  ;;  %v28658_v3 = vadd.f32 %v20385_v11, %v28483_v27  ;;  %v10920_v62 = vpop.f32.mrb[23].mxu1  ;;  %v11504_v50 = vsel %vm11264_vm5, %v11420_v1, 0.0 }
 0xaf2   :  { %v11502_v5 = vsel %vm11264_vm5, %v11419_v8, 0.0  ;;  %v28664_v12 = vadd.f32 %v28483_v27, %v10920_v62 }
 0xaf3   :  { %v11503_v35 = vadd.f32 %v11502_v5, %v11501_v47  ;;  %v11307_v52 = vadd.f32 %v11306_v2, %v11305_v29  ;;  %v11422_v30 = vmul.f32 %v28658_v3, %v28658_v3  ;;  %v11310_v23 = vsel %vm11264_vm5, %v28658_v3, 0.0 }
 0xaf4   :  { %v11308_v4 = vsel %vm11264_vm5, %v28664_v12, 0.0  ;;  %v11421_v46 = vmul.f32 %v28664_v12, %v28664_v12  ;;  %v20388_v0 = vpop.f32.mrb[24].mxu1 }
 0xaf5   :  { %v11309_v9 = vadd.f32 %v11308_v4, %v11307_v52  ;;  %v11505_v55 = vadd.f32 %v11504_v50, %v11503_v35  ;;  %v28683_v20 = vadd.f32 %v20388_v0, %v28483_v27  ;;  %v10930_v57 = vpop.f32.mrb[25].mxu1  ;;  %v11508_v41 = vsel %vm11264_vm5, %v11422_v30, 0.0 }
 0xaf6   :  { %v11506_v21 = vsel %vm11264_vm5, %v11421_v46, 0.0  ;;  %v28689_v6 = vadd.f32 %v28483_v27, %v10930_v57 }
 0xaf7   :  { %v11507_v61 = vadd.f32 %v11506_v21, %v11505_v55  ;;  %v11311_v25 = vadd.f32 %v11310_v23, %v11309_v9  ;;  %v11424_v7 = vmul.f32 %v28683_v20, %v28683_v20  ;;  %v11314_v58 = vsel %vm11264_vm5, %v28683_v20, 0.0 }
 0xaf8   :  { %v11312_v56 = vsel %vm11264_vm5, %v28689_v6, 0.0  ;;  %v11423_v15 = vmul.f32 %v28689_v6, %v28689_v6  ;;  %v20391_v26 = vpop.f32.mrb[26].mxu1 }
 0xaf9   :  { %v11313_v17 = vadd.f32 %v11312_v56, %v11311_v25  ;;  %v11509_v45 = vadd.f32 %v11508_v41, %v11507_v61  ;;  %v28702_v38 = vadd.f32 %v20391_v26, %v28483_v27  ;;  %v10940_v63 = vpop.f32.mrb[27].mxu1  ;;  %v11512_v29 = vsel %vm11264_vm5, %v11424_v7, 0.0 }
 0xafa   :  { %v11510_v1 = vsel %vm11264_vm5, %v11423_v15, 0.0  ;;  %v28708_v31 = vadd.f32 %v28483_v27, %v10940_v63 }
 0xafb   :  { %31847 = vst [vmem:[#allocation92_spill] sm:$0xff] %v28702_v38  ;;  %v11511_v8 = vadd.f32 %v11510_v1, %v11509_v45  ;;  %v11315_v11 = vadd.f32 %v11314_v58, %v11313_v17  ;;  %v11426_v47 = vmul.f32 %v28702_v38, %v28702_v38  ;;  %v11318_v4 = vsel %vm11264_vm5, %v28702_v38, 0.0 }
 0xafc   :  { %v11316_v62 = vsel %vm11264_vm5, %v28708_v31, 0.0  ;;  %v11425_v2 = vmul.f32 %v28708_v31, %v28708_v31  ;;  %v20394_v5 = vpop.f32.mrb[28].mxu1 }
 0xafd   :  { %v11317_v35 = vadd.f32 %v11316_v62, %v11315_v11  ;;  %v11513_v52 = vadd.f32 %v11512_v29, %v11511_v8  ;;  %v28718_v50 = vadd.f32 %v20394_v5, %v28483_v27  ;;  %v10950_v30 = vpop.f32.mrb[29].mxu1  ;;  %v11516_v16 = vsel %vm11264_vm5, %v11426_v47, 0.0  ;;  %v16619_v8 = vld [vmem:[%s30353_s5 + $0x48] sm:$0xff]  }
 0xafe   :  { %v11514_v46 = vsel %vm11264_vm5, %v11425_v2, 0.0  ;;  %v28724_v0 = vadd.f32 %v28483_v27, %v10950_v30  ;;  %v16611_v11 = vld [vmem:[%s30353_s5 + $0x8] sm:$0xff]   ;;  %20534 = vmatprep.subr.bf16.mxu0 %v16619_v8 }
 0xaff   :  { %31848 = vst [vmem:[#allocation93_spill] sm:$0xff] %v28718_v50  ;;  %v11515_v43 = vadd.f32 %v11514_v46, %v11513_v52  ;;  %v11319_v28 = vadd.f32 %v11318_v4, %v11317_v35  ;;  %v11428_v9 = vmul.f32 %v28718_v50, %v28718_v50  ;;  %v11322_v7 = vsel %vm11264_vm5, %v28718_v50, 0.0  ;;  %v16635_v29 = vld [vmem:[%s30353_s5 + $0xc8] sm:$0xff]   ;;  %20536 = vmatpush3.bf16.msra.mxu0 %v16611_v11 }
 0xb00   :  { %31849 = vst [vmem:[#allocation94_spill] sm:$0xff] %v28724_v0  ;;  %v11320_v55 = vsel %vm11264_vm5, %v28724_v0, 0.0  ;;  %v11427_v57 = vmul.f32 %v28724_v0, %v28724_v0  ;;  %v20397_v23 = vpop.f32.mrb[30].mxu1  ;;  %20566 = vmatprep.subr.bf16.mxu1 %v16635_v29  ;;  %v31896_v50 = vld [vmem:[#allocation91_spill] sm:$0xff] }
 0xb01   :  { %v11321_v21 = vadd.f32 %v11320_v55, %v11319_v28  ;;  %v11517_v61 = vadd.f32 %v11516_v16, %v11515_v43  ;;  %v28734_v25 = vadd.f32 %v20397_v23, %v28483_v27  ;;  %v10960_v41 = vpop.f32.mrb[31].mxu1  ;;  %v11520_v17 = vsel %vm11264_vm5, %v11428_v9, 0.0 }
 0xb02   :  { %v11518_v56 = vsel %vm11264_vm5, %v11427_v57, 0.0  ;;  %v28740_v15 = vadd.f32 %v28483_v27, %v10960_v41  ;;  %v16627_v57 = vld [vmem:[%s30353_s5 + $0x88] sm:$0xff]  }
 0xb03   :  { %31850 = vst [vmem:[#allocation95_spill] sm:$0xff] %v28734_v25  ;;  %v11519_v26 = vadd.f32 %v11518_v56, %v11517_v61  ;;  %v11323_v53 = vadd.f32 %v11322_v7, %v11321_v21  ;;  %v11430_v45 = vmul.f32 %v28734_v25, %v28734_v25  ;;  %v11326_v35 = vsel %vm11264_vm5, %v28734_v25, 0.0  ;;  %20568 = vmatpush3.bf16.msra.mxu1 %v16627_v57 }
 0xb04   :  { %31851 = vst [vmem:[#allocation96_spill] sm:$0xff] %v28740_v15  ;;  %v11324_v63 = vsel %vm11264_vm5, %v28740_v15, 0.0  ;;  %v11429_v58 = vmul.f32 %v28740_v15, %v28740_v15  ;;  %v20400_v1 = vpop.f32.mrb[32].mxu1 }
 0xb05   :  { %v11325_v47 = vadd.f32 %v11324_v63, %v11323_v53  ;;  %v11521_v62 = vadd.f32 %v11520_v17, %v11519_v26  ;;  %v28759_v2 = vadd.f32 %v20400_v1, %v28483_v27  ;;  %v10970_v5 = vpop.f32.mrb[33].mxu1  ;;  %v11524_v43 = vsel %vm11264_vm5, %v11430_v45, 0.0 }
 0xb06   :  { %v11522_v52 = vsel %vm11264_vm5, %v11429_v58, 0.0  ;;  %v28765_v30 = vadd.f32 %v28483_v27, %v10970_v5 }
 0xb07   :  { %v11523_v4 = vadd.f32 %v11522_v52, %v11521_v62  ;;  %v11327_v46 = vadd.f32 %v11326_v35, %v11325_v47  ;;  %v11432_v28 = vmul.f32 %v28759_v2, %v28759_v2  ;;  %v11330_v7 = vsel %vm11264_vm5, %v28759_v2, 0.0 }
 0xb08   :  { %31852 = vst [vmem:[#allocation97_spill] sm:$0xff] %v28765_v30  ;;  %v11328_v16 = vsel %vm11264_vm5, %v28765_v30, 0.0  ;;  %v11431_v9 = vmul.f32 %v28765_v30, %v28765_v30  ;;  %v20403_v55 = vpop.f32.mrb[34].mxu1 }
 0xb09   :  { %v11329_v23 = vadd.f32 %v11328_v16, %v11327_v46  ;;  %v11525_v21 = vadd.f32 %v11524_v43, %v11523_v4  ;;  %v28778_v61 = vadd.f32 %v20403_v55, %v28483_v27  ;;  %v10980_v41 = vpop.f32.mrb[35].mxu1  ;;  %v11528_v45 = vsel %vm11264_vm5, %v11432_v28, 0.0 }
 0xb0a   :  { %v11526_v56 = vsel %vm11264_vm5, %v11431_v9, 0.0  ;;  %v28784_v26 = vadd.f32 %v28483_v27, %v10980_v41 }
 0xb0b   :  { %v11527_v53 = vadd.f32 %v11526_v56, %v11525_v21  ;;  %v11331_v17 = vadd.f32 %v11330_v7, %v11329_v23  ;;  %v11434_v63 = vmul.f32 %v28778_v61, %v28778_v61  ;;  %v11334_v5 = vsel %vm11264_vm5, %v28778_v61, 0.0 }
 0xb0c   :  { %v11332_v58 = vsel %vm11264_vm5, %v28784_v26, 0.0  ;;  %v11433_v1 = vmul.f32 %v28784_v26, %v28784_v26  ;;  %v20406_v8 = vpop.f32.mrb[36].mxu1 }
 0xb0d   :  { %v11333_v11 = vadd.f32 %v11332_v58, %v11331_v17  ;;  %v11529_v29 = vadd.f32 %v11528_v45, %v11527_v53  ;;  %v28794_v47 = vadd.f32 %v20406_v8, %v28483_v27  ;;  %v10990_v62 = vpop.f32.mrb[37].mxu1  ;;  %v11532_v43 = vsel %vm11264_vm5, %v11434_v63, 0.0 }
 0xb0e   :  { %v11530_v35 = vsel %vm11264_vm5, %v11433_v1, 0.0  ;;  %v28800_v52 = vadd.f32 %v28483_v27, %v10990_v62  ;;  %v16612_v62 = vld [vmem:[%s30353_s5 + $0x10] sm:$0xff]  }
 0xb0f   :  { %v11531_v4 = vadd.f32 %v11530_v35, %v11529_v29  ;;  %v11335_v46 = vadd.f32 %v11334_v5, %v11333_v11  ;;  %v11436_v28 = vmul.f32 %v28794_v47, %v28794_v47  ;;  %v11338_v7 = vsel %vm11264_vm5, %v28794_v47, 0.0  ;;  %v16620_v29 = vld [vmem:[%s30353_s5 + $0x50] sm:$0xff]  }
 0xb10   :  { %v11336_v16 = vsel %vm11264_vm5, %v28800_v52, 0.0  ;;  %v11435_v9 = vmul.f32 %v28800_v52, %v28800_v52  ;;  %v20409_v55 = vpop.f32.mrb[38].mxu1  ;;  %v16636_v5 = vld [vmem:[%s30353_s5 + $0xd0] sm:$0xff]   ;;  %20538 = vmatprep.subr.bf16.mxu0 %v16620_v29 }
 0xb11   :  { %v11337_v57 = vadd.f32 %v11336_v16, %v11335_v46  ;;  %v11533_v23 = vadd.f32 %v11532_v43, %v11531_v4  ;;  %v28810_v21 = vadd.f32 %v20409_v55, %v28483_v27  ;;  %v11000_v41 = vpop.f32.mrb[39].mxu1  ;;  %v11536_v63 = vsel %vm11264_vm5, %v11436_v28, 0.0  ;;  %20570 = vmatprep.subr.bf16.mxu1 %v16636_v5  ;;  %20540 = vmatpush3.bf16.msra.mxu0 %v16612_v62  ;;  %v31893_v22 = vld [vmem:[#allocation97_spill] sm:$0xff] }
 0xb12   :  { %v11534_v56 = vsel %vm11264_vm5, %v11435_v9, 0.0  ;;  %v28816_v53 = vadd.f32 %v28483_v27, %v11000_v41 }
 0xb13   :  { %v11535_v17 = vadd.f32 %v11534_v56, %v11533_v23  ;;  %v11339_v45 = vadd.f32 %v11338_v7, %v11337_v57  ;;  %v11438_v58 = vmul.f32 %v28810_v21, %v28810_v21  ;;  %v11342_v28 = vsel %vm11264_vm5, %v28810_v21, 0.0 }
 0xb14   :  { %v11340_v1 = vsel %vm11264_vm5, %v28816_v53, 0.0  ;;  %v11437_v8 = vmul.f32 %v28816_v53, %v28816_v53  ;;  %v20412_v11 = vpop.f32.mrb[40].mxu1 }
 0xb15   :  { %v11341_v35 = vadd.f32 %v11340_v1, %v11339_v45  ;;  %v11537_v4 = vadd.f32 %v11536_v63, %v11535_v17  ;;  %v28835_v46 = vadd.f32 %v20412_v11, %v28483_v27  ;;  %v11010_v43 = vpop.f32.mrb[41].mxu1  ;;  %v11540_v23 = vsel %vm11264_vm5, %v11438_v58, 0.0  ;;  %v16628_v45 = vld [vmem:[%s30353_s5 + $0x90] sm:$0xff]  }
 0xb16   :  { %v11538_v16 = vsel %vm11264_vm5, %v11437_v8, 0.0  ;;  %v28841_v9 = vadd.f32 %v28483_v27, %v11010_v43  ;;  %20572 = vmatpush3.bf16.msra.mxu1 %v16628_v45 }
 0xb17   :  { %v11539_v55 = vadd.f32 %v11538_v16, %v11537_v4  ;;  %v11343_v57 = vadd.f32 %v11342_v28, %v11341_v35  ;;  %v11440_v41 = vmul.f32 %v28835_v46, %v28835_v46  ;;  %v11346_v11 = vsel %vm11264_vm5, %v28835_v46, 0.0 }
 0xb18   :  { %v11344_v7 = vsel %vm11264_vm5, %v28841_v9, 0.0  ;;  %v11439_v56 = vmul.f32 %v28841_v9, %v28841_v9  ;;  %v20415_v17 = vpop.f32.mrb[42].mxu1 }
 0xb19   :  { %v11345_v63 = vadd.f32 %v11344_v7, %v11343_v57  ;;  %v11541_v1 = vadd.f32 %v11540_v23, %v11539_v55  ;;  %v28854_v8 = vadd.f32 %v20415_v17, %v28483_v27  ;;  %v11020_v58 = vpop.f32.mrb[43].mxu1  ;;  %v11544_v4 = vsel %vm11264_vm5, %v11440_v41, 0.0 }
 0xb1a   :  { %v11542_v29 = vsel %vm11264_vm5, %v11439_v56, 0.0  ;;  %v28860_v62 = vadd.f32 %v28483_v27, %v11020_v58 }
 0xb1b   :  { %31853 = vst [vmem:[#allocation98_spill] sm:$0xff] %v28854_v8  ;;  %v11543_v5 = vadd.f32 %v11542_v29, %v11541_v1  ;;  %v11347_v35 = vadd.f32 %v11346_v11, %v11345_v63  ;;  %v11442_v43 = vmul.f32 %v28854_v8, %v28854_v8  ;;  %v11350_v17 = vsel %vm11264_vm5, %v28854_v8, 0.0 }
 0xb1c   :  { %v11348_v28 = vsel %vm11264_vm5, %v28860_v62, 0.0  ;;  %v11441_v16 = vmul.f32 %v28860_v62, %v28860_v62  ;;  %v20418_v55 = vpop.f32.mrb[44].mxu1 }
 0xb1d   :  { %v11349_v57 = vadd.f32 %v11348_v28, %v11347_v35  ;;  %v11545_v23 = vadd.f32 %v11544_v4, %v11543_v5  ;;  %v28870_v7 = vadd.f32 %v20418_v55, %v28483_v27  ;;  %v11030_v56 = vpop.f32.mrb[45].mxu1  ;;  %v11548_v58 = vsel %vm11264_vm5, %v11442_v43, 0.0 }
 0xb1e   :  { %v11546_v41 = vsel %vm11264_vm5, %v11441_v16, 0.0  ;;  %v28876_v45 = vadd.f32 %v28483_v27, %v11030_v56 }
 0xb1f   :  { %31854 = vst [vmem:[#allocation99_spill] sm:$0xff] %v28870_v7  ;;  %v11547_v63 = vadd.f32 %v11546_v41, %v11545_v23  ;;  %v11351_v1 = vadd.f32 %v11350_v17, %v11349_v57  ;;  %v11444_v11 = vmul.f32 %v28870_v7, %v28870_v7  ;;  %v11354_v57 = vsel %vm11264_vm5, %v28870_v7, 0.0 }
 0xb20   :  { %31855 = vst [vmem:[#allocation100_spill] sm:$0xff] %v28876_v45  ;;  %v11352_v29 = vsel %vm11264_vm5, %v28876_v45, 0.0  ;;  %v11443_v5 = vmul.f32 %v28876_v45, %v28876_v45  ;;  %v20421_v35 = vpop.f32.mrb[46].mxu1 }
 0xb21   :  { %v11353_v4 = vadd.f32 %v11352_v29, %v11351_v1  ;;  %v11549_v28 = vadd.f32 %v11548_v58, %v11547_v63  ;;  %v28886_v16 = vadd.f32 %v20421_v35, %v28483_v27  ;;  %v11040_v55 = vpop.f32.mrb[47].mxu1  ;;  %v11552_v41 = vsel %vm11264_vm5, %v11444_v11, 0.0  ;;  %v16613_v35 = vld [vmem:[%s30353_s5 + $0x18] sm:$0xff]  }
 0xb22   :  { %v11550_v43 = vsel %vm11264_vm5, %v11443_v5, 0.0  ;;  %v28892_v23 = vadd.f32 %v28483_v27, %v11040_v55  ;;  %v16621_v5 = vld [vmem:[%s30353_s5 + $0x58] sm:$0xff]  }
 0xb23   :  { %31856 = vst [vmem:[#allocation101_spill] sm:$0xff] %v28886_v16  ;;  %v11551_v56 = vadd.f32 %v11550_v43, %v11549_v28  ;;  %v11355_v17 = vadd.f32 %v11354_v57, %v11353_v4  ;;  %v11446_v1 = vmul.f32 %v28886_v16, %v28886_v16  ;;  %v16637_v11 = vld [vmem:[%s30353_s5 + $0xd8] sm:$0xff]   ;;  %20542 = vmatprep.subr.bf16.mxu0 %v16621_v5  ;;  %v11358_v43 = vsel %vm11264_vm5, %v28886_v16, 0.0 }
 0xb24   :  { %31857 = vst [vmem:[#allocation102_spill] sm:$0xff] %v28892_v23  ;;  %v11356_v63 = vsel %vm11264_vm5, %v28892_v23, 0.0  ;;  %v11445_v58 = vmul.f32 %v28892_v23, %v28892_v23  ;;  %v20424_v29 = vpop.f32.mrb[48].mxu1  ;;  %20574 = vmatprep.subr.bf16.mxu1 %v16637_v11  ;;  %20544 = vmatpush3.bf16.msra.mxu0 %v16613_v35 }
 0xb25   :  { %v11357_v4 = vadd.f32 %v11356_v63, %v11355_v17  ;;  %v11553_v28 = vadd.f32 %v11552_v41, %v11551_v56  ;;  %v28911_v55 = vadd.f32 %v20424_v29, %v28483_v27  ;;  %v11050_v57 = vpop.f32.mrb[49].mxu1  ;;  %v11556_v17 = vsel %vm11264_vm5, %v11446_v1, 0.0 }
 0xb26   :  { %v11554_v36 = vsel %vm11264_vm5, %v11445_v58, 0.0  ;;  %v28917_v33 = vadd.f32 %v28483_v27, %v11050_v57  ;;  %v16629_v58 = vld [vmem:[%s30353_s5 + $0x98] sm:$0xff]  }
 0xb27   :  { %31858 = vst [vmem:[#allocation103_spill] sm:$0xff] %v28911_v55  ;;  %v11555_v30 = vadd.f32 %v11554_v36, %v11553_v28  ;;  %v11359_v23 = vadd.f32 %v11358_v43, %v11357_v4  ;;  %v11448_v56 = vmul.f32 %v28911_v55, %v28911_v55  ;;  %20576 = vmatpush3.bf16.msra.mxu1 %v16629_v58  ;;  %v11362_v11 = vsel %vm11264_vm5, %v28911_v55, 0.0 }
 0xb28   :  { %31859 = vst [vmem:[#allocation104_spill] sm:$0xff] %v28917_v33  ;;  %v11360_v41 = vsel %vm11264_vm5, %v28917_v33, 0.0  ;;  %v11447_v63 = vmul.f32 %v28917_v33, %v28917_v33  ;;  %v20427_v29 = vpop.f32.mrb[50].mxu1 }
 0xb29   :  { %v11361_v5 = vadd.f32 %v11360_v41, %v11359_v23  ;;  %v11557_v35 = vadd.f32 %v11556_v17, %v11555_v30  ;;  %v28930_v36 = vadd.f32 %v20427_v29, %v28483_v27  ;;  %v11060_v1 = vpop.f32.mrb[51].mxu1  ;;  %v11560_v33 = vsel %vm11264_vm5, %v11448_v56, 0.0  ;;  %v16614_v29 = vld [vmem:[%s30353_s5 + $0x20] sm:$0xff]  }
 0xb2a   :  { %v11558_v4 = vsel %vm11264_vm5, %v11447_v63, 0.0  ;;  %v28936_v28 = vadd.f32 %v28483_v27, %v11060_v1  ;;  %v16622_v63 = vld [vmem:[%s30353_s5 + $0x60] sm:$0xff]  }
 0xb2b   :  { %31860 = vst [vmem:[#allocation105_spill] sm:$0xff] %v28930_v36  ;;  %v11559_v57 = vadd.f32 %v11558_v4, %v11557_v35  ;;  %v11363_v43 = vadd.f32 %v11362_v11, %v11361_v5  ;;  %v11450_v30 = vmul.f32 %v28930_v36, %v28930_v36  ;;  %v16638_v56 = vld [vmem:[%s30353_s5 + $0xe0] sm:$0xff]   ;;  %20546 = vmatprep.subr.bf16.mxu0 %v16622_v63  ;;  %v16623_v4 = vld [vmem:[%s30353_s5 + $0x68] sm:$0xff]  }
 0xb2c   :  { %31861 = vst [vmem:[#allocation106_spill] sm:$0xff] %v28936_v28  ;;  %v11364_v23 = vsel %vm11264_vm5, %v28936_v28, 0.0  ;;  %v11449_v17 = vmul.f32 %v28936_v28, %v28936_v28  ;;  %v20430_v41 = vpop.f32.mrb[52].mxu1  ;;  %20578 = vmatprep.subr.bf16.mxu1 %v16638_v56  ;;  %v16630_v11 = vld [vmem:[%s30353_s5 + $0xa0] sm:$0xff]   ;;  %v11366_v28 = vsel %vm11264_vm5, %v28930_v36, 0.0  ;;  %20548 = vmatpush3.bf16.msra.mxu0 %v16614_v29  ;;  %v16615_v63 = vld [vmem:[%s30353_s5 + $0x28] sm:$0xff]  }
 0xb2d   :  { %v11365_v58 = vadd.f32 %v11364_v23, %v11363_v43  ;;  %v11561_v5 = vadd.f32 %v11560_v33, %v11559_v57  ;;  %v28955_v35 = vadd.f32 %v20430_v41, %v28483_v27  ;;  %v11070_v1 = vpop.f32.mrb[53].mxu1  ;;  %20580 = vmatpush3.bf16.msra.mxu1 %v16630_v11  ;;  %v16639_v57 = vld [vmem:[%s30353_s5 + $0xe8] sm:$0xff]   ;;  %20550 = vmatprep.subr.bf16.mxu0 %v16623_v4  ;;  %v11564_v56 = vsel %vm11264_vm5, %v11450_v30, 0.0  ;;  %v16640_v11 = vld [vmem:[%s30353_s5 + $0xf0] sm:$0xff]  }
 0xb2e   :  { %v11562_v43 = vsel %vm11264_vm5, %v11449_v17, 0.0  ;;  %v28967_v33 = vadd.f32 %v28483_v27, %v11070_v1  ;;  %20582 = vmatprep.subr.bf16.mxu1 %v16639_v57  ;;  %v16631_v17 = vld [vmem:[%s30353_s5 + $0xa8] sm:$0xff]  }
 0xb2f   :  { %31862 = vst [vmem:[#allocation107_spill] sm:$0xff] %v28955_v35  ;;  %v11563_v23 = vadd.f32 %v11562_v43, %v11561_v5  ;;  %v11367_v41 = vadd.f32 %v11366_v28, %v11365_v58  ;;  %v11452_v29 = vmul.f32 %v28955_v35, %v28955_v35  ;;  %v16624_v5 = vld [vmem:[%s30353_s5 + $0x70] sm:$0xff]   ;;  %v11370_v36 = vsel %vm11264_vm5, %v28955_v35, 0.0 }
 0xb30   :  { %31863 = vst [vmem:[#allocation108_spill] sm:$0xff] %v28967_v33  ;;  %v11368_v1 = vsel %vm11264_vm5, %v28967_v33, 0.0  ;;  %v11451_v28 = vmul.f32 %v28967_v33, %v28967_v33  ;;  %v20433_v58 = vpop.f32.mrb[54].mxu1  ;;  %20552 = vmatpush3.bf16.msra.mxu0 %v16615_v63 }
 0xb31   :  { %v11369_v4 = vadd.f32 %v11368_v1, %v11367_v41  ;;  %v11565_v30 = vadd.f32 %v11564_v56, %v11563_v23  ;;  %v28992_v43 = vadd.f32 %v20433_v58, %v28483_v27  ;;  %v11080_v57 = vpop.f32.mrb[55].mxu1  ;;  %20584 = vmatpush3.bf16.msra.mxu1 %v16631_v17  ;;  %20554 = vmatprep.subr.bf16.mxu0 %v16624_v5  ;;  %v16616_v23 = vld [vmem:[%s30353_s5 + $0x30] sm:$0xff]   ;;  %v11568_v56 = vsel %vm11264_vm5, %v11452_v29, 0.0  ;;  %v16625_v17 = vld [vmem:[%s30353_s5 + $0x78] sm:$0xff]  }
 0xb32   :  { %v11566_v33 = vsel %vm11264_vm5, %v11451_v28, 0.0  ;;  %v28998_v55 = vadd.f32 %v28483_v27, %v11080_v57  ;;  %20586 = vmatprep.subr.bf16.mxu1 %v16640_v11  ;;  %v16632_v41 = vld [vmem:[%s30353_s5 + $0xb0] sm:$0xff]   ;;  %v16641_v28 = vld [vmem:[%s30353_s5 + $0xf8] sm:$0xff]  }
 0xb33   :  { %31864 = vst [vmem:[#allocation109_spill] sm:$0xff] %v28992_v43  ;;  %v11567_v16 = vadd.f32 %v11566_v33, %v11565_v30  ;;  %v11371_v7 = vadd.f32 %v11370_v36, %v11369_v4  ;;  %v11454_v1 = vmul.f32 %v28992_v43, %v28992_v43  ;;  %v11374_v4 = vsel %vm11264_vm5, %v28992_v43, 0.0 }
 0xb34   :  { %31865 = vst [vmem:[#allocation110_spill] sm:$0xff] %v28998_v55  ;;  %v11372_v63 = vsel %vm11264_vm5, %v28998_v55, 0.0  ;;  %v11453_v36 = vmul.f32 %v28998_v55, %v28998_v55  ;;  %v20436_v33 = vpop.f32.mrb[56].mxu1  ;;  %20556 = vmatpush3.bf16.msra.mxu0 %v16616_v23 }
 0xb35   :  { %v11373_v58 = vadd.f32 %v11372_v63, %v11371_v7  ;;  %v11569_v29 = vadd.f32 %v11568_v56, %v11567_v16  ;;  %v29020_v5 = vadd.f32 %v20436_v33, %v28483_v27  ;;  %v11090_v11 = vpop.f32.mrb[57].mxu1  ;;  %20588 = vmatpush3.bf16.msra.mxu1 %v16632_v41  ;;  %20558 = vmatprep.subr.bf16.mxu0 %v16625_v17  ;;  %v16617_v7 = vld [vmem:[%s30353_s5 + $0x38] sm:$0xff]   ;;  %v11572_v56 = vsel %vm11264_vm5, %v11454_v1, 0.0 }
 0xb36   :  { %v11570_v30 = vsel %vm11264_vm5, %v11453_v36, 0.0  ;;  %v29026_v57 = vadd.f32 %v28483_v27, %v11090_v11  ;;  %20590 = vmatprep.subr.bf16.mxu1 %v16641_v28  ;;  %v16633_v16 = vld [vmem:[%s30353_s5 + $0xb8] sm:$0xff]  }
 0xb37   :  { %31866 = vst [vmem:[#allocation111_spill] sm:$0xff] %v29020_v5  ;;  %v11571_v55 = vadd.f32 %v11570_v30, %v11569_v29  ;;  %v11375_v35 = vadd.f32 %v11374_v4, %v11373_v58  ;;  %v11456_v63 = vmul.f32 %v29020_v5, %v29020_v5  ;;  %v11378_v29 = vsel %vm11264_vm5, %v29020_v5, 0.0 }
 0xb38   :  { %31867 = vst [vmem:[#allocation112_spill] sm:$0xff] %v29026_v57  ;;  %v11376_v23 = vsel %vm11264_vm5, %v29026_v57, 0.0  ;;  %v11455_v41 = vmul.f32 %v29026_v57, %v29026_v57  ;;  %v20439_v36 = vpop.f32.mrb[58].mxu1  ;;  %20560 = vmatpush3.bf16.msra.mxu0 %v16617_v7 }
 0xb39   :  { %v11377_v33 = vadd.f32 %v11376_v23, %v11375_v35  ;;  %v11573_v17 = vadd.f32 %v11572_v56, %v11571_v55  ;;  %v29042_v28 = vadd.f32 %v20439_v36, %v28483_v27  ;;  %v11100_v58 = vpop.f32.mrb[59].mxu1  ;;  %20592 = vmatpush3.bf16.msra.mxu1 %v16633_v16  ;;  %v11576_v57 = vsel %vm11264_vm5, %v11456_v63, 0.0 }
 0xb3a   :  { %v11574_v1 = vsel %vm11264_vm5, %v11455_v41, 0.0  ;;  %v29048_v11 = vadd.f32 %v28483_v27, %v11100_v58 }
 0xb3b   :  { %31868 = vst [vmem:[#allocation48_spill] sm:$0xff] %v29042_v28  ;;  %v11575_v4 = vadd.f32 %v11574_v1, %v11573_v17  ;;  %v11379_v30 = vadd.f32 %v11378_v29, %v11377_v33  ;;  %v11458_v55 = vmul.f32 %v29042_v28, %v29042_v28  ;;  %v11382_v16 = vsel %vm11264_vm5, %v29042_v28, 0.0 }
 0xb3c   :  { %31869 = vst [vmem:[#allocation115_spill] sm:$0xff] %v29048_v11  ;;  %v11380_v35 = vsel %vm11264_vm5, %v29048_v11, 0.0  ;;  %v11457_v56 = vmul.f32 %v29048_v11, %v29048_v11  ;;  %v20442_v23 = vpop.f32.mrb[60].mxu1 }
 0xb3d   :  { %v11381_v41 = vadd.f32 %v11380_v35, %v11379_v30  ;;  %v11577_v36 = vadd.f32 %v11576_v57, %v11575_v4  ;;  %v29058_v58 = vadd.f32 %v20442_v23, %v28483_v27  ;;  %v11110_v7 = vpop.f32.mrb[61].mxu1  ;;  %v11580_v1 = vsel %vm11264_vm5, %v11458_v55, 0.0 }
 0xb3e   :  { %v11578_v63 = vsel %vm11264_vm5, %v11457_v56, 0.0  ;;  %v29064_v33 = vadd.f32 %v28483_v27, %v11110_v7 }
 0xb3f   :  { %31870 = vst [vmem:[#allocation116_spill] sm:$0xff] %v29058_v58  ;;  %v11579_v17 = vadd.f32 %v11578_v63, %v11577_v36  ;;  %v11383_v29 = vadd.f32 %v11382_v16, %v11381_v41  ;;  %v11460_v30 = vmul.f32 %v29058_v58, %v29058_v58  ;;  %v11386_v41 = vsel %vm11264_vm5, %v29058_v58, 0.0 }
 0xb40   :  { %31871 = vst [vmem:[#allocation117_spill] sm:$0xff] %v29064_v33  ;;  %v11384_v57 = vsel %vm11264_vm5, %v29064_v33, 0.0  ;;  %v11459_v4 = vmul.f32 %v29064_v33, %v29064_v33  ;;  %v20445_v35 = vpop.f32.mrb[62].mxu1 }
 0xb41   :  { %v11385_v23 = vadd.f32 %v11384_v57, %v11383_v29  ;;  %v11581_v28 = vadd.f32 %v11580_v1, %v11579_v17  ;;  %v29074_v56 = vadd.f32 %v20445_v35, %v28483_v27  ;;  %v11120_v7 = vpop.f32.mrb[63].mxu1  ;;  %v11584_v11 = vsel %vm11264_vm5, %v11460_v30, 0.0 }
 0xb42   :  { %v11582_v55 = vsel %vm11264_vm5, %v11459_v4, 0.0  ;;  %v29080_v36 = vadd.f32 %v28483_v27, %v11120_v7 }
 0xb43   :  { %31872 = vst [vmem:[#allocation118_spill] sm:$0xff] %v29074_v56  ;;  %v11583_v16 = vadd.f32 %v11582_v55, %v11581_v28  ;;  %v11387_v63 = vadd.f32 %v11386_v41, %v11385_v23  ;;  %v11462_v29 = vmul.f32 %v29074_v56, %v29074_v56  ;;  %v11390_v4 = vsel %vm11264_vm5, %v29074_v56, 0.0 }
 0xb44   :  { %31873 = vst [vmem:[#allocation119_spill] sm:$0xff] %v29080_v36  ;;  %v11388_v17 = vsel %vm11264_vm5, %v29080_v36, 0.0  ;;  %v11461_v1 = vmul.f32 %v29080_v36, %v29080_v36  ;;  %v31894_v36 = vld [vmem:[#allocation104_spill] sm:$0xff] }
 0xb45   :  { %v11389_v57 = vadd.f32 %v11388_v17, %v11387_v63  ;;  %v11585_v35 = vadd.f32 %v11584_v11, %v11583_v16  ;;  %v11588_v30 = vsel %vm11264_vm5, %v11462_v29, 0.0 }
 0xb46   :  { %v11586_v27 = vsel %vm11264_vm5, %v11461_v1, 0.0 }
 0xb47   :  { %v11391_v28 = vadd.f32 %v11390_v4, %v11389_v57  ;;  %v11587_v23 = vadd.f32 %v11586_v27, %v11585_v35  ;;  %v31881_v4 = vld [vmem:[#allocation105_spill] sm:$0xff]  ;;  %v31895_v27 = vld [vmem:[#allocation54_spill] sm:$0xff] }
 0xb49   :  { %v11392_v7 = vrot.slane %v11391_v28, 4  ;;  %v11589_v41 = vadd.f32 %v11588_v30, %v11587_v23 }
 0xb4b   :  { %v11393_v55 = vadd.f32 %v11392_v7, %v11391_v28  ;;  %v11590_v58 = vrot.slane %v11589_v41, 4  ;;  %v31884_v28 = vld [vmem:[#allocation110_spill] sm:$0xff] }
 0xb4d   :  { %v11394_v33 = vrot.slane %v11393_v55, 2  ;;  %v11591_v5 = vadd.f32 %v11590_v58, %v11589_v41 }
 0xb4f   :  { %v11395_v43 = vadd.f32 %v11394_v33, %v11393_v55  ;;  %v11592_v45 = vrot.slane %v11591_v5, 2  ;;  %v31883_v33 = vld [vmem:[#allocation107_spill] sm:$0xff] }
 0xb51   :  { %v11396_v8 = vrot.slane %v11395_v43, 1  ;;  %v11593_v63 = vadd.f32 %v11592_v45, %v11591_v5 }
 0xb53   :  { %v11397_v11 = vadd.f32 %v11396_v8, %v11395_v43  ;;  %v11594_v16 = vrot.slane %v11593_v63, 1 }
 0xb55   :  { %v29093_v17 = vmul.f32 0.001953125, %v11397_v11  ;;  %v11595_v56 = vadd.f32 %v11594_v16, %v11593_v63 }
 0xb57   :  { %v11596_v1 = vmul.f32 0.001953125, %v11595_v56  ;;  %v11597_v57 = vmul.f32 %v29093_v17, %v29093_v17  ;;  %v11616_v11 = vsub.f32 %v28610_v54, %v29093_v17  ;;  %v11632_v29 = vsub.f32 %v28759_v2, %v29093_v17  ;;  %v31874_v54 = vld [vmem:[#allocation98_spill] sm:$0xff]  ;;  %v31882_v56 = vld [vmem:[#allocation108_spill] sm:$0xff] }
 0xb58   :  { %v11633_v41 = vsub.f32 %v28784_v26, %v29093_v17  ;;  %v31879_v26 = vld [vmem:[#allocation103_spill] sm:$0xff]  ;;  %v11651_v45 = vsub.f32 %v31882_v56, %v29093_v17  ;;  %v31889_v56 = vld [vmem:[#allocation48_spill] sm:$0xff]  ;;  %v11631_v58 = vsub.f32 %v31893_v22, %v29093_v17  ;;  %v11647_v35 = vsub.f32 %v31894_v36, %v29093_v17 }
 0xb59   :  { %v11598_v5 = vsub.f32 %v11596_v1, %v11597_v57  ;;  %v11648_v43 = vsub.f32 %v31879_v26, %v29093_v17  ;;  %v11650_v57 = vsub.f32 %v31881_v4, %v29093_v17  ;;  %v31886_v26 = vld [vmem:[#allocation112_spill] sm:$0xff]  ;;  %v31888_v4 = vld [vmem:[#allocation115_spill] sm:$0xff]  ;;  %v11599_v25 = vsub.f32 %v31895_v27, %v29093_v17 }
 0xb5a   :  { %v11615_v13 = vsub.f32 %v31896_v50, %v29093_v17  ;;  %v31897_v1 = vsub.f32 %v28486_v34, %v29093_v17 }
 0xb5b   :  { %v11663_v7 = vadd.f32 1e-05, %v11598_v5  ;;  %v31885_v5 = vld [vmem:[#allocation109_spill] sm:$0xff] }
 0xb5d   :  { %22161 = vrsqrt.f32 %v11663_v7  ;;  %v11634_v7 = vsub.f32 %v28778_v61, %v29093_v17  ;;  %v31880_v61 = vld [vmem:[#allocation106_spill] sm:$0xff] }
 0xb5e   :  { %v11649_v23 = vsub.f32 %v31880_v61, %v29093_v17  ;;  %v31887_v61 = vld [vmem:[#allocation111_spill] sm:$0xff] }
 0xb67   :  { %v29215_v15 = vpop.eup %22161 }
 0xb68   :  { %v11698_v44 = vmul.f32 %v29215_v15, %v11632_v29  ;;  %v11714_v2 = vmul.f32 %v29215_v15, %v11648_v43  ;;  %v11666_v16 = vmul.f32 %v29215_v15, %v31897_v1  ;;  %v11697_v22 = vmul.f32 %v29215_v15, %v11631_v58 }
 0xb69   :  { %v11713_v8 = vmul.f32 %v29215_v15, %v11647_v35  ;;  %v11665_v36 = vmul.f32 %v29215_v15, %v11599_v25  ;;  %v11682_v27 = vmul.f32 %v29215_v15, %v11616_v11  ;;  %v11681_v55 = vmul.f32 %v29215_v15, %v11615_v13 }
 0xb6a   :  { %v11762_v50 = vmax.f32 %v11698_v44, 0.0  ;;  %v11778_v0 = vmax.f32 %v11714_v2, 0.0  ;;  %v11730_v29 = vmax.f32 %v11666_v16, 0.0  ;;  %v11761_v24 = vmax.f32 %v11697_v22, 0.0 }
 0xb6b   :  { %v11777_v43 = vmax.f32 %v11713_v8, 0.0  ;;  %v11729_v30 = vmax.f32 %v11665_v36, 0.0  ;;  %v11746_v63 = vmax.f32 %v11682_v27, 0.0  ;;  %v11745_v34 = vmax.f32 %v11681_v55, 0.0 }
 0xb6c   :  { %v22077_v38 = vpack.i.bf16 %v11762_v50, %v11778_v0  ;;  %v11699_v1 = vmul.f32 %v29215_v15, %v11633_v41  ;;  %v11715_v58 = vmul.f32 %v29215_v15, %v11649_v23  ;;  %v31898_v25 = vsub.f32 %v28505_v10, %v29093_v17 }
 0xb6d   :  { %v22075_v35 = vpack.i.bf16 %v11761_v24, %v11777_v43  ;;  %v22119_v39 = vpack.i.bf16 %v11730_v29, %v11746_v63  ;;  %v31899_v44 = vsub.f32 %v28632_v14, %v29093_v17  ;;  %v22117_v11 = vpack.i.bf16 %v11729_v30, %v11745_v34 }
 0xb6e   :  { %v11667_v13 = vmul.f32 %v29215_v15, %v31898_v25  ;;  %v11763_v16 = vmax.f32 %v11699_v1, 0.0  ;;  %v11779_v55 = vmax.f32 %v11715_v58, 0.0  ;;  %v11700_v0 = vmul.f32 %v29215_v15, %v11634_v7 }
 0xb6f   :  { %v11683_v8 = vmul.f32 %v29215_v15, %v31899_v44  ;;  %22076 = vxpose.xlu0.b32.start [1/16] (narrow) %v22075_v35, 16  ;;  %v11716_v24 = vmul.f32 %v29215_v15, %v11650_v57  ;;  %v31900_v10 = vsub.f32 %v28500_v37, %v29093_v17  ;;  %22118 = vxpose.xlu1.b32.start [1/16] (narrow) %v22117_v11, 16 }
 0xb70   :  { %v11731_v41 = vmax.f32 %v11667_v13, 0.0  ;;  %v22079_v2 = vpack.i.bf16 %v11763_v16, %v11779_v55  ;;  %v11764_v14 = vmax.f32 %v11700_v0, 0.0  ;;  %v31901_v30 = vsub.f32 %v28626_v59, %v29093_v17 }
 0xb71   :  { %v11747_v23 = vmax.f32 %v11683_v8, 0.0  ;;  %v11668_v63 = vmul.f32 %v29215_v15, %v31900_v10  ;;  %v31902_v7 = vsub.f32 %v28800_v52, %v29093_v17  ;;  %v11780_v57 = vmax.f32 %v11716_v24, 0.0 }
 0xb72   :  { %v11684_v22 = vmul.f32 %v29215_v15, %v31901_v30  ;;  %v11717_v37 = vmul.f32 %v29215_v15, %v11651_v45  ;;  %v31903_v34 = vsub.f32 %v28520_v42, %v29093_v17  ;;  %v31904_v59 = vsub.f32 %v28648_v60, %v29093_v17 }
 0xb73   :  { %v11701_v36 = vmul.f32 %v29215_v15, %v31902_v7  ;;  %v22121_v27 = vpack.i.bf16 %v11731_v41, %v11747_v23  ;;  %v11732_v50 = vmax.f32 %v11668_v63, 0.0  ;;  %22078 = vxpose.xlu0.b32.cont [2/16] (narrow) %v22077_v38, 16  ;;  %v22081_v52 = vpack.i.bf16 %v11764_v14, %v11780_v57  ;;  %22120 = vxpose.xlu1.b32.cont [2/16] (narrow) %v22119_v39, 16  ;;  %v16650_v63 = vld [vmem:[%s30353_s5 + $0x140] sm:$0xff]  }
 0xb74   :  { %v11748_v29 = vmax.f32 %v11684_v22, 0.0  ;;  %v11669_v1 = vmul.f32 %v29215_v15, %v31903_v34  ;;  %v11685_v58 = vmul.f32 %v29215_v15, %v31904_v59  ;;  %v11781_v35 = vmax.f32 %v11717_v37, 0.0  ;;  %20594 = vmatprep.subr.bf16.mxu0 %v16650_v63 }
 0xb75   :  { %v11765_v43 = vmax.f32 %v11701_v36, 0.0  ;;  %v31905_v25 = vsub.f32 %v28794_v47, %v29093_v17  ;;  %v31906_v13 = vsub.f32 %v31883_v33, %v29093_v17  ;;  %v31907_v60 = vsub.f32 %v28514_v18, %v29093_v17 }
 0xb76   :  { %v22123_v44 = vpack.i.bf16 %v11732_v50, %v11748_v29  ;;  %v11733_v8 = vmax.f32 %v11669_v1, 0.0  ;;  %v11749_v11 = vmax.f32 %v11685_v58, 0.0  ;;  %v31908_v47 = vsub.f32 %v28642_v48, %v29093_v17  ;;  %v16666_v48 = vld [vmem:[%s30353_s5 + $0x1c0] sm:$0xff]  }
 0xb77   :  { %v11702_v45 = vmul.f32 %v29215_v15, %v31905_v25  ;;  %v11718_v42 = vmul.f32 %v29215_v15, %v31906_v13  ;;  %v11670_v38 = vmul.f32 %v29215_v15, %v31907_v60  ;;  %v22083_v16 = vpack.i.bf16 %v11765_v43, %v11781_v35  ;;  %22080 = vxpose.xlu0.b32.cont [3/16] (narrow) %v22079_v2, 16 }
 0xb78   :  { %v11686_v41 = vmul.f32 %v29215_v15, %v31908_v47  ;;  %v22125_v33 = vpack.i.bf16 %v11733_v8, %v11749_v11  ;;  %v31909_v39 = vsub.f32 %v28816_v53, %v29093_v17  ;;  %v31910_v18 = vsub.f32 %v31884_v28, %v29093_v17  ;;  %22122 = vxpose.xlu1.b32.cont [3/16] (narrow) %v22121_v27, 16 }
 0xb79   :  { %v11766_v55 = vmax.f32 %v11702_v45, 0.0  ;;  %v11782_v0 = vmax.f32 %v11718_v42, 0.0  ;;  %v11734_v23 = vmax.f32 %v11670_v38, 0.0  ;;  %v31911_v53 = vsub.f32 %v28536_v49, %v29093_v17  ;;  %20626 = vmatprep.subr.bf16.mxu1 %v16666_v48 }
 0xb7a   :  { %v11703_v24 = vmul.f32 %v29215_v15, %v31909_v39  ;;  %v11719_v10 = vmul.f32 %v29215_v15, %v31910_v18  ;;  %v11750_v30 = vmax.f32 %v11686_v41, 0.0  ;;  %v31912_v28 = vsub.f32 %v28664_v12, %v29093_v17 }
 0xb7b   :  { %v22085_v14 = vpack.i.bf16 %v11766_v55, %v11782_v0  ;;  %v11671_v22 = vmul.f32 %v29215_v15, %v31911_v53  ;;  %v31913_v50 = vsub.f32 %v28810_v21, %v29093_v17  ;;  %v31914_v37 = vsub.f32 %v31885_v5, %v29093_v17  ;;  %22082 = vxpose.xlu0.b32.cont [4/16] (narrow) %v22081_v52, 16 }
 0xb7c   :  { %v11687_v7 = vmul.f32 %v29215_v15, %v31912_v28  ;;  %v11767_v36 = vmax.f32 %v11703_v24, 0.0  ;;  %v11783_v57 = vmax.f32 %v11719_v10, 0.0  ;;  %v22127_v29 = vpack.i.bf16 %v11734_v23, %v11750_v30  ;;  %22124 = vxpose.xlu1.b32.cont [4/16] (narrow) %v22123_v44, 16 }
 0xb7d   :  { %v11704_v2 = vmul.f32 %v29215_v15, %v31913_v50  ;;  %v11720_v49 = vmul.f32 %v29215_v15, %v31914_v37  ;;  %v11735_v43 = vmax.f32 %v11671_v22, 0.0  ;;  %v31915_v34 = vsub.f32 %v28530_v40, %v29093_v17 }
 0xb7e   :  { %v11751_v12 = vmax.f32 %v11687_v7, 0.0  ;;  %v22087_v1 = vpack.i.bf16 %v11767_v36, %v11783_v57  ;;  %v31916_v21 = vsub.f32 %v28658_v3, %v29093_v17  ;;  %v31917_v45 = vsub.f32 %v28841_v9, %v29093_v17 }
 0xb7f   :  { %v11672_v27 = vmul.f32 %v29215_v15, %v31915_v34  ;;  %v11768_v59 = vmax.f32 %v11704_v2, 0.0  ;;  %v11784_v58 = vmax.f32 %v11720_v49, 0.0  ;;  %v31918_v40 = vsub.f32 %v31886_v26, %v29093_v17  ;;  %22084 = vxpose.xlu0.b32.cont [5/16] (narrow) %v22083_v16, 16 }
 0xb80   :  { %v11688_v35 = vmul.f32 %v29215_v15, %v31916_v21  ;;  %v22129_v5 = vpack.i.bf16 %v11735_v43, %v11751_v12  ;;  %v11705_v13 = vmul.f32 %v29215_v15, %v31917_v45  ;;  %v31919_v3 = vsub.f32 %v28552_v32, %v29093_v17  ;;  %22126 = vxpose.xlu1.b32.cont [5/16] (narrow) %v22125_v33, 16  ;;  %v31931_v12 = vld [vmem:[#allocation55_spill] sm:$0xff] }
 0xb81   :  { %v11736_v25 = vmax.f32 %v11672_v27, 0.0  ;;  %v11721_v42 = vmul.f32 %v29215_v15, %v31918_v40  ;;  %v29333_v8 = vpack.i.bf16 %v11768_v59, %v11784_v58  ;;  %v31920_v60 = vsub.f32 %v28689_v6, %v29093_v17  ;;  %v31933_v58 = vld [vmem:[#allocation92_spill] sm:$0xff]  ;;  %v31937_v40 = vld [vmem:[#allocation117_spill] sm:$0xff] }
 0xb82   :  { %v11752_v11 = vmax.f32 %v11688_v35, 0.0  ;;  %v11673_v52 = vmul.f32 %v29215_v15, %v31919_v3  ;;  %v11769_v38 = vmax.f32 %v11705_v13, 0.0  ;;  %v31921_v26 = vsub.f32 %v28835_v46, %v29093_v17 }
 0xb83   :  { %v11689_v9 = vmul.f32 %v29215_v15, %v31920_v60  ;;  %v11785_v55 = vmax.f32 %v11721_v42, 0.0  ;;  %v31922_v0 = vsub.f32 %v31887_v61, %v29093_v17  ;;  %v31923_v6 = vsub.f32 %v28546_v19, %v29093_v17  ;;  %22086 = vxpose.xlu0.b32.cont [6/16] (narrow) %v22085_v14, 16  ;;  %v31935_v14 = vld [vmem:[#allocation100_spill] sm:$0xff] }
 0xb84   :  { %v11706_v44 = vmul.f32 %v29215_v15, %v31921_v26  ;;  %v29351_v32 = vpack.i.bf16 %v11736_v25, %v11752_v11  ;;  %v11737_v41 = vmax.f32 %v11673_v52, 0.0  ;;  %v31924_v10 = vsub.f32 %v28683_v20, %v29093_v17  ;;  %22128 = vxpose.xlu1.b32.cont [6/16] (narrow) %v22127_v29, 16  ;;  %v31939_v52 = vld [vmem:[#allocation88_spill] sm:$0xff] }
 0xb85   :  { %v11722_v47 = vmul.f32 %v29215_v15, %v31922_v0  ;;  %v11753_v23 = vmax.f32 %v11689_v9, 0.0  ;;  %v11674_v39 = vmul.f32 %v29215_v15, %v31923_v6  ;;  %v29357_v24 = vpack.i.bf16 %v11769_v38, %v11785_v55  ;;  %v31941_v38 = vld [vmem:[#allocation94_spill] sm:$0xff]  ;;  %v31945_v6 = vld [vmem:[#allocation116_spill] sm:$0xff] }
 0xb86   :  { %v11770_v46 = vmax.f32 %v11706_v44, 0.0  ;;  %v11690_v61 = vmul.f32 %v29215_v15, %v31924_v10  ;;  %v31925_v30 = vsub.f32 %v28860_v62, %v29093_v17  ;;  %v31926_v16 = vsub.f32 %v31888_v4, %v29093_v17 }
 0xb87   :  { %v11786_v18 = vmax.f32 %v11722_v47, 0.0  ;;  %v29363_v63 = vpack.i.bf16 %v11737_v41, %v11753_v23  ;;  %v11738_v48 = vmax.f32 %v11674_v39, 0.0  ;;  %v31927_v20 = vsub.f32 %v28568_v51, %v29093_v17  ;;  %22088 = vxpose.xlu0.b32.cont [7/16] (narrow) %v22087_v1, 16  ;;  %v31943_v47 = vld [vmem:[#allocation99_spill] sm:$0xff] }
 0xb88   :  { %v11707_v19 = vmul.f32 %v29215_v15, %v31925_v30  ;;  %v11723_v53 = vmul.f32 %v29215_v15, %v31926_v16  ;;  %v11754_v28 = vmax.f32 %v11690_v61, 0.0  ;;  %v31928_v7 = vsub.f32 %v28708_v31, %v29093_v17  ;;  %22130 = vxpose.xlu1.b32.cont [7/16] (narrow) %v22129_v5, 16 }
 0xb89   :  { %v29373_v22 = vpack.i.bf16 %v11770_v46, %v11786_v18  ;;  %v11675_v33 = vmul.f32 %v29215_v15, %v31927_v20  ;;  %v31929_v4 = vsub.f32 %v31874_v54, %v29093_v17  ;;  %v31930_v2 = vsub.f32 %v31889_v56, %v29093_v17 }
 0xb8a   :  { %v11691_v62 = vmul.f32 %v29215_v15, %v31928_v7  ;;  %v11771_v36 = vmax.f32 %v11707_v19, 0.0  ;;  %v11787_v57 = vmax.f32 %v11723_v53, 0.0  ;;  %v22135_v51 = vpack.i.bf16 %v11738_v48, %v11754_v28  ;;  %v31947_v48 = vld [vmem:[#allocation21_spill] sm:$0xff] }
 0xb8b   :  { %v11708_v50 = vmul.f32 %v29215_v15, %v31929_v4  ;;  %v11724_v37 = vmul.f32 %v29215_v15, %v31930_v2  ;;  %v11739_v49 = vmax.f32 %v11675_v33, 0.0  ;;  %v31932_v31 = vsub.f32 %v31931_v12, %v29093_v17  ;;  %v31949_v28 = vld [vmem:[#allocation93_spill] sm:$0xff]  ;;  %v31953_v4 = vld [vmem:[#allocation119_spill] sm:$0xff]  ;;  %22090 = vxpose.xlu0.b32.cont [8/16] (narrow) %v29333_v8, 16 }
 0xb8c   :  { %v11755_v43 = vmax.f32 %v11691_v62, 0.0  ;;  %v22095_v27 = vpack.i.bf16 %v11771_v36, %v11787_v57  ;;  %v31934_v21 = vsub.f32 %v31933_v58, %v29093_v17  ;;  %v31936_v45 = vsub.f32 %v31935_v14, %v29093_v17  ;;  %v31951_v36 = vld [vmem:[#allocation102_spill] sm:$0xff]  ;;  %22132 = vxpose.xlu1.b32.cont [8/16] (narrow) %v29351_v32, 16 }
 0xb8d   :  { %v11676_v34 = vmul.f32 %v29215_v15, %v31932_v31  ;;  %v11772_v59 = vmax.f32 %v11708_v50, 0.0  ;;  %v11788_v54 = vmax.f32 %v11724_v37, 0.0  ;;  %v31938_v42 = vsub.f32 %v31937_v40, %v29093_v17  ;;  %v31961_v14 = vld [vmem:[#allocation118_spill] sm:$0xff] }
 0xb8e   :  { %v11692_v56 = vmul.f32 %v29215_v15, %v31934_v21  ;;  %v22137_v35 = vpack.i.bf16 %v11739_v49, %v11755_v43  ;;  %v11709_v13 = vmul.f32 %v29215_v15, %v31936_v45  ;;  %v31940_v60 = vsub.f32 %v31939_v52, %v29093_v17  ;;  %v31955_v43 = vld [vmem:[#allocation90_spill] sm:$0xff] }
 0xb8f   :  { %v11740_v25 = vmax.f32 %v11676_v34, 0.0  ;;  %v11725_v29 = vmul.f32 %v29215_v15, %v31938_v42  ;;  %v22097_v11 = vpack.i.bf16 %v11772_v59, %v11788_v54  ;;  %v31942_v55 = vsub.f32 %v31941_v38, %v29093_v17  ;;  %v31957_v34 = vld [vmem:[#allocation96_spill] sm:$0xff]  ;;  %22092 = vxpose.xlu0.b32.cont [9/16] (narrow) %v29357_v24, 16 }
 0xb90   :  { %v11756_v3 = vmax.f32 %v11692_v56, 0.0  ;;  %v11677_v9 = vmul.f32 %v29215_v15, %v31940_v60  ;;  %v11773_v44 = vmax.f32 %v11709_v13, 0.0  ;;  %v31944_v41 = vsub.f32 %v31943_v47, %v29093_v17  ;;  %v31959_v56 = vld [vmem:[#allocation101_spill] sm:$0xff]  ;;  %22134 = vxpose.xlu1.b32.cont [9/16] (narrow) %v29363_v63, 16 }
 0xb91   :  { %v11693_v26 = vmul.f32 %v29215_v15, %v31942_v55  ;;  %v11789_v0 = vmax.f32 %v11725_v29, 0.0  ;;  %v31946_v39 = vsub.f32 %v31945_v6, %v29093_v17  ;;  %v31948_v30 = vsub.f32 %v31947_v48, %v29093_v17  ;;  %v31965_v55 = vld [vmem:[#allocation95_spill] sm:$0xff] }
 0xb92   :  { %v11710_v23 = vmul.f32 %v29215_v15, %v31944_v41  ;;  %v22139_v18 = vpack.i.bf16 %v11740_v25, %v11756_v3  ;;  %v11741_v10 = vmax.f32 %v11677_v9, 0.0  ;;  %v31950_v20 = vsub.f32 %v31949_v28, %v29093_v17  ;;  %v31963_v3 = vld [vmem:[#allocation89_spill] sm:$0xff]  ;;  %v16642_v48 = vld [vmem:[%s30353_s5 + $0x100] sm:$0xff]   ;;  %v16651_v28 = vld [vmem:[%s30353_s5 + $0x148] sm:$0xff]  }
 0xb93   :  { %v11726_v46 = vmul.f32 %v29215_v15, %v31946_v39  ;;  %v11757_v61 = vmax.f32 %v11693_v26, 0.0  ;;  %v11678_v1 = vmul.f32 %v29215_v15, %v31948_v30  ;;  %v22099_v19 = vpack.i.bf16 %v11773_v44, %v11789_v0  ;;  %22094 = vxpose.xlu0.b32.cont [10/16] (narrow) %v29373_v22, 16 }
 0xb94   :  { %v11774_v16 = vmax.f32 %v11710_v23, 0.0  ;;  %v11694_v33 = vmul.f32 %v29215_v15, %v31950_v20  ;;  %v31952_v5 = vsub.f32 %v31951_v36, %v29093_v17  ;;  %v31954_v50 = vsub.f32 %v31953_v4, %v29093_v17  ;;  %22136 = vxpose.xlu1.b32.cont [10/16] (narrow) %v22135_v51, 16  ;;  %v16643_v36 = vld [vmem:[%s30353_s5 + $0x108] sm:$0xff]  }
 0xb95   :  { %v11790_v53 = vmax.f32 %v11726_v46, 0.0  ;;  %v22141_v7 = vpack.i.bf16 %v11741_v10, %v11757_v61  ;;  %v11742_v62 = vmax.f32 %v11678_v1, 0.0  ;;  %v31956_v12 = vsub.f32 %v31955_v43, %v29093_v17 }
 0xb96   :  { %v11711_v57 = vmul.f32 %v29215_v15, %v31952_v5  ;;  %v11727_v2 = vmul.f32 %v29215_v15, %v31954_v50  ;;  %v11758_v49 = vmax.f32 %v11694_v33, 0.0  ;;  %v31958_v59 = vsub.f32 %v31957_v34, %v29093_v17  ;;  %v16667_v33 = vld [vmem:[%s30353_s5 + $0x1c8] sm:$0xff]  }
 0xb97   :  { %v22101_v37 = vpack.i.bf16 %v11774_v16, %v11790_v53  ;;  %v11679_v31 = vmul.f32 %v29215_v15, %v31956_v12  ;;  %v31960_v25 = vsub.f32 %v31959_v56, %v29093_v17  ;;  %v31962_v45 = vsub.f32 %v31961_v14, %v29093_v17  ;;  %22096 = vxpose.xlu0.b32.cont [11/16] (narrow) %v22095_v27, 16  ;;  %v16658_v53 = vld [vmem:[%s30353_s5 + $0x180] sm:$0xff]   ;;  %v16659_v50 = vld [vmem:[%s30353_s5 + $0x188] sm:$0xff]   ;;  %v16668_v12 = vld [vmem:[%s30353_s5 + $0x1d0] sm:$0xff]  }
 0xb98   :  { %v11695_v54 = vmul.f32 %v29215_v15, %v31958_v59  ;;  %v11775_v58 = vmax.f32 %v11711_v57, 0.0  ;;  %v11791_v21 = vmax.f32 %v11727_v2, 0.0  ;;  %v22143_v40 = vpack.i.bf16 %v11742_v62, %v11758_v49  ;;  %22138 = vxpose.xlu1.b32.cont [11/16] (narrow) %v22137_v35, 16  ;;  %v16652_v2 = vld [vmem:[%s30353_s5 + $0x150] sm:$0xff]  }
 0xb99   :  { %v11712_v8 = vmul.f32 %v29215_v15, %v31960_v25  ;;  %v11728_v13 = vmul.f32 %v29215_v15, %v31962_v45  ;;  %v11743_v42 = vmax.f32 %v11679_v31, 0.0  ;;  %v31964_v52 = vsub.f32 %v31963_v3, %v29093_v17  ;;  %v16644_v14 = vld [vmem:[%s30353_s5 + $0x110] sm:$0xff]  }
 0xb9a   :  { %v11759_v29 = vmax.f32 %v11695_v54, 0.0  ;;  %v22103_v60 = vpack.i.bf16 %v11775_v58, %v11791_v21  ;;  %v31966_v26 = vsub.f32 %v31965_v55, %v29093_v17 }
 0xb9b   :  { %v11680_v32 = vmul.f32 %v29215_v15, %v31964_v52  ;;  %v11776_v9 = vmax.f32 %v11712_v8, 0.0  ;;  %v11792_v38 = vmax.f32 %v11728_v13, 0.0  ;;  %22098 = vxpose.xlu0.b32.cont [12/16] (narrow) %v22097_v11, 16 }
 0xb9c   :  { %v11696_v44 = vmul.f32 %v29215_v15, %v31966_v26  ;;  %v22145_v0 = vpack.i.bf16 %v11743_v42, %v11759_v29  ;;  %22140 = vxpose.xlu1.b32.cont [12/16] (narrow) %v22139_v18, 16  ;;  %v16660_v42 = vld [vmem:[%s30353_s5 + $0x190] sm:$0xff]   ;;  %v16653_v29 = vld [vmem:[%s30353_s5 + $0x158] sm:$0xff]  }
 0xb9d   :  { %v11744_v47 = vmax.f32 %v11680_v32, 0.0  ;;  %v22105_v41 = vpack.i.bf16 %v11776_v9, %v11792_v38 }
 0xb9e   :  { %v11760_v23 = vmax.f32 %v11696_v44, 0.0 }
 0xb9f   :  { %22100 = vxpose.xlu0.b32.cont [13/16] (narrow) %v22099_v19, 16 }
 0xba0   :  { %v22147_v6 = vpack.i.bf16 %v11744_v47, %v11760_v23  ;;  %22142 = vxpose.xlu1.b32.cont [13/16] (narrow) %v22141_v7, 16  ;;  %v16645_v47 = vld [vmem:[%s30353_s5 + $0x118] sm:$0xff]  }
 0xba3   :  { %22102 = vxpose.xlu0.b32.cont [14/16] (narrow) %v22101_v37, 16 }
 0xba4   :  { %22144 = vxpose.xlu1.b32.cont [14/16] (narrow) %v22143_v40, 16 }
 0xba7   :  { %22104 = vxpose.xlu0.b32.cont [15/16] (narrow) %v22103_v60, 16  ;;  %v16669_v60 = vld [vmem:[%s30353_s5 + $0x1d8] sm:$0xff]  }
 0xba8   :  { %22146 = vxpose.xlu1.b32.cont [15/16] (narrow) %v22145_v0, 16 }
 0xbab   :  { %22106 = vxpose.xlu0.b32.end [16/16] (narrow) %v22105_v41, 16 }
 0xbac   :  { %22148 = vxpose.xlu1.b32.end [16/16] (narrow) %v22147_v6, 16 }
 0xbef   :  { %v22107_v15 = vpop.trf.xlu0 }
 0xbf0   :  { %v29468_v17 = vunpack.i.h.bf16 %v22107_v15  ;;  %v29470_v24 = vunpack.i.l.bf16 %v22107_v15  ;;  %v22149_v63 = vpop.trf.xlu1 }
 0xbf1   :  { %v29472_v22 = vunpack.i.h.bf16 %v22149_v63  ;;  %v29474_v51 = vunpack.i.l.bf16 %v22149_v63  ;;  %v16661_v63 = vld [vmem:[%s30353_s5 + $0x198] sm:$0xff]  }
 0xbf2   :  { %v11996_v27 = vrot.slane %v29470_v24, 7  ;;  %v11995_v35 = vrot.slane %v29468_v17, 7  ;;  %v15563_v18 = vrot.slane %v29470_v24, 9  ;;  %v15565_v1 = vrot.slane %v29470_v24, 10 }
 0xbf3   :  { %v11924_v11 = vrot.slane %v29474_v51, 1  ;;  %v11923_v39 = vrot.slane %v29472_v22, 1  ;;  %v11928_v46 = vrot.slane %v29474_v51, 2  ;;  %v11932_v30 = vrot.slane %v29474_v51, 3  ;;  %v22112_v58 = vpop.trf.xlu0 }
 0xbf4   :  { %v12074_v10 = vsel %vm547_vm2, %v29474_v51, %v11996_v27  ;;  %v12073_v61 = vsel %vm547_vm2, %v29472_v22, %v11995_v35  ;;  %v11935_v7 = vrot.slane %v29472_v22, 4  ;;  %v15566_v5 = vrot.slane %v29468_v17, 11  ;;  %v22154_v43 = vpop.trf.xlu1 }
 0xbf5   :  { %13200 = vmatprep.mubr.f32.mxu0 %v12074_v10  ;;  %v12076_v19 = vsel %vm547_vm2, %v11924_v11, %v29470_v24  ;;  %v12075_v16 = vsel %vm547_vm2, %v11923_v39, %v29468_v17  ;;  %v12078_v20 = vsel %vm547_vm2, %v11928_v46, %v15563_v18  ;;  %v12080_v62 = vsel %vm547_vm2, %v11932_v30, %v15565_v1  ;;  %v16670_v46 = vld [vmem:[%s30353_s5 + $0x1e0] sm:$0xff]   ;;  %v16655_v1 = vld [vmem:[%s30353_s5 + $0x168] sm:$0xff]  }
 0xbf6   :  { %13270 = vmatprep.mubr.f32.mxu1 %v12076_v19  ;;  %13201 = vmatmul.mubr.f32.vlgmr.msra.gmra.mrb[64].mxu0 %v12073_v61  ;;  %v11939_v57 = vrot.slane %v29472_v22, 5  ;;  %v15568_v4 = vrot.slane %v29468_v17, 12  ;;  %v11944_v37 = vrot.slane %v29474_v51, 6  ;;  %v15571_v49 = vrot.slane %v29470_v24, 13  ;;  %v16662_v30 = vld [vmem:[%s30353_s5 + $0x1a0] sm:$0xff]   ;;  %v16671_v19 = vld [vmem:[%s30353_s5 + $0x1e8] sm:$0xff]  }
 0xbf7   :  { %13271 = vmatmul.mubr.f32.vlgmr.msra.gmra.mrb[64].mxu1 %v12075_v16  ;;  %20596 = vmatpush3.bf16.msra.mxu0 %v16642_v48  ;;  %v29525_v31 = vsel %vm547_vm2, %v11935_v7, %v15566_v5  ;;  %v11948_v59 = vrot.slane %v29474_v51, 7  ;;  %v12026_v54 = vrot.slane %v11996_v27, 7  ;;  %v11943_v56 = vrot.slane %v29472_v22, 6  ;;  %v16654_v27 = vld [vmem:[%s30353_s5 + $0x160] sm:$0xff]   ;;  %v16647_v16 = vld [vmem:[%s30353_s5 + $0x128] sm:$0xff]   ;;  %v16664_v7 = vld [vmem:[%s30353_s5 + $0x1b0] sm:$0xff]  }
 0xbf8   :  { %20628 = vmatpush3.bf16.msra.mxu1 %v16658_v53  ;;  %13340 = vmatprep.mubr.f32.mxu0 %v12078_v20  ;;  %v29528_v34 = vsel %vm547_vm2, %v11939_v57, %v15568_v4  ;;  %v29532_v21 = vsel %vm547_vm2, %v11944_v37, %v15571_v49  ;;  %v15570_v25 = vrot.slane %v29468_v17, 13  ;;  %v11947_v8 = vrot.slane %v29472_v22, 7  ;;  %v16646_v48 = vld [vmem:[%s30353_s5 + $0x120] sm:$0xff]   ;;  %v16663_v53 = vld [vmem:[%s30353_s5 + $0x1a8] sm:$0xff]   ;;  %v16672_v20 = vld [vmem:[%s30353_s5 + $0x1f0] sm:$0xff]  }
 0xbf9   :  { %13410 = vmatprep.mubr.f32.mxu1 %v12080_v62  ;;  %20598 = vmatprep.subr.bf16.mxu0 %v16651_v28  ;;  %v29541_v45 = vsel %vm547_vm2, %v11948_v59, %v12026_v54  ;;  %v12025_v13 = vrot.slane %v11995_v35, 7  ;;  %v29543_v40 = vunpack.i.h.bf16 %v22154_v43  ;;  %v29554_v52 = vunpack.i.l.bf16 %v22154_v43  ;;  %v16656_v28 = vld [vmem:[%s30353_s5 + $0x170] sm:$0xff]   ;;  %v16657_v62 = vld [vmem:[%s30353_s5 + $0x178] sm:$0xff]   ;;  %v16698_v43 = vld [vmem:[%s30353_s5 + $0x2c0] sm:$0xff]  }
 0xbfa   :  { %20630 = vmatprep.subr.bf16.mxu1 %v16667_v33  ;;  %v29552_v3 = vsel %vm547_vm2, %v11943_v56, %v15570_v25  ;;  %v29556_v32 = vunpack.i.h.bf16 %v22112_v58  ;;  %v29564_v38 = vunpack.i.l.bf16 %v22112_v58  ;;  %v16648_v33 = vld [vmem:[%s30353_s5 + $0x130] sm:$0xff]   ;;  %v16649_v5 = vld [vmem:[%s30353_s5 + $0x138] sm:$0xff]   ;;  %v11927_v4 = vrot.slane %v29472_v22, 2  ;;  %v16674_v54 = vld [vmem:[%s30353_s5 + $0x200] sm:$0xff]  }
 0xbfb   :  { %20600 = vmatpush3.bf16.msra.mxu0 %v16643_v36  ;;  %v29562_v9 = vsel %vm547_vm2, %v11947_v8, %v12025_v13  ;;  %v11954_v55 = vrot.slane %v29554_v52, 1  ;;  %v11953_v44 = vrot.slane %v29543_v40, 1  ;;  %v11958_v0 = vrot.slane %v29554_v52, 2  ;;  %v16673_v36 = vld [vmem:[%s30353_s5 + $0x1f8] sm:$0xff]   ;;  %v16690_v8 = vld [vmem:[%s30353_s5 + $0x280] sm:$0xff]  }
 0xbfc   :  { %20632 = vmatpush3.bf16.msra.mxu1 %v16659_v50  ;;  %20602 = vmatprep.subr.bf16.mxu0 %v16652_v2  ;;  %v12011_v26 = vrot.slane %v29556_v32, 7  ;;  %v12012_v41 = vrot.slane %v29564_v38, 7  ;;  %v15575_v23 = vrot.slane %v29564_v38, 9  ;;  %v11962_v6 = vrot.slane %v29554_v52, 3  ;;  %v16665_v57 = vld [vmem:[%s30353_s5 + $0x1b8] sm:$0xff]   ;;  %v16682_v2 = vld [vmem:[%s30353_s5 + $0x240] sm:$0xff]  }
 0xbfd   :  { %20634 = vmatprep.subr.bf16.mxu1 %v16668_v12  ;;  %v15577_v15 = vrot.slane %v29564_v38, 10  ;;  %v29585_v35 = vsel %vm547_vm2, %v11954_v55, %v29564_v38  ;;  %v29595_v39 = vsel %vm547_vm2, %v11953_v44, %v29556_v32  ;;  %v15562_v50 = vrot.slane %v29468_v17, 9 }
 0xbfe   :  { %v29591_v11 = vsel %vm547_vm2, %v29543_v40, %v12011_v26  ;;  %v29604_v18 = vsel %vm547_vm2, %v29554_v52, %v12012_v41  ;;  %v29607_v10 = vsel %vm547_vm2, %v11958_v0, %v15575_v23  ;;  %v11931_v37 = vrot.slane %v29472_v22, 3 }
 0xbff   :  { %20604 = vmatpush3.bf16.msra.mxu0 %v16644_v14  ;;  %v29610_v61 = vsel %vm547_vm2, %v11962_v6, %v15577_v15  ;;  %v15564_v49 = vrot.slane %v29468_v17, 10  ;;  %v11936_v12 = vrot.slane %v29474_v51, 4  ;;  %v15567_v59 = vrot.slane %v29470_v24, 11 }
 0xc00   :  { %20636 = vmatpush3.bf16.msra.mxu1 %v16660_v42  ;;  %20606 = vmatprep.subr.bf16.mxu0 %v16653_v29  ;;  %v11940_v58 = vrot.slane %v29474_v51, 5  ;;  %v15569_v22 = vrot.slane %v29470_v24, 12  ;;  %v11957_v17 = vrot.slane %v29543_v40, 2  ;;  %v15574_v56 = vrot.slane %v29556_v32, 9  ;;  %v16683_v51 = vld [vmem:[%s30353_s5 + $0x248] sm:$0xff]  }
 0xc01   :  { %20638 = vmatprep.subr.bf16.mxu1 %v16669_v60  ;;  %v12077_v25 = vsel %vm547_vm2, %v11927_v4, %v15562_v50  ;;  %v12079_v14 = vsel %vm547_vm2, %v11931_v37, %v15564_v49  ;;  %v11961_v13 = vrot.slane %v29543_v40, 3  ;;  %v15576_v42 = vrot.slane %v29556_v32, 10  ;;  %v16699_v60 = vld [vmem:[%s30353_s5 + $0x2c8] sm:$0xff]   ;;  %v16704_v37 = vld [vmem:[%s30353_s5 + $0x2f0] sm:$0xff]  }
 0xc02   :  { %v29682_v24 = vsel %vm547_vm2, %v11957_v17, %v15574_v56  ;;  %v12082_v29 = vsel %vm547_vm2, %v11936_v12, %v15567_v59  ;;  %v11966_v55 = vrot.slane %v29554_v52, 4  ;;  %v15579_v44 = vrot.slane %v29564_v38, 11  ;;  %v16679_v4 = vld [vmem:[%s30353_s5 + $0x228] sm:$0xff]   ;;  %v16680_v49 = vld [vmem:[%s30353_s5 + $0x230] sm:$0xff]   ;;  %v16689_v12 = vld [vmem:[%s30353_s5 + $0x278] sm:$0xff]  }
 0xc03   :  { %20608 = vmatpush3.bf16.msra.mxu0 %v16645_v47  ;;  %v12084_v0 = vsel %vm547_vm2, %v11940_v58, %v15569_v22  ;;  %v16675_v47 = vld [vmem:[%s30353_s5 + $0x208] sm:$0xff]   ;;  %v29697_v23 = vsel %vm547_vm2, %v11961_v13, %v15576_v42  ;;  %v11970_v6 = vrot.slane %v29554_v52, 5  ;;  %v15581_v15 = vrot.slane %v29564_v38, 12  ;;  %v16705_v59 = vld [vmem:[%s30353_s5 + $0x2f8] sm:$0xff]   ;;  %v16714_v22 = vld [vmem:[%s30353_s5 + $0x340] sm:$0xff]  }
 0xc04   :  { %20640 = vmatpush3.bf16.msra.mxu1 %v16661_v63  ;;  %20610 = vmatprep.subr.bf16.mxu0 %v16654_v27  ;;  %v16691_v63 = vld [vmem:[%s30353_s5 + $0x288] sm:$0xff]   ;;  %v16684_v27 = vld [vmem:[%s30353_s5 + $0x250] sm:$0xff]   ;;  %v16697_v58 = vld [vmem:[%s30353_s5 + $0x2b8] sm:$0xff]   ;;  %v11969_v42 = vrot.slane %v29543_v40, 5 }
 0xc05   :  { %20642 = vmatprep.subr.bf16.mxu1 %v16670_v46  ;;  %v29708_v46 = vsel %vm547_vm2, %v11966_v55, %v15579_v44  ;;  %v16695_v50 = vld [vmem:[%s30353_s5 + $0x2a8] sm:$0xff]   ;;  %v16730_v17 = vld [vmem:[%s30353_s5 + $0x3c0] sm:$0xff]   ;;  %v15583_v55 = vrot.slane %v29564_v38, 13  ;;  %v11973_v44 = vrot.slane %v29543_v40, 6  ;;  %v12039_v38 = vrot.slane %v12011_v26, 7  ;;  %v16717_v26 = vld [vmem:[%s30353_s5 + $0x358] sm:$0xff]  }
 0xc06   :  { %v16706_v56 = vld [vmem:[%s30353_s5 + $0x300] sm:$0xff]  }
 0xc07   :  { %20612 = vmatpush3.bf16.msra.mxu0 %v16646_v48  ;;  %v16700_v48 = vld [vmem:[%s30353_s5 + $0x2d0] sm:$0xff]  }
 0xc08   :  { %20644 = vmatpush3.bf16.msra.mxu1 %v16662_v30  ;;  %20614 = vmatprep.subr.bf16.mxu0 %v16655_v1  ;;  %v29714_v30 = vsel %vm547_vm2, %v11970_v6, %v15581_v15  ;;  %v16676_v1 = vld [vmem:[%s30353_s5 + $0x210] sm:$0xff]   ;;  %v12040_v6 = vrot.slane %v12012_v41, 7  ;;  %v15582_v15 = vrot.slane %v29556_v32, 13 }
 0xc09   :  { %20646 = vmatprep.subr.bf16.mxu1 %v16671_v19  ;;  %v16692_v19 = vld [vmem:[%s30353_s5 + $0x290] sm:$0xff]  }
 0xc0b   :  { %20616 = vmatpush3.bf16.msra.mxu0 %v16647_v16  ;;  %v16685_v16 = vld [vmem:[%s30353_s5 + $0x258] sm:$0xff]  }
 0xc0c   :  { %20648 = vmatpush3.bf16.msra.mxu1 %v16663_v53  ;;  %20618 = vmatprep.subr.bf16.mxu0 %v16656_v28  ;;  %v16701_v53 = vld [vmem:[%s30353_s5 + $0x2d8] sm:$0xff]  }
 0xc0d   :  { %20650 = vmatprep.subr.bf16.mxu1 %v16672_v20  ;;  %v16677_v28 = vld [vmem:[%s30353_s5 + $0x218] sm:$0xff]  }
 0xc0e   :  { %v16693_v20 = vld [vmem:[%s30353_s5 + $0x298] sm:$0xff]  }
 0xc0f   :  { %20620 = vmatpush3.bf16.msra.mxu0 %v16648_v33  ;;  %v16686_v33 = vld [vmem:[%s30353_s5 + $0x260] sm:$0xff]  }
 0xc10   :  { %20652 = vmatpush3.bf16.msra.mxu1 %v16664_v7  ;;  %20622 = vmatprep.subr.bf16.mxu0 %v16657_v62  ;;  %v16702_v7 = vld [vmem:[%s30353_s5 + $0x2e0] sm:$0xff]  }
 0xc11   :  { %20654 = vmatprep.subr.bf16.mxu1 %v16673_v36  ;;  %v16678_v62 = vld [vmem:[%s30353_s5 + $0x220] sm:$0xff]  }
 0xc12   :  { %v16694_v36 = vld [vmem:[%s30353_s5 + $0x2a0] sm:$0xff]  }
 0xc13   :  { %20624 = vmatpush3.bf16.msra.mxu0 %v16649_v5  ;;  %v16687_v5 = vld [vmem:[%s30353_s5 + $0x268] sm:$0xff]  }
 0xc14   :  { %20656 = vmatpush3.bf16.msra.mxu1 %v16665_v57  ;;  %20658 = vmatprep.subr.bf16.mxu0 %v16682_v2  ;;  %v16703_v57 = vld [vmem:[%s30353_s5 + $0x2e8] sm:$0xff]   ;;  %v16688_v2 = vld [vmem:[%s30353_s5 + $0x270] sm:$0xff]  }
 0xc15   :  { %20690 = vmatprep.subr.bf16.mxu1 %v16698_v43  ;;  %v16696_v43 = vld [vmem:[%s30353_s5 + $0x2b0] sm:$0xff]  }
 0xc16   :  { %13341 = vmatmul.mubr.f32.vlgmr.msra.gmra.mrb[66].mxu0 %v12077_v25  ;;  %v11965_v25 = vrot.slane %v29543_v40, 4 }
 0xc17   :  { %13411 = vmatmul.mubr.f32.vlgmr.msra.gmra.mrb[66].mxu1 %v12079_v14  ;;  %20660 = vmatpush3.bf16.msra.mxu0 %v16674_v54  ;;  %v16681_v54 = vld [vmem:[%s30353_s5 + $0x238] sm:$0xff]   ;;  %v16722_v14 = vld [vmem:[%s30353_s5 + $0x380] sm:$0xff]  }
 0xc18   :  { %13480 = vmatprep.mubr.f32.mxu0 %v12082_v29  ;;  %20692 = vmatpush3.bf16.msra.mxu1 %v16690_v8  ;;  %v15578_v8 = vrot.slane %v29556_v32, 11  ;;  %v15580_v29 = vrot.slane %v29556_v32, 12  ;;  %v16724_v32 = vld [vmem:[%s30353_s5 + $0x390] sm:$0xff]  }
 0xc19   :  { %13550 = vmatprep.mubr.f32.mxu1 %v12084_v0  ;;  %20662 = vmatprep.subr.bf16.mxu0 %v16683_v51  ;;  %v16715_v51 = vld [vmem:[%s30353_s5 + $0x348] sm:$0xff]  }
 0xc1a   :  { %20694 = vmatprep.subr.bf16.mxu1 %v16699_v60  ;;  %v29801_v13 = vsel %vm547_vm2, %v11965_v25, %v15578_v8  ;;  %v16731_v60 = vld [vmem:[%s30353_s5 + $0x3c8] sm:$0xff]  }
 0xc1b   :  { %20664 = vmatpush3.bf16.msra.mxu0 %v16675_v47  ;;  %v16707_v0 = vld [vmem:[%s30353_s5 + $0x308] sm:$0xff]   ;;  %v11978_v47 = vrot.slane %v29554_v52, 7 }
 0xc1c   :  { %20696 = vmatpush3.bf16.msra.mxu1 %v16691_v63  ;;  %20666 = vmatprep.subr.bf16.mxu0 %v16684_v27  ;;  %v16716_v63 = vld [vmem:[%s30353_s5 + $0x350] sm:$0xff]   ;;  %v16763_v25 = vld [vmem:[%s30353_s5 + $0x4c8] sm:$0xff]  }
 0xc1d   :  { %20698 = vmatprep.subr.bf16.mxu1 %v16700_v48  ;;  %v29840_v41 = vsel %vm547_vm2, %v11978_v47, %v12040_v6  ;;  %v29843_v48 = vsel %vm547_vm2, %v11973_v44, %v15582_v15  ;;  %v16739_v8 = vld [vmem:[%s30353_s5 + $0x408] sm:$0xff]   ;;  %v16742_v44 = vld [vmem:[%s30353_s5 + $0x420] sm:$0xff]  }
 0xc1e   :  { %v16751_v47 = vld [vmem:[%s30353_s5 + $0x468] sm:$0xff]  }
 0xc1f   :  { %20668 = vmatpush3.bf16.msra.mxu0 %v16676_v1  ;;  %v16767_v6 = vld [vmem:[%s30353_s5 + $0x4e8] sm:$0xff]  }
 0xc20   :  { %20700 = vmatpush3.bf16.msra.mxu1 %v16692_v19  ;;  %20670 = vmatprep.subr.bf16.mxu0 %v16685_v16  ;;  %v16733_v19 = vld [vmem:[%s30353_s5 + $0x3d8] sm:$0xff]   ;;  %v16743_v15 = vld [vmem:[%s30353_s5 + $0x428] sm:$0xff]  }
 0xc21   :  { %20702 = vmatprep.subr.bf16.mxu1 %v16701_v53  ;;  %v16709_v16 = vld [vmem:[%s30353_s5 + $0x318] sm:$0xff]  }
 0xc22   :  { %v16725_v53 = vld [vmem:[%s30353_s5 + $0x398] sm:$0xff]  }
 0xc23   :  { %20672 = vmatpush3.bf16.msra.mxu0 %v16677_v28  ;;  %v16718_v28 = vld [vmem:[%s30353_s5 + $0x360] sm:$0xff]  }
 0xc24   :  { %20704 = vmatpush3.bf16.msra.mxu1 %v16693_v20  ;;  %20674 = vmatprep.subr.bf16.mxu0 %v16686_v33  ;;  %v16734_v20 = vld [vmem:[%s30353_s5 + $0x3e0] sm:$0xff]  }
 0xc25   :  { %20706 = vmatprep.subr.bf16.mxu1 %v16702_v7  ;;  %v16710_v33 = vld [vmem:[%s30353_s5 + $0x320] sm:$0xff]  }
 0xc26   :  { %v16726_v7 = vld [vmem:[%s30353_s5 + $0x3a0] sm:$0xff]  }
 0xc27   :  { %20676 = vmatpush3.bf16.msra.mxu0 %v16678_v62  ;;  %v16719_v62 = vld [vmem:[%s30353_s5 + $0x368] sm:$0xff]  }
 0xc28   :  { %20708 = vmatpush3.bf16.msra.mxu1 %v16694_v36  ;;  %20678 = vmatprep.subr.bf16.mxu0 %v16687_v5  ;;  %v16735_v36 = vld [vmem:[%s30353_s5 + $0x3e8] sm:$0xff]  }
 0xc29   :  { %20710 = vmatprep.subr.bf16.mxu1 %v16703_v57  ;;  %v16711_v5 = vld [vmem:[%s30353_s5 + $0x328] sm:$0xff]  }
 0xc2a   :  { %v16727_v57 = vld [vmem:[%s30353_s5 + $0x3a8] sm:$0xff]  }
 0xc2b   :  { %20680 = vmatpush3.bf16.msra.mxu0 %v16679_v4  ;;  %v16720_v4 = vld [vmem:[%s30353_s5 + $0x370] sm:$0xff]  }
 0xc2c   :  { %20712 = vmatpush3.bf16.msra.mxu1 %v16695_v50  ;;  %20682 = vmatprep.subr.bf16.mxu0 %v16688_v2  ;;  %v16736_v50 = vld [vmem:[%s30353_s5 + $0x3f0] sm:$0xff]  }
 0xc2d   :  { %20714 = vmatprep.subr.bf16.mxu1 %v16704_v37  ;;  %v16712_v2 = vld [vmem:[%s30353_s5 + $0x330] sm:$0xff]  }
 0xc2e   :  { %v16728_v37 = vld [vmem:[%s30353_s5 + $0x3b0] sm:$0xff]  }
 0xc2f   :  { %20684 = vmatpush3.bf16.msra.mxu0 %v16680_v49  ;;  %v16721_v49 = vld [vmem:[%s30353_s5 + $0x378] sm:$0xff]  }
 0xc30   :  { %20716 = vmatpush3.bf16.msra.mxu1 %v16696_v43  ;;  %20686 = vmatprep.subr.bf16.mxu0 %v16689_v12  ;;  %v16737_v43 = vld [vmem:[%s30353_s5 + $0x3f8] sm:$0xff]  }
 0xc31   :  { %20718 = vmatprep.subr.bf16.mxu1 %v16705_v59  ;;  %v16713_v12 = vld [vmem:[%s30353_s5 + $0x338] sm:$0xff]  }
 0xc32   :  { %v16729_v59 = vld [vmem:[%s30353_s5 + $0x3b8] sm:$0xff]  }
 0xc33   :  { %20688 = vmatpush3.bf16.msra.mxu0 %v16681_v54  ;;  %v16746_v54 = vld [vmem:[%s30353_s5 + $0x440] sm:$0xff]  }
 0xc34   :  { %20720 = vmatpush3.bf16.msra.mxu1 %v16697_v58  ;;  %20722 = vmatprep.subr.bf16.mxu0 %v16714_v22  ;;  %v16762_v58 = vld [vmem:[%s30353_s5 + $0x4c0] sm:$0xff]  }
 0xc35   :  { %20754 = vmatprep.subr.bf16.mxu1 %v16730_v17  ;;  %v16738_v22 = vld [vmem:[%s30353_s5 + $0x400] sm:$0xff]  }
 0xc36   :  { %13481 = vmatmul.mubr.f32.vlgmr.msra.gmra.mrb[68].mxu0 %v29525_v31  ;;  %v11974_v31 = vrot.slane %v29554_v52, 6  ;;  %v11977_v52 = vrot.slane %v29543_v40, 7  ;;  %v16708_v40 = vld [vmem:[%s30353_s5 + $0x310] sm:$0xff]   ;;  %v16754_v17 = vld [vmem:[%s30353_s5 + $0x480] sm:$0xff]  }
 0xc37   :  { %13551 = vmatmul.mubr.f32.vlgmr.msra.gmra.mrb[68].mxu1 %v29528_v34  ;;  %20724 = vmatpush3.bf16.msra.mxu0 %v16706_v56  ;;  %v29817_v34 = vsel %vm547_vm2, %v11969_v42, %v15580_v29  ;;  %v16747_v56 = vld [vmem:[%s30353_s5 + $0x448] sm:$0xff]   ;;  %v16756_v42 = vld [vmem:[%s30353_s5 + $0x490] sm:$0xff]   ;;  %v16741_v29 = vld [vmem:[%s30353_s5 + $0x418] sm:$0xff]  }
 0xc38   :  { %13620 = vmatprep.mubr.f32.mxu0 %v29532_v21  ;;  %20756 = vmatpush3.bf16.msra.mxu1 %v16722_v14  ;;  %v16723_v21 = vld [vmem:[%s30353_s5 + $0x388] sm:$0xff]   ;;  %v29831_v27 = vsel %vm547_vm2, %v11974_v31, %v15583_v55  ;;  %v29846_v1 = vsel %vm547_vm2, %v11977_v52, %v12039_v38  ;;  %v16750_v31 = vld [vmem:[%s30353_s5 + $0x460] sm:$0xff]   ;;  %v16768_v52 = vld [vmem:[%s30353_s5 + $0x4f0] sm:$0xff]  }
 0xc39   :  { %13690 = vmatprep.mubr.f32.mxu1 %v29541_v45  ;;  %20726 = vmatprep.subr.bf16.mxu0 %v16715_v51  ;;  %v16732_v45 = vld [vmem:[%s30353_s5 + $0x3d0] sm:$0xff]   ;;  %v16755_v14 = vld [vmem:[%s30353_s5 + $0x488] sm:$0xff]   ;;  %v16766_v55 = vld [vmem:[%s30353_s5 + $0x4e0] sm:$0xff]  }
 0xc3a   :  { %20758 = vmatprep.subr.bf16.mxu1 %v16731_v60  ;;  %v16740_v51 = vld [vmem:[%s30353_s5 + $0x410] sm:$0xff]   ;;  %v16757_v60 = vld [vmem:[%s30353_s5 + $0x498] sm:$0xff]  }
 0xc3b   :  { %20728 = vmatpush3.bf16.msra.mxu0 %v16707_v0  ;;  %v16758_v0 = vld [vmem:[%s30353_s5 + $0x4a0] sm:$0xff]   ;;  %v16744_v38 = vld [vmem:[%s30353_s5 + $0x430] sm:$0xff]  }
 0xc3c   :  { %20760 = vmatpush3.bf16.msra.mxu1 %v16723_v21  ;;  %20730 = vmatprep.subr.bf16.mxu0 %v16716_v63  ;;  %v16759_v21 = vld [vmem:[%s30353_s5 + $0x4a8] sm:$0xff]   ;;  %v16752_v63 = vld [vmem:[%s30353_s5 + $0x470] sm:$0xff]  }
 0xc3d   :  { %20762 = vmatprep.subr.bf16.mxu1 %v16732_v45  ;;  %v16760_v45 = vld [vmem:[%s30353_s5 + $0x4b0] sm:$0xff]  }
 0xc3f   :  { %20732 = vmatpush3.bf16.msra.mxu0 %v16708_v40  ;;  %v16753_v40 = vld [vmem:[%s30353_s5 + $0x478] sm:$0xff]  }
 0xc40   :  { %20764 = vmatpush3.bf16.msra.mxu1 %v16724_v32  ;;  %20734 = vmatprep.subr.bf16.mxu0 %v16717_v26  ;;  %v16769_v32 = vld [vmem:[%s30353_s5 + $0x4f8] sm:$0xff]  }
 0xc41   :  { %20766 = vmatprep.subr.bf16.mxu1 %v16733_v19  ;;  %v16745_v26 = vld [vmem:[%s30353_s5 + $0x438] sm:$0xff]  }
 0xc42   :  { %v16761_v19 = vld [vmem:[%s30353_s5 + $0x4b8] sm:$0xff]  }
 0xc43   :  { %20736 = vmatpush3.bf16.msra.mxu0 %v16709_v16  ;;  %v16778_v16 = vld [vmem:[%s30353_s5 + $0x540] sm:$0xff]  }
 0xc44   :  { %20768 = vmatpush3.bf16.msra.mxu1 %v16725_v53  ;;  %20738 = vmatprep.subr.bf16.mxu0 %v16718_v28  ;;  %v16794_v53 = vld [vmem:[%s30353_s5 + $0x5c0] sm:$0xff]  }
 0xc45   :  { %20770 = vmatprep.subr.bf16.mxu1 %v16734_v20  ;;  %v16770_v28 = vld [vmem:[%s30353_s5 + $0x500] sm:$0xff]  }
 0xc46   :  { %v16786_v20 = vld [vmem:[%s30353_s5 + $0x580] sm:$0xff]  }
 0xc47   :  { %20740 = vmatpush3.bf16.msra.mxu0 %v16710_v33  ;;  %v16779_v33 = vld [vmem:[%s30353_s5 + $0x548] sm:$0xff]  }
 0xc48   :  { %20772 = vmatpush3.bf16.msra.mxu1 %v16726_v7  ;;  %20742 = vmatprep.subr.bf16.mxu0 %v16719_v62  ;;  %v16795_v7 = vld [vmem:[%s30353_s5 + $0x5c8] sm:$0xff]  }
 0xc49   :  { %20774 = vmatprep.subr.bf16.mxu1 %v16735_v36  ;;  %v16771_v62 = vld [vmem:[%s30353_s5 + $0x508] sm:$0xff]   ;;  %v16788_v36 = vld [vmem:[%s30353_s5 + $0x590] sm:$0xff]  }
 0xc4b   :  { %20744 = vmatpush3.bf16.msra.mxu0 %v16711_v5  ;;  %v16781_v5 = vld [vmem:[%s30353_s5 + $0x558] sm:$0xff]  }
 0xc4c   :  { %20776 = vmatpush3.bf16.msra.mxu1 %v16727_v57  ;;  %20746 = vmatprep.subr.bf16.mxu0 %v16720_v4  ;;  %v16797_v57 = vld [vmem:[%s30353_s5 + $0x5d8] sm:$0xff]  }
 0xc4d   :  { %20778 = vmatprep.subr.bf16.mxu1 %v16736_v50  ;;  %v16773_v4 = vld [vmem:[%s30353_s5 + $0x518] sm:$0xff]  }
 0xc4e   :  { %v16789_v50 = vld [vmem:[%s30353_s5 + $0x598] sm:$0xff]  }
 0xc4f   :  { %20748 = vmatpush3.bf16.msra.mxu0 %v16712_v2  ;;  %v16782_v2 = vld [vmem:[%s30353_s5 + $0x560] sm:$0xff]  }
 0xc50   :  { %20780 = vmatpush3.bf16.msra.mxu1 %v16728_v37  ;;  %20750 = vmatprep.subr.bf16.mxu0 %v16721_v49  ;;  %v16798_v37 = vld [vmem:[%s30353_s5 + $0x5e0] sm:$0xff]  }
 0xc51   :  { %20782 = vmatprep.subr.bf16.mxu1 %v16737_v43  ;;  %v16774_v49 = vld [vmem:[%s30353_s5 + $0x520] sm:$0xff]  }
 0xc52   :  { %v16790_v43 = vld [vmem:[%s30353_s5 + $0x5a0] sm:$0xff]  }
 0xc53   :  { %20752 = vmatpush3.bf16.msra.mxu0 %v16713_v12  ;;  %v16783_v12 = vld [vmem:[%s30353_s5 + $0x568] sm:$0xff]  }
 0xc54   :  { %20784 = vmatpush3.bf16.msra.mxu1 %v16729_v59  ;;  %20786 = vmatprep.subr.bf16.mxu0 %v16746_v54  ;;  %v16799_v59 = vld [vmem:[%s30353_s5 + $0x5e8] sm:$0xff]  }
 0xc55   :  { %20818 = vmatprep.subr.bf16.mxu1 %v16762_v58  ;;  %v16775_v54 = vld [vmem:[%s30353_s5 + $0x528] sm:$0xff]  }
 0xc56   :  { %13621 = vmatmul.mubr.f32.vlgmr.msra.gmra.mrb[70].mxu0 %v29552_v3  ;;  %v16748_v3 = vld [vmem:[%s30353_s5 + $0x450] sm:$0xff]   ;;  %v16791_v58 = vld [vmem:[%s30353_s5 + $0x5a8] sm:$0xff]  }
 0xc57   :  { %13691 = vmatmul.mubr.f32.vlgmr.msra.gmra.mrb[70].mxu1 %v29562_v9  ;;  %20788 = vmatpush3.bf16.msra.mxu0 %v16738_v22  ;;  %v16764_v9 = vld [vmem:[%s30353_s5 + $0x4d0] sm:$0xff]  }
 0xc58   :  { %20820 = vmatpush3.bf16.msra.mxu1 %v16754_v17  ;;  %20790 = vmatprep.subr.bf16.mxu0 %v16747_v56  ;;  %v16784_v22 = vld [vmem:[%s30353_s5 + $0x570] sm:$0xff]  }
 0xc59   :  { %20822 = vmatprep.subr.bf16.mxu1 %v16763_v25  ;;  %13830 = vmatprep.mubr.f32.mxu1 %v29585_v35  ;;  %v16749_v35 = vld [vmem:[%s30353_s5 + $0x458] sm:$0xff]   ;;  %v16800_v17 = vld [vmem:[%s30353_s5 + $0x5f0] sm:$0xff]  }
 0xc5a   :  { %13760 = vmatprep.mubr.f32.mxu0 %v29604_v18  ;;  %v16765_v18 = vld [vmem:[%s30353_s5 + $0x4d8] sm:$0xff]   ;;  %v16776_v56 = vld [vmem:[%s30353_s5 + $0x530] sm:$0xff]  }
 0xc5b   :  { %20792 = vmatpush3.bf16.msra.mxu0 %v16739_v8  ;;  %v16792_v25 = vld [vmem:[%s30353_s5 + $0x5b0] sm:$0xff]   ;;  %v16785_v8 = vld [vmem:[%s30353_s5 + $0x578] sm:$0xff]  }
 0xc5c   :  { %20824 = vmatpush3.bf16.msra.mxu1 %v16755_v14  ;;  %20794 = vmatprep.subr.bf16.mxu0 %v16748_v3  ;;  %v16801_v14 = vld [vmem:[%s30353_s5 + $0x5f8] sm:$0xff]  }
 0xc5d   :  { %20826 = vmatprep.subr.bf16.mxu1 %v16764_v9  ;;  %v16777_v3 = vld [vmem:[%s30353_s5 + $0x538] sm:$0xff]  }
 0xc5e   :  { %v16793_v9 = vld [vmem:[%s30353_s5 + $0x5b8] sm:$0xff]  }
 0xc5f   :  { %20796 = vmatpush3.bf16.msra.mxu0 %v16740_v51  ;;  %v16810_v51 = vld [vmem:[%s30353_s5 + $0x640] sm:$0xff]  }
 0xc60   :  { %20828 = vmatpush3.bf16.msra.mxu1 %v16756_v42  ;;  %20798 = vmatprep.subr.bf16.mxu0 %v16749_v35  ;;  %v16826_v42 = vld [vmem:[%s30353_s5 + $0x6c0] sm:$0xff]  }
 0xc61   :  { %20830 = vmatprep.subr.bf16.mxu1 %v16765_v18  ;;  %v16802_v35 = vld [vmem:[%s30353_s5 + $0x600] sm:$0xff]  }
 0xc62   :  { %v16818_v18 = vld [vmem:[%s30353_s5 + $0x680] sm:$0xff]  }
 0xc63   :  { %20800 = vmatpush3.bf16.msra.mxu0 %v16741_v29  ;;  %v16811_v29 = vld [vmem:[%s30353_s5 + $0x648] sm:$0xff]  }
 0xc64   :  { %20832 = vmatpush3.bf16.msra.mxu1 %v16757_v60  ;;  %20802 = vmatprep.subr.bf16.mxu0 %v16750_v31  ;;  %v16827_v60 = vld [vmem:[%s30353_s5 + $0x6c8] sm:$0xff]  }
 0xc65   :  { %20834 = vmatprep.subr.bf16.mxu1 %v16766_v55  ;;  %v16803_v31 = vld [vmem:[%s30353_s5 + $0x608] sm:$0xff]   ;;  %v16820_v55 = vld [vmem:[%s30353_s5 + $0x690] sm:$0xff]  }
 0xc67   :  { %20804 = vmatpush3.bf16.msra.mxu0 %v16742_v44  ;;  %v16813_v44 = vld [vmem:[%s30353_s5 + $0x658] sm:$0xff]  }
 0xc68   :  { %20836 = vmatpush3.bf16.msra.mxu1 %v16758_v0  ;;  %20806 = vmatprep.subr.bf16.mxu0 %v16751_v47  ;;  %v16829_v0 = vld [vmem:[%s30353_s5 + $0x6d8] sm:$0xff]  }
 0xc69   :  { %20838 = vmatprep.subr.bf16.mxu1 %v16767_v6  ;;  %v16805_v47 = vld [vmem:[%s30353_s5 + $0x618] sm:$0xff]  }
 0xc6a   :  { %v16821_v6 = vld [vmem:[%s30353_s5 + $0x698] sm:$0xff]  }
 0xc6b   :  { %20808 = vmatpush3.bf16.msra.mxu0 %v16743_v15  ;;  %v16814_v15 = vld [vmem:[%s30353_s5 + $0x660] sm:$0xff]  }
 0xc6c   :  { %20840 = vmatpush3.bf16.msra.mxu1 %v16759_v21  ;;  %20810 = vmatprep.subr.bf16.mxu0 %v16752_v63  ;;  %v16830_v21 = vld [vmem:[%s30353_s5 + $0x6e0] sm:$0xff]  }
 0xc6d   :  { %20842 = vmatprep.subr.bf16.mxu1 %v16768_v52  ;;  %v16806_v63 = vld [vmem:[%s30353_s5 + $0x620] sm:$0xff]  }
 0xc6e   :  { %v16822_v52 = vld [vmem:[%s30353_s5 + $0x6a0] sm:$0xff]  }
 0xc6f   :  { %20812 = vmatpush3.bf16.msra.mxu0 %v16744_v38  ;;  %v16815_v38 = vld [vmem:[%s30353_s5 + $0x668] sm:$0xff]  }
 0xc70   :  { %20844 = vmatpush3.bf16.msra.mxu1 %v16760_v45  ;;  %20814 = vmatprep.subr.bf16.mxu0 %v16753_v40  ;;  %v16831_v45 = vld [vmem:[%s30353_s5 + $0x6e8] sm:$0xff]  }
 0xc71   :  { %20846 = vmatprep.subr.bf16.mxu1 %v16769_v32  ;;  %v16807_v40 = vld [vmem:[%s30353_s5 + $0x628] sm:$0xff]  }
 0xc72   :  { %v16823_v32 = vld [vmem:[%s30353_s5 + $0x6a8] sm:$0xff]  }
 0xc73   :  { %20816 = vmatpush3.bf16.msra.mxu0 %v16745_v26  ;;  %v16816_v26 = vld [vmem:[%s30353_s5 + $0x670] sm:$0xff]  }
 0xc74   :  { %20848 = vmatpush3.bf16.msra.mxu1 %v16761_v19  ;;  %20850 = vmatprep.subr.bf16.mxu0 %v16778_v16  ;;  %v16832_v19 = vld [vmem:[%s30353_s5 + $0x6f0] sm:$0xff]  }
 0xc75   :  { %20882 = vmatprep.subr.bf16.mxu1 %v16794_v53  ;;  %v16808_v16 = vld [vmem:[%s30353_s5 + $0x630] sm:$0xff]  }
 0xc76   :  { %13761 = vmatmul.mubr.f32.vlgmr.msra.gmra.mrb[72].mxu0 %v29591_v11  ;;  %v16787_v11 = vld [vmem:[%s30353_s5 + $0x588] sm:$0xff]   ;;  %v16824_v53 = vld [vmem:[%s30353_s5 + $0x6b0] sm:$0xff]  }
 0xc77   :  { %13831 = vmatmul.mubr.f32.vlgmr.msra.gmra.mrb[72].mxu1 %v29595_v39  ;;  %20852 = vmatpush3.bf16.msra.mxu0 %v16770_v28  ;;  %v16780_v39 = vld [vmem:[%s30353_s5 + $0x550] sm:$0xff]   ;;  %v16817_v28 = vld [vmem:[%s30353_s5 + $0x678] sm:$0xff]  }
 0xc78   :  { %13900 = vmatprep.mubr.f32.mxu0 %v29607_v10  ;;  %20884 = vmatpush3.bf16.msra.mxu1 %v16786_v20  ;;  %v16796_v10 = vld [vmem:[%s30353_s5 + $0x5d0] sm:$0xff]   ;;  %v16833_v20 = vld [vmem:[%s30353_s5 + $0x6f8] sm:$0xff]  }
 0xc79   :  { %13970 = vmatprep.mubr.f32.mxu1 %v29610_v61  ;;  %20854 = vmatprep.subr.bf16.mxu0 %v16779_v33  ;;  %v16772_v61 = vld [vmem:[%s30353_s5 + $0x510] sm:$0xff]   ;;  %v16809_v33 = vld [vmem:[%s30353_s5 + $0x638] sm:$0xff]  }
 0xc7a   :  { %20886 = vmatprep.subr.bf16.mxu1 %v16795_v7  ;;  %v16825_v7 = vld [vmem:[%s30353_s5 + $0x6b8] sm:$0xff]  }
 0xc7b   :  { %20856 = vmatpush3.bf16.msra.mxu0 %v16771_v62  ;;  %v16842_v62 = vld [vmem:[%s30353_s5 + $0x740] sm:$0xff]  }
 0xc7c   :  { %20888 = vmatpush3.bf16.msra.mxu1 %v16787_v11  ;;  %20858 = vmatprep.subr.bf16.mxu0 %v16780_v39  ;;  %v16858_v11 = vld [vmem:[%s30353_s5 + $0x7c0] sm:$0xff]  }
 0xc7d   :  { %20890 = vmatprep.subr.bf16.mxu1 %v16796_v10  ;;  %v16834_v39 = vld [vmem:[%s30353_s5 + $0x700] sm:$0xff]  }
 0xc7e   :  { %v16850_v10 = vld [vmem:[%s30353_s5 + $0x780] sm:$0xff]  }
 0xc7f   :  { %20860 = vmatpush3.bf16.msra.mxu0 %v16772_v61  ;;  %v16843_v61 = vld [vmem:[%s30353_s5 + $0x748] sm:$0xff]  }
 0xc80   :  { %20892 = vmatpush3.bf16.msra.mxu1 %v16788_v36  ;;  %20862 = vmatprep.subr.bf16.mxu0 %v16781_v5  ;;  %v16859_v36 = vld [vmem:[%s30353_s5 + $0x7c8] sm:$0xff]  }
 0xc81   :  { %20894 = vmatprep.subr.bf16.mxu1 %v16797_v57  ;;  %v16835_v5 = vld [vmem:[%s30353_s5 + $0x708] sm:$0xff]   ;;  %v16852_v57 = vld [vmem:[%s30353_s5 + $0x790] sm:$0xff]  }
 0xc83   :  { %20864 = vmatpush3.bf16.msra.mxu0 %v16773_v4  ;;  %v16845_v4 = vld [vmem:[%s30353_s5 + $0x758] sm:$0xff]  }
 0xc84   :  { %20896 = vmatpush3.bf16.msra.mxu1 %v16789_v50  ;;  %20866 = vmatprep.subr.bf16.mxu0 %v16782_v2  ;;  %v16861_v50 = vld [vmem:[%s30353_s5 + $0x7d8] sm:$0xff]  }
 0xc85   :  { %20898 = vmatprep.subr.bf16.mxu1 %v16798_v37  ;;  %v16837_v2 = vld [vmem:[%s30353_s5 + $0x718] sm:$0xff]  }
 0xc86   :  { %v16853_v37 = vld [vmem:[%s30353_s5 + $0x798] sm:$0xff]  }
 0xc87   :  { %20868 = vmatpush3.bf16.msra.mxu0 %v16774_v49  ;;  %v16846_v49 = vld [vmem:[%s30353_s5 + $0x760] sm:$0xff]  }
 0xc88   :  { %20900 = vmatpush3.bf16.msra.mxu1 %v16790_v43  ;;  %20870 = vmatprep.subr.bf16.mxu0 %v16783_v12  ;;  %v16862_v43 = vld [vmem:[%s30353_s5 + $0x7e0] sm:$0xff]  }
 0xc89   :  { %20902 = vmatprep.subr.bf16.mxu1 %v16799_v59  ;;  %v16838_v12 = vld [vmem:[%s30353_s5 + $0x720] sm:$0xff]  }
 0xc8a   :  { %v16854_v59 = vld [vmem:[%s30353_s5 + $0x7a0] sm:$0xff]  }
 0xc8b   :  { %20872 = vmatpush3.bf16.msra.mxu0 %v16775_v54  ;;  %v16847_v54 = vld [vmem:[%s30353_s5 + $0x768] sm:$0xff]  }
 0xc8c   :  { %20904 = vmatpush3.bf16.msra.mxu1 %v16791_v58  ;;  %20874 = vmatprep.subr.bf16.mxu0 %v16784_v22  ;;  %v16863_v58 = vld [vmem:[%s30353_s5 + $0x7e8] sm:$0xff]  }
 0xc8d   :  { %20906 = vmatprep.subr.bf16.mxu1 %v16800_v17  ;;  %v16839_v22 = vld [vmem:[%s30353_s5 + $0x728] sm:$0xff]  }
 0xc8f   :  { %20876 = vmatpush3.bf16.msra.mxu0 %v16776_v56  ;;  %v16855_v56 = vld [vmem:[%s30353_s5 + $0x7a8] sm:$0xff]  }
 0xc90   :  { %20908 = vmatpush3.bf16.msra.mxu1 %v16792_v25  ;;  %20878 = vmatprep.subr.bf16.mxu0 %v16785_v8  ;;  %v16848_v25 = vld [vmem:[%s30353_s5 + $0x770] sm:$0xff]  }
 0xc91   :  { %20910 = vmatprep.subr.bf16.mxu1 %v16801_v14  ;;  %v15584_v14 = vld [vmem:[%s30354_s6] ss:$0 sm:$0xff] }
 0xc93   :  { %20880 = vmatpush3.bf16.msra.mxu0 %v16777_v3 }
 0xc94   :  { %20912 = vmatpush3.bf16.msra.mxu1 %v16793_v9  ;;  %20914 = vmatprep.subr.bf16.mxu0 %v16810_v51  ;;  %v16864_v9 = vld [vmem:[%s30353_s5 + $0x7f0] sm:$0xff]  }
 0xc95   :  { %20946 = vmatprep.subr.bf16.mxu1 %v16826_v42 }
 0xc96   :  { %13901 = vmatmul.mubr.f32.vlgmr.msra.gmra.mrb[74].mxu0 %v29682_v24  ;;  %v16819_v24 = vld [vmem:[%s30353_s5 + $0x688] sm:$0xff]  }
 0xc97   :  { %13971 = vmatmul.mubr.f32.vlgmr.msra.gmra.mrb[74].mxu1 %v29697_v23  ;;  %20916 = vmatpush3.bf16.msra.mxu0 %v16802_v35  ;;  %v16812_v23 = vld [vmem:[%s30353_s5 + $0x650] sm:$0xff]  }
 0xc98   :  { %14040 = vmatprep.mubr.f32.mxu0 %v29708_v46  ;;  %20948 = vmatpush3.bf16.msra.mxu1 %v16818_v18  ;;  %v16828_v46 = vld [vmem:[%s30353_s5 + $0x6d0] sm:$0xff]  }
 0xc99   :  { %14110 = vmatprep.mubr.f32.mxu1 %v29714_v30  ;;  %20918 = vmatprep.subr.bf16.mxu0 %v16811_v29  ;;  %v16804_v30 = vld [vmem:[%s30353_s5 + $0x610] sm:$0xff]  }
 0xc9a   :  { %20950 = vmatprep.subr.bf16.mxu1 %v16827_v60  ;;  %v16840_v18 = vld [vmem:[%s30353_s5 + $0x730] sm:$0xff]  }
 0xc9b   :  { %20920 = vmatpush3.bf16.msra.mxu0 %v16803_v31  ;;  %v16856_v60 = vld [vmem:[%s30353_s5 + $0x7b0] sm:$0xff]   ;;  %v16849_v31 = vld [vmem:[%s30353_s5 + $0x778] sm:$0xff]  }
 0xc9c   :  { %20952 = vmatpush3.bf16.msra.mxu1 %v16819_v24  ;;  %20922 = vmatprep.subr.bf16.mxu0 %v16812_v23  ;;  %v16865_v24 = vld [vmem:[%s30353_s5 + $0x7f8] sm:$0xff]  }
 0xc9d   :  { %20954 = vmatprep.subr.bf16.mxu1 %v16828_v46  ;;  %v16841_v46 = vld [vmem:[%s30353_s5 + $0x738] sm:$0xff]  }
 0xc9f   :  { %20924 = vmatpush3.bf16.msra.mxu0 %v16804_v30  ;;  %v16857_v30 = vld [vmem:[%s30353_s5 + $0x7b8] sm:$0xff]  }
 0xca0   :  { %20956 = vmatpush3.bf16.msra.mxu1 %v16820_v55  ;;  %20926 = vmatprep.subr.bf16.mxu0 %v16813_v44 }
 0xca1   :  { %20958 = vmatprep.subr.bf16.mxu1 %v16829_v0 }
 0xca3   :  { %20928 = vmatpush3.bf16.msra.mxu0 %v16805_v47 }
 0xca4   :  { %20960 = vmatpush3.bf16.msra.mxu1 %v16821_v6  ;;  %20930 = vmatprep.subr.bf16.mxu0 %v16814_v15 }
 0xca5   :  { %20962 = vmatprep.subr.bf16.mxu1 %v16830_v21 }
 0xca7   :  { %20932 = vmatpush3.bf16.msra.mxu0 %v16806_v63 }
 0xca8   :  { %20964 = vmatpush3.bf16.msra.mxu1 %v16822_v52  ;;  %20934 = vmatprep.subr.bf16.mxu0 %v16815_v38 }
 0xca9   :  { %20966 = vmatprep.subr.bf16.mxu1 %v16831_v45 }
 0xcab   :  { %20936 = vmatpush3.bf16.msra.mxu0 %v16807_v40 }
 0xcac   :  { %20968 = vmatpush3.bf16.msra.mxu1 %v16823_v32  ;;  %20938 = vmatprep.subr.bf16.mxu0 %v16816_v26 }
 0xcad   :  { %20970 = vmatprep.subr.bf16.mxu1 %v16832_v19 }
 0xcaf   :  { %20940 = vmatpush3.bf16.msra.mxu0 %v16808_v16 }
 0xcb0   :  { %20972 = vmatpush3.bf16.msra.mxu1 %v16824_v53  ;;  %20942 = vmatprep.subr.bf16.mxu0 %v16817_v28 }
 0xcb1   :  { %20974 = vmatprep.subr.bf16.mxu1 %v16833_v20 }
 0xcb3   :  { %20944 = vmatpush3.bf16.msra.mxu0 %v16809_v33 }
 0xcb4   :  { %20976 = vmatpush3.bf16.msra.mxu1 %v16825_v7  ;;  %20978 = vmatprep.subr.bf16.mxu0 %v16842_v62 }
 0xcb5   :  { %21010 = vmatprep.subr.bf16.mxu1 %v16858_v11  ;;  %v14257_v11 = vld [vmem:[%s30355_s7] sm:$0xff] }
 0xcb6   :  { %14041 = vmatmul.mubr.f32.vlgmr.msra.gmra.mrb[76].mxu0 %v29801_v13  ;;  %v16851_v13 = vld [vmem:[%s30353_s5 + $0x788] sm:$0xff]  }
 0xcb7   :  { %14111 = vmatmul.mubr.f32.vlgmr.msra.gmra.mrb[76].mxu1 %v29817_v34  ;;  %20980 = vmatpush3.bf16.msra.mxu0 %v16834_v39  ;;  %v16844_v34 = vld [vmem:[%s30353_s5 + $0x750] sm:$0xff]   ;;  %v14258_v39 = vld [vmem:[%s30355_s7 + $0x8] sm:$0xff] }
 0xcb8   :  { %14180 = vmatprep.mubr.f32.mxu0 %v29831_v27  ;;  %21012 = vmatpush3.bf16.msra.mxu1 %v16850_v10  ;;  %v16860_v27 = vld [vmem:[%s30353_s5 + $0x7d0] sm:$0xff]  }
 0xcb9   :  { %14250 = vmatprep.mubr.f32.mxu1 %v29840_v41  ;;  %20982 = vmatprep.subr.bf16.mxu0 %v16843_v61  ;;  %v16836_v41 = vld [vmem:[%s30353_s5 + $0x710] sm:$0xff]   ;;  %v22310_v61 = vmov 0.0|0.0  }
 0xcba   :  { %21014 = vmatprep.subr.bf16.mxu1 %v16859_v36  ;;  %v14259_v10 = vld [vmem:[%s30355_s7 + $0x10] sm:$0xff]  ;;  %v21042_v36 = vpack.c.bf16 %v14258_v39, %v14257_v11 }
 0xcbb   :  { %20984 = vmatpush3.bf16.msra.mxu0 %v16835_v5  ;;  %v14260_v5 = vld [vmem:[%s30355_s7 + $0x18] sm:$0xff] }
 0xcbc   :  { %21016 = vmatpush3.bf16.msra.mxu1 %v16851_v13  ;;  %20986 = vmatprep.subr.bf16.mxu0 %v16844_v34  ;;  %v31967_v13 = vmov 0.0   ;;  %v21045_v34 = vpack.c.bf16 %v14260_v5, %v14259_v10 }
 0xcbd   :  { %21018 = vmatprep.subr.bf16.mxu1 %v16860_v27 }
 0xcbf   :  { %20988 = vmatpush3.bf16.msra.mxu0 %v16836_v41 }
 0xcc0   :  { %21020 = vmatpush3.bf16.msra.mxu1 %v16852_v57  ;;  %20990 = vmatprep.subr.bf16.mxu0 %v16845_v4 }
 0xcc1   :  { %21022 = vmatprep.subr.bf16.mxu1 %v16861_v50 }
 0xcc3   :  { %20992 = vmatpush3.bf16.msra.mxu0 %v16837_v2 }
 0xcc4   :  { %21024 = vmatpush3.bf16.msra.mxu1 %v16853_v37  ;;  %20994 = vmatprep.subr.bf16.mxu0 %v16846_v49 }
 0xcc5   :  { %21026 = vmatprep.subr.bf16.mxu1 %v16862_v43 }
 0xcc7   :  { %20996 = vmatpush3.bf16.msra.mxu0 %v16838_v12 }
 0xcc8   :  { %21028 = vmatpush3.bf16.msra.mxu1 %v16854_v59  ;;  %20998 = vmatprep.subr.bf16.mxu0 %v16847_v54 }
 0xcc9   :  { %v18095_v17 = vpop.f32.mrb[64].mxu0  ;;  %21030 = vmatprep.subr.bf16.mxu1 %v16863_v58 }
 0xcca   :  { %v18130_v8 = vpop.f32.mrb[64].mxu1  ;;  %v18096_v3 = vpop.f32.mrb[65].mxu0 }
 0xccb   :  { %v18097_v51 = vadd.f32 %v18096_v3, %v18095_v17  ;;  %v18131_v42 = vpop.f32.mrb[65].mxu1  ;;  %21000 = vmatpush3.bf16.msra.mxu0 %v16839_v22 }
 0xccc   :  { %v18132_v35 = vadd.f32 %v18131_v42, %v18130_v8  ;;  %21032 = vmatpush3.bf16.msra.mxu1 %v16855_v56  ;;  %21002 = vmatprep.subr.bf16.mxu0 %v16848_v25 }
 0xccd   :  { %v13203_v29 = vadd.f32 %v18097_v51, %v15584_v14  ;;  %21034 = vmatprep.subr.bf16.mxu1 %v16864_v9 }
 0xccf   :  { %v13273_v23 = vadd.f32 %v18132_v35, %v13203_v29  ;;  %21004 = vmatpush3.bf16.msra.mxu0 %v16840_v18 }
 0xcd0   :  { %21036 = vmatpush3.bf16.msra.mxu1 %v16856_v60  ;;  %21006 = vmatprep.subr.bf16.mxu0 %v16849_v31 }
 0xcd1   :  { %21038 = vmatprep.subr.bf16.mxu1 %v16865_v24 }
 0xcd3   :  { %21008 = vmatpush3.bf16.msra.mxu0 %v16841_v46 }
 0xcd4   :  { %21040 = vmatpush3.bf16.msra.mxu1 %v16857_v30  ;;  %21041 = vmatprep.subr.bf16.mxu0 %v22310_v61 }
 0xcd6   :  { %14181 = vmatmul.mubr.f32.vlgmr.msra.gmra.mrb[78].mxu0 %v29843_v48 }
 0xcd7   :  { %14251 = vmatmul.mubr.f32.vlgmr.msra.gmra.mrb[78].mxu1 %v29846_v1  ;;  %20454 = vmatprep.mubr.msk.f32.mxu0 %vm22311_vm6, %v31967_v13 }
 0xcd8   :  { %21043 = vmatpush3.bf16.msra.mxu0 %v21042_v36 }
 0xcd9   :  { %21044 = vmatprep.subr.bf16.mxu0 %v22310_v61 }
 0xcdc   :  { %21046 = vmatpush3.bf16.msra.mxu0 %v21045_v34 }
 0xce9   :  { %v18165_v55 = vpop.f32.mrb[66].mxu0 }
 0xcea   :  { %v18200_v44 = vpop.f32.mrb[66].mxu1  ;;  %v18166_v0 = vpop.f32.mrb[67].mxu0 }
 0xceb   :  { %v18167_v47 = vadd.f32 %v18166_v0, %v18165_v55  ;;  %v18201_v6 = vpop.f32.mrb[67].mxu1 }
 0xcec   :  { %v18202_v15 = vadd.f32 %v18201_v6, %v18200_v44  ;;  %v15585_v44 = vld [vmem:[%s30356_s8] ss:$0 sm:$0xff] }
 0xced   :  { %v13343_v21 = vadd.f32 %v18167_v47, %v13273_v23 }
 0xcef   :  { %v13413_v63 = vadd.f32 %v18202_v15, %v13343_v21 }
 0xd09   :  { %v18235_v52 = vpop.f32.mrb[68].mxu0 }
 0xd0a   :  { %v18270_v38 = vpop.f32.mrb[68].mxu1  ;;  %v18236_v45 = vpop.f32.mrb[69].mxu0 }
 0xd0b   :  { %v18237_v40 = vadd.f32 %v18236_v45, %v18235_v52  ;;  %v18271_v32 = vpop.f32.mrb[69].mxu1 }
 0xd0c   :  { %v18272_v26 = vadd.f32 %v18271_v32, %v18270_v38 }
 0xd0d   :  { %v13483_v19 = vadd.f32 %v18237_v40, %v13413_v63 }
 0xd0f   :  { %v13553_v16 = vadd.f32 %v18272_v26, %v13483_v19 }
 0xd29   :  { %v18305_v53 = vpop.f32.mrb[70].mxu0 }
 0xd2a   :  { %v18340_v48 = vpop.f32.mrb[70].mxu1  ;;  %v18306_v28 = vpop.f32.mrb[71].mxu0 }
 0xd2b   :  { %v18307_v1 = vadd.f32 %v18306_v28, %v18305_v53  ;;  %v18341_v20 = vpop.f32.mrb[71].mxu1 }
 0xd2c   :  { %v18342_v33 = vadd.f32 %v18341_v20, %v18340_v48 }
 0xd2d   :  { %v13623_v7 = vadd.f32 %v18307_v1, %v13553_v16 }
 0xd2f   :  { %v13693_v62 = vadd.f32 %v18342_v33, %v13623_v7 }
 0xd49   :  { %v18375_v27 = vpop.f32.mrb[72].mxu0 }
 0xd4a   :  { %v18410_v41 = vpop.f32.mrb[72].mxu1  ;;  %v18376_v57 = vpop.f32.mrb[73].mxu0 }
 0xd4b   :  { %v18377_v4 = vadd.f32 %v18376_v57, %v18375_v27  ;;  %v18411_v50 = vpop.f32.mrb[73].mxu1 }
 0xd4c   :  { %v18412_v2 = vadd.f32 %v18411_v50, %v18410_v41 }
 0xd4d   :  { %v13763_v37 = vadd.f32 %v18377_v4, %v13693_v62 }
 0xd4f   :  { %v13833_v49 = vadd.f32 %v18412_v2, %v13763_v37 }
 0xd69   :  { %v18445_v43 = vpop.f32.mrb[74].mxu0 }
 0xd6a   :  { %v18480_v12 = vpop.f32.mrb[74].mxu1  ;;  %v18446_v59 = vpop.f32.mrb[75].mxu0 }
 0xd6b   :  { %v18447_v54 = vadd.f32 %v18446_v59, %v18445_v43  ;;  %v18481_v58 = vpop.f32.mrb[75].mxu1 }
 0xd6c   :  { %v18482_v22 = vadd.f32 %v18481_v58, %v18480_v12 }
 0xd6d   :  { %v13903_v17 = vadd.f32 %v18447_v54, %v13833_v49 }
 0xd6f   :  { %v13973_v56 = vadd.f32 %v18482_v22, %v13903_v17 }
 0xd89   :  { %v18515_v25 = vpop.f32.mrb[76].mxu0 }
 0xd8a   :  { %v18550_v8 = vpop.f32.mrb[76].mxu1  ;;  %v18516_v14 = vpop.f32.mrb[77].mxu0 }
 0xd8b   :  { %v18517_v3 = vadd.f32 %v18516_v14, %v18515_v25  ;;  %v18551_v9 = vpop.f32.mrb[77].mxu1 }
 0xd8c   :  { %v18552_v51 = vadd.f32 %v18551_v9, %v18550_v8 }
 0xd8d   :  { %v14043_v42 = vadd.f32 %v18517_v3, %v13973_v56 }
 0xd8f   :  { %v14113_v35 = vadd.f32 %v18552_v51, %v14043_v42 }
 0xda9   :  { %v18585_v18 = vpop.f32.mrb[78].mxu0 }
 0xdaa   :  { %v18620_v29 = vpop.f32.mrb[78].mxu1  ;;  %v18586_v60 = vpop.f32.mrb[79].mxu0 }
 0xdab   :  { %v18587_v31 = vadd.f32 %v18586_v60, %v18585_v18  ;;  %v18621_v24 = vpop.f32.mrb[79].mxu1 }
 0xdac   :  { %v18622_v23 = vadd.f32 %v18621_v24, %v18620_v29 }
 0xdad   :  { %v14183_v46 = vadd.f32 %v18587_v31, %v14113_v35 }
 0xdaf   :  { %v14253_v30 = vadd.f32 %v18622_v23, %v14183_v46 }
 0xdb1   :  { %v14256_v55 = vmax.f32 %v14253_v30, 0.0 }
 0xdb3   :  { %20455 = vmatmul.mubr.msk.f32.vlgmr.msra.gmra.mrb[80].mxu0 %vm5418_vm4, %v14256_v55 }
 0xe86   :  { %v14337_v0 = vpop.f32.mrb[80].mxu0 }
 0xe87   :  { %v14338_v47 = vadd.f32 %v15585_v44, %v14337_v0  ;;  %v20456_v6 = vpop.f32.mrb[81].mxu0 }
 0xe89   :  { %14342 = vst.msk [vmem:[#allocation4] sm:$0x3] %vm14341_vm7, %v14338_v47 }
 0xe8a   :  { %22296 = shalt.err (!%p22293_p4)
}
 0xe8b   :  { %s22297_s13 = scalar_lea.hbm %s30357_s9, 32 }
 0xe8c   :  { %p22298_p5 = scmp.ne.s32.totalorder %s30357_s9, %s22297_s13  ;;  %p22301_p6 = scmp.lt.u32.totalorder %s22297_s13, %s30357_s9 }
 0xe8e   :  { %p22303_p7 = pnand %p22301_p6, %p22298_p5 }
 0xe90   :  { %22306 = shalt.err (!%p22303_p7)
}
 0xe91   :  { %14352 = dma.vmem_to_hbm [thread:$0]  %s14350_s30, 32, %s30357_s9, [#allocation5]  }
 0xe92   :  { %22307 = dma.done.wait [#allocation5], 32  }
 0xe93   :  { %22308 = vsyncadd [#allocation5], 4294967264 }
 0xe94   :  { %14356 = vsyncpa [#allocation5], 1 }

</bundles_post_ra>
